<compile_context>
chip_gen: v7x
topology: tpu7x:2x2x1
jax: 0.10.0
libtpu: 0.0.40
codegen_flags: <defaults>
</compile_context>

<pallas_src>
import math

import jax
import jax.numpy as jnp
from jax.experimental import pallas as pl
from jax.experimental.pallas import tpu as pltpu

LN_EPS = 1e-5  # torch.nn.LayerNorm default


def _layernorm(x, gamma, beta):
    mu = jnp.mean(x, axis=-1, keepdims=True)
    xc = x - mu
    var = jnp.mean(xc * xc, axis=-1, keepdims=True)
    inv = jax.lax.rsqrt(var + LN_EPS)
    return xc * inv * gamma + beta


def st_adapter_kernel(x_prev_ref, x_main_ref, x_next_ref,
                      g1_ref, b1_ref, wd_ref, bd_ref,
                      wc_ref, bc_ref, g2_ref, b2_ref, wu_ref, bu_ref,
                      out_ref, ctr_ref, lft_ref, rgt_ref):
    tT, H, W, C = x_main_ref.shape
    A = wd_ref.shape[1]
    nP = tT + 2                                    # z-planes held (1 halo frame per side)

    t_idx = pl.program_id(1)
    has_prev = t_idx > 0                           # left T-halo frame is a real frame?
    has_next = t_idx + 1 < pl.num_programs(1)      # right T-halo frame is a real frame?

    # ---- hoisted parameter loads (done once per grid step) --------------------
    g1 = g1_ref[...]
    b1 = b1_ref[...]
    wd = wd_ref[...]
    bd = bd_ref[...]
    wc = wc_ref[...]                               # (3, 3, 3, A) per-channel taps
    bc = bc_ref[...]
    g2 = g2_ref[...]
    b2 = b2_ref[...]
    wu = wu_ref[...]
    bu = bu_ref[...]

    # ---- stage 1: LayerNorm1 + down_proj, one batched MXU call ----------------
    x_all = jnp.concatenate(
        [x_prev_ref[...], x_main_ref[...], x_next_ref[...]], axis=0
    ).astype(jnp.float32)                          # (tT+2, H, W, C)
    h1 = _layernorm(x_all, g1, b1)
    z = jnp.dot(h1.reshape(nP * H * W, C).astype(jnp.bfloat16), wd,
                preferred_element_type=jnp.float32) + bd
    z = z.reshape(nP, H, W, A)

    # zero the clamped T-halo planes at the clip boundaries (SAME padding in T)
    t_pos = jax.lax.broadcasted_iota(jnp.int32, (nP, 1, 1, 1), 0)
    valid = jnp.logical_and(jnp.logical_or(t_pos != 0, has_prev),
                            jnp.logical_or(t_pos != nP - 1, has_next))
    z = jnp.where(valid, z, 0.0)

    # W +-1 taps built once per plane.  pltpu.roll follows the jnp.roll
    # convention out[w] = x[w - shift]; mask the wrapped column (SAME padding).
    w_pos = jax.lax.broadcasted_iota(jnp.int32, (W, 1), 0)
    z3 = z.reshape(nP * H, W, A)                   # W stays the sublane axis
    z_l = jnp.where(w_pos >= 1, pltpu.roll(z3, 1, axis=1), 0.0).reshape(z.shape)
    z_r = jnp.where(w_pos <= W - 2, pltpu.roll(z3, W - 1, axis=1), 0.0).reshape(z.shape)

    # Store into the H-padded scratch volumes.  Only the two H halo faces need
    # zeroing; the interior rows are fully overwritten (no full-volume memset).
    zero_face = jnp.zeros((nP, 1, W, A), jnp.float32)
    for ref, val in ((ctr_ref, z), (lft_ref, z_l), (rgt_ref, z_r)):
        ref[:, 0:1, :, :] = zero_face
        ref[:, H + 1:H + 2, :, :] = zero_face
        ref[:, 1:H + 1, :, :] = val

    # ---- stage 2: depthwise 3x3x3 conv, batched over all tT output frames -----
    acc = jnp.zeros((tT, H, W, A), jnp.float32)
    for dt in range(3):
        for dh in range(3):
            w3 = wc[dt, dh]                        # (3, A) taps for this (dt, dh)
            acc = acc + lft_ref[dt:dt + tT, dh:dh + H] * w3[0]
            acc = acc + ctr_ref[dt:dt + tT, dh:dh + H] * w3[1]
            acc = acc + rgt_ref[dt:dt + tT, dh:dh + H] * w3[2]
    acc = acc + bc

    # ---- stage 3: LayerNorm2 + up_proj + residual, one batched MXU call -------
    h2 = _layernorm(acc, g2, b2)
    y = jnp.dot(h2.reshape(tT * H * W, A).astype(jnp.bfloat16), wu,
                preferred_element_type=jnp.float32) + bu
    out_ref[...] = (x_all[1:tT + 1] + y.reshape(tT, H, W, C)).astype(out_ref.dtype)


def _ceil_to(v, m):
    return -(-v // m) * m


def _padded_bytes(shape, dtype):
    """Bytes of one VMEM buffer including physical tile padding."""
    itemsize = jnp.dtype(dtype).itemsize
    sublane = 8 * max(1, 4 // itemsize)            # (8,128) f32, (16,128) bf16, ...
    s = list(shape)
    s[-1] = _ceil_to(s[-1], 128)
    if len(s) >= 2:
        s[-2] = _ceil_to(s[-2], sublane)
    return math.prod(s) * itemsize


def st_adapter_forward(x, params, T, *, t_tile=8, vmem_fraction=0.8):
    """x: (B*T, H, W, C) channels-last, like the PyTorch module input."""
    BT, H, W, C = x.shape
    assert BT % T == 0
    B = BT // T
    A = params["w_down"].shape[1]
    xr = x.reshape(B, T, H, W, C)

    # bf16 operands for the two MXU projections (f32 accumulation in the kernel).
    wd = params["w_down"].astype(jnp.bfloat16)
    wu = params["w_up"].astype(jnp.bfloat16)

    params_list = [params["g1"], params["b1"], wd, params["b_down"],
                   params["w_conv"], params["b_conv"], params["g2"], params["b2"],
                   wu, params["b_up"]]

    # ---- generation-aware VMEM budget (128 MiB on v5e/v6e, 64 MiB on v7x) -----
    try:
        vmem_cap = int(getattr(pltpu.get_tpu_info(), "vmem_capacity_bytes",
                               64 << 20))
    except Exception:  # conservative fallback
        vmem_cap = 64 << 20
    budget = int(vmem_cap * vmem_fraction)

    def est(tT):
        io = 2 * (2 * _padded_bytes((tT, H, W, C), x.dtype)        # in + out blocks
                  + 2 * _padded_bytes((1, H, W, C), x.dtype))      # halo frames
        prm = 2 * sum(_padded_bytes(p.shape, p.dtype) for p in params_list)
        scratch = 3 * _padded_bytes((tT + 2, H + 2, W, A), jnp.float32)
        live = (_padded_bytes((tT + 2, H, W, C), jnp.float32)          # LN1 block
                + _padded_bytes(((tT + 2) * H * W, C), jnp.bfloat16)   # matmul lhs
                + 3 * _padded_bytes((tT + 2, H, W, A), jnp.float32)    # z / z_l / z_r
                + _padded_bytes((tT, H, W, A), jnp.float32)            # conv acc
                + _padded_bytes((tT * H * W, C), jnp.float32))         # up_proj out
        return io + prm + scratch + live + (2 << 20)               # spill headroom

    # largest divisor of T that is <= t_tile and whose working set fits the budget
    divs = sorted((d for d in range(1, T + 1) if T % d == 0), reverse=True)
    tT = next((d for d in divs if d <= max(t_tile, 1) and est(d) <= budget),
              divs[-1])
    nT = T // tT
    vmem_limit = int(min(max(est(tT) + (4 << 20), 16 << 20), budget))

    def const_spec(shape):
        n = len(shape)
        return pl.BlockSpec(shape, lambda b, t, n=n: (0,) * n)

    # ---- advisory cost estimate (includes the (tT+2)/tT halo read amplification)
    n_halo = B * nT * (tT + 2) * H * W
    n_out = B * T * H * W
    cost = pl.CostEstimate(
        flops=int(n_halo * (2 * C * A + 8 * C)
                  + n_out * (54 * A + 2 * A * C + 8 * A + 2 * C)),
        transcendentals=int(n_halo + n_out),
        bytes_accessed=int(n_halo * C * x.dtype.itemsize
                           + n_out * C * x.dtype.itemsize
                           + B * nT * sum(int(p.size) * p.dtype.itemsize
                                          for p in params_list)))

    out = pl.pallas_call(
        st_adapter_kernel,
        out_shape=jax.ShapeDtypeStruct((B, T, H, W, C), x.dtype),
        grid_spec=pltpu.PrefetchScalarGridSpec(
            num_scalar_prefetch=0,
            grid=(B, nT),
            in_specs=[
                # previous frame (clamped; masked to zero in-kernel at the clip edge)
                pl.BlockSpec((None, 1, H, W, C),
                             lambda b, t: (b, jnp.maximum(t * tT - 1, 0), 0, 0, 0)),
                # the tT frames this grid step produces
                pl.BlockSpec((None, tT, H, W, C), lambda b, t: (b, t, 0, 0, 0)),
                # next frame (clamped; masked at the clip edge)
                pl.BlockSpec((None, 1, H, W, C),
                             lambda b, t: (b, jnp.minimum(t * tT + tT, T - 1), 0, 0, 0)),
            ] + [const_spec(p.shape) for p in params_list],
            out_specs=pl.BlockSpec((None, tT, H, W, C), lambda b, t: (b, t, 0, 0, 0)),
            scratch_shapes=[pltpu.VMEM((tT + 2, H + 2, W, A), jnp.float32),
                            pltpu.VMEM((tT + 2, H + 2, W, A), jnp.float32),
                            pltpu.VMEM((tT + 2, H + 2, W, A), jnp.float32)],
        ),
        compiler_params=pltpu.CompilerParams(
            dimension_semantics=("parallel", "parallel"),
            vmem_limit_bytes=vmem_limit),
        cost_estimate=cost,
    )(xr, xr, xr, *params_list)
    return out.reshape(BT, H, W, C)


def st_adapter_ref(x, params, T):
    """Pure-JAX reference of the PyTorch forward (channels-last conv).

    The two projections mirror the kernel's MXU policy (bf16 operands, f32
    accumulation); LayerNorm, the depthwise conv and the residual are f32.
    """
    BT, H, W, C = x.shape
    B = BT // T
    A = params["w_down"].shape[1]
    xr = x.reshape(B, T, H, W, C).astype(jnp.float32)

    def ln(v, g, b):
        mu = jnp.mean(v, -1, keepdims=True)
        var = jnp.mean((v - mu) ** 2, -1, keepdims=True)
        return (v - mu) * jax.lax.rsqrt(var + LN_EPS) * g.reshape(-1) + b.reshape(-1)

    def bf16_matmul(a, w):
        return jnp.dot(a.astype(jnp.bfloat16), w.astype(jnp.bfloat16),
                       preferred_element_type=jnp.float32)

    h = ln(xr, params["g1"], params["b1"])
    z = (bf16_matmul(h.reshape(-1, C), params["w_down"]).reshape(B, T, H, W, A)
         + params["b_down"].reshape(-1))
    zc = jax.lax.conv_general_dilated(
        z, params["w_conv"][:, :, :, None, :],
        window_strides=(1, 1, 1), padding="SAME",
        dimension_numbers=("NDHWC", "DHWIO", "NDHWC"),
        feature_group_count=A,
        precision=jax.lax.Precision.HIGHEST) + params["b_conv"].reshape(-1)
    h2 = ln(zc, params["g2"], params["b2"])
    y = (bf16_matmul(h2.reshape(-1, A), params["w_up"]).reshape(B, T, H, W, C)
         + params["b_up"].reshape(-1))
    return x + y.reshape(BT, H, W, C)


def make_params(key, C, A):
    # PyTorch __init__ shapes: norm1 (C,), down_proj (A,C)+(A,),
    # dw_conv (A,1,3,3,3)+(A,), norm2 (A,), up_proj (C,A)+(C,).
    # The module zero-inits dw_conv and the projection biases; here we use small
    # deterministic nonzero values so the whole compute path is exercised.
    ks = jax.random.split(key, 10)
    f = jnp.float32
    return {
        "g1": (1.0 + 0.1 * jax.random.normal(ks[0], (1, C), f)),
        "b1": 0.05 * jax.random.normal(ks[1], (1, C), f),
        # down_proj weight stored transposed to (C, A): y = x @ W^T + b
        "w_down": 0.2 * jax.random.normal(ks[2], (C, A), f),
        "b_down": 0.05 * jax.random.normal(ks[3], (1, A), f),
        # dw_conv weight (A,1,3,3,3) -> channels-last taps (3,3,3,A)
        "w_conv": jnp.transpose(
            0.2 * jax.random.normal(ks[4], (A, 1, 3, 3, 3), f)[:, 0],
            (1, 2, 3, 0)),
        "b_conv": 0.05 * jax.random.normal(ks[5], (1, A), f),
        "g2": (1.0 + 0.1 * jax.random.normal(ks[6], (1, A), f)),
        "b2": 0.05 * jax.random.normal(ks[7], (1, A), f),
        # up_proj weight (C, A) stored transposed to (A, C)
        "w_up": 0.2 * jax.random.normal(ks[8], (A, C), f),
        "b_up": 0.05 * jax.random.normal(ks[9], (1, C), f),
    }


if __name__ == "__main__":
    B, T, H, W, C, A = 2, 4, 8, 8, 32, 16
    key = jax.random.PRNGKey(0)
    kx, kp = jax.random.split(key)
    x = jax.random.normal(kx, (B * T, H, W, C), jnp.float32)
    params = make_params(kp, C, A)

    out = st_adapter_forward(x, params, T)
    out = jax.block_until_ready(out)

    ref = st_adapter_ref(x, params, T)
    assert out.shape == (B * T, H, W, C)
    max_err = float(jnp.max(jnp.abs(out - ref)))
    # bf16 matmul operands + differing f32 accumulation order => small tolerance.
    assert jnp.allclose(out, ref, atol=2e-3, rtol=2e-3), max_err

    print("KERNEL_OK")
</pallas_src>

<mosaic_0001>
module attributes {stable_mosaic.version = 11 : i64} {
  func.func @st_adapter_kernel(%arg0: i32, %arg1: i32, %arg2: memref<1x1x8x8x32xf32, #tpu.memory_space<vmem>>, %arg3: memref<1x4x8x8x32xf32, #tpu.memory_space<vmem>>, %arg4: memref<1x1x8x8x32xf32, #tpu.memory_space<vmem>>, %arg5: memref<1x32xf32, #tpu.memory_space<vmem>>, %arg6: memref<1x32xf32, #tpu.memory_space<vmem>>, %arg7: memref<32x16xbf16, #tpu.memory_space<vmem>>, %arg8: memref<1x16xf32, #tpu.memory_space<vmem>>, %arg9: memref<3x3x3x16xf32, #tpu.memory_space<vmem>>, %arg10: memref<1x16xf32, #tpu.memory_space<vmem>>, %arg11: memref<1x16xf32, #tpu.memory_space<vmem>>, %arg12: memref<1x16xf32, #tpu.memory_space<vmem>>, %arg13: memref<16x32xbf16, #tpu.memory_space<vmem>>, %arg14: memref<1x32xf32, #tpu.memory_space<vmem>>, %arg15: memref<1x4x8x8x32xf32, #tpu.memory_space<vmem>>, %arg16: memref<6x10x8x16xf32, #tpu.memory_space<vmem>>, %arg17: memref<6x10x8x16xf32, #tpu.memory_space<vmem>>, %arg18: memref<6x10x8x16xf32, #tpu.memory_space<vmem>>) attributes {dimension_semantics = [#tpu.dimension_semantics<parallel>, #tpu.dimension_semantics<parallel>], iteration_bounds = array<i64: 2, 1>, scalar_prefetch = 0 : i64, scratch_operands = 3 : i64, tpu.core_type = #tpu.core_type<tc>, window_params = [{transform_indices = @transform_0, window_bounds = array<i64: 1, 1, 8, 8, 32>}, {transform_indices = @transform_1, window_bounds = array<i64: 1, 4, 8, 8, 32>}, {transform_indices = @transform_2, window_bounds = array<i64: 1, 1, 8, 8, 32>}, {pipeline_mode = #tpu.pipeline_mode<synchronous>, transform_indices = @transform_3, window_bounds = array<i64: 1, 32>}, {pipeline_mode = #tpu.pipeline_mode<synchronous>, transform_indices = @transform_4, window_bounds = array<i64: 1, 32>}, {pipeline_mode = #tpu.pipeline_mode<synchronous>, transform_indices = @transform_5, window_bounds = array<i64: 32, 16>}, {pipeline_mode = #tpu.pipeline_mode<synchronous>, transform_indices = @transform_6, window_bounds = array<i64: 1, 16>}, {pipeline_mode = #tpu.pipeline_mode<synchronous>, transform_indices = @transform_7, window_bounds = array<i64: 3, 3, 3, 16>}, {pipeline_mode = #tpu.pipeline_mode<synchronous>, transform_indices = @transform_8, window_bounds = array<i64: 1, 16>}, {pipeline_mode = #tpu.pipeline_mode<synchronous>, transform_indices = @transform_9, window_bounds = array<i64: 1, 16>}, {pipeline_mode = #tpu.pipeline_mode<synchronous>, transform_indices = @transform_10, window_bounds = array<i64: 1, 16>}, {pipeline_mode = #tpu.pipeline_mode<synchronous>, transform_indices = @transform_11, window_bounds = array<i64: 16, 32>}, {pipeline_mode = #tpu.pipeline_mode<synchronous>, transform_indices = @transform_12, window_bounds = array<i64: 1, 32>}, {transform_indices = @transform_13, window_bounds = array<i64: 1, 4, 8, 8, 32>}]} {
    %c0_i32 = arith.constant 0 : i32
    %0 = arith.cmpi sgt, %arg1, %c0_i32 : i32
    %c1_i32 = arith.constant 1 : i32
    %1 = arith.addi %arg1, %c1_i32 : i32
    %c1_i32_0 = arith.constant 1 : i32
    %2 = arith.cmpi slt, %1, %c1_i32_0 : i32
    %c0 = arith.constant 0 : index
    %c0_1 = arith.constant 0 : index
    %3 = vector.load %arg5[%c0, %c0_1] : memref<1x32xf32, #tpu.memory_space<vmem>>, vector<1x32xf32>
    %c0_2 = arith.constant 0 : index
    %c0_3 = arith.constant 0 : index
    %4 = vector.load %arg6[%c0_2, %c0_3] : memref<1x32xf32, #tpu.memory_space<vmem>>, vector<1x32xf32>
    %c0_4 = arith.constant 0 : index
    %c0_5 = arith.constant 0 : index
    %5 = vector.load %arg7[%c0_4, %c0_5] : memref<32x16xbf16, #tpu.memory_space<vmem>>, vector<32x16xbf16>
    %c0_6 = arith.constant 0 : index
    %c0_7 = arith.constant 0 : index
    %6 = vector.load %arg8[%c0_6, %c0_7] : memref<1x16xf32, #tpu.memory_space<vmem>>, vector<1x16xf32>
    %c0_8 = arith.constant 0 : index
    %c0_9 = arith.constant 0 : index
    %c0_10 = arith.constant 0 : index
    %c0_11 = arith.constant 0 : index
    %7 = vector.load %arg9[%c0_8, %c0_9, %c0_10, %c0_11] : memref<3x3x3x16xf32, #tpu.memory_space<vmem>>, vector<3x3x3x16xf32>
    %c0_12 = arith.constant 0 : index
    %c0_13 = arith.constant 0 : index
    %8 = vector.load %arg10[%c0_12, %c0_13] : memref<1x16xf32, #tpu.memory_space<vmem>>, vector<1x16xf32>
    %c0_14 = arith.constant 0 : index
    %c0_15 = arith.constant 0 : index
    %9 = vector.load %arg11[%c0_14, %c0_15] : memref<1x16xf32, #tpu.memory_space<vmem>>, vector<1x16xf32>
    %c0_16 = arith.constant 0 : index
    %c0_17 = arith.constant 0 : index
    %10 = vector.load %arg12[%c0_16, %c0_17] : memref<1x16xf32, #tpu.memory_space<vmem>>, vector<1x16xf32>
    %c0_18 = arith.constant 0 : index
    %c0_19 = arith.constant 0 : index
    %11 = vector.load %arg13[%c0_18, %c0_19] : memref<16x32xbf16, #tpu.memory_space<vmem>>, vector<16x32xbf16>
    %c0_20 = arith.constant 0 : index
    %c0_21 = arith.constant 0 : index
    %12 = vector.load %arg14[%c0_20, %c0_21] : memref<1x32xf32, #tpu.memory_space<vmem>>, vector<1x32xf32>
    %c0_22 = arith.constant 0 : index
    %c0_23 = arith.constant 0 : index
    %c0_24 = arith.constant 0 : index
    %c0_25 = arith.constant 0 : index
    %c0_26 = arith.constant 0 : index
    %13 = vector.load %arg2[%c0_22, %c0_23, %c0_24, %c0_25, %c0_26] : memref<1x1x8x8x32xf32, #tpu.memory_space<vmem>>, vector<1x1x8x8x32xf32>
    %14 = vector.shape_cast %13 : vector<1x1x8x8x32xf32> to vector<1x8x8x32xf32>
    %c0_27 = arith.constant 0 : index
    %c0_28 = arith.constant 0 : index
    %c0_29 = arith.constant 0 : index
    %c0_30 = arith.constant 0 : index
    %c0_31 = arith.constant 0 : index
    %15 = vector.load %arg3[%c0_27, %c0_28, %c0_29, %c0_30, %c0_31] : memref<1x4x8x8x32xf32, #tpu.memory_space<vmem>>, vector<1x4x8x8x32xf32>
    %16 = vector.shape_cast %15 : vector<1x4x8x8x32xf32> to vector<4x8x8x32xf32>
    %c0_32 = arith.constant 0 : index
    %c0_33 = arith.constant 0 : index
    %c0_34 = arith.constant 0 : index
    %c0_35 = arith.constant 0 : index
    %c0_36 = arith.constant 0 : index
    %17 = vector.load %arg4[%c0_32, %c0_33, %c0_34, %c0_35, %c0_36] : memref<1x1x8x8x32xf32, #tpu.memory_space<vmem>>, vector<1x1x8x8x32xf32>
    %18 = vector.shape_cast %17 : vector<1x1x8x8x32xf32> to vector<1x8x8x32xf32>
    %19 = tpu.concatenate %14, %16, %18 in 0 : vector<1x8x8x32xf32>, vector<4x8x8x32xf32>, vector<1x8x8x32xf32> -> vector<6x8x8x32xf32>
    %cst = arith.constant dense<0.000000e+00> : vector<6x8x8xf32>
    %20 = vector.multi_reduction <add>, %19, %cst [3] : vector<6x8x8x32xf32> to vector<6x8x8xf32>
    %21 = vector.shape_cast %20 : vector<6x8x8xf32> to vector<6x8x8x1xf32>
    %cst_37 = arith.constant 3.200000e+01 : f32
    %22 = vector.broadcast %cst_37 : f32 to vector<6x8x8x1xf32>
    %23 = arith.divf %21, %22 : vector<6x8x8x1xf32>
    %24 = vector.broadcast %23 : vector<6x8x8x1xf32> to vector<6x8x8x32xf32>
    %25 = arith.subf %19, %24 : vector<6x8x8x32xf32>
    %26 = arith.mulf %25, %25 : vector<6x8x8x32xf32>
    %cst_38 = arith.constant dense<0.000000e+00> : vector<6x8x8xf32>
    %27 = vector.multi_reduction <add>, %26, %cst_38 [3] : vector<6x8x8x32xf32> to vector<6x8x8xf32>
    %28 = vector.shape_cast %27 : vector<6x8x8xf32> to vector<6x8x8x1xf32>
    %cst_39 = arith.constant 3.200000e+01 : f32
    %29 = vector.broadcast %cst_39 : f32 to vector<6x8x8x1xf32>
    %30 = arith.divf %28, %29 : vector<6x8x8x1xf32>
    %cst_40 = arith.constant 9.99999974E-6 : f32
    %31 = vector.broadcast %cst_40 : f32 to vector<6x8x8x1xf32>
    %32 = arith.addf %30, %31 : vector<6x8x8x1xf32>
    %33 = math.rsqrt %32 : vector<6x8x8x1xf32>
    %34 = vector.broadcast %33 : vector<6x8x8x1xf32> to vector<6x8x8x32xf32>
    %35 = arith.mulf %25, %34 : vector<6x8x8x32xf32>
    %36 = vector.shape_cast %3 : vector<1x32xf32> to vector<1x1x1x32xf32>
    %37 = vector.broadcast %36 : vector<1x1x1x32xf32> to vector<6x8x8x32xf32>
    %38 = arith.mulf %35, %37 : vector<6x8x8x32xf32>
    %39 = vector.shape_cast %4 : vector<1x32xf32> to vector<1x1x1x32xf32>
    %40 = vector.broadcast %39 : vector<1x1x1x32xf32> to vector<6x8x8x32xf32>
    %41 = arith.addf %38, %40 : vector<6x8x8x32xf32>
    %42 = vector.shape_cast %41 : vector<6x8x8x32xf32> to vector<384x32xf32>
    %43 = arith.truncf %42 : vector<384x32xf32> to vector<384x32xbf16>
    %cst_41 = arith.constant dense<0.000000e+00> : vector<384x16xf32>
    %44 = tpu.matmul %43, %5, %cst_41 {dimension_numbers = #tpu.dot_dimension_numbers<[1], [0], [0], [1], [0, 0, 1, 1], [], []>} : vector<384x32xbf16>, vector<32x16xbf16>, vector<384x16xf32> -> vector<384x16xf32>
    %45 = vector.broadcast %6 : vector<1x16xf32> to vector<384x16xf32>
    %46 = arith.addf %44, %45 : vector<384x16xf32>
    %47 = vector.shape_cast %46 : vector<384x16xf32> to vector<6x8x8x16xf32>
    %48 = tpu.iota {dimensions = array<i32: 0>} : vector<6x1x1x1xi32>
    %c0_i32_42 = arith.constant 0 : i32
    %49 = vector.broadcast %c0_i32_42 : i32 to vector<6x1x1x1xi32>
    %50 = arith.cmpi ne, %48, %49 : vector<6x1x1x1xi32>
    %51 = vector.broadcast %0 : i1 to vector<6x1x1x1xi1>
    %52 = arith.ori %50, %51 : vector<6x1x1x1xi1>
    %c5_i32 = arith.constant 5 : i32
    %53 = vector.broadcast %c5_i32 : i32 to vector<6x1x1x1xi32>
    %54 = arith.cmpi ne, %48, %53 : vector<6x1x1x1xi32>
    %55 = vector.broadcast %2 : i1 to vector<6x1x1x1xi1>
    %56 = arith.ori %54, %55 : vector<6x1x1x1xi1>
    %57 = arith.andi %52, %56 : vector<6x1x1x1xi1>
    %cst_43 = arith.constant 0.000000e+00 : f32
    %58 = vector.shape_cast %57 : vector<6x1x1x1xi1> to vector<6x1x1x1xi1>
    %59 = vector.broadcast %58 : vector<6x1x1x1xi1> to vector<6x8x8x16xi1>
    %60 = vector.broadcast %cst_43 : f32 to vector<6x8x8x16xf32>
    %61 = arith.select %59, %47, %60 : vector<6x8x8x16xi1>, vector<6x8x8x16xf32>
    %62 = tpu.iota {dimensions = array<i32: 0>} : vector<8x1xi32>
    %63 = vector.shape_cast %61 : vector<6x8x8x16xf32> to vector<48x8x16xf32>
    %c1_i32_44 = arith.constant 1 : i32
    %64 = vector.broadcast %c1_i32_44 : i32 to vector<8x1xi32>
    %65 = arith.cmpi sge, %62, %64 : vector<8x1xi32>
    %c1_i32_45 = arith.constant 1 : i32
    %66 = tpu.dynamic_rotate %63 by %c1_i32_45 dim 1 : vector<48x8x16xf32>, i32 -> vector<48x8x16xf32>
    %cst_46 = arith.constant 0.000000e+00 : f32
    %67 = vector.shape_cast %65 : vector<8x1xi1> to vector<1x8x1xi1>
    %68 = vector.broadcast %67 : vector<1x8x1xi1> to vector<48x8x16xi1>
    %69 = vector.broadcast %cst_46 : f32 to vector<48x8x16xf32>
    %70 = arith.select %68, %66, %69 : vector<48x8x16xi1>, vector<48x8x16xf32>
    %71 = vector.shape_cast %70 : vector<48x8x16xf32> to vector<6x8x8x16xf32>
    %c6_i32 = arith.constant 6 : i32
    %72 = vector.broadcast %c6_i32 : i32 to vector<8x1xi32>
    %73 = arith.cmpi sle, %62, %72 : vector<8x1xi32>
    %c7_i32 = arith.constant 7 : i32
    %74 = tpu.dynamic_rotate %63 by %c7_i32 dim 1 : vector<48x8x16xf32>, i32 -> vector<48x8x16xf32>
    %cst_47 = arith.constant 0.000000e+00 : f32
    %75 = vector.shape_cast %73 : vector<8x1xi1> to vector<1x8x1xi1>
    %76 = vector.broadcast %75 : vector<1x8x1xi1> to vector<48x8x16xi1>
    %77 = vector.broadcast %cst_47 : f32 to vector<48x8x16xf32>
    %78 = arith.select %76, %74, %77 : vector<48x8x16xi1>, vector<48x8x16xf32>
    %79 = vector.shape_cast %78 : vector<48x8x16xf32> to vector<6x8x8x16xf32>
    %cst_48 = arith.constant 0.000000e+00 : f32
    %80 = vector.broadcast %cst_48 : f32 to vector<6x1x8x16xf32>
    %c0_49 = arith.constant 0 : index
    %c0_50 = arith.constant 0 : index
    %c0_51 = arith.constant 0 : index
    %c0_52 = arith.constant 0 : index
    %81 = vector.load %arg16[%c0_49, %c0_50, %c0_51, %c0_52] : memref<6x10x8x16xf32, #tpu.memory_space<vmem>>, vector<6x1x8x16xf32>
    tpu.vector_store %arg16[%c0_49, %c0_50, %c0_51, %c0_52], %80 {strides = array<i32>} : memref<6x10x8x16xf32, #tpu.memory_space<vmem>>, vector<6x1x8x16xf32>,
    %c0_53 = arith.constant 0 : index
    %c9 = arith.constant 9 : index
    %c0_54 = arith.constant 0 : index
    %c0_55 = arith.constant 0 : index
    %82 = vector.load %arg16[%c0_53, %c9, %c0_54, %c0_55] : memref<6x10x8x16xf32, #tpu.memory_space<vmem>>, vector<6x1x8x16xf32>
    tpu.vector_store %arg16[%c0_53, %c9, %c0_54, %c0_55], %80 {strides = array<i32>} : memref<6x10x8x16xf32, #tpu.memory_space<vmem>>, vector<6x1x8x16xf32>,
    %c0_56 = arith.constant 0 : index
    %c1 = arith.constant 1 : index
    %c0_57 = arith.constant 0 : index
    %c0_58 = arith.constant 0 : index
    %83 = vector.load %arg16[%c0_56, %c1, %c0_57, %c0_58] : memref<6x10x8x16xf32, #tpu.memory_space<vmem>>, vector<6x8x8x16xf32>
    tpu.vector_store %arg16[%c0_56, %c1, %c0_57, %c0_58], %61 {strides = array<i32>} : memref<6x10x8x16xf32, #tpu.memory_space<vmem>>, vector<6x8x8x16xf32>,
    %c0_59 = arith.constant 0 : index
    %c0_60 = arith.constant 0 : index
    %c0_61 = arith.constant 0 : index
    %c0_62 = arith.constant 0 : index
    %84 = vector.load %arg17[%c0_59, %c0_60, %c0_61, %c0_62] : memref<6x10x8x16xf32, #tpu.memory_space<vmem>>, vector<6x1x8x16xf32>
    tpu.vector_store %arg17[%c0_59, %c0_60, %c0_61, %c0_62], %80 {strides = array<i32>} : memref<6x10x8x16xf32, #tpu.memory_space<vmem>>, vector<6x1x8x16xf32>,
    %c0_63 = arith.constant 0 : index
    %c9_64 = arith.constant 9 : index
    %c0_65 = arith.constant 0 : index
    %c0_66 = arith.constant 0 : index
    %85 = vector.load %arg17[%c0_63, %c9_64, %c0_65, %c0_66] : memref<6x10x8x16xf32, #tpu.memory_space<vmem>>, vector<6x1x8x16xf32>
    tpu.vector_store %arg17[%c0_63, %c9_64, %c0_65, %c0_66], %80 {strides = array<i32>} : memref<6x10x8x16xf32, #tpu.memory_space<vmem>>, vector<6x1x8x16xf32>,
    %c0_67 = arith.constant 0 : index
    %c1_68 = arith.constant 1 : index
    %c0_69 = arith.constant 0 : index
    %c0_70 = arith.constant 0 : index
    %86 = vector.load %arg17[%c0_67, %c1_68, %c0_69, %c0_70] : memref<6x10x8x16xf32, #tpu.memory_space<vmem>>, vector<6x8x8x16xf32>
    tpu.vector_store %arg17[%c0_67, %c1_68, %c0_69, %c0_70], %71 {strides = array<i32>} : memref<6x10x8x16xf32, #tpu.memory_space<vmem>>, vector<6x8x8x16xf32>,
    %c0_71 = arith.constant 0 : index
    %c0_72 = arith.constant 0 : index
    %c0_73 = arith.constant 0 : index
    %c0_74 = arith.constant 0 : index
    %87 = vector.load %arg18[%c0_71, %c0_72, %c0_73, %c0_74] : memref<6x10x8x16xf32, #tpu.memory_space<vmem>>, vector<6x1x8x16xf32>
    tpu.vector_store %arg18[%c0_71, %c0_72, %c0_73, %c0_74], %80 {strides = array<i32>} : memref<6x10x8x16xf32, #tpu.memory_space<vmem>>, vector<6x1x8x16xf32>,
    %c0_75 = arith.constant 0 : index
    %c9_76 = arith.constant 9 : index
    %c0_77 = arith.constant 0 : index
    %c0_78 = arith.constant 0 : index
    %88 = vector.load %arg18[%c0_75, %c9_76, %c0_77, %c0_78] : memref<6x10x8x16xf32, #tpu.memory_space<vmem>>, vector<6x1x8x16xf32>
    tpu.vector_store %arg18[%c0_75, %c9_76, %c0_77, %c0_78], %80 {strides = array<i32>} : memref<6x10x8x16xf32, #tpu.memory_space<vmem>>, vector<6x1x8x16xf32>,
    %c0_79 = arith.constant 0 : index
    %c1_80 = arith.constant 1 : index
    %c0_81 = arith.constant 0 : index
    %c0_82 = arith.constant 0 : index
    %89 = vector.load %arg18[%c0_79, %c1_80, %c0_81, %c0_82] : memref<6x10x8x16xf32, #tpu.memory_space<vmem>>, vector<6x8x8x16xf32>
    tpu.vector_store %arg18[%c0_79, %c1_80, %c0_81, %c0_82], %79 {strides = array<i32>} : memref<6x10x8x16xf32, #tpu.memory_space<vmem>>, vector<6x8x8x16xf32>,
    %cst_83 = arith.constant 0.000000e+00 : f32
    %90 = vector.broadcast %cst_83 : f32 to vector<4x8x8x16xf32>
    %91 = vector.extract_strided_slice %7 {offsets = [0, 0, 0, 0], sizes = [1, 1, 3, 16], strides = [1, 1, 1, 1]} : vector<3x3x3x16xf32> to vector<1x1x3x16xf32>
    %92 = vector.shape_cast %91 : vector<1x1x3x16xf32> to vector<3x16xf32>
    %c0_84 = arith.constant 0 : index
    %c0_85 = arith.constant 0 : index
    %c0_86 = arith.constant 0 : index
    %c0_87 = arith.constant 0 : index
    %93 = vector.load %arg17[%c0_84, %c0_85, %c0_86, %c0_87] : memref<6x10x8x16xf32, #tpu.memory_space<vmem>>, vector<4x8x8x16xf32>
    %94 = vector.extract_strided_slice %92 {offsets = [0, 0], sizes = [1, 16], strides = [1, 1]} : vector<3x16xf32> to vector<1x16xf32>
    %95 = vector.shape_cast %94 : vector<1x16xf32> to vector<16xf32>
    %96 = vector.shape_cast %95 : vector<16xf32> to vector<1x1x1x16xf32>
    %97 = vector.broadcast %96 : vector<1x1x1x16xf32> to vector<4x8x8x16xf32>
    %98 = arith.mulf %93, %97 : vector<4x8x8x16xf32>
    %99 = arith.addf %90, %98 : vector<4x8x8x16xf32>
    %c0_88 = arith.constant 0 : index
    %c0_89 = arith.constant 0 : index
    %c0_90 = arith.constant 0 : index
    %c0_91 = arith.constant 0 : index
    %100 = vector.load %arg16[%c0_88, %c0_89, %c0_90, %c0_91] : memref<6x10x8x16xf32, #tpu.memory_space<vmem>>, vector<4x8x8x16xf32>
    %101 = vector.extract_strided_slice %92 {offsets = [1, 0], sizes = [1, 16], strides = [1, 1]} : vector<3x16xf32> to vector<1x16xf32>
    %102 = vector.shape_cast %101 : vector<1x16xf32> to vector<16xf32>
    %103 = vector.shape_cast %102 : vector<16xf32> to vector<1x1x1x16xf32>
    %104 = vector.broadcast %103 : vector<1x1x1x16xf32> to vector<4x8x8x16xf32>
    %105 = arith.mulf %100, %104 : vector<4x8x8x16xf32>
    %106 = arith.addf %99, %105 : vector<4x8x8x16xf32>
    %c0_92 = arith.constant 0 : index
    %c0_93 = arith.constant 0 : index
    %c0_94 = arith.constant 0 : index
    %c0_95 = arith.constant 0 : index
    %107 = vector.load %arg18[%c0_92, %c0_93, %c0_94, %c0_95] : memref<6x10x8x16xf32, #tpu.memory_space<vmem>>, vector<4x8x8x16xf32>
    %108 = vector.extract_strided_slice %92 {offsets = [2, 0], sizes = [1, 16], strides = [1, 1]} : vector<3x16xf32> to vector<1x16xf32>
    %109 = vector.shape_cast %108 : vector<1x16xf32> to vector<16xf32>
    %110 = vector.shape_cast %109 : vector<16xf32> to vector<1x1x1x16xf32>
    %111 = vector.broadcast %110 : vector<1x1x1x16xf32> to vector<4x8x8x16xf32>
    %112 = arith.mulf %107, %111 : vector<4x8x8x16xf32>
    %113 = arith.addf %106, %112 : vector<4x8x8x16xf32>
    %114 = vector.extract_strided_slice %7 {offsets = [0, 1, 0, 0], sizes = [1, 1, 3, 16], strides = [1, 1, 1, 1]} : vector<3x3x3x16xf32> to vector<1x1x3x16xf32>
    %115 = vector.shape_cast %114 : vector<1x1x3x16xf32> to vector<3x16xf32>
    %c0_96 = arith.constant 0 : index
    %c1_97 = arith.constant 1 : index
    %c0_98 = arith.constant 0 : index
    %c0_99 = arith.constant 0 : index
    %116 = vector.load %arg17[%c0_96, %c1_97, %c0_98, %c0_99] : memref<6x10x8x16xf32, #tpu.memory_space<vmem>>, vector<4x8x8x16xf32>
    %117 = vector.extract_strided_slice %115 {offsets = [0, 0], sizes = [1, 16], strides = [1, 1]} : vector<3x16xf32> to vector<1x16xf32>
    %118 = vector.shape_cast %117 : vector<1x16xf32> to vector<16xf32>
    %119 = vector.shape_cast %118 : vector<16xf32> to vector<1x1x1x16xf32>
    %120 = vector.broadcast %119 : vector<1x1x1x16xf32> to vector<4x8x8x16xf32>
    %121 = arith.mulf %116, %120 : vector<4x8x8x16xf32>
    %122 = arith.addf %113, %121 : vector<4x8x8x16xf32>
    %c0_100 = arith.constant 0 : index
    %c1_101 = arith.constant 1 : index
    %c0_102 = arith.constant 0 : index
    %c0_103 = arith.constant 0 : index
    %123 = vector.load %arg16[%c0_100, %c1_101, %c0_102, %c0_103] : memref<6x10x8x16xf32, #tpu.memory_space<vmem>>, vector<4x8x8x16xf32>
    %124 = vector.extract_strided_slice %115 {offsets = [1, 0], sizes = [1, 16], strides = [1, 1]} : vector<3x16xf32> to vector<1x16xf32>
    %125 = vector.shape_cast %124 : vector<1x16xf32> to vector<16xf32>
    %126 = vector.shape_cast %125 : vector<16xf32> to vector<1x1x1x16xf32>
    %127 = vector.broadcast %126 : vector<1x1x1x16xf32> to vector<4x8x8x16xf32>
    %128 = arith.mulf %123, %127 : vector<4x8x8x16xf32>
    %129 = arith.addf %122, %128 : vector<4x8x8x16xf32>
    %c0_104 = arith.constant 0 : index
    %c1_105 = arith.constant 1 : index
    %c0_106 = arith.constant 0 : index
    %c0_107 = arith.constant 0 : index
    %130 = vector.load %arg18[%c0_104, %c1_105, %c0_106, %c0_107] : memref<6x10x8x16xf32, #tpu.memory_space<vmem>>, vector<4x8x8x16xf32>
    %131 = vector.extract_strided_slice %115 {offsets = [2, 0], sizes = [1, 16], strides = [1, 1]} : vector<3x16xf32> to vector<1x16xf32>
    %132 = vector.shape_cast %131 : vector<1x16xf32> to vector<16xf32>
    %133 = vector.shape_cast %132 : vector<16xf32> to vector<1x1x1x16xf32>
    %134 = vector.broadcast %133 : vector<1x1x1x16xf32> to vector<4x8x8x16xf32>
    %135 = arith.mulf %130, %134 : vector<4x8x8x16xf32>
    %136 = arith.addf %129, %135 : vector<4x8x8x16xf32>
    %137 = vector.extract_strided_slice %7 {offsets = [0, 2, 0, 0], sizes = [1, 1, 3, 16], strides = [1, 1, 1, 1]} : vector<3x3x3x16xf32> to vector<1x1x3x16xf32>
    %138 = vector.shape_cast %137 : vector<1x1x3x16xf32> to vector<3x16xf32>
    %c0_108 = arith.constant 0 : index
    %c2 = arith.constant 2 : index
    %c0_109 = arith.constant 0 : index
    %c0_110 = arith.constant 0 : index
    %139 = vector.load %arg17[%c0_108, %c2, %c0_109, %c0_110] : memref<6x10x8x16xf32, #tpu.memory_space<vmem>>, vector<4x8x8x16xf32>
    %140 = vector.extract_strided_slice %138 {offsets = [0, 0], sizes = [1, 16], strides = [1, 1]} : vector<3x16xf32> to vector<1x16xf32>
    %141 = vector.shape_cast %140 : vector<1x16xf32> to vector<16xf32>
    %142 = vector.shape_cast %141 : vector<16xf32> to vector<1x1x1x16xf32>
    %143 = vector.broadcast %142 : vector<1x1x1x16xf32> to vector<4x8x8x16xf32>
    %144 = arith.mulf %139, %143 : vector<4x8x8x16xf32>
    %145 = arith.addf %136, %144 : vector<4x8x8x16xf32>
    %c0_111 = arith.constant 0 : index
    %c2_112 = arith.constant 2 : index
    %c0_113 = arith.constant 0 : index
    %c0_114 = arith.constant 0 : index
    %146 = vector.load %arg16[%c0_111, %c2_112, %c0_113, %c0_114] : memref<6x10x8x16xf32, #tpu.memory_space<vmem>>, vector<4x8x8x16xf32>
    %147 = vector.extract_strided_slice %138 {offsets = [1, 0], sizes = [1, 16], strides = [1, 1]} : vector<3x16xf32> to vector<1x16xf32>
    %148 = vector.shape_cast %147 : vector<1x16xf32> to vector<16xf32>
    %149 = vector.shape_cast %148 : vector<16xf32> to vector<1x1x1x16xf32>
    %150 = vector.broadcast %149 : vector<1x1x1x16xf32> to vector<4x8x8x16xf32>
    %151 = arith.mulf %146, %150 : vector<4x8x8x16xf32>
    %152 = arith.addf %145, %151 : vector<4x8x8x16xf32>
    %c0_115 = arith.constant 0 : index
    %c2_116 = arith.constant 2 : index
    %c0_117 = arith.constant 0 : index
    %c0_118 = arith.constant 0 : index
    %153 = vector.load %arg18[%c0_115, %c2_116, %c0_117, %c0_118] : memref<6x10x8x16xf32, #tpu.memory_space<vmem>>, vector<4x8x8x16xf32>
    %154 = vector.extract_strided_slice %138 {offsets = [2, 0], sizes = [1, 16], strides = [1, 1]} : vector<3x16xf32> to vector<1x16xf32>
    %155 = vector.shape_cast %154 : vector<1x16xf32> to vector<16xf32>
    %156 = vector.shape_cast %155 : vector<16xf32> to vector<1x1x1x16xf32>
    %157 = vector.broadcast %156 : vector<1x1x1x16xf32> to vector<4x8x8x16xf32>
    %158 = arith.mulf %153, %157 : vector<4x8x8x16xf32>
    %159 = arith.addf %152, %158 : vector<4x8x8x16xf32>
    %160 = vector.extract_strided_slice %7 {offsets = [1, 0, 0, 0], sizes = [1, 1, 3, 16], strides = [1, 1, 1, 1]} : vector<3x3x3x16xf32> to vector<1x1x3x16xf32>
    %161 = vector.shape_cast %160 : vector<1x1x3x16xf32> to vector<3x16xf32>
    %c1_119 = arith.constant 1 : index
    %c0_120 = arith.constant 0 : index
    %c0_121 = arith.constant 0 : index
    %c0_122 = arith.constant 0 : index
    %162 = vector.load %arg17[%c1_119, %c0_120, %c0_121, %c0_122] : memref<6x10x8x16xf32, #tpu.memory_space<vmem>>, vector<4x8x8x16xf32>
    %163 = vector.extract_strided_slice %161 {offsets = [0, 0], sizes = [1, 16], strides = [1, 1]} : vector<3x16xf32> to vector<1x16xf32>
    %164 = vector.shape_cast %163 : vector<1x16xf32> to vector<16xf32>
    %165 = vector.shape_cast %164 : vector<16xf32> to vector<1x1x1x16xf32>
    %166 = vector.broadcast %165 : vector<1x1x1x16xf32> to vector<4x8x8x16xf32>
    %167 = arith.mulf %162, %166 : vector<4x8x8x16xf32>
    %168 = arith.addf %159, %167 : vector<4x8x8x16xf32>
    %c1_123 = arith.constant 1 : index
    %c0_124 = arith.constant 0 : index
    %c0_125 = arith.constant 0 : index
    %c0_126 = arith.constant 0 : index
    %169 = vector.load %arg16[%c1_123, %c0_124, %c0_125, %c0_126] : memref<6x10x8x16xf32, #tpu.memory_space<vmem>>, vector<4x8x8x16xf32>
    %170 = vector.extract_strided_slice %161 {offsets = [1, 0], sizes = [1, 16], strides = [1, 1]} : vector<3x16xf32> to vector<1x16xf32>
    %171 = vector.shape_cast %170 : vector<1x16xf32> to vector<16xf32>
    %172 = vector.shape_cast %171 : vector<16xf32> to vector<1x1x1x16xf32>
    %173 = vector.broadcast %172 : vector<1x1x1x16xf32> to vector<4x8x8x16xf32>
    %174 = arith.mulf %169, %173 : vector<4x8x8x16xf32>
    %175 = arith.addf %168, %174 : vector<4x8x8x16xf32>
    %c1_127 = arith.constant 1 : index
    %c0_128 = arith.constant 0 : index
    %c0_129 = arith.constant 0 : index
    %c0_130 = arith.constant 0 : index
    %176 = vector.load %arg18[%c1_127, %c0_128, %c0_129, %c0_130] : memref<6x10x8x16xf32, #tpu.memory_space<vmem>>, vector<4x8x8x16xf32>
    %177 = vector.extract_strided_slice %161 {offsets = [2, 0], sizes = [1, 16], strides = [1, 1]} : vector<3x16xf32> to vector<1x16xf32>
    %178 = vector.shape_cast %177 : vector<1x16xf32> to vector<16xf32>
    %179 = vector.shape_cast %178 : vector<16xf32> to vector<1x1x1x16xf32>
    %180 = vector.broadcast %179 : vector<1x1x1x16xf32> to vector<4x8x8x16xf32>
    %181 = arith.mulf %176, %180 : vector<4x8x8x16xf32>
    %182 = arith.addf %175, %181 : vector<4x8x8x16xf32>
    %183 = vector.extract_strided_slice %7 {offsets = [1, 1, 0, 0], sizes = [1, 1, 3, 16], strides = [1, 1, 1, 1]} : vector<3x3x3x16xf32> to vector<1x1x3x16xf32>
    %184 = vector.shape_cast %183 : vector<1x1x3x16xf32> to vector<3x16xf32>
    %c1_131 = arith.constant 1 : index
    %c1_132 = arith.constant 1 : index
    %c0_133 = arith.constant 0 : index
    %c0_134 = arith.constant 0 : index
    %185 = vector.load %arg17[%c1_131, %c1_132, %c0_133, %c0_134] : memref<6x10x8x16xf32, #tpu.memory_space<vmem>>, vector<4x8x8x16xf32>
    %186 = vector.extract_strided_slice %184 {offsets = [0, 0], sizes = [1, 16], strides = [1, 1]} : vector<3x16xf32> to vector<1x16xf32>
    %187 = vector.shape_cast %186 : vector<1x16xf32> to vector<16xf32>
    %188 = vector.shape_cast %187 : vector<16xf32> to vector<1x1x1x16xf32>
    %189 = vector.broadcast %188 : vector<1x1x1x16xf32> to vector<4x8x8x16xf32>
    %190 = arith.mulf %185, %189 : vector<4x8x8x16xf32>
    %191 = arith.addf %182, %190 : vector<4x8x8x16xf32>
    %c1_135 = arith.constant 1 : index
    %c1_136 = arith.constant 1 : index
    %c0_137 = arith.constant 0 : index
    %c0_138 = arith.constant 0 : index
    %192 = vector.load %arg16[%c1_135, %c1_136, %c0_137, %c0_138] : memref<6x10x8x16xf32, #tpu.memory_space<vmem>>, vector<4x8x8x16xf32>
    %193 = vector.extract_strided_slice %184 {offsets = [1, 0], sizes = [1, 16], strides = [1, 1]} : vector<3x16xf32> to vector<1x16xf32>
    %194 = vector.shape_cast %193 : vector<1x16xf32> to vector<16xf32>
    %195 = vector.shape_cast %194 : vector<16xf32> to vector<1x1x1x16xf32>
    %196 = vector.broadcast %195 : vector<1x1x1x16xf32> to vector<4x8x8x16xf32>
    %197 = arith.mulf %192, %196 : vector<4x8x8x16xf32>
    %198 = arith.addf %191, %197 : vector<4x8x8x16xf32>
    %c1_139 = arith.constant 1 : index
    %c1_140 = arith.constant 1 : index
    %c0_141 = arith.constant 0 : index
    %c0_142 = arith.constant 0 : index
    %199 = vector.load %arg18[%c1_139, %c1_140, %c0_141, %c0_142] : memref<6x10x8x16xf32, #tpu.memory_space<vmem>>, vector<4x8x8x16xf32>
    %200 = vector.extract_strided_slice %184 {offsets = [2, 0], sizes = [1, 16], strides = [1, 1]} : vector<3x16xf32> to vector<1x16xf32>
    %201 = vector.shape_cast %200 : vector<1x16xf32> to vector<16xf32>
    %202 = vector.shape_cast %201 : vector<16xf32> to vector<1x1x1x16xf32>
    %203 = vector.broadcast %202 : vector<1x1x1x16xf32> to vector<4x8x8x16xf32>
    %204 = arith.mulf %199, %203 : vector<4x8x8x16xf32>
    %205 = arith.addf %198, %204 : vector<4x8x8x16xf32>
    %206 = vector.extract_strided_slice %7 {offsets = [1, 2, 0, 0], sizes = [1, 1, 3, 16], strides = [1, 1, 1, 1]} : vector<3x3x3x16xf32> to vector<1x1x3x16xf32>
    %207 = vector.shape_cast %206 : vector<1x1x3x16xf32> to vector<3x16xf32>
    %c1_143 = arith.constant 1 : index
    %c2_144 = arith.constant 2 : index
    %c0_145 = arith.constant 0 : index
    %c0_146 = arith.constant 0 : index
    %208 = vector.load %arg17[%c1_143, %c2_144, %c0_145, %c0_146] : memref<6x10x8x16xf32, #tpu.memory_space<vmem>>, vector<4x8x8x16xf32>
    %209 = vector.extract_strided_slice %207 {offsets = [0, 0], sizes = [1, 16], strides = [1, 1]} : vector<3x16xf32> to vector<1x16xf32>
    %210 = vector.shape_cast %209 : vector<1x16xf32> to vector<16xf32>
    %211 = vector.shape_cast %210 : vector<16xf32> to vector<1x1x1x16xf32>
    %212 = vector.broadcast %211 : vector<1x1x1x16xf32> to vector<4x8x8x16xf32>
    %213 = arith.mulf %208, %212 : vector<4x8x8x16xf32>
    %214 = arith.addf %205, %213 : vector<4x8x8x16xf32>
    %c1_147 = arith.constant 1 : index
    %c2_148 = arith.constant 2 : index
    %c0_149 = arith.constant 0 : index
    %c0_150 = arith.constant 0 : index
    %215 = vector.load %arg16[%c1_147, %c2_148, %c0_149, %c0_150] : memref<6x10x8x16xf32, #tpu.memory_space<vmem>>, vector<4x8x8x16xf32>
    %216 = vector.extract_strided_slice %207 {offsets = [1, 0], sizes = [1, 16], strides = [1, 1]} : vector<3x16xf32> to vector<1x16xf32>
    %217 = vector.shape_cast %216 : vector<1x16xf32> to vector<16xf32>
    %218 = vector.shape_cast %217 : vector<16xf32> to vector<1x1x1x16xf32>
    %219 = vector.broadcast %218 : vector<1x1x1x16xf32> to vector<4x8x8x16xf32>
    %220 = arith.mulf %215, %219 : vector<4x8x8x16xf32>
    %221 = arith.addf %214, %220 : vector<4x8x8x16xf32>
    %c1_151 = arith.constant 1 : index
    %c2_152 = arith.constant 2 : index
    %c0_153 = arith.constant 0 : index
    %c0_154 = arith.constant 0 : index
    %222 = vector.load %arg18[%c1_151, %c2_152, %c0_153, %c0_154] : memref<6x10x8x16xf32, #tpu.memory_space<vmem>>, vector<4x8x8x16xf32>
    %223 = vector.extract_strided_slice %207 {offsets = [2, 0], sizes = [1, 16], strides = [1, 1]} : vector<3x16xf32> to vector<1x16xf32>
    %224 = vector.shape_cast %223 : vector<1x16xf32> to vector<16xf32>
    %225 = vector.shape_cast %224 : vector<16xf32> to vector<1x1x1x16xf32>
    %226 = vector.broadcast %225 : vector<1x1x1x16xf32> to vector<4x8x8x16xf32>
    %227 = arith.mulf %222, %226 : vector<4x8x8x16xf32>
    %228 = arith.addf %221, %227 : vector<4x8x8x16xf32>
    %229 = vector.extract_strided_slice %7 {offsets = [2, 0, 0, 0], sizes = [1, 1, 3, 16], strides = [1, 1, 1, 1]} : vector<3x3x3x16xf32> to vector<1x1x3x16xf32>
    %230 = vector.shape_cast %229 : vector<1x1x3x16xf32> to vector<3x16xf32>
    %c2_155 = arith.constant 2 : index
    %c0_156 = arith.constant 0 : index
    %c0_157 = arith.constant 0 : index
    %c0_158 = arith.constant 0 : index
    %231 = vector.load %arg17[%c2_155, %c0_156, %c0_157, %c0_158] : memref<6x10x8x16xf32, #tpu.memory_space<vmem>>, vector<4x8x8x16xf32>
    %232 = vector.extract_strided_slice %230 {offsets = [0, 0], sizes = [1, 16], strides = [1, 1]} : vector<3x16xf32> to vector<1x16xf32>
    %233 = vector.shape_cast %232 : vector<1x16xf32> to vector<16xf32>
    %234 = vector.shape_cast %233 : vector<16xf32> to vector<1x1x1x16xf32>
    %235 = vector.broadcast %234 : vector<1x1x1x16xf32> to vector<4x8x8x16xf32>
    %236 = arith.mulf %231, %235 : vector<4x8x8x16xf32>
    %237 = arith.addf %228, %236 : vector<4x8x8x16xf32>
    %c2_159 = arith.constant 2 : index
    %c0_160 = arith.constant 0 : index
    %c0_161 = arith.constant 0 : index
    %c0_162 = arith.constant 0 : index
    %238 = vector.load %arg16[%c2_159, %c0_160, %c0_161, %c0_162] : memref<6x10x8x16xf32, #tpu.memory_space<vmem>>, vector<4x8x8x16xf32>
    %239 = vector.extract_strided_slice %230 {offsets = [1, 0], sizes = [1, 16], strides = [1, 1]} : vector<3x16xf32> to vector<1x16xf32>
    %240 = vector.shape_cast %239 : vector<1x16xf32> to vector<16xf32>
    %241 = vector.shape_cast %240 : vector<16xf32> to vector<1x1x1x16xf32>
    %242 = vector.broadcast %241 : vector<1x1x1x16xf32> to vector<4x8x8x16xf32>
    %243 = arith.mulf %238, %242 : vector<4x8x8x16xf32>
    %244 = arith.addf %237, %243 : vector<4x8x8x16xf32>
    %c2_163 = arith.constant 2 : index
    %c0_164 = arith.constant 0 : index
    %c0_165 = arith.constant 0 : index
    %c0_166 = arith.constant 0 : index
    %245 = vector.load %arg18[%c2_163, %c0_164, %c0_165, %c0_166] : memref<6x10x8x16xf32, #tpu.memory_space<vmem>>, vector<4x8x8x16xf32>
    %246 = vector.extract_strided_slice %230 {offsets = [2, 0], sizes = [1, 16], strides = [1, 1]} : vector<3x16xf32> to vector<1x16xf32>
    %247 = vector.shape_cast %246 : vector<1x16xf32> to vector<16xf32>
    %248 = vector.shape_cast %247 : vector<16xf32> to vector<1x1x1x16xf32>
    %249 = vector.broadcast %248 : vector<1x1x1x16xf32> to vector<4x8x8x16xf32>
    %250 = arith.mulf %245, %249 : vector<4x8x8x16xf32>
    %251 = arith.addf %244, %250 : vector<4x8x8x16xf32>
    %252 = vector.extract_strided_slice %7 {offsets = [2, 1, 0, 0], sizes = [1, 1, 3, 16], strides = [1, 1, 1, 1]} : vector<3x3x3x16xf32> to vector<1x1x3x16xf32>
    %253 = vector.shape_cast %252 : vector<1x1x3x16xf32> to vector<3x16xf32>
    %c2_167 = arith.constant 2 : index
    %c1_168 = arith.constant 1 : index
    %c0_169 = arith.constant 0 : index
    %c0_170 = arith.constant 0 : index
    %254 = vector.load %arg17[%c2_167, %c1_168, %c0_169, %c0_170] : memref<6x10x8x16xf32, #tpu.memory_space<vmem>>, vector<4x8x8x16xf32>
    %255 = vector.extract_strided_slice %253 {offsets = [0, 0], sizes = [1, 16], strides = [1, 1]} : vector<3x16xf32> to vector<1x16xf32>
    %256 = vector.shape_cast %255 : vector<1x16xf32> to vector<16xf32>
    %257 = vector.shape_cast %256 : vector<16xf32> to vector<1x1x1x16xf32>
    %258 = vector.broadcast %257 : vector<1x1x1x16xf32> to vector<4x8x8x16xf32>
    %259 = arith.mulf %254, %258 : vector<4x8x8x16xf32>
    %260 = arith.addf %251, %259 : vector<4x8x8x16xf32>
    %c2_171 = arith.constant 2 : index
    %c1_172 = arith.constant 1 : index
    %c0_173 = arith.constant 0 : index
    %c0_174 = arith.constant 0 : index
    %261 = vector.load %arg16[%c2_171, %c1_172, %c0_173, %c0_174] : memref<6x10x8x16xf32, #tpu.memory_space<vmem>>, vector<4x8x8x16xf32>
    %262 = vector.extract_strided_slice %253 {offsets = [1, 0], sizes = [1, 16], strides = [1, 1]} : vector<3x16xf32> to vector<1x16xf32>
    %263 = vector.shape_cast %262 : vector<1x16xf32> to vector<16xf32>
    %264 = vector.shape_cast %263 : vector<16xf32> to vector<1x1x1x16xf32>
    %265 = vector.broadcast %264 : vector<1x1x1x16xf32> to vector<4x8x8x16xf32>
    %266 = arith.mulf %261, %265 : vector<4x8x8x16xf32>
    %267 = arith.addf %260, %266 : vector<4x8x8x16xf32>
    %c2_175 = arith.constant 2 : index
    %c1_176 = arith.constant 1 : index
    %c0_177 = arith.constant 0 : index
    %c0_178 = arith.constant 0 : index
    %268 = vector.load %arg18[%c2_175, %c1_176, %c0_177, %c0_178] : memref<6x10x8x16xf32, #tpu.memory_space<vmem>>, vector<4x8x8x16xf32>
    %269 = vector.extract_strided_slice %253 {offsets = [2, 0], sizes = [1, 16], strides = [1, 1]} : vector<3x16xf32> to vector<1x16xf32>
    %270 = vector.shape_cast %269 : vector<1x16xf32> to vector<16xf32>
    %271 = vector.shape_cast %270 : vector<16xf32> to vector<1x1x1x16xf32>
    %272 = vector.broadcast %271 : vector<1x1x1x16xf32> to vector<4x8x8x16xf32>
    %273 = arith.mulf %268, %272 : vector<4x8x8x16xf32>
    %274 = arith.addf %267, %273 : vector<4x8x8x16xf32>
    %275 = vector.extract_strided_slice %7 {offsets = [2, 2, 0, 0], sizes = [1, 1, 3, 16], strides = [1, 1, 1, 1]} : vector<3x3x3x16xf32> to vector<1x1x3x16xf32>
    %276 = vector.shape_cast %275 : vector<1x1x3x16xf32> to vector<3x16xf32>
    %c2_179 = arith.constant 2 : index
    %c2_180 = arith.constant 2 : index
    %c0_181 = arith.constant 0 : index
    %c0_182 = arith.constant 0 : index
    %277 = vector.load %arg17[%c2_179, %c2_180, %c0_181, %c0_182] : memref<6x10x8x16xf32, #tpu.memory_space<vmem>>, vector<4x8x8x16xf32>
    %278 = vector.extract_strided_slice %276 {offsets = [0, 0], sizes = [1, 16], strides = [1, 1]} : vector<3x16xf32> to vector<1x16xf32>
    %279 = vector.shape_cast %278 : vector<1x16xf32> to vector<16xf32>
    %280 = vector.shape_cast %279 : vector<16xf32> to vector<1x1x1x16xf32>
    %281 = vector.broadcast %280 : vector<1x1x1x16xf32> to vector<4x8x8x16xf32>
    %282 = arith.mulf %277, %281 : vector<4x8x8x16xf32>
    %283 = arith.addf %274, %282 : vector<4x8x8x16xf32>
    %c2_183 = arith.constant 2 : index
    %c2_184 = arith.constant 2 : index
    %c0_185 = arith.constant 0 : index
    %c0_186 = arith.constant 0 : index
    %284 = vector.load %arg16[%c2_183, %c2_184, %c0_185, %c0_186] : memref<6x10x8x16xf32, #tpu.memory_space<vmem>>, vector<4x8x8x16xf32>
    %285 = vector.extract_strided_slice %276 {offsets = [1, 0], sizes = [1, 16], strides = [1, 1]} : vector<3x16xf32> to vector<1x16xf32>
    %286 = vector.shape_cast %285 : vector<1x16xf32> to vector<16xf32>
    %287 = vector.shape_cast %286 : vector<16xf32> to vector<1x1x1x16xf32>
    %288 = vector.broadcast %287 : vector<1x1x1x16xf32> to vector<4x8x8x16xf32>
    %289 = arith.mulf %284, %288 : vector<4x8x8x16xf32>
    %290 = arith.addf %283, %289 : vector<4x8x8x16xf32>
    %c2_187 = arith.constant 2 : index
    %c2_188 = arith.constant 2 : index
    %c0_189 = arith.constant 0 : index
    %c0_190 = arith.constant 0 : index
    %291 = vector.load %arg18[%c2_187, %c2_188, %c0_189, %c0_190] : memref<6x10x8x16xf32, #tpu.memory_space<vmem>>, vector<4x8x8x16xf32>
    %292 = vector.extract_strided_slice %276 {offsets = [2, 0], sizes = [1, 16], strides = [1, 1]} : vector<3x16xf32> to vector<1x16xf32>
    %293 = vector.shape_cast %292 : vector<1x16xf32> to vector<16xf32>
    %294 = vector.shape_cast %293 : vector<16xf32> to vector<1x1x1x16xf32>
    %295 = vector.broadcast %294 : vector<1x1x1x16xf32> to vector<4x8x8x16xf32>
    %296 = arith.mulf %291, %295 : vector<4x8x8x16xf32>
    %297 = arith.addf %290, %296 : vector<4x8x8x16xf32>
    %298 = vector.shape_cast %8 : vector<1x16xf32> to vector<1x1x1x16xf32>
    %299 = vector.broadcast %298 : vector<1x1x1x16xf32> to vector<4x8x8x16xf32>
    %300 = arith.addf %297, %299 : vector<4x8x8x16xf32>
    %cst_191 = arith.constant dense<0.000000e+00> : vector<4x8x8xf32>
    %301 = vector.multi_reduction <add>, %300, %cst_191 [3] : vector<4x8x8x16xf32> to vector<4x8x8xf32>
    %302 = vector.shape_cast %301 : vector<4x8x8xf32> to vector<4x8x8x1xf32>
    %cst_192 = arith.constant 1.600000e+01 : f32
    %303 = vector.broadcast %cst_192 : f32 to vector<4x8x8x1xf32>
    %304 = arith.divf %302, %303 : vector<4x8x8x1xf32>
    %305 = vector.broadcast %304 : vector<4x8x8x1xf32> to vector<4x8x8x16xf32>
    %306 = arith.subf %300, %305 : vector<4x8x8x16xf32>
    %307 = arith.mulf %306, %306 : vector<4x8x8x16xf32>
    %cst_193 = arith.constant dense<0.000000e+00> : vector<4x8x8xf32>
    %308 = vector.multi_reduction <add>, %307, %cst_193 [3] : vector<4x8x8x16xf32> to vector<4x8x8xf32>
    %309 = vector.shape_cast %308 : vector<4x8x8xf32> to vector<4x8x8x1xf32>
    %cst_194 = arith.constant 1.600000e+01 : f32
    %310 = vector.broadcast %cst_194 : f32 to vector<4x8x8x1xf32>
    %311 = arith.divf %309, %310 : vector<4x8x8x1xf32>
    %cst_195 = arith.constant 9.99999974E-6 : f32
    %312 = vector.broadcast %cst_195 : f32 to vector<4x8x8x1xf32>
    %313 = arith.addf %311, %312 : vector<4x8x8x1xf32>
    %314 = math.rsqrt %313 : vector<4x8x8x1xf32>
    %315 = vector.broadcast %314 : vector<4x8x8x1xf32> to vector<4x8x8x16xf32>
    %316 = arith.mulf %306, %315 : vector<4x8x8x16xf32>
    %317 = vector.shape_cast %9 : vector<1x16xf32> to vector<1x1x1x16xf32>
    %318 = vector.broadcast %317 : vector<1x1x1x16xf32> to vector<4x8x8x16xf32>
    %319 = arith.mulf %316, %318 : vector<4x8x8x16xf32>
    %320 = vector.shape_cast %10 : vector<1x16xf32> to vector<1x1x1x16xf32>
    %321 = vector.broadcast %320 : vector<1x1x1x16xf32> to vector<4x8x8x16xf32>
    %322 = arith.addf %319, %321 : vector<4x8x8x16xf32>
    %323 = vector.shape_cast %322 : vector<4x8x8x16xf32> to vector<256x16xf32>
    %324 = arith.truncf %323 : vector<256x16xf32> to vector<256x16xbf16>
    %cst_196 = arith.constant dense<0.000000e+00> : vector<256x32xf32>
    %325 = tpu.matmul %324, %11, %cst_196 {dimension_numbers = #tpu.dot_dimension_numbers<[1], [0], [0], [1], [0, 0, 1, 1], [], []>} : vector<256x16xbf16>, vector<16x32xbf16>, vector<256x32xf32> -> vector<256x32xf32>
    %326 = vector.broadcast %12 : vector<1x32xf32> to vector<256x32xf32>
    %327 = arith.addf %325, %326 : vector<256x32xf32>
    %328 = vector.extract_strided_slice %19 {offsets = [1, 0, 0, 0], sizes = [4, 8, 8, 32], strides = [1, 1, 1, 1]} : vector<6x8x8x32xf32> to vector<4x8x8x32xf32>
    %329 = vector.shape_cast %327 : vector<256x32xf32> to vector<4x8x8x32xf32>
    %330 = arith.addf %328, %329 : vector<4x8x8x32xf32>
    %c0_197 = arith.constant 0 : index
    %c0_198 = arith.constant 0 : index
    %c0_199 = arith.constant 0 : index
    %c0_200 = arith.constant 0 : index
    %c0_201 = arith.constant 0 : index
    %331 = vector.load %arg15[%c0_197, %c0_198, %c0_199, %c0_200, %c0_201] : memref<1x4x8x8x32xf32, #tpu.memory_space<vmem>>, vector<1x4x8x8x32xf32>
    %332 = vector.shape_cast %331 : vector<1x4x8x8x32xf32> to vector<4x8x8x32xf32>
    %333 = vector.shape_cast %330 : vector<4x8x8x32xf32> to vector<1x4x8x8x32xf32>
    tpu.vector_store %arg15[%c0_197, %c0_198, %c0_199, %c0_200, %c0_201], %333 {strides = array<i32>} : memref<1x4x8x8x32xf32, #tpu.memory_space<vmem>>, vector<1x4x8x8x32xf32>,
    return
  }
  func.func @transform_0(%arg0: i32, %arg1: i32) -> (i32, i32, i32, i32, i32) {
    %c4_i32 = arith.constant 4 : i32
    %0 = arith.muli %arg1, %c4_i32 : i32
    %c1_i32 = arith.constant 1 : i32
    %1 = arith.subi %0, %c1_i32 : i32
    %c0_i32 = arith.constant 0 : i32
    %2 = arith.maxsi %1, %c0_i32 : i32
    %c0_i32_0 = arith.constant 0 : i32
    %c0_i32_1 = arith.constant 0 : i32
    %c0_i32_2 = arith.constant 0 : i32
    %c0_i32_3 = arith.constant 0 : i32
    return %arg0, %2, %c0_i32_0, %c0_i32_1, %c0_i32_2 : i32, i32, i32, i32, i32
  }
  func.func @transform_1(%arg0: i32, %arg1: i32) -> (i32, i32, i32, i32, i32) {
    %c0_i32 = arith.constant 0 : i32
    %c0_i32_0 = arith.constant 0 : i32
    %c0_i32_1 = arith.constant 0 : i32
    %c0_i32_2 = arith.constant 0 : i32
    return %arg0, %arg1, %c0_i32, %c0_i32_0, %c0_i32_1 : i32, i32, i32, i32, i32
  }
  func.func @transform_2(%arg0: i32, %arg1: i32) -> (i32, i32, i32, i32, i32) {
    %c4_i32 = arith.constant 4 : i32
    %0 = arith.muli %arg1, %c4_i32 : i32
    %c4_i32_0 = arith.constant 4 : i32
    %1 = arith.addi %0, %c4_i32_0 : i32
    %c3_i32 = arith.constant 3 : i32
    %2 = arith.minsi %1, %c3_i32 : i32
    %c0_i32 = arith.constant 0 : i32
    %c0_i32_1 = arith.constant 0 : i32
    %c0_i32_2 = arith.constant 0 : i32
    %c0_i32_3 = arith.constant 0 : i32
    return %arg0, %2, %c0_i32, %c0_i32_1, %c0_i32_2 : i32, i32, i32, i32, i32
  }
  func.func @transform_3(%arg0: i32, %arg1: i32) -> (i32, i32) {
    %c0_i32 = arith.constant 0 : i32
    %c0_i32_0 = arith.constant 0 : i32
    %c0_i32_1 = arith.constant 0 : i32
    return %c0_i32, %c0_i32_0 : i32, i32
  }
  func.func @transform_4(%arg0: i32, %arg1: i32) -> (i32, i32) {
    %c0_i32 = arith.constant 0 : i32
    %c0_i32_0 = arith.constant 0 : i32
    %c0_i32_1 = arith.constant 0 : i32
    return %c0_i32, %c0_i32_0 : i32, i32
  }
  func.func @transform_5(%arg0: i32, %arg1: i32) -> (i32, i32) {
    %c0_i32 = arith.constant 0 : i32
    %c0_i32_0 = arith.constant 0 : i32
    %c0_i32_1 = arith.constant 0 : i32
    return %c0_i32, %c0_i32_0 : i32, i32
  }
  func.func @transform_6(%arg0: i32, %arg1: i32) -> (i32, i32) {
    %c0_i32 = arith.constant 0 : i32
    %c0_i32_0 = arith.constant 0 : i32
    %c0_i32_1 = arith.constant 0 : i32
    return %c0_i32, %c0_i32_0 : i32, i32
  }
  func.func @transform_7(%arg0: i32, %arg1: i32) -> (i32, i32, i32, i32) {
    %c0_i32 = arith.constant 0 : i32
    %c0_i32_0 = arith.constant 0 : i32
    %c0_i32_1 = arith.constant 0 : i32
    %c0_i32_2 = arith.constant 0 : i32
    %c0_i32_3 = arith.constant 0 : i32
    return %c0_i32, %c0_i32_0, %c0_i32_1, %c0_i32_2 : i32, i32, i32, i32
  }
  func.func @transform_8(%arg0: i32, %arg1: i32) -> (i32, i32) {
    %c0_i32 = arith.constant 0 : i32
    %c0_i32_0 = arith.constant 0 : i32
    %c0_i32_1 = arith.constant 0 : i32
    return %c0_i32, %c0_i32_0 : i32, i32
  }
  func.func @transform_9(%arg0: i32, %arg1: i32) -> (i32, i32) {
    %c0_i32 = arith.constant 0 : i32
    %c0_i32_0 = arith.constant 0 : i32
    %c0_i32_1 = arith.constant 0 : i32
    return %c0_i32, %c0_i32_0 : i32, i32
  }
  func.func @transform_10(%arg0: i32, %arg1: i32) -> (i32, i32) {
    %c0_i32 = arith.constant 0 : i32
    %c0_i32_0 = arith.constant 0 : i32
    %c0_i32_1 = arith.constant 0 : i32
    return %c0_i32, %c0_i32_0 : i32, i32
  }
  func.func @transform_11(%arg0: i32, %arg1: i32) -> (i32, i32) {
    %c0_i32 = arith.constant 0 : i32
    %c0_i32_0 = arith.constant 0 : i32
    %c0_i32_1 = arith.constant 0 : i32
    return %c0_i32, %c0_i32_0 : i32, i32
  }
  func.func @transform_12(%arg0: i32, %arg1: i32) -> (i32, i32) {
    %c0_i32 = arith.constant 0 : i32
    %c0_i32_0 = arith.constant 0 : i32
    %c0_i32_1 = arith.constant 0 : i32
    return %c0_i32, %c0_i32_0 : i32, i32
  }
  func.func @transform_13(%arg0: i32, %arg1: i32) -> (i32, i32, i32, i32, i32) {
    %c0_i32 = arith.constant 0 : i32
    %c0_i32_0 = arith.constant 0 : i32
    %c0_i32_1 = arith.constant 0 : i32
    %c0_i32_2 = arith.constant 0 : i32
    return %arg0, %arg1, %c0_i32, %c0_i32_0, %c0_i32_1 : i32, i32, i32, i32, i32
  }
}

</mosaic_0001>

<bundles_post_ra>
// kernel: tpu_custom_call.1
= control target key start
LH: loop header
LB: loop body
LE: loop exit
PB: predicated region body
PF: predicated region fallthrough
CT: control target
= control target key end

     0   :  { %s11359_s0 = inlined_call_operand.hbm [shape: f32[2,4,8,8,32], index: 0, kind: input, shape index: {}]   ;;  %s11360_s1 = inlined_call_operand.hbm [shape: f32[2,4,8,8,32], index: 1, kind: input, shape index: {}]   ;;  %s11361_s2 = inlined_call_operand.hbm [shape: f32[2,4,8,8,32], index: 2, kind: input, shape index: {}]   ;;  %s11362_s3 = inlined_call_operand.vmem [shape: f32[1,32], index: 3, kind: input, shape index: {}]   ;;  %s11363_s4 = inlined_call_operand.vmem [shape: f32[1,32], index: 4, kind: input, shape index: {}]   ;;  %s11364_s5 = inlined_call_operand.vmem [shape: bf16[32,16], index: 5, kind: input, shape index: {}]   ;;  %s11365_s6 = inlined_call_operand.vmem [shape: f32[1,16], index: 6, kind: input, shape index: {}]   ;;  %s11366_s7 = inlined_call_operand.vmem [shape: f32[3,3,3,16], index: 7, kind: input, shape index: {}]   ;;  %s11367_s8 = inlined_call_operand.vmem [shape: f32[1,16], index: 8, kind: input, shape index: {}]   ;;  %s11368_s9 = inlined_call_operand.vmem [shape: f32[1,16], index: 9, kind: input, shape index: {}]   ;;  %s11369_s10 = inlined_call_operand.vmem [shape: f32[1,16], index: 10, kind: input, shape index: {}]   ;;  %s11370_s11 = inlined_call_operand.vmem [shape: bf16[16,32], index: 11, kind: input, shape index: {}]   ;;  %s11371_s12 = inlined_call_operand.vmem [shape: f32[1,32], index: 12, kind: input, shape index: {}]   ;;  %s11372_s13 = inlined_call_operand.hbm [shape: f32[2,4,8,8,32], index: 13, kind: output, shape index: {}]  }
   0x1   :  { %11607 = sst [smem:[#allocation158_spill]] %s11360_s1 }
   0x2   :  { %11608 = sst [smem:[#allocation159_spill]] %s11368_s9 }
   0x3   :  { %11609 = sst [smem:[#allocation160_spill]] %s11369_s10 }
   0x4   :  { %11610 = sst [smem:[#allocation161_spill]] %s11371_s12 }
   0x5   :  { %11611 = sst [smem:[#allocation162_spill]] %s11372_s13 }
   0x6   :  { %18 = vsyncpa [#allocation6], 0 }
   0x7   :  { %20 = vsyncpa [#allocation6 + $0x1], 0 }
   0x8   :  { %21 = vsyncpa [#allocation9], 0 }
   0x9   :  { %23 = vsyncpa [#allocation9 + $0x1], 0 }
   0xa   :  { %24 = vsyncpa [#allocation7], 0 }
   0xb   :  { %26 = vsyncpa [#allocation7 + $0x1], 0  ;;  %s6688_s25 = smov 0   ;;  %s6690_s26 = smov 0  }
   0xc   :  { %s6692_s27 = smov 0   ;;  %s6694_s28 = smov 0  }
   0xd   :  { %s6696_s29 = smov 0   ;;  %s6698_s30 = smov 0  }
   0xe LB: > { %11612 = sst [smem:[#allocation15_spill]] %s6587_s25  ;;  %s6719_s14 = sadd.s32 4294967295, %s6607_s30   ;;  %s6607_s30 = sphi %s6698_s30, %s32_s30   ;;  %s6603_s29 = sphi %s6696_s29, %s12231_s29   ;;  %s6599_s28 = sphi %s6694_s28, %s12230_s28   ;;  %s6595_s27 = sphi %s6692_s27, %s12229_s27   ;;  %s6591_s26 = sphi %s6690_s26, %s12233_s26   ;;  %s6587_s25 = sphi %s6688_s25, %s12232_s25  }
   0xf   : > { %11613 = sst [smem:[#allocation16_spill]] %s6595_s27  ;;  %s5896_s15 = sadd.s32 4294967294, %s6607_s30  }
  0x10   : > { %11614 = sst [smem:[#allocation17_spill]] %s6599_s28  ;;  %s44_s16 = sadd.s32 1, %s6603_s29 }
  0x11   : > { %11615 = sst [smem:[#allocation18_spill]] %s6603_s29  ;;  %s61_s17 = sadd.s32 1, %s6595_s27 }
  0x12   : > { %11616 = sst [smem:[#allocation19_spill]] %s6607_s30  ;;  %p46_p0 = scmp.ge.s32.totalorder %s44_s16, 2 }
  0x13   : > { %p68_p1 = scmp.ne.s32.totalorder %s6595_s27, %s6591_s26  ;;  %p69_p2 = scmp.eq.s32.totalorder %s6607_s30, 0 }
  0x14   : > { %p74_p3 = scmp.ne.s32.totalorder %s6591_s26, %s6587_s25  ;;  %s12235_s16 = smov (%p46_p0, %s44_s16), 0 }
  0x15   : > { %11617 = sst [smem:[#allocation20_spill]] %s12235_s16  ;;  %p6731_p4 = por %p69_p2, %p68_p1 }
  0x16   : > { %p75_p5 = scmp.eq.s32.totalorder %s6719_s14, 0  ;;  %s56_s19 = ssub.s32 %s6603_s29, %s12235_s16 }
  0x17   : > { %p374_p6 = scmp.eq.s32.totalorder %s6719_s14, 1  ;;  %p59_p7 = scmp.eq.s32.totalorder %s56_s19, 0 }
  0x18   : > { %p6739_p8 = por %p75_p5, %p74_p3  ;;  %p380_p10 = scmp.eq.s32.totalorder %s5896_s15, 1 }
  0x19   : > { %p6743_p9 = por %p374_p6, %p68_p1  ;;  %p6129_p13 = scmp.lt.s32.totalorder %s6607_s30, 2 }
  0x1a   : > { %s11619_s20 = scalar_select %p6739_p8, 1, 0 }
  0x1b   : > { %s11620_s21 = scalar_select %p6743_p9, 1, 0 }
  0x1c   : > { %s6748_s22 = scalar_select %p59_p7, %s6595_s27, %s61_s17  }
  0x1d   : > { %11621 = sst [smem:[#allocation21_spill]] %s11620_s21  ;;  %p6750_p11 = por %p380_p10, %p74_p3 }
  0x1e   : > { %11622 = sst [smem:[#allocation22_spill]] %s6748_s22  ;;  %s6757_s24 = sand.u32 1, %s6595_s27  }
  0x1f   : > { %s11623_s23 = scalar_select %p6750_p11, 1, 0 }
  0x20   : > { %s6760_s19 = sshll.u32 %s6603_s29, 12  ;;  %p6764_p0 = pnand %p6129_p13, %p6731_p4 }
  0x21   : > { %11624 = sst [smem:[#allocation23_spill]] %s11623_s23  ;;  %s457_s15 = sand.u32 1, %s6607_s30  }
  0x22   : > { %s5902_s17 = sshll.u32 %s6757_s24, 8  ;;  %s11626_s1 = sld [smem:[#allocation158_spill]] }
  0x23   : > { %s461_s29 = scalar_lea.vmem [#allocation8], %s5902_s17  ;;  %s6780_s18 = scalar_lea.sflag [#allocation9], %s457_s15 }
  0x24   : > { %s471_s27 = sshll.u32 %s461_s29, 4  ;;  %p6786_p4 = pneg %p6764_p0  ;;  %s6777_s27 = int_to_ptr.vmem [resolvable:$true] %s471_s27 }
  0x28   : > { %s6774_s23 = scalar_lea.hbm %s11626_s1, %s6760_s19  ;;  %s6436_s29 = scalar_lea.hbm %s11626_s1, 8192 }
  0x29   : > { %s6431_s13 = scalar_lea.hbm %s6774_s23, 4096  ;;  %p6437_p7 = scmp.lt.u32.totalorder %s6774_s23, %s11626_s1 }
  0x2a   : > { %p6432_p3 = scmp.ne.s32.totalorder %s6774_s23, %s6431_s13  ;;  %p6438_p10 = scmp.lt.u32.totalorder %s6436_s29, %s6431_s13 }
  0x2b   : > { %p6440_p12 = scmp.lt.u32.totalorder %s6431_s13, %s6774_s23 }
  0x2c   : > { %p6434_p5 = pnand %p6786_p4, %p6432_p3  ;;  %p6439_p13 = por %p6438_p10, %p6437_p7 }
  0x2e   : > { %p6435_p6 = pneg %p6434_p5  ;;  %p6441_p1 = por %p6440_p12, %p6439_p13 }
  0x30   : > { %p6442_p2 = pnand %p6441_p1, %p6435_p6 }
  0x32   : > { %6445 = shalt.err (!%p6442_p2)
}
  0x33   : > { %s6446_s15 = scalar_lea.vmem %s6777_s27, 4096  ;;  %s6609_s25 = smov [#allocation8]  }
  0x34   : > { %p6447_p3 = scmp.ne.s32.totalorder %s6777_s27, %s6446_s15  ;;  %s6451_s22 = sshll.u32 %s6609_s25, 4  ;;  %s6452_s22 = int_to_ptr.vmem [resolvable:$false] %s6451_s22 }
  0x35   : > { %s6453_s28 = scalar_lea.vmem %s6452_s22, 8192  ;;  %p6454_p9 = scmp.lt.s32.totalorder %s6777_s27, %s6452_s22 }
  0x36   : > { %p6449_p5 = pnand %p6447_p3, %p6786_p4  ;;  %p6455_p8 = scmp.lt.s32.totalorder %s6453_s28, %s6446_s15 }
  0x38   : > { %p6450_p11 = pneg %p6449_p5  ;;  %p6456_p7 = por %p6455_p8, %p6454_p9 }
  0x3a   : > { %p6457_p10 = pnand %p6456_p7, %p6450_p11 }
  0x3c   : > { %6460 = shalt.err (!%p6457_p10)
}
  0x3d   : > { %s11383_s13 = smov 128   ;;  %s11385_s29 = smov 8  }
  0x3e   : > { %6121 = dma.hbm_to_vmem [thread:$0]  (!%p6764_p0), %s6774_s23, 4096, %s6777_s27, %s6780_s18, %s11383_s13, %s11383_s13, %s11385_s29  }
  0x3f   : > { %p11628_p8 = scmp.lt.s32.totalorder %s6607_s30, 3  ;;  %p11629_p9 = scmp.ge.s32.totalorder %s6607_s30, 1 }
  0x40   : > { %s5899_s15 = sshll.u32 %s6757_s24, 6  ;;  %s6826_s28 = scalar_lea.hbm %s11359_s0, %s6760_s19 }
  0x41   : > { %p6817_p11 = pnand %p11629_p9, %p11628_p8  ;;  %s434_s1 = scalar_lea.vmem [#allocation5], %s5899_s15 }
  0x42   : > { %s447_s12 = sshll.u32 %s434_s1, 4  ;;  %s485_s10 = scalar_lea.vmem [#allocation10], %s5899_s15  ;;  %s6828_s12 = int_to_ptr.vmem [resolvable:$true] %s447_s12 }
  0x43   : > { %s11630_s17 = scalar_select %p6817_p11, 1, 0 }
  0x44   : > { %s498_s27 = sshll.u32 %s485_s10, 4  ;;  %s431_s23 = scalar_lea.sflag [#allocation6], %s6757_s24  ;;  %s6830_s27 = int_to_ptr.vmem [resolvable:$true] %s498_s27 }
  0x45   : > { %s6461_s13 = scalar_lea.hbm %s6826_s28, 1024  ;;  %s6466_s29 = scalar_lea.hbm %s11359_s0, 8192 }
  0x46   : > { %p6462_p12 = scmp.ne.s32.totalorder %s6826_s28, %s6461_s13  ;;  %p6467_p6 = scmp.lt.u32.totalorder %s6826_s28, %s11359_s0 }
  0x47   : > { %p6468_p13 = scmp.lt.u32.totalorder %s6466_s29, %s6461_s13  ;;  %p6470_p5 = scmp.lt.u32.totalorder %s6461_s13, %s6826_s28 }
  0x48   : > { %p6464_p1 = pnand %p6462_p12, %p6786_p4 }
  0x49   : > { %p6469_p3 = por %p6468_p13, %p6467_p6 }
  0x4a   : > { %p6465_p2 = pneg %p6464_p1 }
  0x4b   : > { %p6471_p7 = por %p6470_p5, %p6469_p3 }
  0x4d   : > { %p6472_p10 = pnand %p6471_p7, %p6465_p2 }
  0x4f   : > { %6475 = shalt.err (!%p6472_p10)
}
  0x50   : > { %s6476_s1 = scalar_lea.vmem %s6828_s12, 1024  ;;  %s6612_s10 = smov [#allocation5]  }
  0x51   : > { %p6477_p8 = scmp.ne.s32.totalorder %s6828_s12, %s6476_s1  ;;  %s6481_s15 = sshll.u32 %s6612_s10, 4  ;;  %s6482_s15 = int_to_ptr.vmem [resolvable:$false] %s6481_s15 }
  0x52   : > { %s6483_s9 = scalar_lea.vmem %s6482_s15, 2048  ;;  %p6484_p1 = scmp.lt.s32.totalorder %s6828_s12, %s6482_s15 }
  0x53   : > { %p6479_p9 = pnand %p6477_p8, %p6786_p4  ;;  %p6485_p11 = scmp.lt.s32.totalorder %s6483_s9, %s6476_s1 }
  0x55   : > { %p6480_p12 = pneg %p6479_p9  ;;  %p6486_p6 = por %p6485_p11, %p6484_p1 }
  0x57   : > { %p6487_p13 = pnand %p6486_p6, %p6480_p12 }
  0x59   : > { %6490 = shalt.err (!%p6487_p13)
}
  0x5a   : > { %s11631_s30 = smov 8   ;;  %s11632_s13 = smov 128  }
  0x5b   : > { %6118 = dma.hbm_to_vmem [thread:$0]  (!%p6764_p0), %s6826_s28, 1024, %s6828_s12, %s431_s23, %s11632_s13, %s11632_s13, %s11631_s30  }
  0x5c   : > { %s5971_s29 = sadd.s32 3072, %s6760_s19  ;;  %s6496_s9 = scalar_lea.hbm %s11361_s2, 8192 }
  0x5d   : > { %s6863_s1 = scalar_lea.hbm %s11361_s2, %s5971_s29 }
  0x5e   : > { %s6491_s10 = scalar_lea.hbm %s6863_s1, 1024  ;;  %p6497_p5 = scmp.lt.u32.totalorder %s6863_s1, %s11361_s2 }
  0x5f   : > { %p6492_p11 = scmp.ne.s32.totalorder %s6863_s1, %s6491_s10  ;;  %p6498_p7 = scmp.lt.u32.totalorder %s6496_s9, %s6491_s10 }
  0x60   : > { %p6500_p8 = scmp.lt.u32.totalorder %s6491_s10, %s6863_s1 }
  0x61   : > { %p6494_p2 = pnand %p6492_p11, %p6786_p4  ;;  %p6499_p10 = por %p6498_p7, %p6497_p5 }
  0x63   : > { %p6495_p3 = pneg %p6494_p2  ;;  %p6501_p9 = por %p6500_p8, %p6499_p10 }
  0x65   : > { %p6502_p12 = pnand %p6501_p9, %p6495_p3 }
  0x67   : > { %6505 = shalt.err (!%p6502_p12)
}
  0x68   : > { %s6506_s28 = scalar_lea.vmem %s6830_s27, 1024  ;;  %s6613_s23 = smov [#allocation10]  }
  0x69   : > { %p6507_p1 = scmp.ne.s32.totalorder %s6830_s27, %s6506_s28  ;;  %s6511_s29 = sshll.u32 %s6613_s23, 4  ;;  %s6512_s29 = int_to_ptr.vmem [resolvable:$false] %s6511_s29 }
  0x6a   : > { %s6513_s25 = scalar_lea.vmem %s6512_s29, 2048  ;;  %p6514_p11 = scmp.lt.s32.totalorder %s6830_s27, %s6512_s29 }
  0x6b   : > { %p6509_p6 = pnand %p6507_p1, %p6786_p4  ;;  %p6515_p2 = scmp.lt.s32.totalorder %s6513_s25, %s6506_s28 }
  0x6d   : > { %p6510_p13 = pneg %p6509_p6  ;;  %p6516_p5 = por %p6515_p2, %p6514_p11 }
  0x6f   : > { %p6517_p7 = pnand %p6516_p5, %p6510_p13 }
  0x71   : > { %6520 = shalt.err (!%p6517_p7)
}
  0x72   : > { %6124 = dma.hbm_to_vmem [thread:$0]  (!%p6764_p0), %s6863_s1, 1024, %s6830_s27, %s6780_s18, %s11632_s13, %s11632_s13, %s11631_s30  }
  0x73   : > { %p11633_p4 = scmp.ne.s32.totalorder %s11630_s17, 0 }
  0x75   : > { %510 = sbr.rel (%p11633_p4) target bundleno = 1739 (0x6cb), region = 72 }
  0x7c   : > { %s6893_s21 = sand.u32 1, %s6591_s26   ;;  %p11634_p3 = scmp.ne.s32.totalorder %s11619_s20, 0 }
  0x7d   : > { %s5909_s22 = sshll.u32 %s6893_s21, 6  ;;  %s513_s10 = scalar_lea.sflag [#allocation6], %s6893_s21 }
  0x7e   : > { %s516_s16 = scalar_lea.vmem [#allocation5], %s5909_s22 }
  0x7f   : > { %6574 = dma.done.wait (%p11634_p3), %s513_s10, 1024  }
  0x80   : > { %6576 = vsyncadd (%p11634_p3), %s513_s10, 4294966272  ;;  %s521_s18 = sand.u32 1, %s6719_s14   ;;  %s5910_s17 = sshll.u32 %s6893_s21, 8 }
  0x81   : > { %s522_s27 = scalar_lea.sflag [#allocation9], %s521_s18  ;;  %s6907_s30 = scalar_lea.vmem [#allocation8], %s5910_s17 }
  0x82   : > { %6578 = dma.done.wait (%p11634_p3), %s522_s27, 5120  }
  0x83   : > { %6580 = vsyncadd (%p11634_p3), %s522_s27, 4294962176  ;;  %vm671_vm0 = vcmask 261120   ;;  %v6913_v0 = vld [vmem:[%s516_s16] sm:$0xff]  ;;  %v6915_v1 = vld [vmem:[%s516_s16 + $0x10] sm:$0xff]  ;;  %s7353_s24 = scalar_lea.vmem [#allocation10], %s5909_s22  ;;  %vm2002_vm1 = vcmask 130048  }
  0x84   : > { %v6917_v2 = vld [vmem:[%s516_s16 + $0x8] sm:$0xff]  ;;  %v672_v3 = vsel %vm671_vm0, %v6913_v0, 0.0  ;;  %v678_v4 = vsel %vm671_vm0, %v6915_v1, 0.0  ;;  %v6923_v5 = vld [vmem:[%s516_s16 + $0x18] sm:$0xff]  ;;  %v6929_v8 = vld [vmem:[%s516_s16 + $0x20] sm:$0xff]  ;;  %s12215_s10 = sld [smem:[#allocation159_spill]] }
  0x85   : > { %673 = vadd.xlane.f32.xlu0 %v672_v3  ;;  %679 = vadd.xlane.f32.xlu1 %v678_v4  ;;  %v675_v6 = vsel %vm671_vm0, %v6917_v2, 0.0  ;;  %v681_v7 = vsel %vm671_vm0, %v6923_v5, 0.0  ;;  %v6931_v9 = vld [vmem:[%s516_s16 + $0x28] sm:$0xff]  ;;  %v684_v10 = vsel %vm671_vm0, %v6929_v8, 0.0  ;;  %v6937_v12 = vld [vmem:[%s516_s16 + $0x30] sm:$0xff]  ;;  %v6939_v13 = vld [vmem:[%s516_s16 + $0x38] sm:$0xff] }
  0x86   : > { %v687_v11 = vsel %vm671_vm0, %v6931_v9, 0.0  ;;  %v690_v14 = vsel %vm671_vm0, %v6937_v12, 0.0  ;;  %v693_v15 = vsel %vm671_vm0, %v6939_v13, 0.0  ;;  %v6946_v16 = vld [vmem:[%s6907_s30] sm:$0xff]  ;;  %v6949_v17 = vld [vmem:[%s6907_s30 + $0x8] sm:$0xff]  ;;  %v6956_v20 = vld [vmem:[%s6907_s30 + $0x10] sm:$0xff] }
  0x87   : > { %v696_v18 = vsel %vm671_vm0, %v6946_v16, 0.0  ;;  %v699_v19 = vsel %vm671_vm0, %v6949_v17, 0.0  ;;  %v6959_v21 = vld [vmem:[%s6907_s30 + $0x18] sm:$0xff]  ;;  %v702_v22 = vsel %vm671_vm0, %v6956_v20, 0.0  ;;  %v6966_v24 = vld [vmem:[%s6907_s30 + $0x20] sm:$0xff]  ;;  %v6969_v25 = vld [vmem:[%s6907_s30 + $0x28] sm:$0xff] }
  0x88   : > { %v705_v23 = vsel %vm671_vm0, %v6959_v21, 0.0  ;;  %v708_v26 = vsel %vm671_vm0, %v6966_v24, 0.0  ;;  %v711_v27 = vsel %vm671_vm0, %v6969_v25, 0.0  ;;  %v6976_v28 = vld [vmem:[%s6907_s30 + $0x30] sm:$0xff]  ;;  %v6979_v29 = vld [vmem:[%s6907_s30 + $0x38] sm:$0xff]  ;;  %v6986_v32 = vld [vmem:[%s6907_s30 + $0x40] sm:$0xff] }
  0x89   : > { %676 = vadd.xlane.f32.xlu0 %v675_v6  ;;  %682 = vadd.xlane.f32.xlu1 %v681_v7  ;;  %v714_v30 = vsel %vm671_vm0, %v6976_v28, 0.0  ;;  %v717_v31 = vsel %vm671_vm0, %v6979_v29, 0.0  ;;  %v6989_v33 = vld [vmem:[%s6907_s30 + $0x48] sm:$0xff]  ;;  %v720_v34 = vsel %vm671_vm0, %v6986_v32, 0.0  ;;  %v6996_v36 = vld [vmem:[%s6907_s30 + $0x50] sm:$0xff]  ;;  %v6999_v37 = vld [vmem:[%s6907_s30 + $0x58] sm:$0xff] }
  0x8a   : > { %v723_v35 = vsel %vm671_vm0, %v6989_v33, 0.0  ;;  %v726_v38 = vsel %vm671_vm0, %v6996_v36, 0.0  ;;  %v729_v39 = vsel %vm671_vm0, %v6999_v37, 0.0  ;;  %v7006_v40 = vld [vmem:[%s6907_s30 + $0x60] sm:$0xff]  ;;  %v7009_v41 = vld [vmem:[%s6907_s30 + $0x68] sm:$0xff]  ;;  %v7016_v44 = vld [vmem:[%s6907_s30 + $0x70] sm:$0xff] }
  0x8b   : > { %v732_v42 = vsel %vm671_vm0, %v7006_v40, 0.0  ;;  %v735_v43 = vsel %vm671_vm0, %v7009_v41, 0.0  ;;  %v7019_v45 = vld [vmem:[%s6907_s30 + $0x78] sm:$0xff]  ;;  %v738_v46 = vsel %vm671_vm0, %v7016_v44, 0.0  ;;  %v7026_v48 = vld [vmem:[%s6907_s30 + $0x80] sm:$0xff]  ;;  %v7029_v49 = vld [vmem:[%s6907_s30 + $0x88] sm:$0xff] }
  0x8c   : > { %v741_v47 = vsel %vm671_vm0, %v7019_v45, 0.0  ;;  %v744_v50 = vsel %vm671_vm0, %v7026_v48, 0.0  ;;  %v747_v51 = vsel %vm671_vm0, %v7029_v49, 0.0  ;;  %v7036_v52 = vld [vmem:[%s6907_s30 + $0x90] sm:$0xff]  ;;  %v7039_v53 = vld [vmem:[%s6907_s30 + $0x98] sm:$0xff]  ;;  %v7046_v56 = vld [vmem:[%s6907_s30 + $0xa0] sm:$0xff] }
  0x8d   : > { %685 = vadd.xlane.f32.xlu0 %v684_v10  ;;  %688 = vadd.xlane.f32.xlu1 %v687_v11  ;;  %v750_v54 = vsel %vm671_vm0, %v7036_v52, 0.0  ;;  %v753_v55 = vsel %vm671_vm0, %v7039_v53, 0.0  ;;  %v7049_v57 = vld [vmem:[%s6907_s30 + $0xa8] sm:$0xff]  ;;  %v756_v58 = vsel %vm671_vm0, %v7046_v56, 0.0  ;;  %v7056_v60 = vld [vmem:[%s6907_s30 + $0xb0] sm:$0xff]  ;;  %v7059_v61 = vld [vmem:[%s6907_s30 + $0xb8] sm:$0xff] }
  0x8e   : > { %v759_v59 = vsel %vm671_vm0, %v7049_v57, 0.0  ;;  %v762_v62 = vsel %vm671_vm0, %v7056_v60, 0.0  ;;  %v765_v63 = vsel %vm671_vm0, %v7059_v61, 0.0  ;;  %v7066_v3 = vld [vmem:[%s6907_s30 + $0xc0] sm:$0xff]  ;;  %v7069_v4 = vld [vmem:[%s6907_s30 + $0xc8] sm:$0xff]  ;;  %v7076_v10 = vld [vmem:[%s6907_s30 + $0xd0] sm:$0xff] }
  0x8f   : > { %v768_v6 = vsel %vm671_vm0, %v7066_v3, 0.0  ;;  %v771_v7 = vsel %vm671_vm0, %v7069_v4, 0.0  ;;  %v7079_v11 = vld [vmem:[%s6907_s30 + $0xd8] sm:$0xff]  ;;  %s12216_s27 = sld [smem:[#allocation160_spill]]  ;;  %s12217_s13 = sld [smem:[#allocation161_spill]] }
  0x90   : > { %s11179_s1 = scalar_lea.vmem [#allocation11], %s5910_s17  ;;  %s12218_s17 = sld [smem:[#allocation17_spill]] }
  0x91   : > { %691 = vadd.xlane.f32.xlu0 %v690_v14  ;;  %694 = vadd.xlane.f32.xlu1 %v693_v15  ;;  %v774_v14 = vsel %vm671_vm0, %v7076_v10, 0.0  ;;  %v777_v15 = vsel %vm671_vm0, %v7079_v11, 0.0  ;;  %s5759_s9 = sshll.u32 %s11179_s1, 4  ;;  %s12220_s28 = sld [smem:[#allocation162_spill]]  ;;  %s11303_s9 = int_to_ptr.vmem [resolvable:$true] %s5759_s9 }
  0x92   : > { %s5743_s25 = scalar_lea.sflag [#allocation7], %s6893_s21  ;;  %s6521_s22 = scalar_lea.vmem %s11303_s9, 4096 }
  0x93   : > { %p6522_p0 = scmp.ne.s32.totalorder %s11303_s9, %s6521_s22 }
  0x95   : > { %697 = vadd.xlane.f32.xlu0 %v696_v18  ;;  %700 = vadd.xlane.f32.xlu1 %v699_v19  ;;  %v7086_v18 = vld [vmem:[%s6907_s30 + $0xe0] sm:$0xff]  ;;  %v7089_v19 = vld [vmem:[%s6907_s30 + $0xe8] sm:$0xff] }
  0x96   : > { %s5972_s15 = sshll.u32 %s12218_s17, 12 }
  0x97   : > { %s12221_s23 = smov %s12220_s28  ;;  %s11301_s29 = scalar_lea.hbm %s12220_s28, %s5972_s15 }
  0x99   : > { %703 = vadd.xlane.f32.xlu0 %v702_v22  ;;  %706 = vadd.xlane.f32.xlu1 %v705_v23  ;;  %v780_v22 = vsel %vm671_vm0, %v7086_v18, 0.0  ;;  %v783_v23 = vsel %vm671_vm0, %v7089_v19, 0.0 }
  0x9d   : > { %709 = vadd.xlane.f32.xlu0 %v708_v26  ;;  %712 = vadd.xlane.f32.xlu1 %v711_v27  ;;  %v7096_v26 = vld [vmem:[%s6907_s30 + $0xf0] sm:$0xff]  ;;  %v7099_v27 = vld [vmem:[%s6907_s30 + $0xf8] sm:$0xff] }
  0xa1   : > { %715 = vadd.xlane.f32.xlu0 %v714_v30  ;;  %718 = vadd.xlane.f32.xlu1 %v717_v31  ;;  %v786_v30 = vsel %vm671_vm0, %v7096_v26, 0.0  ;;  %v789_v31 = vsel %vm671_vm0, %v7099_v27, 0.0 }
  0xa5   : > { %721 = vadd.xlane.f32.xlu0 %v720_v34  ;;  %724 = vadd.xlane.f32.xlu1 %v723_v35 }
  0xa9   : > { %727 = vadd.xlane.f32.xlu0 %v726_v38  ;;  %730 = vadd.xlane.f32.xlu1 %v729_v39 }
  0xad   : > { %733 = vadd.xlane.f32.xlu0 %v732_v42  ;;  %736 = vadd.xlane.f32.xlu1 %v735_v43 }
  0xb1   : > { %739 = vadd.xlane.f32.xlu0 %v738_v46  ;;  %742 = vadd.xlane.f32.xlu1 %v741_v47 }
  0xb5   : > { %745 = vadd.xlane.f32.xlu0 %v744_v50  ;;  %748 = vadd.xlane.f32.xlu1 %v747_v51 }
  0xb9   : > { %751 = vadd.xlane.f32.xlu0 %v750_v54  ;;  %754 = vadd.xlane.f32.xlu1 %v753_v55 }
  0xbd   : > { %757 = vadd.xlane.f32.xlu0 %v756_v58  ;;  %760 = vadd.xlane.f32.xlu1 %v759_v59 }
  0xc1   : > { %763 = vadd.xlane.f32.xlu0 %v762_v62  ;;  %766 = vadd.xlane.f32.xlu1 %v765_v63 }
  0xc5   : > { %769 = vadd.xlane.f32.xlu0 %v768_v6  ;;  %772 = vadd.xlane.f32.xlu1 %v771_v7 }
  0xc9   : > { %775 = vadd.xlane.f32.xlu0 %v774_v14  ;;  %778 = vadd.xlane.f32.xlu1 %v777_v15 }
  0xcd   : > { %781 = vadd.xlane.f32.xlu0 %v780_v22  ;;  %784 = vadd.xlane.f32.xlu1 %v783_v23 }
  0xd1   : > { %787 = vadd.xlane.f32.xlu0 %v786_v30  ;;  %790 = vadd.xlane.f32.xlu1 %v789_v31 }
 0x112   : > { %v674_v34 = vpop.xlane.xlu0 %673  ;;  %v680_v35 = vpop.xlane.xlu1 %679 }
 0x113   : > { %v817_v38 = vmul.f32 0.03125, %v674_v34  ;;  %v819_v39 = vmul.f32 0.03125, %v680_v35 }
 0x115   : > { %v7106_v42 = vsub.f32 %v6913_v0, %v817_v38  ;;  %v7109_v43 = vsub.f32 %v6915_v1, %v819_v39 }
 0x116   : > { %v677_v46 = vpop.xlane.xlu0 %676  ;;  %v683_v47 = vpop.xlane.xlu1 %682 }
 0x117   : > { %v818_v50 = vmul.f32 0.03125, %v677_v46  ;;  %v820_v51 = vmul.f32 0.03125, %v683_v47  ;;  %v913_v54 = vmul.f32 %v7106_v42, %v7106_v42  ;;  %v915_v55 = vmul.f32 %v7109_v43, %v7109_v43 }
 0x119   : > { %v7116_v58 = vsub.f32 %v6917_v2, %v818_v50  ;;  %v7119_v59 = vsub.f32 %v6923_v5, %v820_v51  ;;  %v961_v0 = vsel %vm671_vm0, %v913_v54, 0.0  ;;  %v967_v63 = vsel %vm671_vm0, %v915_v55, 0.0 }
 0x11a   : > { %962 = vadd.xlane.f32.xlu0 %v961_v0  ;;  %v686_v1 = vpop.xlane.xlu0 %685  ;;  %v689_v62 = vpop.xlane.xlu1 %688 }
 0x11b   : > { %v821_v6 = vmul.f32 0.03125, %v686_v1  ;;  %v822_v7 = vmul.f32 0.03125, %v689_v62  ;;  %v914_v14 = vmul.f32 %v7116_v58, %v7116_v58  ;;  %v916_v15 = vmul.f32 %v7119_v59, %v7119_v59 }
 0x11d   : > { %v7128_v2 = vsub.f32 %v6929_v8, %v821_v6  ;;  %v7131_v5 = vsub.f32 %v6931_v9, %v822_v7  ;;  %v964_v22 = vsel %vm671_vm0, %v914_v14, 0.0  ;;  %v970_v31 = vsel %vm671_vm0, %v916_v15, 0.0 }
 0x11e   : > { %968 = vadd.xlane.f32.xlu0 %v967_v63  ;;  %965 = vadd.xlane.f32.xlu1 %v964_v22  ;;  %v692_v23 = vpop.xlane.xlu0 %691  ;;  %v695_v30 = vpop.xlane.xlu1 %694 }
 0x11f   : > { %v823_v34 = vmul.f32 0.03125, %v692_v23  ;;  %v824_v35 = vmul.f32 0.03125, %v695_v30  ;;  %v917_v38 = vmul.f32 %v7128_v2, %v7128_v2  ;;  %v918_v8 = vmul.f32 %v7131_v5, %v7131_v5 }
 0x121   : > { %v7140_v39 = vsub.f32 %v6937_v12, %v823_v34  ;;  %v7143_v9 = vsub.f32 %v6939_v13, %v824_v35  ;;  %v973_v46 = vsel %vm671_vm0, %v917_v38, 0.0  ;;  %v976_v51 = vsel %vm671_vm0, %v918_v8, 0.0 }
 0x122   : > { %971 = vadd.xlane.f32.xlu1 %v970_v31  ;;  %974 = vadd.xlane.f32.xlu0 %v973_v46  ;;  %v698_v47 = vpop.xlane.xlu0 %697  ;;  %v701_v50 = vpop.xlane.xlu1 %700 }
 0x123   : > { %v825_v54 = vmul.f32 0.03125, %v698_v47  ;;  %v826_v55 = vmul.f32 0.03125, %v701_v50  ;;  %v919_v0 = vmul.f32 %v7140_v39, %v7140_v39  ;;  %v920_v12 = vmul.f32 %v7143_v9, %v7143_v9 }
 0x125   : > { %v7152_v1 = vsub.f32 %v6946_v16, %v825_v54  ;;  %v7155_v13 = vsub.f32 %v6949_v17, %v826_v55  ;;  %v979_v62 = vsel %vm671_vm0, %v919_v0, 0.0  ;;  %v982_v7 = vsel %vm671_vm0, %v920_v12, 0.0 }
 0x126   : > { %977 = vadd.xlane.f32.xlu1 %v976_v51  ;;  %980 = vadd.xlane.f32.xlu0 %v979_v62  ;;  %v704_v63 = vpop.xlane.xlu0 %703  ;;  %v707_v6 = vpop.xlane.xlu1 %706 }
 0x127   : > { %v827_v14 = vmul.f32 0.03125, %v704_v63  ;;  %v828_v15 = vmul.f32 0.03125, %v707_v6  ;;  %v921_v22 = vmul.f32 %v7152_v1, %v7152_v1  ;;  %v922_v16 = vmul.f32 %v7155_v13, %v7155_v13 }
 0x129   : > { %v7164_v23 = vsub.f32 %v6956_v20, %v827_v14  ;;  %v7167_v17 = vsub.f32 %v6959_v21, %v828_v15  ;;  %v985_v30 = vsel %vm671_vm0, %v921_v22, 0.0  ;;  %v988_v35 = vsel %vm671_vm0, %v922_v16, 0.0 }
 0x12a   : > { %983 = vadd.xlane.f32.xlu1 %v982_v7  ;;  %986 = vadd.xlane.f32.xlu0 %v985_v30  ;;  %v710_v31 = vpop.xlane.xlu0 %709  ;;  %v713_v34 = vpop.xlane.xlu1 %712 }
 0x12b   : > { %v829_v38 = vmul.f32 0.03125, %v710_v31  ;;  %v830_v8 = vmul.f32 0.03125, %v713_v34  ;;  %v923_v46 = vmul.f32 %v7164_v23, %v7164_v23  ;;  %v924_v20 = vmul.f32 %v7167_v17, %v7167_v17 }
 0x12d   : > { %v7176_v47 = vsub.f32 %v6966_v24, %v829_v38  ;;  %v7179_v21 = vsub.f32 %v6969_v25, %v830_v8  ;;  %v991_v50 = vsel %vm671_vm0, %v923_v46, 0.0  ;;  %v994_v55 = vsel %vm671_vm0, %v924_v20, 0.0 }
 0x12e   : > { %989 = vadd.xlane.f32.xlu1 %v988_v35  ;;  %992 = vadd.xlane.f32.xlu0 %v991_v50  ;;  %v716_v51 = vpop.xlane.xlu0 %715  ;;  %v719_v54 = vpop.xlane.xlu1 %718 }
 0x12f   : > { %v831_v0 = vmul.f32 0.03125, %v716_v51  ;;  %v832_v12 = vmul.f32 0.03125, %v719_v54  ;;  %v925_v62 = vmul.f32 %v7176_v47, %v7176_v47  ;;  %v926_v24 = vmul.f32 %v7179_v21, %v7179_v21 }
 0x131   : > { %v7188_v63 = vsub.f32 %v6976_v28, %v831_v0  ;;  %v7191_v25 = vsub.f32 %v6979_v29, %v832_v12  ;;  %v997_v6 = vsel %vm671_vm0, %v925_v62, 0.0  ;;  %v1000_v15 = vsel %vm671_vm0, %v926_v24, 0.0 }
 0x132   : > { %995 = vadd.xlane.f32.xlu1 %v994_v55  ;;  %998 = vadd.xlane.f32.xlu0 %v997_v6  ;;  %v722_v7 = vpop.xlane.xlu0 %721  ;;  %v725_v14 = vpop.xlane.xlu1 %724 }
 0x133   : > { %v833_v22 = vmul.f32 0.03125, %v722_v7  ;;  %v834_v16 = vmul.f32 0.03125, %v725_v14  ;;  %v927_v30 = vmul.f32 %v7188_v63, %v7188_v63  ;;  %v928_v28 = vmul.f32 %v7191_v25, %v7191_v25 }
 0x135   : > { %v7200_v31 = vsub.f32 %v6986_v32, %v833_v22  ;;  %v7203_v29 = vsub.f32 %v6989_v33, %v834_v16  ;;  %v1003_v34 = vsel %vm671_vm0, %v927_v30, 0.0  ;;  %v1006_v8 = vsel %vm671_vm0, %v928_v28, 0.0  ;;  %v6184_v30 = vld [vmem:[%s11364_s5] sm:$0xff]  }
 0x136   : > { %1001 = vadd.xlane.f32.xlu1 %v1000_v15  ;;  %1004 = vadd.xlane.f32.xlu0 %v1003_v34  ;;  %v728_v35 = vpop.xlane.xlu0 %727  ;;  %v731_v38 = vpop.xlane.xlu1 %730 }
 0x137   : > { %v835_v46 = vmul.f32 0.03125, %v728_v35  ;;  %v836_v20 = vmul.f32 0.03125, %v731_v38  ;;  %v929_v50 = vmul.f32 %v7200_v31, %v7200_v31  ;;  %v930_v32 = vmul.f32 %v7203_v29, %v7203_v29  ;;  %6017 = vmatprep.subr.bf16.mxu0 %v6184_v30  ;;  %6103 = vmatprep.subr.bf16.mxu1 %v6184_v30 }
 0x138   : > { %6018 = vmatpush3.bf16.msra.mxu0 %v6184_v30  ;;  %6105 = vmatpush3.bf16.msra.mxu1 %v6184_v30 }
 0x139   : > { %v7212_v51 = vsub.f32 %v6996_v36, %v835_v46  ;;  %v7215_v33 = vsub.f32 %v6999_v37, %v836_v20  ;;  %v1009_v54 = vsel %vm671_vm0, %v929_v50, 0.0  ;;  %v1012_v12 = vsel %vm671_vm0, %v930_v32, 0.0  ;;  %v6185_v32 = vld [vmem:[%s11364_s5 + $0x8] sm:$0xff]  }
 0x13a   : > { %1007 = vadd.xlane.f32.xlu1 %v1006_v8  ;;  %1010 = vadd.xlane.f32.xlu0 %v1009_v54  ;;  %v734_v55 = vpop.xlane.xlu0 %733  ;;  %v737_v0 = vpop.xlane.xlu1 %736 }
 0x13b   : > { %v837_v62 = vmul.f32 0.03125, %v734_v55  ;;  %v838_v24 = vmul.f32 0.03125, %v737_v0  ;;  %v931_v6 = vmul.f32 %v7212_v51, %v7212_v51  ;;  %v932_v36 = vmul.f32 %v7215_v33, %v7215_v33  ;;  %6019 = vmatprep.subr.bf16.mxu0 %v6185_v32  ;;  %6104 = vmatprep.subr.bf16.mxu1 %v6185_v32 }
 0x13c   : > { %6020 = vmatpush3.bf16.msra.mxu0 %v6185_v32  ;;  %6106 = vmatpush3.bf16.msra.mxu1 %v6185_v32 }
 0x13d   : > { %v7224_v7 = vsub.f32 %v7006_v40, %v837_v62  ;;  %v7227_v37 = vsub.f32 %v7009_v41, %v838_v24  ;;  %v1015_v14 = vsel %vm671_vm0, %v931_v6, 0.0  ;;  %v1018_v16 = vsel %vm671_vm0, %v932_v36, 0.0 }
 0x13e   : > { %1013 = vadd.xlane.f32.xlu1 %v1012_v12  ;;  %1016 = vadd.xlane.f32.xlu0 %v1015_v14  ;;  %v740_v15 = vpop.xlane.xlu0 %739  ;;  %v743_v22 = vpop.xlane.xlu1 %742 }
 0x13f   : > { %v839_v28 = vmul.f32 0.03125, %v740_v15  ;;  %v840_v34 = vmul.f32 0.03125, %v743_v22  ;;  %v933_v40 = vmul.f32 %v7224_v7, %v7224_v7  ;;  %v934_v41 = vmul.f32 %v7227_v37, %v7227_v37 }
 0x141   : > { %v7239_v35 = vsub.f32 %v7016_v44, %v839_v28  ;;  %v7242_v38 = vsub.f32 %v7019_v45, %v840_v34  ;;  %v1021_v8 = vsel %vm671_vm0, %v933_v40, 0.0  ;;  %v1024_v50 = vsel %vm671_vm0, %v934_v41, 0.0 }
 0x142   : > { %1019 = vadd.xlane.f32.xlu1 %v1018_v16  ;;  %1022 = vadd.xlane.f32.xlu0 %v1021_v8  ;;  %v746_v46 = vpop.xlane.xlu0 %745  ;;  %v749_v20 = vpop.xlane.xlu1 %748 }
 0x143   : > { %v841_v54 = vmul.f32 0.03125, %v746_v46  ;;  %v842_v44 = vmul.f32 0.03125, %v749_v20  ;;  %v935_v45 = vmul.f32 %v7239_v35, %v7239_v35  ;;  %v936_v55 = vmul.f32 %v7242_v38, %v7242_v38 }
 0x145   : > { %v7254_v0 = vsub.f32 %v7026_v48, %v841_v54  ;;  %v7257_v12 = vsub.f32 %v7029_v49, %v842_v44  ;;  %v1027_v62 = vsel %vm671_vm0, %v935_v45, 0.0  ;;  %v1030_v36 = vsel %vm671_vm0, %v936_v55, 0.0 }
 0x146   : > { %1025 = vadd.xlane.f32.xlu1 %v1024_v50  ;;  %1028 = vadd.xlane.f32.xlu0 %v1027_v62  ;;  %v752_v24 = vpop.xlane.xlu0 %751  ;;  %v755_v6 = vpop.xlane.xlu1 %754 }
 0x147   : > { %v843_v14 = vmul.f32 0.03125, %v752_v24  ;;  %v844_v15 = vmul.f32 0.03125, %v755_v6  ;;  %v937_v22 = vmul.f32 %v7254_v0, %v7254_v0  ;;  %v938_v48 = vmul.f32 %v7257_v12, %v7257_v12 }
 0x149   : > { %v7266_v49 = vsub.f32 %v7036_v52, %v843_v14  ;;  %v7269_v16 = vsub.f32 %v7039_v53, %v844_v15  ;;  %v1033_v30 = vsel %vm671_vm0, %v937_v22, 0.0  ;;  %v1036_v40 = vsel %vm671_vm0, %v938_v48, 0.0 }
 0x14a   : > { %1031 = vadd.xlane.f32.xlu1 %v1030_v36  ;;  %1034 = vadd.xlane.f32.xlu0 %v1033_v30  ;;  %v758_v28 = vpop.xlane.xlu0 %757  ;;  %v761_v34 = vpop.xlane.xlu1 %760 }
 0x14b   : > { %v845_v41 = vmul.f32 0.03125, %v758_v28  ;;  %v846_v8 = vmul.f32 0.03125, %v761_v34  ;;  %v939_v46 = vmul.f32 %v7266_v49, %v7266_v49  ;;  %v940_v52 = vmul.f32 %v7269_v16, %v7269_v16 }
 0x14d   : > { %v7278_v20 = vsub.f32 %v7046_v56, %v845_v41  ;;  %v7281_v53 = vsub.f32 %v7049_v57, %v846_v8  ;;  %v1039_v50 = vsel %vm671_vm0, %v939_v46, 0.0  ;;  %v1042_v44 = vsel %vm671_vm0, %v940_v52, 0.0 }
 0x14e   : > { %1037 = vadd.xlane.f32.xlu1 %v1036_v40  ;;  %1040 = vadd.xlane.f32.xlu0 %v1039_v50  ;;  %v764_v32 = vpop.xlane.xlu0 %763  ;;  %v767_v54 = vpop.xlane.xlu1 %766 }
 0x14f   : > { %v847_v45 = vmul.f32 0.03125, %v764_v32  ;;  %v848_v55 = vmul.f32 0.03125, %v767_v54  ;;  %v941_v62 = vmul.f32 %v7278_v20, %v7278_v20  ;;  %v942_v56 = vmul.f32 %v7281_v53, %v7281_v53 }
 0x151   : > { %v7290_v24 = vsub.f32 %v7056_v60, %v847_v45  ;;  %v7293_v57 = vsub.f32 %v7059_v61, %v848_v55  ;;  %v1045_v6 = vsel %vm671_vm0, %v941_v62, 0.0  ;;  %v1048_v15 = vsel %vm671_vm0, %v942_v56, 0.0 }
 0x152   : > { %1043 = vadd.xlane.f32.xlu1 %v1042_v44  ;;  %1046 = vadd.xlane.f32.xlu0 %v1045_v6  ;;  %v770_v36 = vpop.xlane.xlu0 %769  ;;  %v773_v14 = vpop.xlane.xlu1 %772 }
 0x153   : > { %v849_v22 = vmul.f32 0.03125, %v770_v36  ;;  %v850_v48 = vmul.f32 0.03125, %v773_v14  ;;  %v943_v30 = vmul.f32 %v7290_v24, %v7290_v24  ;;  %v944_v60 = vmul.f32 %v7293_v57, %v7293_v57 }
 0x155   : > { %v7302_v28 = vsub.f32 %v7066_v3, %v849_v22  ;;  %v7305_v61 = vsub.f32 %v7069_v4, %v850_v48  ;;  %v1051_v34 = vsel %vm671_vm0, %v943_v30, 0.0  ;;  %v1054_v8 = vsel %vm671_vm0, %v944_v60, 0.0 }
 0x156   : > { %1049 = vadd.xlane.f32.xlu1 %v1048_v15  ;;  %1052 = vadd.xlane.f32.xlu0 %v1051_v34  ;;  %v776_v40 = vpop.xlane.xlu0 %775  ;;  %v779_v41 = vpop.xlane.xlu1 %778 }
 0x157   : > { %v851_v46 = vmul.f32 0.03125, %v776_v40  ;;  %v852_v52 = vmul.f32 0.03125, %v779_v41  ;;  %v945_v50 = vmul.f32 %v7302_v28, %v7302_v28  ;;  %v946_v3 = vmul.f32 %v7305_v61, %v7305_v61 }
 0x159   : > { %v7314_v32 = vsub.f32 %v7076_v10, %v851_v46  ;;  %v7317_v4 = vsub.f32 %v7079_v11, %v852_v52  ;;  %v1057_v54 = vsel %vm671_vm0, %v945_v50, 0.0  ;;  %v1060_v55 = vsel %vm671_vm0, %v946_v3, 0.0  ;;  %v664_v3 = vld [vmem:[%s7353_s24 + $0x8] sm:$0xff] }
 0x15a   : > { %1055 = vadd.xlane.f32.xlu1 %v1054_v8  ;;  %1058 = vadd.xlane.f32.xlu0 %v1057_v54  ;;  %v782_v44 = vpop.xlane.xlu0 %781  ;;  %v785_v45 = vpop.xlane.xlu1 %784  ;;  %v665_v54 = vld [vmem:[%s7353_s24 + $0x10] sm:$0xff] }
 0x15b   : > { %v853_v62 = vmul.f32 0.03125, %v782_v44  ;;  %v854_v56 = vmul.f32 0.03125, %v785_v45  ;;  %v947_v6 = vmul.f32 %v7314_v32, %v7314_v32  ;;  %v948_v10 = vmul.f32 %v7317_v4, %v7317_v4 }
 0x15c   : > { %v795_v45 = vsel %vm671_vm0, %v664_v3, 0.0 }
 0x15d   : > { %v7326_v36 = vsub.f32 %v7086_v18, %v853_v62  ;;  %v7329_v11 = vsub.f32 %v7089_v19, %v854_v56  ;;  %v1063_v14 = vsel %vm671_vm0, %v947_v6, 0.0  ;;  %v1066_v48 = vsel %vm671_vm0, %v948_v10, 0.0  ;;  %v667_v6 = vld [vmem:[%s7353_s24 + $0x20] sm:$0xff]  ;;  %v668_v10 = vld [vmem:[%s7353_s24 + $0x28] sm:$0xff] }
 0x15e   : > { %1061 = vadd.xlane.f32.xlu1 %v1060_v55  ;;  %1064 = vadd.xlane.f32.xlu0 %v1063_v14  ;;  %v788_v15 = vpop.xlane.xlu0 %787  ;;  %v791_v22 = vpop.xlane.xlu1 %790  ;;  %v666_v55 = vld [vmem:[%s7353_s24 + $0x18] sm:$0xff]  ;;  %v798_v62 = vsel %vm671_vm0, %v665_v54, 0.0  ;;  %v804_v14 = vsel %vm671_vm0, %v667_v6, 0.0 }
 0x15f   : > { %v855_v30 = vmul.f32 0.03125, %v788_v15  ;;  %v856_v60 = vmul.f32 0.03125, %v791_v22  ;;  %v949_v34 = vmul.f32 %v7326_v36, %v7326_v36  ;;  %v950_v18 = vmul.f32 %v7329_v11, %v7329_v11  ;;  %v669_v22 = vld [vmem:[%s7353_s24 + $0x30] sm:$0xff] }
 0x160   : > { %v801_v56 = vsel %vm671_vm0, %v666_v55, 0.0  ;;  %v807_v15 = vsel %vm671_vm0, %v668_v10, 0.0 }
 0x161   : > { %v7338_v19 = vsub.f32 %v7096_v26, %v855_v30  ;;  %v7341_v40 = vsub.f32 %v7099_v27, %v856_v60  ;;  %v1069_v41 = vsel %vm671_vm0, %v949_v34, 0.0  ;;  %v1072_v8 = vsel %vm671_vm0, %v950_v18, 0.0  ;;  %v663_v27 = vld [vmem:[%s7353_s24] sm:$0xff] }
 0x162   : > { %1067 = vadd.xlane.f32.xlu1 %v1066_v48  ;;  %1070 = vadd.xlane.f32.xlu0 %v1069_v41  ;;  %v792_v44 = vsel %vm671_vm0, %v663_v27, 0.0  ;;  %v670_v48 = vld [vmem:[%s7353_s24 + $0x38] sm:$0xff]  ;;  %v810_v30 = vsel %vm671_vm0, %v669_v22, 0.0 }
 0x163   : > { %v951_v46 = vmul.f32 %v7338_v19, %v7338_v19  ;;  %v952_v52 = vmul.f32 %v7341_v40, %v7341_v40  ;;  %v813_v60 = vsel %vm671_vm0, %v670_v48, 0.0 }
 0x165   : > { %v1075_v50 = vsel %vm671_vm0, %v951_v46, 0.0  ;;  %v1078_v26 = vsel %vm671_vm0, %v952_v52, 0.0 }
 0x166   : > { %1073 = vadd.xlane.f32.xlu1 %v1072_v8  ;;  %1076 = vadd.xlane.f32.xlu0 %v1075_v50 }
 0x16a   : > { %1079 = vadd.xlane.f32.xlu1 %v1078_v26  ;;  %793 = vadd.xlane.f32.xlu0 %v792_v44 }
 0x16e   : > { %796 = vadd.xlane.f32.xlu1 %v795_v45  ;;  %799 = vadd.xlane.f32.xlu0 %v798_v62 }
 0x172   : > { %802 = vadd.xlane.f32.xlu1 %v801_v56  ;;  %805 = vadd.xlane.f32.xlu0 %v804_v14 }
 0x176   : > { %808 = vadd.xlane.f32.xlu1 %v807_v15  ;;  %811 = vadd.xlane.f32.xlu0 %v810_v30 }
 0x17a   : > { %814 = vadd.xlane.f32.xlu1 %v813_v60 }
 0x1a7   : > { %v963_v34 = vpop.xlane.xlu0 %962 }
 0x1a8   : > { %v1105_v18 = vmul.f32 0.03125, %v963_v34 }
 0x1aa   : > { %v1153_v41 = vadd.f32 1e-05, %v1105_v18 }
 0x1ab   : > { %v966_v8 = vpop.xlane.xlu1 %965  ;;  %v969_v46 = vpop.xlane.xlu0 %968 }
 0x1ac   : > { %6187 = vrsqrt.f32 %v1153_v41  ;;  %v1106_v52 = vmul.f32 0.03125, %v966_v8  ;;  %v1107_v50 = vmul.f32 0.03125, %v969_v46  ;;  %v7375_v8 = vld [vmem:[%s11362_s3] ss:$0 sm:$0xff] }
 0x1ae   : > { %v1154_v26 = vadd.f32 1e-05, %v1106_v52  ;;  %v1155_v27 = vadd.f32 1e-05, %v1107_v50 }
 0x1af   : > { %v972_v3 = vpop.xlane.xlu1 %971  ;;  %v975_v54 = vpop.xlane.xlu0 %974 }
 0x1b0   : > { %6189 = vrsqrt.f32 %v1154_v26  ;;  %v1108_v44 = vmul.f32 0.03125, %v972_v3  ;;  %v1109_v45 = vmul.f32 0.03125, %v975_v54 }
 0x1b1   : > { %6191 = vrsqrt.f32 %v1155_v27 }
 0x1b2   : > { %v1156_v55 = vadd.f32 1e-05, %v1108_v44  ;;  %v1157_v62 = vadd.f32 1e-05, %v1109_v45 }
 0x1b3   : > { %v978_v56 = vpop.xlane.xlu1 %977  ;;  %v981_v6 = vpop.xlane.xlu0 %980 }
 0x1b4   : > { %6193 = vrsqrt.f32 %v1156_v55  ;;  %v1110_v10 = vmul.f32 0.03125, %v978_v56  ;;  %v1111_v14 = vmul.f32 0.03125, %v981_v6  ;;  %v7382_v55 = vld [vmem:[%s11363_s4] ss:$0 sm:$0xff] }
 0x1b5   : > { %6195 = vrsqrt.f32 %v1157_v62 }
 0x1b6   : > { %v6188_v15 = vpop.eup %6187  ;;  %v1158_v22 = vadd.f32 1e-05, %v1110_v10  ;;  %v1159_v48 = vadd.f32 1e-05, %v1111_v14 }
 0x1b7   : > { %v984_v30 = vpop.xlane.xlu1 %983  ;;  %v987_v60 = vpop.xlane.xlu0 %986  ;;  %v1249_v34 = vmul.f32 %v6188_v15, %v7106_v42 }
 0x1b8   : > { %6197 = vrsqrt.f32 %v1158_v22  ;;  %v1112_v18 = vmul.f32 0.03125, %v984_v30  ;;  %v1113_v41 = vmul.f32 0.03125, %v987_v60 }
 0x1b9   : > { %6199 = vrsqrt.f32 %v1159_v48  ;;  %v1303_v44 = vmul.f32 %v7375_v8, %v1249_v34 }
 0x1ba   : > { %v6190_v46 = vpop.eup %6189  ;;  %v1160_v52 = vadd.f32 1e-05, %v1112_v18  ;;  %v1161_v50 = vadd.f32 1e-05, %v1113_v41 }
 0x1bb   : > { %v6192_v26 = vpop.eup %6191  ;;  %v990_v27 = vpop.xlane.xlu1 %989  ;;  %v1250_v54 = vmul.f32 %v6190_v46, %v7116_v58  ;;  %v1357_v48 = vadd.f32 %v7382_v55, %v1303_v44 }
 0x1bc   : > { %v993_v3 = vpop.xlane.xlu0 %992  ;;  %6201 = vrsqrt.f32 %v1160_v52  ;;  %v1114_v42 = vmul.f32 0.03125, %v990_v27  ;;  %v1251_v62 = vmul.f32 %v6192_v26, %v7109_v43 }
 0x1bd   : > { %v1115_v45 = vmul.f32 0.03125, %v993_v3  ;;  %6203 = vrsqrt.f32 %v1161_v50  ;;  %v1304_v56 = vmul.f32 %v7375_v8, %v1250_v54 }
 0x1be   : > { %v6194_v6 = vpop.eup %6193  ;;  %v1162_v10 = vadd.f32 1e-05, %v1114_v42  ;;  %v1305_v34 = vmul.f32 %v7375_v8, %v1251_v62 }
 0x1bf   : > { %v1163_v14 = vadd.f32 1e-05, %v1115_v45  ;;  %v6196_v15 = vpop.eup %6195  ;;  %v996_v58 = vpop.xlane.xlu1 %995  ;;  %v1358_v30 = vadd.f32 %v7382_v55, %v1304_v56  ;;  %v1252_v60 = vmul.f32 %v6194_v6, %v7119_v59 }
 0x1c0   : > { %v999_v22 = vpop.xlane.xlu0 %998  ;;  %6205 = vrsqrt.f32 %v1162_v10  ;;  %v1116_v18 = vmul.f32 0.03125, %v996_v58  ;;  %v1253_v52 = vmul.f32 %v6196_v15, %v7128_v2  ;;  %v1359_v59 = vadd.f32 %v7382_v55, %v1305_v34 }
 0x1c1   : > { %v1117_v43 = vmul.f32 0.03125, %v999_v22  ;;  %6207 = vrsqrt.f32 %v1163_v14  ;;  %v1405_v41 = vpack.c.bf16 %v1358_v30, %v1357_v48  ;;  %v1306_v46 = vmul.f32 %v7375_v8, %v1252_v60 }
 0x1c2   : > { %v6198_v50 = vpop.eup %6197  ;;  %v1164_v26 = vadd.f32 1e-05, %v1116_v18  ;;  %v1307_v62 = vmul.f32 %v7375_v8, %v1253_v52 }
 0x1c3   : > { %v1165_v27 = vadd.f32 1e-05, %v1117_v43  ;;  %v6200_v3 = vpop.eup %6199  ;;  %v1002_v54 = vpop.xlane.xlu1 %1001  ;;  %6021 = vmatprep.mubr.msk.bf16.mxu0 %vm671_vm0, %v1405_v41  ;;  %v1360_v42 = vadd.f32 %v7382_v55, %v1306_v46  ;;  %v1254_v45 = vmul.f32 %v6198_v50, %v7131_v5 }
 0x1c4   : > { %v1005_v44 = vpop.xlane.xlu0 %1004  ;;  %6209 = vrsqrt.f32 %v1164_v26  ;;  %v1118_v56 = vmul.f32 0.03125, %v1002_v54  ;;  %v1255_v2 = vmul.f32 %v6200_v3, %v7140_v39  ;;  %v1361_v5 = vadd.f32 %v7382_v55, %v1307_v62 }
 0x1c5   : > { %v1119_v6 = vmul.f32 0.03125, %v1005_v44  ;;  %6211 = vrsqrt.f32 %v1165_v27  ;;  %v1406_v10 = vpack.c.bf16 %v1360_v42, %v1359_v59  ;;  %v1308_v14 = vmul.f32 %v7375_v8, %v1254_v45 }
 0x1c6   : > { %v6202_v15 = vpop.eup %6201  ;;  %v1166_v58 = vadd.f32 1e-05, %v1118_v56  ;;  %v1309_v39 = vmul.f32 %v7375_v8, %v1255_v2 }
 0x1c7   : > { %v1167_v22 = vadd.f32 1e-05, %v1119_v6  ;;  %v6204_v48 = vpop.eup %6203  ;;  %v1008_v30 = vpop.xlane.xlu1 %1007  ;;  %6022 = vmatmul.mubr.msk.bf16.vlgmr.msra.gmra.mrb[0].mxu0 %vm671_vm0, %v1406_v10  ;;  %v1362_v34 = vadd.f32 %v7382_v55, %v1308_v14  ;;  %v1256_v18 = vmul.f32 %v6202_v15, %v7143_v9 }
 0x1c8   : > { %v1011_v60 = vpop.xlane.xlu0 %1010  ;;  %6213 = vrsqrt.f32 %v1166_v58  ;;  %v1120_v43 = vmul.f32 0.03125, %v1008_v30  ;;  %v1257_v50 = vmul.f32 %v6204_v48, %v7152_v1  ;;  %v1363_v9 = vadd.f32 %v7382_v55, %v1309_v39 }
 0x1c9   : > { %v1121_v41 = vmul.f32 0.03125, %v1011_v60  ;;  %6215 = vrsqrt.f32 %v1167_v22  ;;  %v1407_v46 = vpack.c.bf16 %v1362_v34, %v1361_v5  ;;  %v1310_v52 = vmul.f32 %v7375_v8, %v1256_v18 }
 0x1ca   : > { %v6206_v26 = vpop.eup %6205  ;;  %v1168_v27 = vadd.f32 1e-05, %v1120_v43  ;;  %v1311_v62 = vmul.f32 %v7375_v8, %v1257_v50 }
 0x1cb   : > { %v1169_v3 = vadd.f32 1e-05, %v1121_v41  ;;  %v6208_v54 = vpop.eup %6207  ;;  %v1014_v44 = vpop.xlane.xlu1 %1013  ;;  %6025 = vmatprep.mubr.msk.bf16.mxu0 %vm671_vm0, %v1407_v46  ;;  %v1364_v42 = vadd.f32 %v7382_v55, %v1310_v52  ;;  %v1258_v45 = vmul.f32 %v6206_v26, %v7155_v13 }
 0x1cc   : > { %v1017_v59 = vpop.xlane.xlu0 %1016  ;;  %6217 = vrsqrt.f32 %v1168_v27  ;;  %v1122_v56 = vmul.f32 0.03125, %v1014_v44  ;;  %v1259_v1 = vmul.f32 %v6208_v54, %v7164_v23  ;;  %v1365_v13 = vadd.f32 %v7382_v55, %v1311_v62 }
 0x1cd   : > { %v1123_v6 = vmul.f32 0.03125, %v1017_v59  ;;  %6219 = vrsqrt.f32 %v1169_v3  ;;  %v1408_v2 = vpack.c.bf16 %v1364_v42, %v1363_v9  ;;  %v1312_v10 = vmul.f32 %v7375_v8, %v1258_v45 }
 0x1ce   : > { %v6210_v14 = vpop.eup %6209  ;;  %v1170_v15 = vadd.f32 1e-05, %v1122_v56  ;;  %v1313_v23 = vmul.f32 %v7375_v8, %v1259_v1 }
 0x1cf   : > { %v1171_v58 = vadd.f32 1e-05, %v1123_v6  ;;  %v6212_v22 = vpop.eup %6211  ;;  %v1020_v48 = vpop.xlane.xlu1 %1019  ;;  %6026 = vmatmul.mubr.msk.bf16.gmra.mrb[4].mxu0 %vm671_vm0, %v1408_v2  ;;  %v1366_v60 = vadd.f32 %v7382_v55, %v1312_v10  ;;  %v1260_v5 = vmul.f32 %v6210_v14, %v7167_v17 }
 0x1d0   : > { %v1023_v30 = vpop.xlane.xlu0 %1022  ;;  %6221 = vrsqrt.f32 %v1170_v15  ;;  %v1124_v34 = vmul.f32 0.03125, %v1020_v48  ;;  %v1261_v41 = vmul.f32 %v6212_v22, %v7176_v47  ;;  %v1367_v17 = vadd.f32 %v7382_v55, %v1313_v23 }
 0x1d1   : > { %v1125_v18 = vmul.f32 0.03125, %v1023_v30  ;;  %6223 = vrsqrt.f32 %v1171_v58  ;;  %v1409_v39 = vpack.c.bf16 %v1366_v60, %v1365_v13  ;;  %v1314_v43 = vmul.f32 %v7375_v8, %v1260_v5 }
 0x1d2   : > { %v6214_v46 = vpop.eup %6213  ;;  %v1172_v52 = vadd.f32 1e-05, %v1124_v34  ;;  %v1315_v59 = vmul.f32 %v7375_v8, %v1261_v41 }
 0x1d3   : > { %v1173_v50 = vadd.f32 1e-05, %v1125_v18  ;;  %v6216_v26 = vpop.eup %6215  ;;  %v1026_v27 = vpop.xlane.xlu1 %1025  ;;  %6029 = vmatprep.mubr.msk.bf16.mxu0 %vm671_vm0, %v1409_v39  ;;  %v1368_v54 = vadd.f32 %v7382_v55, %v1314_v43  ;;  %v1262_v44 = vmul.f32 %v6214_v46, %v7179_v21 }
 0x1d4   : > { %v1029_v3 = vpop.xlane.xlu0 %1028  ;;  %6225 = vrsqrt.f32 %v1172_v52  ;;  %v1126_v9 = vmul.f32 0.03125, %v1026_v27  ;;  %v1263_v47 = vmul.f32 %v6216_v26, %v7188_v63  ;;  %v1369_v21 = vadd.f32 %v7382_v55, %v1315_v59 }
 0x1d5   : > { %v1127_v42 = vmul.f32 0.03125, %v1029_v3  ;;  %6227 = vrsqrt.f32 %v1173_v50  ;;  %v1410_v45 = vpack.c.bf16 %v1368_v54, %v1367_v17  ;;  %v1316_v62 = vmul.f32 %v7375_v8, %v1262_v44 }
 0x1d6   : > { %v6218_v56 = vpop.eup %6217  ;;  %v1174_v6 = vadd.f32 1e-05, %v1126_v9  ;;  %v1317_v63 = vmul.f32 %v7375_v8, %v1263_v47 }
 0x1d7   : > { %v1175_v1 = vadd.f32 1e-05, %v1127_v42  ;;  %v6220_v2 = vpop.eup %6219  ;;  %v1032_v10 = vpop.xlane.xlu1 %1031  ;;  %6030 = vmatmul.mubr.msk.bf16.gmra.mrb[8].mxu0 %vm671_vm0, %v1410_v45  ;;  %v1370_v15 = vadd.f32 %v7382_v55, %v1316_v62  ;;  %v1264_v58 = vmul.f32 %v6218_v56, %v7191_v25 }
 0x1d8   : > { %v1035_v14 = vpop.xlane.xlu0 %1034  ;;  %6229 = vrsqrt.f32 %v1174_v6  ;;  %v1128_v22 = vmul.f32 0.03125, %v1032_v10  ;;  %v1265_v60 = vmul.f32 %v6220_v2, %v7200_v31  ;;  %v1371_v25 = vadd.f32 %v7382_v55, %v1317_v63 }
 0x1d9   : > { %v1129_v48 = vmul.f32 0.03125, %v1035_v14  ;;  %6231 = vrsqrt.f32 %v1175_v1  ;;  %v1411_v30 = vpack.c.bf16 %v1370_v15, %v1369_v21  ;;  %v1318_v13 = vmul.f32 %v7375_v8, %v1264_v58 }
 0x1da   : > { %v6222_v5 = vpop.eup %6221  ;;  %v1176_v23 = vadd.f32 1e-05, %v1128_v22  ;;  %v1319_v52 = vmul.f32 %v7375_v8, %v1265_v60 }
 0x1db   : > { %v1177_v34 = vadd.f32 1e-05, %v1129_v48  ;;  %v6224_v18 = vpop.eup %6223  ;;  %v1038_v39 = vpop.xlane.xlu1 %1037  ;;  %6033 = vmatprep.mubr.msk.bf16.mxu0 %vm671_vm0, %v1411_v30  ;;  %v1372_v41 = vadd.f32 %v7382_v55, %v1318_v13  ;;  %v1266_v46 = vmul.f32 %v6222_v5, %v7203_v29 }
 0x1dc   : > { %v1041_v43 = vpop.xlane.xlu0 %1040  ;;  %6233 = vrsqrt.f32 %v1176_v23  ;;  %v1130_v50 = vmul.f32 0.03125, %v1038_v39  ;;  %v1267_v31 = vmul.f32 %v6224_v18, %v7212_v51  ;;  %v1373_v29 = vadd.f32 %v7382_v55, %v1319_v52 }
 0x1dd   : > { %v1131_v26 = vmul.f32 0.03125, %v1041_v43  ;;  %6235 = vrsqrt.f32 %v1177_v34  ;;  %v1412_v27 = vpack.c.bf16 %v1372_v41, %v1371_v25  ;;  %v1320_v3 = vmul.f32 %v7375_v8, %v1266_v46 }
 0x1de   : > { %v6226_v17 = vpop.eup %6225  ;;  %v1178_v54 = vadd.f32 1e-05, %v1130_v50  ;;  %v1321_v51 = vmul.f32 %v7375_v8, %v1267_v31 }
 0x1df   : > { %v1179_v44 = vadd.f32 1e-05, %v1131_v26  ;;  %v6228_v59 = vpop.eup %6227  ;;  %v1044_v9 = vpop.xlane.xlu1 %1043  ;;  %6034 = vmatmul.mubr.msk.bf16.gmra.mrb[12].mxu0 %vm671_vm0, %v1412_v27  ;;  %v1374_v47 = vadd.f32 %v7382_v55, %v1320_v3  ;;  %v1268_v45 = vmul.f32 %v6226_v17, %v7215_v33 }
 0x1e0   : > { %v1047_v42 = vpop.xlane.xlu0 %1046  ;;  %6237 = vrsqrt.f32 %v1178_v54  ;;  %v1132_v62 = vmul.f32 0.03125, %v1044_v9  ;;  %v1269_v2 = vmul.f32 %v6228_v59, %v7224_v7  ;;  %v1375_v33 = vadd.f32 %v7382_v55, %v1321_v51 }
 0x1e1   : > { %v1133_v56 = vmul.f32 0.03125, %v1047_v42  ;;  %6239 = vrsqrt.f32 %v1179_v44  ;;  %v1413_v6 = vpack.c.bf16 %v1374_v47, %v1373_v29  ;;  %v1322_v1 = vmul.f32 %v7375_v8, %v1268_v45 }
 0x1e2   : > { %v6230_v10 = vpop.eup %6229  ;;  %v1180_v14 = vadd.f32 1e-05, %v1132_v62  ;;  %v1323_v30 = vmul.f32 %v7375_v8, %v1269_v2 }
 0x1e3   : > { %v1181_v21 = vadd.f32 1e-05, %v1133_v56  ;;  %v6232_v15 = vpop.eup %6231  ;;  %v1050_v58 = vpop.xlane.xlu1 %1049  ;;  %6037 = vmatprep.mubr.msk.bf16.mxu0 %vm671_vm0, %v1413_v6  ;;  %v1376_v22 = vadd.f32 %v7382_v55, %v1322_v1  ;;  %v1270_v48 = vmul.f32 %v6230_v10, %v7227_v37 }
 0x1e4   : > { %v1053_v63 = vpop.xlane.xlu0 %1052  ;;  %v1271_v13 = vmul.f32 %v6232_v15, %v7239_v35  ;;  %6241 = vrsqrt.f32 %v1180_v14  ;;  %v1134_v7 = vmul.f32 0.03125, %v1050_v58  ;;  %v1377_v37 = vadd.f32 %v7382_v55, %v1323_v30 }
 0x1e5   : > { %v1135_v60 = vmul.f32 0.03125, %v1053_v63  ;;  %6243 = vrsqrt.f32 %v1181_v21  ;;  %v1414_v5 = vpack.c.bf16 %v1376_v22, %v1375_v33  ;;  %v1324_v23 = vmul.f32 %v7375_v8, %v1270_v48 }
 0x1e6   : > { %v6234_v34 = vpop.eup %6233  ;;  %v1182_v18 = vadd.f32 1e-05, %v1134_v7  ;;  %v1325_v52 = vmul.f32 %v7375_v8, %v1271_v13 }
 0x1e7   : > { %v1183_v39 = vadd.f32 1e-05, %v1135_v60  ;;  %v6236_v43 = vpop.eup %6235  ;;  %v1272_v25 = vmul.f32 %v6234_v34, %v7242_v38  ;;  %v1056_v41 = vpop.xlane.xlu1 %1055  ;;  %6038 = vmatmul.mubr.msk.bf16.gmra.mrb[16].mxu0 %vm671_vm0, %v1414_v5  ;;  %v1378_v35 = vadd.f32 %v7382_v55, %v1324_v23 }
 0x1e8   : > { %v1059_v46 = vpop.xlane.xlu0 %1058  ;;  %v1273_v50 = vmul.f32 %v6236_v43, %v7254_v0  ;;  %6245 = vrsqrt.f32 %v1182_v18  ;;  %v1136_v26 = vmul.f32 0.03125, %v1056_v41  ;;  %v1379_v29 = vadd.f32 %v7382_v55, %v1325_v52 }
 0x1e9   : > { %v1137_v31 = vmul.f32 0.03125, %v1059_v46  ;;  %6247 = vrsqrt.f32 %v1183_v39  ;;  %v1415_v27 = vpack.c.bf16 %v1378_v35, %v1377_v37  ;;  %v1326_v3 = vmul.f32 %v7375_v8, %v1272_v25 }
 0x1ea   : > { %v6238_v38 = vpop.eup %6237  ;;  %v1184_v17 = vadd.f32 1e-05, %v1136_v26  ;;  %v1327_v47 = vmul.f32 %v7375_v8, %v1273_v50 }
 0x1eb   : > { %v1185_v54 = vadd.f32 1e-05, %v1137_v31  ;;  %v6240_v44 = vpop.eup %6239  ;;  %v1274_v59 = vmul.f32 %v6238_v38, %v7257_v12  ;;  %v1062_v9 = vpop.xlane.xlu1 %1061  ;;  %6041 = vmatprep.mubr.msk.bf16.mxu0 %vm671_vm0, %v1415_v27  ;;  %v1380_v0 = vadd.f32 %v7382_v55, %v1326_v3 }
 0x1ec   : > { %v1065_v42 = vpop.xlane.xlu0 %1064  ;;  %v1275_v45 = vmul.f32 %v6240_v44, %v7266_v49  ;;  %6249 = vrsqrt.f32 %v1184_v17  ;;  %v1138_v51 = vmul.f32 0.03125, %v1062_v9  ;;  %v1381_v58 = vadd.f32 %v7382_v55, %v1327_v47 }
 0x1ed   : > { %v1139_v62 = vmul.f32 0.03125, %v1065_v42  ;;  %6251 = vrsqrt.f32 %v1185_v54  ;;  %v1416_v56 = vpack.c.bf16 %v1380_v0, %v1379_v29  ;;  %v1328_v6 = vmul.f32 %v7375_v8, %v1274_v59 }
 0x1ee   : > { %v6242_v12 = vpop.eup %6241  ;;  %v1186_v1 = vadd.f32 1e-05, %v1138_v51  ;;  %v1329_v63 = vmul.f32 %v7375_v8, %v1275_v45 }
 0x1ef   : > { %v1187_v2 = vadd.f32 1e-05, %v1139_v62  ;;  %v6244_v10 = vpop.eup %6243  ;;  %v1276_v14 = vmul.f32 %v6242_v12, %v7269_v16  ;;  %v1068_v21 = vpop.xlane.xlu1 %1067  ;;  %6042 = vmatmul.mubr.msk.bf16.gmra.mrb[20].mxu0 %vm671_vm0, %v1416_v56  ;;  %v1382_v49 = vadd.f32 %v7382_v55, %v1328_v6 }
 0x1f0   : > { %v1071_v15 = vpop.xlane.xlu0 %1070  ;;  %v1277_v33 = vmul.f32 %v6244_v10, %v7278_v20  ;;  %6253 = vrsqrt.f32 %v1186_v1  ;;  %v1140_v22 = vmul.f32 0.03125, %v1068_v21  ;;  %v1383_v39 = vadd.f32 %v7382_v55, %v1329_v63 }
 0x1f1   : > { %v1141_v48 = vmul.f32 0.03125, %v1071_v15  ;;  %6255 = vrsqrt.f32 %v1187_v2  ;;  %v1417_v30 = vpack.c.bf16 %v1382_v49, %v1381_v58  ;;  %v1330_v13 = vmul.f32 %v7375_v8, %v1276_v14 }
 0x1f2   : > { %v6246_v16 = vpop.eup %6245  ;;  %v1188_v7 = vadd.f32 1e-05, %v1140_v22  ;;  %v1331_v43 = vmul.f32 %v7375_v8, %v1277_v33 }
 0x1f3   : > { %v1189_v60 = vadd.f32 1e-05, %v1141_v48  ;;  %v6248_v5 = vpop.eup %6247  ;;  %v1278_v23 = vmul.f32 %v6246_v16, %v7281_v53  ;;  %v1074_v34 = vpop.xlane.xlu1 %1073  ;;  %6045 = vmatprep.mubr.msk.bf16.mxu0 %vm671_vm0, %v1417_v30  ;;  %v1384_v20 = vadd.f32 %v7382_v55, %v1330_v13 }
 0x1f4   : > { %v1077_v18 = vpop.xlane.xlu0 %1076  ;;  %v1279_v25 = vmul.f32 %v6248_v5, %v7290_v24  ;;  %6257 = vrsqrt.f32 %v1188_v7  ;;  %v1142_v41 = vmul.f32 0.03125, %v1074_v34  ;;  %v1385_v3 = vadd.f32 %v7382_v55, %v1331_v43 }
 0x1f5   : > { %v1143_v46 = vmul.f32 0.03125, %v1077_v18  ;;  %6259 = vrsqrt.f32 %v1189_v60  ;;  %v1418_v37 = vpack.c.bf16 %v1384_v20, %v1383_v39  ;;  %v1332_v35 = vmul.f32 %v7375_v8, %v1278_v23 }
 0x1f6   : > { %v6250_v53 = vpop.eup %6249  ;;  %v1190_v52 = vadd.f32 1e-05, %v1142_v41  ;;  %v1333_v38 = vmul.f32 %v7375_v8, %v1279_v25  ;;  %v608_v41 = vld [vmem:[%s11366_s7] sm:$0x7] }
 0x1f7   : > { %v1191_v50 = vadd.f32 1e-05, %v1143_v46  ;;  %v6252_v26 = vpop.eup %6251  ;;  %v1280_v31 = vmul.f32 %v6250_v53, %v7293_v57  ;;  %v1080_v27 = vpop.xlane.xlu1 %1079  ;;  %6046 = vmatmul.mubr.msk.bf16.gmra.mrb[24].mxu0 %vm671_vm0, %v1418_v37  ;;  %v1386_v24 = vadd.f32 %v7382_v55, %v1332_v35 }
 0x1f8   : > { %v1281_v17 = vmul.f32 %v6252_v26, %v7302_v28  ;;  %6261 = vrsqrt.f32 %v1190_v52  ;;  %v1144_v54 = vmul.f32 0.03125, %v1080_v27  ;;  %v1387_v0 = vadd.f32 %v7382_v55, %v1333_v38  ;;  %v609_v27 = vld [vmem:[%s11366_s7 + $0x4] sm:$0x7] }
 0x1f9   : > { %6263 = vrsqrt.f32 %v1191_v50  ;;  %v1419_v44 = vpack.c.bf16 %v1386_v24, %v1385_v3  ;;  %v1334_v59 = vmul.f32 %v7375_v8, %v1280_v31 }
 0x1fa   : > { %v6254_v9 = vpop.eup %6253  ;;  %v1192_v42 = vadd.f32 1e-05, %v1144_v54  ;;  %v1335_v45 = vmul.f32 %v7375_v8, %v1281_v17 }
 0x1fb   : > { %v6256_v57 = vpop.eup %6255  ;;  %v1282_v29 = vmul.f32 %v6254_v9, %v7305_v61  ;;  %6049 = vmatprep.mubr.msk.bf16.mxu0 %vm671_vm0, %v1419_v44  ;;  %v1388_v47 = vadd.f32 %v7382_v55, %v1334_v59 }
 0x1fc   : > { %v1283_v28 = vmul.f32 %v6256_v57, %v7314_v32  ;;  %6265 = vrsqrt.f32 %v1192_v42  ;;  %v1389_v61 = vadd.f32 %v7382_v55, %v1335_v45 }
 0x1fd   : > { %v1420_v51 = vpack.c.bf16 %v1388_v47, %v1387_v0  ;;  %v1336_v62 = vmul.f32 %v7375_v8, %v1282_v29  ;;  %v610_v47 = vld [vmem:[%s11366_s7 + $0x8] sm:$0x7] }
 0x1fe   : > { %v6258_v56 = vpop.eup %6257  ;;  %v1337_v2 = vmul.f32 %v7375_v8, %v1283_v28 }
 0x1ff   : > { %v6260_v6 = vpop.eup %6259  ;;  %v1284_v12 = vmul.f32 %v6258_v56, %v7317_v4  ;;  %6050 = vmatmul.mubr.msk.bf16.gmra.mrb[28].mxu0 %vm671_vm0, %v1420_v51  ;;  %v1390_v1 = vadd.f32 %v7382_v55, %v1336_v62 }
 0x200   : > { %v1285_v10 = vmul.f32 %v6260_v6, %v7326_v36  ;;  %v1391_v4 = vadd.f32 %v7382_v55, %v1337_v2 }
 0x201   : > { %v1421_v14 = vpack.c.bf16 %v1390_v1, %v1389_v61  ;;  %v1338_v32 = vmul.f32 %v7375_v8, %v1284_v12 }
 0x202   : > { %v6262_v21 = vpop.eup %6261  ;;  %v1339_v63 = vmul.f32 %v7375_v8, %v1285_v10 }
 0x203   : > { %v6264_v15 = vpop.eup %6263  ;;  %v1286_v58 = vmul.f32 %v6262_v21, %v7329_v11  ;;  %6053 = vmatprep.mubr.msk.bf16.mxu0 %vm671_vm0, %v1421_v14  ;;  %v1392_v49 = vadd.f32 %v7382_v55, %v1338_v32 }
 0x204   : > { %v1287_v33 = vmul.f32 %v6264_v15, %v7338_v19  ;;  %v1393_v11 = vadd.f32 %v7382_v55, %v1339_v63 }
 0x205   : > { %v1422_v22 = vpack.c.bf16 %v1392_v49, %v1391_v4  ;;  %v1340_v36 = vmul.f32 %v7375_v8, %v1286_v58 }
 0x206   : > { %v6266_v48 = vpop.eup %6265  ;;  %v1341_v16 = vmul.f32 %v7375_v8, %v1287_v33 }
 0x207   : > { %v1288_v30 = vmul.f32 %v6266_v48, %v7341_v40  ;;  %6054 = vmatmul.mubr.msk.bf16.gmra.mrb[32].mxu0 %vm671_vm0, %v1422_v22  ;;  %v1394_v13 = vadd.f32 %v7382_v55, %v1340_v36  ;;  %v6614_v40 = vmov 0.0   ;;  %v611_v22 = vld [vmem:[%s11366_s7 + $0xc] sm:$0x7] }
 0x208   : > { %v1395_v19 = vadd.f32 %v7382_v55, %v1341_v16  ;;  %2004 = vst.msk [vmem:[#allocation2 + $0x50] sm:$0xff] %vm2002_vm1, %v6614_v40  ;;  %2066 = vst.msk [vmem:[#allocation3 + $0x50] sm:$0xff] %vm2002_vm1, %v6614_v40  ;;  %v1805_v34 = vrot.slane %v6614_v40, 7  ;;  %v1904_v39 = vrot.slane %v6614_v40, 1 }
 0x209   : > { %v1423_v7 = vpack.c.bf16 %v1394_v13, %v1393_v11  ;;  %v1342_v60 = vmul.f32 %v7375_v8, %v1288_v30  ;;  %2128 = vst.msk [vmem:[#allocation4 + $0x50] sm:$0xff] %vm2002_vm1, %v6614_v40  ;;  %2003 = vst.msk [vmem:[#allocation2] sm:$0xff] %vm2002_vm1, %v6614_v40  ;;  %v1802_v8 = vlaneseq }
 0x20a   : > { %2005 = vst.msk [vmem:[#allocation2 + $0xa0] sm:$0xff] %vm2002_vm1, %v6614_v40  ;;  %2006 = vst.msk [vmem:[#allocation2 + $0xf0] sm:$0xff] %vm2002_vm1, %v6614_v40 }
 0x20b   : > { %6057 = vmatprep.mubr.msk.bf16.mxu0 %vm671_vm0, %v1423_v7  ;;  %v1396_v5 = vadd.f32 %v7382_v55, %v1342_v60  ;;  %2007 = vst.msk [vmem:[#allocation2 + $0x140] sm:$0xff] %vm2002_vm1, %v6614_v40  ;;  %2008 = vst.msk [vmem:[#allocation2 + $0x190] sm:$0xff] %vm2002_vm1, %v6614_v40  ;;  %v7573_v55 = vshrl.u32 %v1802_v8, 7 }
 0x20c   : > { %2010 = vst.msk [vmem:[#allocation2 + $0x48] sm:$0xff] %vm2002_vm1, %v6614_v40  ;;  %2011 = vst.msk [vmem:[#allocation2 + $0x98] sm:$0xff] %vm2002_vm1, %v6614_v40 }
 0x20d   : > { %v1424_v23 = vpack.c.bf16 %v1396_v5, %v1395_v19  ;;  %2012 = vst.msk [vmem:[#allocation2 + $0xe8] sm:$0xff] %vm2002_vm1, %v6614_v40  ;;  %2013 = vst.msk [vmem:[#allocation2 + $0x138] sm:$0xff] %vm2002_vm1, %v6614_v40  ;;  %vm1804_vm2 = vcmp.ge.s32.totalorder %v7573_v55, 1  ;;  %vm1903_vm3 = vcmp.le.s32.totalorder %v7573_v55, 6  ;;  %v7614_v43 = vsub.s32 0, %v7573_v55 }
 0x20e   : > { %2014 = vst.msk [vmem:[#allocation2 + $0x188] sm:$0xff] %vm2002_vm1, %v6614_v40  ;;  %2015 = vst.msk [vmem:[#allocation2 + $0x1d8] sm:$0xff] %vm2002_vm1, %v6614_v40  ;;  %v1855_v18 = vsel %vm1804_vm2, %v1805_v34, 0.0  ;;  %v1954_v20 = vsel %vm1903_vm3, %v1904_v39, 0.0  ;;  %v7617_v25 = vsub.s32 1, %v7573_v55  ;;  %v7629_v35 = vsub.s32 2, %v7573_v55 }
 0x20f   : > { %6058 = vmatmul.mubr.msk.bf16.gmra.mrb[36].mxu0 %vm671_vm0, %v1424_v23  ;;  %2017 = vst.msk [vmem:[#allocation2 + $0x8] sm:$0xff] %vm2002_vm1, %v6614_v40  ;;  %2018 = vst.msk [vmem:[#allocation2 + $0x10] sm:$0xff] %vm2002_vm1, %v6614_v40  ;;  %v7623_v46 = vrot.slane %v608_v41, %v7614_v43  ;;  %v7640_v24 = vrot.slane %v609_v27, %v7614_v43  ;;  %v7655_v28 = vrot.slane %v610_v47, %v7614_v43  ;;  %v3093_v19 = vld [vmem:[#allocation3 + $0x50] sm:$0xff] }
 0x210   : > { %2019 = vst.msk [vmem:[#allocation2 + $0x18] sm:$0xff] %vm2002_vm1, %v6614_v40  ;;  %2020 = vst.msk [vmem:[#allocation2 + $0x20] sm:$0xff] %vm2002_vm1, %v6614_v40  ;;  %v7626_v37 = vrot.slane %v608_v41, %v7617_v25  ;;  %v2289_v52 = vld [vmem:[#allocation2] sm:$0xff]  ;;  %v7632_v50 = vrot.slane %v608_v41, %v7629_v35  ;;  %v7644_v44 = vrot.slane %v609_v27, %v7617_v25  ;;  %v2197_v8 = vld [vmem:[#allocation3 + $0x50] sm:$0xff] }
 0x211   : > { %2021 = vst.msk [vmem:[#allocation2 + $0x28] sm:$0xff] %vm2002_vm1, %v6614_v40  ;;  %2022 = vst.msk [vmem:[#allocation2 + $0x30] sm:$0xff] %vm2002_vm1, %v6614_v40  ;;  %v7648_v57 = vrot.slane %v609_v27, %v7629_v35  ;;  %v7663_v61 = vrot.slane %v610_v47, %v7617_v25  ;;  %v7673_v4 = vrot.slane %v610_v47, %v7629_v35  ;;  %v2297_v34 = vld [vmem:[#allocation2 + $0x50] sm:$0xff]  ;;  %v2305_v41 = vld [vmem:[#allocation2 + $0xa0] sm:$0xff] }
 0x212   : > { %2023 = vst.msk [vmem:[#allocation2 + $0x38] sm:$0xff] %vm2002_vm1, %v6614_v40  ;;  %2024 = vst.msk [vmem:[#allocation2 + $0x40] sm:$0xff] %vm2002_vm1, %v6614_v40  ;;  %v2325_v31 = vmul.f32 %v7626_v37, %v2289_v52  ;;  %v7686_v7 = vrot.slane %v611_v22, %v7614_v43  ;;  %v7690_v39 = vrot.slane %v611_v22, %v7617_v25  ;;  %v3194_v27 = vld [vmem:[#allocation2 + $0x50] sm:$0xff] }
 0x213   : > { %2057 = vst.msk [vmem:[#allocation2 + $0x198] sm:$0xff] %vm2002_vm1, %v6614_v40  ;;  %2058 = vst.msk [vmem:[#allocation2 + $0x1a0] sm:$0xff] %vm2002_vm1, %v6614_v40 }
 0x214   : > { %2059 = vst.msk [vmem:[#allocation2 + $0x1a8] sm:$0xff] %vm2002_vm1, %v6614_v40  ;;  %2060 = vst.msk [vmem:[#allocation2 + $0x1b0] sm:$0xff] %vm2002_vm1, %v6614_v40  ;;  %v3129_v52 = vmul.f32 %v7686_v7, %v3093_v19 }
 0x215   : > { %2061 = vst.msk [vmem:[#allocation2 + $0x1b8] sm:$0xff] %vm2002_vm1, %v6614_v40  ;;  %2062 = vst.msk [vmem:[#allocation2 + $0x1c0] sm:$0xff] %vm2002_vm1, %v6614_v40 }
 0x216   : > { %2063 = vst.msk [vmem:[#allocation2 + $0x1c8] sm:$0xff] %vm2002_vm1, %v6614_v40  ;;  %2064 = vst.msk [vmem:[#allocation2 + $0x1d0] sm:$0xff] %vm2002_vm1, %v6614_v40  ;;  %v2589_v42 = vld [vmem:[#allocation2 + $0x8] sm:$0xff]  ;;  %v2891_v15 = vld [vmem:[#allocation2 + $0x10] sm:$0xff] }
 0x217   : > { %2065 = vst.msk [vmem:[#allocation3] sm:$0xff] %vm2002_vm1, %v6614_v40  ;;  %2067 = vst.msk [vmem:[#allocation3 + $0xa0] sm:$0xff] %vm2002_vm1, %v6614_v40  ;;  %v2625_v0 = vmul.f32 %v7644_v44, %v2589_v42  ;;  %v7660_v6 = vld [vmem:[#allocation2 + $0x18] sm:$0xff]  ;;  %v2927_v63 = vmul.f32 %v7663_v61, %v2891_v15  ;;  %v2341_v42 = vmul.f32 %v7626_v37, %v2305_v41 }
 0x218   : > { %2068 = vst.msk [vmem:[#allocation3 + $0xf0] sm:$0xff] %vm2002_vm1, %v6614_v40  ;;  %2069 = vst.msk [vmem:[#allocation3 + $0x140] sm:$0xff] %vm2002_vm1, %v6614_v40  ;;  %v2328_v14 = vmul.f32 %v7626_v37, %v7660_v6 }
 0x219   : > { %2070 = vst.msk [vmem:[#allocation3 + $0x190] sm:$0xff] %vm2002_vm1, %v6614_v40  ;;  %2072 = vst.msk [vmem:[#allocation3 + $0x48] sm:$0xff] %vm2002_vm1, %v6614_v40 }
 0x21a   : > { %2073 = vst.msk [vmem:[#allocation3 + $0x98] sm:$0xff] %vm2002_vm1, %v6614_v40  ;;  %2074 = vst.msk [vmem:[#allocation3 + $0xe8] sm:$0xff] %vm2002_vm1, %v6614_v40 }
 0x21b   : > { %2075 = vst.msk [vmem:[#allocation3 + $0x138] sm:$0xff] %vm2002_vm1, %v6614_v40  ;;  %2076 = vst.msk [vmem:[#allocation3 + $0x188] sm:$0xff] %vm2002_vm1, %v6614_v40 }
 0x21c   : > { %2077 = vst.msk [vmem:[#allocation3 + $0x1d8] sm:$0xff] %vm2002_vm1, %v6614_v40  ;;  %2127 = vst.msk [vmem:[#allocation4] sm:$0xff] %vm2002_vm1, %v6614_v40 }
 0x21d   : > { %2129 = vst.msk [vmem:[#allocation4 + $0xa0] sm:$0xff] %vm2002_vm1, %v6614_v40  ;;  %2130 = vst.msk [vmem:[#allocation4 + $0xf0] sm:$0xff] %vm2002_vm1, %v6614_v40 }
 0x21e   : > { %2131 = vst.msk [vmem:[#allocation4 + $0x140] sm:$0xff] %vm2002_vm1, %v6614_v40  ;;  %2132 = vst.msk [vmem:[#allocation4 + $0x190] sm:$0xff] %vm2002_vm1, %v6614_v40  ;;  %v2189_v53 = vld [vmem:[#allocation3] sm:$0xff] }
 0x21f   : > { %2134 = vst.msk [vmem:[#allocation4 + $0x48] sm:$0xff] %vm2002_vm1, %v6614_v40  ;;  %2135 = vst.msk [vmem:[#allocation4 + $0x98] sm:$0xff] %vm2002_vm1, %v6614_v40  ;;  %v2225_v26 = vmul.f32 %v7623_v46, %v2189_v53 }
 0x220   : > { %2136 = vst.msk [vmem:[#allocation4 + $0xe8] sm:$0xff] %vm2002_vm1, %v6614_v40  ;;  %2137 = vst.msk [vmem:[#allocation4 + $0x138] sm:$0xff] %vm2002_vm1, %v6614_v40 }
 0x221   : > { %2138 = vst.msk [vmem:[#allocation4 + $0x188] sm:$0xff] %vm2002_vm1, %v6614_v40  ;;  %2139 = vst.msk [vmem:[#allocation4 + $0x1d8] sm:$0xff] %vm2002_vm1, %v6614_v40  ;;  %v2357_v38 = vadd.f32 %v2325_v31, %v2225_v26  ;;  %v2592_v26 = vld [vmem:[#allocation2 + $0x20] sm:$0xff] }
 0x222   : > { %2079 = vst.msk [vmem:[#allocation3 + $0x8] sm:$0xff] %vm2002_vm1, %v1855_v18  ;;  %2080 = vst.msk [vmem:[#allocation3 + $0x10] sm:$0xff] %vm2002_vm1, %v1855_v18 }
 0x223   : > { %2081 = vst.msk [vmem:[#allocation3 + $0x18] sm:$0xff] %vm2002_vm1, %v1855_v18  ;;  %2082 = vst.msk [vmem:[#allocation3 + $0x20] sm:$0xff] %vm2002_vm1, %v1855_v18  ;;  %v2389_v3 = vld [vmem:[#allocation4] sm:$0xff] }
 0x224   : > { %2083 = vst.msk [vmem:[#allocation3 + $0x28] sm:$0xff] %vm2002_vm1, %v1855_v18  ;;  %2084 = vst.msk [vmem:[#allocation3 + $0x30] sm:$0xff] %vm2002_vm1, %v1855_v18  ;;  %v2425_v17 = vmul.f32 %v7632_v50, %v2389_v3 }
 0x225   : > { %2085 = vst.msk [vmem:[#allocation3 + $0x38] sm:$0xff] %vm2002_vm1, %v1855_v18  ;;  %2086 = vst.msk [vmem:[#allocation3 + $0x40] sm:$0xff] %vm2002_vm1, %v1855_v18 }
 0x226   : > { %2119 = vst.msk [vmem:[#allocation3 + $0x198] sm:$0xff] %vm2002_vm1, %v1855_v18  ;;  %2120 = vst.msk [vmem:[#allocation3 + $0x1a0] sm:$0xff] %vm2002_vm1, %v1855_v18  ;;  %v2457_v59 = vadd.f32 %v2425_v17, %v2357_v38  ;;  %v2628_v38 = vmul.f32 %v7644_v44, %v2592_v26 }
 0x227   : > { %2121 = vst.msk [vmem:[#allocation3 + $0x1a8] sm:$0xff] %vm2002_vm1, %v1855_v18  ;;  %2122 = vst.msk [vmem:[#allocation3 + $0x1b0] sm:$0xff] %vm2002_vm1, %v1855_v18 }
 0x228   : > { %2123 = vst.msk [vmem:[#allocation3 + $0x1b8] sm:$0xff] %vm2002_vm1, %v1855_v18  ;;  %2124 = vst.msk [vmem:[#allocation3 + $0x1c0] sm:$0xff] %vm2002_vm1, %v1855_v18 }
 0x229   : > { %2125 = vst.msk [vmem:[#allocation3 + $0x1c8] sm:$0xff] %vm2002_vm1, %v1855_v18  ;;  %2126 = vst.msk [vmem:[#allocation3 + $0x1d0] sm:$0xff] %vm2002_vm1, %v1855_v18  ;;  %v2489_v54 = vld [vmem:[#allocation3 + $0x8] sm:$0xff]  ;;  %v2790_v12 = vld [vmem:[#allocation3 + $0x10] sm:$0xff] }
 0x22a   : > { %2141 = vst.msk [vmem:[#allocation4 + $0x8] sm:$0xff] %vm2002_vm1, %v1954_v20  ;;  %2142 = vst.msk [vmem:[#allocation4 + $0x10] sm:$0xff] %vm2002_vm1, %v1954_v20  ;;  %v2525_v9 = vmul.f32 %v7640_v24, %v2489_v54  ;;  %v7658_v56 = vld [vmem:[#allocation3 + $0x18] sm:$0xff]  ;;  %v2826_v2 = vmul.f32 %v7655_v28, %v2790_v12  ;;  %v2492_v60 = vld [vmem:[#allocation3 + $0x20] sm:$0xff]  ;;  %v2233_v54 = vmul.f32 %v7623_v46, %v2197_v8 }
 0x22b   : > { %2143 = vst.msk [vmem:[#allocation4 + $0x18] sm:$0xff] %vm2002_vm1, %v1954_v20  ;;  %2144 = vst.msk [vmem:[#allocation4 + $0x20] sm:$0xff] %vm2002_vm1, %v1954_v20  ;;  %v2228_v10 = vmul.f32 %v7623_v46, %v7658_v56  ;;  %v2528_v23 = vmul.f32 %v7640_v24, %v2492_v60 }
 0x22c   : > { %2145 = vst.msk [vmem:[#allocation4 + $0x28] sm:$0xff] %vm2002_vm1, %v1954_v20  ;;  %2146 = vst.msk [vmem:[#allocation4 + $0x30] sm:$0xff] %vm2002_vm1, %v1954_v20  ;;  %v2557_v29 = vadd.f32 %v2525_v9, %v2457_v59  ;;  %v2333_v59 = vmul.f32 %v7626_v37, %v2297_v34 }
 0x22d   : > { %2147 = vst.msk [vmem:[#allocation4 + $0x38] sm:$0xff] %vm2002_vm1, %v1954_v20  ;;  %2148 = vst.msk [vmem:[#allocation4 + $0x40] sm:$0xff] %vm2002_vm1, %v1954_v20  ;;  %v2360_v36 = vadd.f32 %v2328_v14, %v2228_v10  ;;  %v2313_v14 = vld [vmem:[#allocation2 + $0xf0] sm:$0xff] }
 0x22e   : > { %2181 = vst.msk [vmem:[#allocation4 + $0x198] sm:$0xff] %vm2002_vm1, %v1954_v20  ;;  %2182 = vst.msk [vmem:[#allocation4 + $0x1a0] sm:$0xff] %vm2002_vm1, %v1954_v20  ;;  %v2657_v51 = vadd.f32 %v2625_v0, %v2557_v29  ;;  %v2397_v29 = vld [vmem:[#allocation4 + $0x50] sm:$0xff]  ;;  %v2405_v0 = vld [vmem:[#allocation4 + $0xa0] sm:$0xff] }
 0x22f   : > { %2183 = vst.msk [vmem:[#allocation4 + $0x1a8] sm:$0xff] %vm2002_vm1, %v1954_v20  ;;  %2184 = vst.msk [vmem:[#allocation4 + $0x1b0] sm:$0xff] %vm2002_vm1, %v1954_v20 }
 0x230   : > { %2185 = vst.msk [vmem:[#allocation4 + $0x1b8] sm:$0xff] %vm2002_vm1, %v1954_v20  ;;  %2186 = vst.msk [vmem:[#allocation4 + $0x1c0] sm:$0xff] %vm2002_vm1, %v1954_v20 }
 0x231   : > { %2187 = vst.msk [vmem:[#allocation4 + $0x1c8] sm:$0xff] %vm2002_vm1, %v1954_v20  ;;  %2188 = vst.msk [vmem:[#allocation4 + $0x1d0] sm:$0xff] %vm2002_vm1, %v1954_v20  ;;  %v2689_v45 = vld [vmem:[#allocation4 + $0x8] sm:$0xff]  ;;  %v7681_v11 = vld [vmem:[#allocation4 + $0x10] sm:$0xff] }
 0x232   : > { %11635 = vst [vmem:[#allocation24_spill] sm:$0xff] %v7617_v25  ;;  %11636 = vst [vmem:[#allocation25_spill] sm:$0xff] %v7629_v35  ;;  %v2725_v62 = vmul.f32 %v7648_v57, %v2689_v45  ;;  %v7670_v32 = vld [vmem:[#allocation4 + $0x18] sm:$0xff]  ;;  %v3028_v16 = vmul.f32 %v7673_v4, %v7681_v11  ;;  %v2205_v20 = vld [vmem:[#allocation3 + $0xa0] sm:$0xff]  ;;  %v3230_v45 = vmul.f32 %v7690_v39, %v3194_v27 }
 0x233   : > { %11637 = vst [vmem:[#allocation26_spill] sm:$0xff] %v7655_v28  ;;  %11638 = vst [vmem:[#allocation27_spill] sm:$0xff] %v7663_v61  ;;  %v2428_v48 = vmul.f32 %v7632_v50, %v7670_v32  ;;  %v2241_v9 = vmul.f32 %v7623_v46, %v2205_v20 }
 0x234   : > { %v2757_v1 = vadd.f32 %v2725_v62, %v2657_v51  ;;  %11639 = vst [vmem:[#allocation28_spill] sm:$0xff] %v7673_v4  ;;  %11640 = vst [vmem:[#allocation29_spill] sm:$0xff] %v7686_v7  ;;  %v2692_v51 = vld [vmem:[#allocation4 + $0x20] sm:$0xff] }
 0x235   : > { %v2460_v5 = vadd.f32 %v2428_v48, %v2360_v36  ;;  %11641 = vst [vmem:[#allocation30_spill] sm:$0xff] %v7690_v39  ;;  %v7702_v62 = vld [vmem:[%s11365_s6] ss:$0 sm:$0xff]  ;;  %v2728_v10 = vmul.f32 %v7648_v57, %v2692_v51  ;;  %v7712_v36 = vadd.f32 %v2341_v42, %v2241_v9  ;;  %v7715_v48 = vmul.f32 %v7632_v50, %v2405_v0  ;;  %v2894_v0 = vld [vmem:[#allocation2 + $0x28] sm:$0xff] }
 0x236   : > { %v2858_v49 = vadd.f32 %v2826_v2, %v2757_v1  ;;  %v2213_v1 = vld [vmem:[#allocation3 + $0xf0] sm:$0xff] }
 0x237   : > { %v2560_v3 = vadd.f32 %v2528_v23, %v2460_v5  ;;  %v2349_v23 = vmul.f32 %v7626_v37, %v2313_v14 }
 0x238   : > { %v2959_v13 = vadd.f32 %v2927_v63, %v2858_v49  ;;  %v7707_v63 = vadd.f32 %v2333_v59, %v2233_v54  ;;  %v3295_v54 = vld [vmem:[#allocation4 + $0x50] sm:$0xff] }
 0x239   : > { %v2660_v2 = vadd.f32 %v2628_v38, %v2560_v3 }
 0x23a   : > { %v3060_v53 = vadd.f32 %v3028_v16, %v2959_v13  ;;  %v2249_v16 = vmul.f32 %v7623_v46, %v2213_v1  ;;  %v2930_v1 = vmul.f32 %v7663_v61, %v2894_v0 }
 0x23c   : > { %v3161_v47 = vadd.f32 %v3129_v52, %v3060_v53 }
 0x23e   : > { %v7719_v60 = vadd.f32 %v3230_v45, %v3161_v47 }
 0x29a   : > { %v6023_v21 = vpop.f32.mrb[0].mxu0 }
 0x29b   : > { %v1553_v58 = vpop.f32.mrb[1].mxu0  ;;  %v2227_v21 = vmul.f32 %v2790_v12, %v7623_v46  ;;  %v7722_v12 = vrot.slane %v611_v22, %v7629_v35 }
 0x29c   : > { %v6024_v33 = vpop.f32.mrb[2].mxu0  ;;  %v2327_v58 = vmul.f32 %v2891_v15, %v7626_v37  ;;  %v2793_v15 = vld [vmem:[#allocation3 + $0x28] sm:$0xff] }
 0x29d   : > { %v1556_v30 = vpop.f32.mrb[3].mxu0  ;;  %v7710_v33 = vmul.f32 %v7632_v50, %v2397_v29  ;;  %11642 = vst [vmem:[#allocation31_spill] sm:$0xff] %v7722_v12  ;;  %v2829_v8 = vmul.f32 %v7655_v28, %v2793_v15  ;;  %v2413_v29 = vld [vmem:[#allocation4 + $0xf0] sm:$0xff]  ;;  %v2381_v15 = vadd.f32 %v2349_v23, %v2249_v16 }
 0x29e   : > { %v2359_v53 = vadd.f32 %v2327_v58, %v2227_v21  ;;  %v2805_v21 = vld [vmem:[#allocation3 + $0x98] sm:$0xff] }
 0x29f   : > { %v2465_v16 = vadd.f32 %v7710_v33, %v7707_v63  ;;  %v7783_v23 = vmul.f32 %v7655_v28, %v2805_v21  ;;  %v7797_v63 = vadd.f32 %v7715_v48, %v7712_v36  ;;  %v2821_v33 = vld [vmem:[#allocation3 + $0x138] sm:$0xff] }
 0x2a2   : > { %v6027_v40 = vpop.f32.mrb[4].mxu0 }
 0x2a3   : > { %v1569_v18 = vpop.f32.mrb[5].mxu0  ;;  %v2760_v40 = vadd.f32 %v2728_v10, %v2660_v2 }
 0x2a4   : > { %v6028_v31 = vpop.f32.mrb[6].mxu0 }
 0x2a5   : > { %v1572_v17 = vpop.f32.mrb[7].mxu0  ;;  %v2427_v31 = vmul.f32 %v7681_v11, %v7632_v50  ;;  %v2861_v51 = vadd.f32 %v2829_v8, %v2760_v40 }
 0x2a7   : > { %v2459_v58 = vadd.f32 %v2427_v31, %v2359_v53  ;;  %v2962_v53 = vadd.f32 %v2930_v1, %v2861_v51  ;;  %v4103_v51 = vld [vmem:[#allocation2 + $0xa0] sm:$0xff] }
 0x2aa   : > { %v6031_v49 = vpop.f32.mrb[8].mxu0 }
 0x2ab   : > { %v1594_v30 = vadd.f32 %v6031_v49, %v7702_v62  ;;  %v1585_v13 = vpop.f32.mrb[9].mxu0  ;;  %v2527_v49 = vmul.f32 %v7640_v24, %v7658_v56  ;;  %v612_v56 = vld [vmem:[%s11366_s7 + $0x10] sm:$0x7] }
 0x2ac   : > { %v1586_v19 = vadd.f32 %v7702_v62, %v1585_v13  ;;  %v6032_v5 = vpop.f32.mrb[10].mxu0 }
 0x2ad   : > { %v1815_v34 = vrot.slane %v1594_v30, 7  ;;  %v1914_v18 = vrot.slane %v1594_v30, 1  ;;  %2027 = vst.msk [vmem:[#allocation2 + $0x68] sm:$0xff] %vm2002_vm1, %v1594_v30  ;;  %v1597_v20 = vadd.f32 %v6032_v5, %v7702_v62  ;;  %v1588_v41 = vpop.f32.mrb[11].mxu0  ;;  %v3331_v5 = vmul.f32 %v7722_v12, %v3295_v54 }
 0x2ae   : > { %v1813_v52 = vrot.slane %v1586_v19, 7  ;;  %v1912_v22 = vrot.slane %v1586_v19, 1  ;;  %2025 = vst.msk [vmem:[#allocation2 + $0x58] sm:$0xff] %vm2002_vm1, %v1586_v19  ;;  %v1589_v26 = vadd.f32 %v7702_v62, %v1588_v41  ;;  %v2449_v19 = vmul.f32 %v7632_v50, %v2413_v29  ;;  %v614_v41 = vld [vmem:[%s11366_s7 + $0x18] sm:$0x7] }
 0x2af   : > { %v1865_v27 = vsel %vm1804_vm2, %v1815_v34, 0.0  ;;  %v1964_v3 = vsel %vm1903_vm3, %v1914_v18, 0.0  ;;  %v1816_v38 = vrot.slane %v1597_v20, 7  ;;  %v1915_v17 = vrot.slane %v1597_v20, 1  ;;  %2028 = vst.msk [vmem:[#allocation2 + $0x70] sm:$0xff] %vm2002_vm1, %v1597_v20  ;;  %v2995_v18 = vld [vmem:[#allocation4 + $0x28] sm:$0xff] }
 0x2b0   : > { %2089 = vst.msk [vmem:[#allocation3 + $0x68] sm:$0xff] %vm2002_vm1, %v1865_v27  ;;  %2151 = vst.msk [vmem:[#allocation4 + $0x68] sm:$0xff] %vm2002_vm1, %v1964_v3  ;;  %v1863_v59 = vsel %vm1804_vm2, %v1813_v52, 0.0  ;;  %v1962_v11 = vsel %vm1903_vm3, %v1912_v22, 0.0  ;;  %v1814_v9 = vrot.slane %v1589_v26, 7  ;;  %v1913_v42 = vrot.slane %v1589_v26, 1 }
 0x2b1   : > { %2026 = vst.msk [vmem:[#allocation2 + $0x60] sm:$0xff] %vm2002_vm1, %v1589_v26  ;;  %2087 = vst.msk [vmem:[#allocation3 + $0x58] sm:$0xff] %vm2002_vm1, %v1863_v59  ;;  %v1866_v47 = vsel %vm1804_vm2, %v1816_v38, 0.0  ;;  %v1965_v45 = vsel %vm1903_vm3, %v1915_v17, 0.0  ;;  %v613_v34 = vld [vmem:[%s11366_s7 + $0x14] sm:$0x7]  ;;  %v3031_v52 = vmul.f32 %v7673_v4, %v2995_v18  ;;  %v7800_v26 = vrot.slane %v612_v56, %v7614_v43 }
 0x2b2   : > { %2149 = vst.msk [vmem:[#allocation4 + $0x58] sm:$0xff] %vm2002_vm1, %v1962_v11  ;;  %2090 = vst.msk [vmem:[#allocation3 + $0x70] sm:$0xff] %vm2002_vm1, %v1866_v47  ;;  %v1864_v2 = vsel %vm1804_vm2, %v1814_v9, 0.0  ;;  %v1963_v10 = vsel %vm1903_vm3, %v1913_v42, 0.0  ;;  %v6035_v14 = vpop.f32.mrb[12].mxu0  ;;  %v2559_v31 = vadd.f32 %v2527_v49, %v2459_v58  ;;  %v2627_v27 = vmul.f32 %v7644_v44, %v7660_v6  ;;  %v4204_v18 = vld [vmem:[#allocation4 + $0xa0] sm:$0xff] }
 0x2b3   : > { %2152 = vst.msk [vmem:[#allocation4 + $0x70] sm:$0xff] %vm2002_vm1, %v1965_v45  ;;  %2088 = vst.msk [vmem:[#allocation3 + $0x60] sm:$0xff] %vm2002_vm1, %v1864_v2  ;;  %v7763_v30 = vadd.f32 %v6035_v14, %v7702_v62  ;;  %v1601_v13 = vpop.f32.mrb[13].mxu0  ;;  %v7806_v38 = vadd.f32 %v2449_v19, %v2381_v15  ;;  %v7809_v17 = vadd.f32 %v3331_v5, %v7719_v60  ;;  %v4002_v45 = vld [vmem:[#allocation3 + $0xa0] sm:$0xff]  ;;  %v615_v58 = vld [vmem:[%s11366_s7 + $0x1c] sm:$0x7] }
 0x2b4   : > { %2150 = vst.msk [vmem:[#allocation4 + $0x60] sm:$0xff] %vm2002_vm1, %v1963_v10  ;;  %v7768_v40 = vadd.f32 %v7702_v62, %v1601_v13  ;;  %v7770_v8 = vpop.f32.mrb[14].mxu0  ;;  %11643 = vst [vmem:[#allocation32_spill] sm:$0xff] %v7800_v26  ;;  %v7812_v54 = vrot.slane %v612_v56, %v7617_v25  ;;  %v7815_v36 = vrot.slane %v613_v34, %v7617_v25  ;;  %v2300_v42 = vld [vmem:[#allocation2 + $0x68] sm:$0xff] }
 0x2b5   : > { %2031 = vst.msk [vmem:[#allocation2 + $0x88] sm:$0xff] %vm2002_vm1, %v7763_v30  ;;  %v7785_v20 = vpop.f32.mrb[15].mxu0  ;;  %v7791_v22 = vld [vmem:[#allocation2 + $0x58] sm:$0xff]  ;;  %11644 = vst [vmem:[#allocation33_spill] sm:$0xff] %v7809_v17  ;;  %v7820_v11 = vrot.slane %v612_v56, %v7629_v35  ;;  %v7823_v6 = vrot.slane %v613_v34, %v7614_v43  ;;  %v7826_v9 = vrot.slane %v613_v34, %v7629_v35 }
 0x2b6   : > { %2029 = vst.msk [vmem:[#allocation2 + $0x78] sm:$0xff] %vm2002_vm1, %v7768_v40  ;;  %11645 = vst [vmem:[#allocation34_spill] sm:$0xff] %v7812_v54  ;;  %v7829_v60 = vrot.slane %v614_v41, %v7614_v43  ;;  %v2334_v0 = vmul.f32 %v7626_v37, %v7791_v22  ;;  %v7835_v47 = vmul.f32 %v7655_v28, %v2821_v33 }
 0x2b7   : > { %v7804_v3 = vld [vmem:[#allocation3 + $0x68] sm:$0xff]  ;;  %11646 = vst [vmem:[#allocation35_spill] sm:$0xff] %v7815_v36  ;;  %11647 = vst [vmem:[#allocation36_spill] sm:$0xff] %v7820_v11  ;;  %v7837_v1 = vadd.f32 %v3031_v52, %v2962_v53  ;;  %v7851_v49 = vrot.slane %v614_v41, %v7617_v25  ;;  %v7854_v13 = vrot.slane %v614_v41, %v7629_v35 }
 0x2b8   : > { %v2198_v48 = vld [vmem:[#allocation3 + $0x58] sm:$0xff]  ;;  %11648 = vst [vmem:[#allocation37_spill] sm:$0xff] %v7823_v6  ;;  %11649 = vst [vmem:[#allocation38_spill] sm:$0xff] %v7826_v9  ;;  %v2236_v2 = vmul.f32 %v7623_v46, %v7804_v3  ;;  %v7843_v14 = vld [vmem:[#allocation2 + $0x60] sm:$0xff]  ;;  %v7856_v15 = vadd.f32 %v2627_v27, %v2559_v31  ;;  %v7865_v53 = vmul.f32 %v7648_v57, %v7670_v32 }
 0x2b9   : > { %v7817_v59 = vld [vmem:[#allocation4 + $0x58] sm:$0xff]  ;;  %11650 = vst [vmem:[#allocation39_spill] sm:$0xff] %v7829_v60  ;;  %v2234_v29 = vmul.f32 %v7623_v46, %v2198_v48  ;;  %11651 = vst [vmem:[#allocation40_spill] sm:$0xff] %v7835_v47  ;;  %v2533_v56 = vmul.f32 %v7640_v24, %v2198_v48  ;;  %v2336_v52 = vmul.f32 %v7626_v37, %v2300_v42 }
 0x2ba   : > { %11652 = vst [vmem:[#allocation41_spill] sm:$0xff] %v7837_v1  ;;  %v7841_v10 = vld [vmem:[#allocation3 + $0x60] sm:$0xff]  ;;  %v7845_v21 = vpop.f32.mrb[16].mxu0  ;;  %11653 = vst [vmem:[#allocation42_spill] sm:$0xff] %v7851_v49  ;;  %v2434_v5 = vmul.f32 %v7632_v50, %v7817_v59  ;;  %v7873_v31 = vmul.f32 %v7829_v60, %v4002_v45  ;;  %v7876_v27 = vmul.f32 %v7851_v49, %v4103_v51  ;;  %v1819_v51 = vrot.slane %v7763_v30, 7 }
 0x2bb   : > { %11654 = vst [vmem:[#allocation43_spill] sm:$0xff] %v7854_v13  ;;  %11655 = vst [vmem:[#allocation44_spill] sm:$0xff] %v7856_v15  ;;  %v2366_v19 = vadd.f32 %v2334_v0, %v2234_v29  ;;  %v7861_v34 = vpop.f32.mrb[17].mxu0  ;;  %v7868_v33 = vld [vmem:[#allocation4 + $0x60] sm:$0xff]  ;;  %v7879_v48 = vrot.slane %v615_v58, %v7614_v43  ;;  %v7881_v29 = vld [vmem:[#allocation4 + $0x68] sm:$0xff]  ;;  %v2235_v32 = vmul.f32 %v7623_v46, %v7841_v10 }
 0x2bc   : > { %11656 = vst [vmem:[#allocation45_spill] sm:$0xff] %v7865_v53  ;;  %v7870_v41 = vpop.f32.mrb[18].mxu0  ;;  %11657 = vst [vmem:[#allocation46_spill] sm:$0xff] %v7873_v31  ;;  %v2335_v47 = vmul.f32 %v7626_v37, %v7843_v14  ;;  %v7888_v15 = vrot.slane %v615_v58, %v7617_v25  ;;  %v2368_v45 = vadd.f32 %v2336_v52, %v2236_v2  ;;  %v616_v2 = vld [vmem:[%s11366_s7 + $0x20] sm:$0x7] }
 0x2bd   : > { %11658 = vst [vmem:[#allocation47_spill] sm:$0xff] %v7876_v27  ;;  %11659 = vst [vmem:[#allocation48_spill] sm:$0xff] %v7879_v48  ;;  %v2466_v0 = vadd.f32 %v2434_v5, %v2366_v19  ;;  %v1620_v53 = vpop.f32.mrb[19].mxu0  ;;  %v7892_v49 = vmul.f32 %v7854_v13, %v4204_v18  ;;  %v7895_v60 = vrot.slane %v615_v58, %v7629_v35 }
 0x2be   : > { %11660 = vst [vmem:[#allocation49_spill] sm:$0xff] %v7888_v15  ;;  %v2565_v19 = vadd.f32 %v2533_v56, %v2465_v16  ;;  %v2367_v5 = vadd.f32 %v2335_v47, %v2235_v32  ;;  %v2435_v27 = vmul.f32 %v7632_v50, %v7868_v33  ;;  %v2534_v12 = vmul.f32 %v7640_v24, %v7841_v10  ;;  %v7914_v56 = vld [vmem:[#allocation3 + $0x70] sm:$0xff] }
 0x2bf   : > { %11661 = vst [vmem:[#allocation50_spill] sm:$0xff] %v7892_v49  ;;  %11662 = vst [vmem:[#allocation51_spill] sm:$0xff] %v7895_v60  ;;  %v2436_v52 = vmul.f32 %v7632_v50, %v7881_v29  ;;  %v2635_v18 = vmul.f32 %v7644_v44, %v2300_v42  ;;  %v2633_v58 = vmul.f32 %v7644_v44, %v7791_v22  ;;  %v2301_v32 = vld [vmem:[#allocation2 + $0x70] sm:$0xff]  ;;  %v1869_v15 = vsel %vm1804_vm2, %v1819_v51, 0.0 }
 0x2c0   : > { %v7910_v16 = vrot.slane %v616_v2, %v7614_v43  ;;  %v2535_v47 = vmul.f32 %v7640_v24, %v7804_v3  ;;  %v2467_v13 = vadd.f32 %v2435_v27, %v2367_v5  ;;  %v2566_v35 = vadd.f32 %v2534_v12, %v2466_v0  ;;  %2093 = vst.msk [vmem:[#allocation3 + $0x88] sm:$0xff] %vm2002_vm1, %v1869_v15 }
 0x2c1   : > { %v2634_v25 = vmul.f32 %v7644_v44, %v7843_v14  ;;  %v2468_v49 = vadd.f32 %v2436_v52, %v2368_v45  ;;  %v7919_v60 = vmul.f32 %v7663_v61, %v2300_v42  ;;  %v1918_v43 = vrot.slane %v7763_v30, 1 }
 0x2c2   : > { %11663 = vst [vmem:[#allocation52_spill] sm:$0xff] %v7910_v16  ;;  %v6043_v2 = vpop.f32.mrb[20].mxu0  ;;  %v7925_v16 = vmul.f32 %v7690_v39, %v2300_v42  ;;  %v2665_v31 = vadd.f32 %v2633_v58, %v2565_v19  ;;  %v2567_v1 = vadd.f32 %v2535_v47, %v2467_v13  ;;  %v7934_v0 = vmul.f32 %v7690_v39, %v7791_v22 }
 0x2c3   : > { %11664 = vst [vmem:[#allocation53_spill] sm:$0xff] %v7919_v60  ;;  %v7927_v27 = vadd.f32 %v2634_v25, %v2566_v35  ;;  %v7930_v12 = vpop.f32.mrb[21].mxu0  ;;  %v2337_v45 = vmul.f32 %v7626_v37, %v2301_v32  ;;  %v2536_v30 = vmul.f32 %v7640_v24, %v7914_v56  ;;  %v1968_v42 = vsel %vm1903_vm3, %v1918_v43, 0.0 }
 0x2c4   : > { %11665 = vst [vmem:[#allocation54_spill] sm:$0xff] %v7925_v16  ;;  %11666 = vst [vmem:[#allocation55_spill] sm:$0xff] %v7934_v0  ;;  %v7941_v51 = vpop.f32.mrb[22].mxu0  ;;  %v2733_v25 = vmul.f32 %v7648_v57, %v7817_v59  ;;  %v7945_v35 = vadd.f32 %v2635_v18, %v2567_v1  ;;  %v1817_v22 = vrot.slane %v7768_v40, 7  ;;  %v1916_v13 = vrot.slane %v7768_v40, 1 }
 0x2c5   : > { %2155 = vst.msk [vmem:[#allocation4 + $0x88] sm:$0xff] %vm2002_vm1, %v1968_v42  ;;  %v7950_v15 = vpop.f32.mrb[23].mxu0  ;;  %v2237_v19 = vmul.f32 %v7623_v46, %v7914_v56  ;;  %v2568_v5 = vadd.f32 %v2536_v30, %v2468_v49  ;;  %v2636_v52 = vmul.f32 %v7644_v44, %v2301_v32  ;;  %v7956_v58 = vmul.f32 %v7663_v61, %v2301_v32 }
 0x2c6   : > { %11667 = vst [vmem:[#allocation56_spill] sm:$0xff] %v7945_v35  ;;  %v2765_v59 = vadd.f32 %v2733_v25, %v2665_v31  ;;  %v1867_v1 = vsel %vm1804_vm2, %v1817_v22, 0.0  ;;  %v1966_v18 = vsel %vm1903_vm3, %v1916_v13, 0.0  ;;  %v1613_v40 = vadd.f32 %v7770_v8, %v7702_v62  ;;  %v2401_v13 = vld [vmem:[#allocation4 + $0x70] sm:$0xff] }
 0x2c7   : > { %11668 = vst [vmem:[#allocation57_spill] sm:$0xff] %v7956_v58  ;;  %2091 = vst.msk [vmem:[#allocation3 + $0x78] sm:$0xff] %vm2002_vm1, %v1867_v1  ;;  %v1605_v49 = vadd.f32 %v7702_v62, %v7785_v20  ;;  %v1626_v47 = vadd.f32 %v7845_v21, %v7702_v62  ;;  %v7972_v31 = vadd.f32 %v7702_v62, %v7861_v34  ;;  %v2304_v58 = vld [vmem:[#allocation2 + $0x88] sm:$0xff] }
 0x2c8   : > { %2153 = vst.msk [vmem:[#allocation4 + $0x78] sm:$0xff] %vm2002_vm1, %v1966_v18  ;;  %v7976_v43 = vadd.f32 %v7870_v41, %v7702_v62  ;;  %v1820_v30 = vrot.slane %v1613_v40, 7  ;;  %v1919_v8 = vrot.slane %v1613_v40, 1  ;;  %2032 = vst.msk [vmem:[#allocation2 + $0x90] sm:$0xff] %vm2002_vm1, %v1613_v40  ;;  %v7980_v42 = vadd.f32 %v7702_v62, %v1620_v53 }
 0x2c9   : > { %v7983_v20 = vadd.f32 %v6043_v2, %v7702_v62  ;;  %v1818_v25 = vrot.slane %v1605_v49, 7  ;;  %v1917_v21 = vrot.slane %v1605_v49, 1  ;;  %2030 = vst.msk [vmem:[#allocation2 + $0x80] sm:$0xff] %vm2002_vm1, %v1605_v49  ;;  %v1823_v34 = vrot.slane %v1626_v47, 7  ;;  %2035 = vst.msk [vmem:[#allocation2 + $0xb8] sm:$0xff] %vm2002_vm1, %v1626_v47  ;;  %v2204_v49 = vld [vmem:[#allocation3 + $0x88] sm:$0xff] }
 0x2ca   : > { %v1922_v22 = vrot.slane %v1626_v47, 1  ;;  %2033 = vst.msk [vmem:[#allocation2 + $0xa8] sm:$0xff] %vm2002_vm1, %v7972_v31  ;;  %2036 = vst.msk [vmem:[#allocation2 + $0xc0] sm:$0xff] %vm2002_vm1, %v7976_v43  ;;  %v7991_v41 = vpop.f32.mrb[24].mxu0  ;;  %v2369_v53 = vadd.f32 %v2337_v45, %v2237_v19  ;;  %v7994_v2 = vmul.f32 %v7690_v39, %v2301_v32  ;;  %v2834_v1 = vmul.f32 %v7655_v28, %v7841_v10 }
 0x2cb   : > { %v1870_v18 = vsel %vm1804_vm2, %v1820_v30, 0.0  ;;  %2034 = vst.msk [vmem:[#allocation2 + $0xb0] sm:$0xff] %vm2002_vm1, %v7980_v42  ;;  %2039 = vst.msk [vmem:[#allocation2 + $0xd8] sm:$0xff] %vm2002_vm1, %v7983_v20  ;;  %v8004_v40 = vpop.f32.mrb[25].mxu0  ;;  %v1969_v45 = vsel %vm1903_vm3, %v1919_v8, 0.0  ;;  %v1868_v10 = vsel %vm1804_vm2, %v1818_v25, 0.0  ;;  %v8019_v30 = vmul.f32 %v7648_v57, %v7881_v29 }
 0x2cc   : > { %11669 = vst [vmem:[#allocation58_spill] sm:$0xff] %v7994_v2  ;;  %2094 = vst.msk [vmem:[#allocation3 + $0x90] sm:$0xff] %vm2002_vm1, %v1870_v18  ;;  %v1967_v32 = vsel %vm1903_vm3, %v1917_v21, 0.0  ;;  %v1873_v19 = vsel %vm1804_vm2, %v1823_v34, 0.0  ;;  %v8015_v47 = vpop.f32.mrb[26].mxu0  ;;  %v2835_v8 = vmul.f32 %v7655_v28, %v7804_v3  ;;  %v8025_v18 = vmul.f32 %v7673_v4, %v7881_v29 }
 0x2cd   : > { %11670 = vst [vmem:[#allocation59_spill] sm:$0xff] %v8019_v30  ;;  %v2668_v25 = vadd.f32 %v2636_v52, %v2568_v5  ;;  %2156 = vst.msk [vmem:[#allocation4 + $0x90] sm:$0xff] %vm2002_vm1, %v1969_v45  ;;  %v8031_v21 = vpop.f32.mrb[27].mxu0  ;;  %v2437_v34 = vmul.f32 %v7632_v50, %v2401_v13  ;;  %v2734_v3 = vmul.f32 %v7648_v57, %v7868_v33  ;;  %v1972_v29 = vsel %vm1903_vm3, %v1922_v22, 0.0 }
 0x2ce   : > { %11671 = vst [vmem:[#allocation60_spill] sm:$0xff] %v8025_v18  ;;  %2092 = vst.msk [vmem:[#allocation3 + $0x80] sm:$0xff] %vm2002_vm1, %v1868_v10  ;;  %v2866_v60 = vadd.f32 %v2834_v1, %v2765_v59  ;;  %v2736_v5 = vmul.f32 %v7648_v57, %v2401_v13  ;;  %v8041_v52 = vmul.f32 %v7655_v28, %v7914_v56  ;;  %v2302_v56 = vld [vmem:[#allocation2 + $0x78] sm:$0xff]  ;;  %v1923_v7 = vrot.slane %v7976_v43, 1 }
 0x2cf   : > { %2154 = vst.msk [vmem:[#allocation4 + $0x80] sm:$0xff] %vm2002_vm1, %v1967_v32  ;;  %2097 = vst.msk [vmem:[#allocation3 + $0xb8] sm:$0xff] %vm2002_vm1, %v1873_v19  ;;  %v8044_v45 = vmul.f32 %v7673_v4, %v2401_v13  ;;  %v2240_v10 = vmul.f32 %v7623_v46, %v2204_v49  ;;  %v2202_v32 = vld [vmem:[#allocation3 + $0x78] sm:$0xff]  ;;  %v2469_v19 = vadd.f32 %v2437_v34, %v2369_v53  ;;  %v2604_v48 = vld [vmem:[#allocation2 + $0x90] sm:$0xff] }
 0x2d0   : > { %11672 = vst [vmem:[#allocation61_spill] sm:$0xff] %v8041_v52  ;;  %2159 = vst.msk [vmem:[#allocation4 + $0xb8] sm:$0xff] %vm2002_vm1, %v1972_v29  ;;  %v2766_v59 = vadd.f32 %v2734_v3, %v7927_v27  ;;  %v2935_v22 = vmul.f32 %v7663_v61, %v7843_v14  ;;  %v8053_v1 = vmul.f32 %v7673_v4, %v7868_v33  ;;  %v2404_v27 = vld [vmem:[#allocation4 + $0x88] sm:$0xff] }
 0x2d1   : > { %11673 = vst [vmem:[#allocation62_spill] sm:$0xff] %v8044_v45  ;;  %v2768_v18 = vadd.f32 %v2736_v5, %v2668_v25  ;;  %v8057_v13 = vmul.f32 %v7690_v39, %v7843_v14  ;;  %v2340_v45 = vmul.f32 %v7626_v37, %v2304_v58  ;;  %v8061_v29 = vmul.f32 %v7644_v44, %v2304_v58 }
 0x2d2   : > { %11674 = vst [vmem:[#allocation63_spill] sm:$0xff] %v8053_v1  ;;  %v8063_v53 = vadd.f32 %v2935_v22, %v2866_v60  ;;  %v8066_v34 = vmul.f32 %v7663_v61, %v2304_v58  ;;  %v2238_v33 = vmul.f32 %v7623_v46, %v2202_v32  ;;  %v2537_v3 = vmul.f32 %v7640_v24, %v2202_v32  ;;  %v8070_v25 = vpop.f32.mrb[28].mxu0 }
 0x2d3   : > { %11675 = vst [vmem:[#allocation64_spill] sm:$0xff] %v8057_v13  ;;  %v2372_v5 = vadd.f32 %v2340_v45, %v2240_v10  ;;  %v8073_v14 = vmul.f32 %v7690_v39, %v2304_v58  ;;  %v2338_v52 = vmul.f32 %v7626_v37, %v2302_v56  ;;  %v2637_v30 = vmul.f32 %v7644_v44, %v2302_v56  ;;  %v8077_v60 = vpop.f32.mrb[29].mxu0  ;;  %v2504_v2 = vld [vmem:[#allocation3 + $0x90] sm:$0xff] }
 0x2d4   : > { %11676 = vst [vmem:[#allocation65_spill] sm:$0xff] %v8063_v53  ;;  %11677 = vst [vmem:[#allocation66_spill] sm:$0xff] %v8066_v34  ;;  %v8079_v22 = vadd.f32 %v2835_v8, %v2766_v59  ;;  %v8082_v34 = vmul.f32 %v7640_v24, %v2204_v49  ;;  %v2938_v35 = vmul.f32 %v7663_v61, %v2302_v56  ;;  %v8088_v45 = vpop.f32.mrb[30].mxu0  ;;  %v2402_v8 = vld [vmem:[#allocation4 + $0x78] sm:$0xff]  ;;  %v1821_v13 = vrot.slane %v7972_v31, 7 }
 0x2d5   : > { %11678 = vst [vmem:[#allocation67_spill] sm:$0xff] %v8073_v14  ;;  %v8086_v1 = vmul.f32 %v7690_v39, %v2302_v56  ;;  %v2440_v58 = vmul.f32 %v7632_v50, %v2404_v27  ;;  %v8092_v10 = vmul.f32 %v7648_v57, %v2404_v27  ;;  %v8095_v53 = vmul.f32 %v7655_v28, %v2204_v49  ;;  %v2203_v0 = vld [vmem:[#allocation3 + $0x80] sm:$0xff] }
 0x2d6   : > { %11679 = vst [vmem:[#allocation68_spill] sm:$0xff] %v8079_v22  ;;  %v2837_v59 = vmul.f32 %v7655_v28, %v2202_v32  ;;  %v8098_v22 = vpop.f32.mrb[31].mxu0  ;;  %v8101_v14 = vmul.f32 %v7673_v4, %v2404_v27  ;;  %v2370_v56 = vadd.f32 %v2338_v52, %v2238_v33  ;;  %v1824_v49 = vrot.slane %v7976_v43, 7  ;;  %v2303_v27 = vld [vmem:[#allocation2 + $0x80] sm:$0xff] }
 0x2d7   : > { %11680 = vst [vmem:[#allocation69_spill] sm:$0xff] %v8086_v1  ;;  %11681 = vst [vmem:[#allocation70_spill] sm:$0xff] %v8092_v10  ;;  %v2569_v1 = vadd.f32 %v2537_v3, %v2469_v19  ;;  %v2472_v16 = vadd.f32 %v2440_v58, %v2372_v5  ;;  %v1920_v10 = vrot.slane %v7972_v31, 1  ;;  %v2438_v32 = vmul.f32 %v7632_v50, %v2402_v8  ;;  %v8116_v58 = vld [vmem:[#allocation2 + $0xb8] sm:$0xff] }
 0x2d8   : > { %11682 = vst [vmem:[#allocation71_spill] sm:$0xff] %v8098_v22  ;;  %11683 = vst [vmem:[#allocation72_spill] sm:$0xff] %v8101_v14  ;;  %v2737_v9 = vmul.f32 %v7648_v57, %v2402_v8  ;;  %v1822_v52 = vrot.slane %v7980_v42, 7  ;;  %v1921_v19 = vrot.slane %v7980_v42, 1  ;;  %v2869_v33 = vadd.f32 %v2837_v59, %v2768_v18  ;;  %v2704_v18 = vld [vmem:[#allocation4 + $0x90] sm:$0xff]  ;;  %v2403_v59 = vld [vmem:[#allocation4 + $0x80] sm:$0xff] }
 0x2d9   : > { %v8112_v3 = vmul.f32 %v7673_v4, %v2402_v8  ;;  %v2540_v5 = vmul.f32 %v7640_v24, %v2504_v2  ;;  %v2239_v31 = vmul.f32 %v7623_v46, %v2203_v0  ;;  %v2470_v43 = vadd.f32 %v2438_v32, %v2370_v56  ;;  %v8154_v22 = vld [vmem:[#allocation4 + $0xb8] sm:$0xff] }
 0x2da   : > { %v2669_v14 = vadd.f32 %v2637_v30, %v2569_v1  ;;  %v2640_v36 = vmul.f32 %v7644_v44, %v2604_v48  ;;  %v8120_v6 = vmul.f32 %v7663_v61, %v2604_v48  ;;  %v8122_v11 = vpop.f32.mrb[32].mxu0  ;;  %v2339_v8 = vmul.f32 %v7626_v37, %v2303_v27 }
 0x2db   : > { %11684 = vst [vmem:[#allocation73_spill] sm:$0xff] %v8112_v3  ;;  %11686 = vst [vmem:[#allocation75_spill] sm:$0xff] %v8122_v11  ;;  %v2572_v42 = vadd.f32 %v2540_v5, %v2472_v16  ;;  %v2638_v3 = vmul.f32 %v7644_v44, %v2303_v27  ;;  %v8127_v54 = vmul.f32 %v7663_v61, %v2303_v27  ;;  %v8129_v17 = vpop.f32.mrb[33].mxu0  ;;  %v8138_v16 = vld [vmem:[#allocation3 + $0xb8] sm:$0xff]  ;;  %v1871_v26 = vsel %vm1804_vm2, %v1821_v13, 0.0 }
 0x2dc   : > { %11685 = vst [vmem:[#allocation74_spill] sm:$0xff] %v8120_v6  ;;  %11687 = vst [vmem:[#allocation76_spill] sm:$0xff] %v8129_v17  ;;  %v8132_v30 = vmul.f32 %v7655_v28, %v2504_v2  ;;  %v2538_v48 = vmul.f32 %v7640_v24, %v2203_v0  ;;  %v8136_v1 = vmul.f32 %v7690_v39, %v2303_v27  ;;  %v8142_v32 = vpop.f32.mrb[34].mxu0  ;;  %v1970_v2 = vsel %vm1903_vm3, %v1920_v10, 0.0 }
 0x2dd   : > { %v2344_v56 = vmul.f32 %v7626_v37, %v8116_v58  ;;  %v8144_v5 = vadd.f32 %v2938_v35, %v2869_v33  ;;  %v2371_v6 = vadd.f32 %v2339_v8, %v2239_v31  ;;  %v2769_v27 = vadd.f32 %v2737_v9, %v2669_v14  ;;  %2095 = vst.msk [vmem:[#allocation3 + $0xa8] sm:$0xff] %vm2002_vm1, %v1871_v26 }
 0x2de   : > { %11688 = vst [vmem:[#allocation77_spill] sm:$0xff] %v8132_v30  ;;  %11689 = vst [vmem:[#allocation78_spill] sm:$0xff] %v8136_v1  ;;  %v8150_v30 = vpop.f32.mrb[35].mxu0  ;;  %v2740_v1 = vmul.f32 %v7648_v57, %v2704_v18  ;;  %v2439_v17 = vmul.f32 %v7632_v50, %v2403_v59  ;;  %v2570_v11 = vadd.f32 %v2538_v48, %v2470_v43  ;;  %v1874_v10 = vsel %vm1804_vm2, %v1824_v49, 0.0 }
 0x2df   : > { %11690 = vst [vmem:[#allocation79_spill] sm:$0xff] %v8144_v5  ;;  %2157 = vst.msk [vmem:[#allocation4 + $0xa8] sm:$0xff] %vm2002_vm1, %v1970_v2  ;;  %v2672_v35 = vadd.f32 %v2640_v36, %v2572_v42  ;;  %v2244_v13 = vmul.f32 %v7623_v46, %v8138_v16  ;;  %v1973_v9 = vsel %vm1903_vm3, %v1923_v7, 0.0  ;;  %v8165_v14 = vmul.f32 %v7673_v4, %v2704_v18 }
 0x2e0   : > { %v2838_v33 = vmul.f32 %v7655_v28, %v2203_v0  ;;  %2098 = vst.msk [vmem:[#allocation3 + $0xc0] sm:$0xff] %vm2002_vm1, %v1874_v10  ;;  %2160 = vst.msk [vmem:[#allocation4 + $0xc0] sm:$0xff] %vm2002_vm1, %v1973_v9  ;;  %v1872_v26 = vsel %vm1804_vm2, %v1822_v52, 0.0  ;;  %v1971_v36 = vsel %vm1903_vm3, %v1921_v19, 0.0  ;;  %v2471_v31 = vadd.f32 %v2439_v17, %v2371_v6 }
 0x2e1   : > { %11691 = vst [vmem:[#allocation80_spill] sm:$0xff] %v8165_v14  ;;  %v2738_v49 = vmul.f32 %v7648_v57, %v2403_v59  ;;  %v8176_v7 = vmul.f32 %v7673_v4, %v2403_v59  ;;  %v2444_v43 = vmul.f32 %v7632_v50, %v8154_v22  ;;  %2096 = vst.msk [vmem:[#allocation3 + $0xb0] sm:$0xff] %vm2002_vm1, %v1872_v26  ;;  %v1827_v52 = vrot.slane %v7983_v20, 7 }
 0x2e2   : > { %2158 = vst.msk [vmem:[#allocation4 + $0xb0] sm:$0xff] %vm2002_vm1, %v1971_v36  ;;  %v2670_v0 = vadd.f32 %v2638_v3, %v2570_v11  ;;  %v2870_v42 = vadd.f32 %v2838_v33, %v2769_v27  ;;  %v1926_v18 = vrot.slane %v7983_v20, 1  ;;  %v8184_v19 = vpop.f32.mrb[36].mxu0  ;;  %v2772_v17 = vadd.f32 %v2740_v1, %v2672_v35 }
 0x2e3   : > { %11692 = vst [vmem:[#allocation81_spill] sm:$0xff] %v8176_v7  ;;  %v2376_v6 = vadd.f32 %v2344_v56, %v2244_v13  ;;  %v1634_v8 = vadd.f32 %v7702_v62, %v7930_v12  ;;  %v1645_v59 = vadd.f32 %v7941_v51, %v7702_v62  ;;  %v8190_v48 = vpop.f32.mrb[37].mxu0  ;;  %v1877_v11 = vsel %vm1804_vm2, %v1827_v52, 0.0  ;;  %v2306_v51 = vld [vmem:[#allocation2 + $0xa8] sm:$0xff] }
 0x2e4   : > { %v1976_v3 = vsel %vm1903_vm3, %v1926_v18, 0.0  ;;  %v8198_v20 = vadd.f32 %v7702_v62, %v7950_v15  ;;  %v8202_v1 = vadd.f32 %v7991_v41, %v7702_v62  ;;  %v8204_v12 = vpop.f32.mrb[38].mxu0  ;;  %v2206_v56 = vld [vmem:[#allocation3 + $0xa8] sm:$0xff]  ;;  %2101 = vst.msk [vmem:[#allocation3 + $0xd8] sm:$0xff] %vm2002_vm1, %v1877_v11  ;;  %v2571_v15 = vadd.f32 %v8082_v34, %v2471_v31 }
 0x2e5   : > { %2163 = vst.msk [vmem:[#allocation4 + $0xd8] sm:$0xff] %vm2002_vm1, %v1976_v3  ;;  %v1825_v2 = vrot.slane %v1634_v8, 7  ;;  %v1924_v27 = vrot.slane %v1634_v8, 1  ;;  %2037 = vst.msk [vmem:[#allocation2 + $0xc8] sm:$0xff] %vm2002_vm1, %v1634_v8  ;;  %v1828_v35 = vrot.slane %v1645_v59, 7  ;;  %v1927_v13 = vrot.slane %v1645_v59, 1 }
 0x2e6   : > { %2040 = vst.msk [vmem:[#allocation2 + $0xe0] sm:$0xff] %vm2002_vm1, %v1645_v59  ;;  %v2770_v41 = vadd.f32 %v2738_v49, %v2670_v0  ;;  %v2242_v10 = vmul.f32 %v7623_v46, %v2206_v56  ;;  %v2541_v9 = vmul.f32 %v7640_v24, %v2206_v56  ;;  %2038 = vst.msk [vmem:[#allocation2 + $0xd0] sm:$0xff] %vm2002_vm1, %v8198_v20  ;;  %v2406_v11 = vld [vmem:[#allocation4 + $0xa8] sm:$0xff] }
 0x2e7   : > { %2043 = vst.msk [vmem:[#allocation2 + $0x108] sm:$0xff] %vm2002_vm1, %v8202_v1  ;;  %v1875_v33 = vsel %vm1804_vm2, %v1825_v2, 0.0  ;;  %v1974_v26 = vsel %vm1903_vm3, %v1924_v27, 0.0  ;;  %v1878_v34 = vsel %vm1804_vm2, %v1828_v35, 0.0  ;;  %v1977_v36 = vsel %vm1903_vm3, %v1927_v13, 0.0  ;;  %v2209_v27 = vld [vmem:[#allocation3 + $0xc0] sm:$0xff] }
 0x2e8   : > { %v8227_v31 = vmul.f32 %v7640_v24, %v8138_v16  ;;  %v8231_v49 = vmul.f32 %v7644_v44, %v8116_v58  ;;  %v2342_v0 = vmul.f32 %v7626_v37, %v2306_v51  ;;  %v2573_v52 = vadd.f32 %v2541_v9, %v7797_v63  ;;  %2099 = vst.msk [vmem:[#allocation3 + $0xc8] sm:$0xff] %vm2002_vm1, %v1875_v33  ;;  %v2207_v3 = vld [vmem:[#allocation3 + $0xb0] sm:$0xff]  ;;  %v2309_v35 = vld [vmem:[#allocation2 + $0xc0] sm:$0xff] }
 0x2e9   : > { %2161 = vst.msk [vmem:[#allocation4 + $0xc8] sm:$0xff] %vm2002_vm1, %v1974_v26  ;;  %2102 = vst.msk [vmem:[#allocation3 + $0xe0] sm:$0xff] %vm2002_vm1, %v1878_v34  ;;  %v8240_v18 = vadd.f32 %v8127_v54, %v2870_v42  ;;  %v8244_v8 = vmul.f32 %v7648_v57, %v8154_v22  ;;  %v8248_v59 = vmul.f32 %v7655_v28, %v8138_v16 }
 0x2ea   : > { %2164 = vst.msk [vmem:[#allocation4 + $0xe0] sm:$0xff] %vm2002_vm1, %v1977_v36  ;;  %v8252_v63 = vmul.f32 %v7663_v61, %v8116_v58  ;;  %v8255_v56 = vadd.f32 %v7783_v23, %v2772_v17  ;;  %v2476_v2 = vadd.f32 %v2444_v43, %v2376_v6  ;;  %v2374_v54 = vadd.f32 %v2342_v0, %v2242_v10  ;;  %v2307_v43 = vld [vmem:[#allocation2 + $0xb0] sm:$0xff]  ;;  %v8272_v17 = vpop.f32.mrb[39].mxu0 }
 0x2eb   : > { %11693 = vst [vmem:[#allocation82_spill] sm:$0xff] %v8240_v18  ;;  %11694 = vst [vmem:[#allocation83_spill] sm:$0xff] %v8244_v8  ;;  %v2641_v42 = vmul.f32 %v7644_v44, %v2306_v51  ;;  %v8259_v13 = vadd.f32 %v8061_v29, %v2571_v15  ;;  %v8262_v16 = vadd.f32 %v8095_v53, %v2770_v41 }
 0x2ec   : > { %11695 = vst [vmem:[#allocation84_spill] sm:$0xff] %v8252_v63  ;;  %11696 = vst [vmem:[#allocation85_spill] sm:$0xff] %v8255_v56  ;;  %v8266_v9 = vmul.f32 %v7673_v4, %v8154_v22  ;;  %v8270_v23 = vmul.f32 %v7690_v39, %v8116_v58  ;;  %v2442_v6 = vmul.f32 %v7632_v50, %v2406_v11 }
 0x2ed   : > { %11697 = vst [vmem:[#allocation86_spill] sm:$0xff] %v8259_v13  ;;  %11698 = vst [vmem:[#allocation87_spill] sm:$0xff] %v8262_v16  ;;  %v2673_v10 = vadd.f32 %v2641_v42, %v2573_v52  ;;  %v8276_v29 = vmul.f32 %v7690_v39, %v2306_v51  ;;  %v2243_v53 = vmul.f32 %v7623_v46, %v2207_v3  ;;  %v2312_v51 = vld [vmem:[#allocation2 + $0xd8] sm:$0xff]  ;;  %v2407_v42 = vld [vmem:[#allocation4 + $0xb0] sm:$0xff] }
 0x2ee   : > { %11699 = vst [vmem:[#allocation88_spill] sm:$0xff] %v8266_v9  ;;  %11700 = vst [vmem:[#allocation89_spill] sm:$0xff] %v8270_v23  ;;  %v2245_v15 = vmul.f32 %v7623_v46, %v2209_v27  ;;  %v2345_v22 = vmul.f32 %v7626_v37, %v2309_v35  ;;  %v2544_v41 = vmul.f32 %v7640_v24, %v2209_v27  ;;  %v2409_v16 = vld [vmem:[#allocation4 + $0xc0] sm:$0xff] }
 0x2ef   : > { %11701 = vst [vmem:[#allocation90_spill] sm:$0xff] %v8276_v29  ;;  %v2644_v58 = vmul.f32 %v7644_v44, %v2309_v35  ;;  %v2474_v33 = vadd.f32 %v2442_v6, %v2374_v54  ;;  %v2741_v26 = vmul.f32 %v7648_v57, %v2406_v11  ;;  %v8285_v34 = vmul.f32 %v7663_v61, %v2309_v35  ;;  %v2210_v14 = vld [vmem:[#allocation3 + $0xc8] sm:$0xff] }
 0x2f0   : > { %v2343_v36 = vmul.f32 %v7626_v37, %v2307_v43  ;;  %v2576_v0 = vadd.f32 %v2544_v41, %v2476_v2  ;;  %v8289_v52 = vmul.f32 %v7690_v39, %v2309_v35  ;;  %v2642_v9 = vmul.f32 %v7644_v44, %v2307_v43 }
 0x2f1   : > { %11702 = vst [vmem:[#allocation91_spill] sm:$0xff] %v8285_v34  ;;  %v2943_v63 = vmul.f32 %v7663_v61, %v2307_v43  ;;  %v2773_v8 = vadd.f32 %v2741_v26, %v2673_v10  ;;  %v2542_v11 = vmul.f32 %v7640_v24, %v2207_v3  ;;  %v8295_v6 = vmul.f32 %v7690_v39, %v2307_v43  ;;  %v2212_v34 = vld [vmem:[#allocation3 + $0xd8] sm:$0xff]  ;;  %v8309_v43 = vld [vmem:[#allocation2 + $0xc8] sm:$0xff] }
 0x2f2   : > { %11703 = vst [vmem:[#allocation92_spill] sm:$0xff] %v8289_v52  ;;  %v2375_v54 = vadd.f32 %v2343_v36, %v2243_v53  ;;  %v2377_v13 = vadd.f32 %v2345_v22, %v2245_v15  ;;  %v2348_v2 = vmul.f32 %v7626_v37, %v2312_v51  ;;  %v8299_v35 = vmul.f32 %v7644_v44, %v2312_v51  ;;  %v2412_v52 = vld [vmem:[#allocation4 + $0xd8] sm:$0xff] }
 0x2f3   : > { %11704 = vst [vmem:[#allocation93_spill] sm:$0xff] %v8295_v6  ;;  %v8302_v41 = vmul.f32 %v7663_v61, %v2312_v51  ;;  %v2443_v10 = vmul.f32 %v7632_v50, %v2407_v42  ;;  %v2574_v26 = vadd.f32 %v2542_v11, %v2474_v33  ;;  %v2842_v53 = vmul.f32 %v7655_v28, %v2207_v3 }
 0x2f4   : > { %v8307_v36 = vmul.f32 %v7690_v39, %v2312_v51  ;;  %v2445_v15 = vmul.f32 %v7632_v50, %v2409_v16  ;;  %v2676_v22 = vadd.f32 %v2644_v58, %v2576_v0  ;;  %v2248_v56 = vmul.f32 %v7623_v46, %v2212_v34 }
 0x2f5   : > { %11705 = vst [vmem:[#allocation94_spill] sm:$0xff] %v8302_v41  ;;  %v2246_v7 = vmul.f32 %v7623_v46, %v2210_v14  ;;  %v2744_v41 = vmul.f32 %v7648_v57, %v2409_v16  ;;  %v8316_v18 = vmul.f32 %v7655_v28, %v2209_v27  ;;  %v2475_v33 = vadd.f32 %v2443_v10, %v2375_v54 }
 0x2f6   : > { %11706 = vst [vmem:[#allocation95_spill] sm:$0xff] %v8307_v36  ;;  %v2874_v3 = vadd.f32 %v2842_v53, %v2773_v8  ;;  %v8318_v11 = vadd.f32 %v2445_v15, %v2377_v13  ;;  %v8321_v51 = vmul.f32 %v7673_v4, %v2409_v16  ;;  %v2742_v36 = vmul.f32 %v7648_v57, %v2407_v42  ;;  %v8333_v8 = vld [vmem:[#allocation4 + $0xc8] sm:$0xff] }
 0x2f7   : > { %11707 = vst [vmem:[#allocation96_spill] sm:$0xff] %v8316_v18  ;;  %v2346_v58 = vmul.f32 %v7626_v37, %v8309_v43  ;;  %v2674_v0 = vadd.f32 %v2642_v9, %v2574_v26  ;;  %v8327_v29 = vmul.f32 %v7673_v4, %v2407_v42  ;;  %v2448_v6 = vmul.f32 %v7632_v50, %v2412_v52 }
 0x2f8   : > { %11708 = vst [vmem:[#allocation97_spill] sm:$0xff] %v8321_v51  ;;  %v8331_v27 = vmul.f32 %v7640_v24, %v2212_v34  ;;  %v8335_v13 = vadd.f32 %v2744_v41, %v2676_v22  ;;  %v2380_v16 = vadd.f32 %v2348_v2, %v2248_v56  ;;  %v1826_v10 = vrot.slane %v8198_v20, 7 }
 0x2f9   : > { %11709 = vst [vmem:[#allocation98_spill] sm:$0xff] %v8327_v29  ;;  %v2378_v54 = vadd.f32 %v2346_v58, %v2246_v7  ;;  %v8339_v53 = vadd.f32 %v8227_v31, %v2475_v33  ;;  %v8341_v9 = vadd.f32 %v2943_v63, %v2874_v3  ;;  %v8344_v42 = vmul.f32 %v7648_v57, %v2412_v52 }
 0x2fa   : > { %v1925_v26 = vrot.slane %v8198_v20, 1  ;;  %v8348_v15 = vmul.f32 %v7655_v28, %v2212_v34  ;;  %v8351_v41 = vmul.f32 %v7673_v4, %v2412_v52  ;;  %v2446_v7 = vmul.f32 %v7632_v50, %v8333_v8 }
 0x2fb   : > { %11710 = vst [vmem:[#allocation99_spill] sm:$0xff] %v8341_v9  ;;  %11711 = vst [vmem:[#allocation100_spill] sm:$0xff] %v8344_v42  ;;  %v1876_v31 = vsel %vm1804_vm2, %v1826_v10, 0.0  ;;  %v2774_v56 = vadd.f32 %v2742_v36, %v2674_v0  ;;  %v1831_v20 = vrot.slane %v8202_v1, 7  ;;  %v1930_v34 = vrot.slane %v8202_v1, 1 }
 0x2fc   : > { %11712 = vst [vmem:[#allocation101_spill] sm:$0xff] %v8351_v41  ;;  %v1975_v63 = vsel %vm1903_vm3, %v1925_v26, 0.0  ;;  %2100 = vst.msk [vmem:[#allocation3 + $0xd0] sm:$0xff] %vm2002_vm1, %v1876_v31  ;;  %v2480_v2 = vadd.f32 %v2448_v6, %v2380_v16  ;;  %v2478_v22 = vadd.f32 %v2446_v7, %v2378_v54  ;;  %v2545_v52 = vmul.f32 %v7640_v24, %v2210_v14 }
 0x2fd   : > { %v2845_v33 = vmul.f32 %v7655_v28, %v2210_v14  ;;  %2162 = vst.msk [vmem:[#allocation4 + $0xd0] sm:$0xff] %vm2002_vm1, %v1975_v63  ;;  %v1881_v36 = vsel %vm1804_vm2, %v1831_v20, 0.0  ;;  %v1980_v3 = vsel %vm1903_vm3, %v1930_v34, 0.0  ;;  %v1650_v58 = vadd.f32 %v7702_v62, %v8004_v40  ;;  %v2311_v34 = vld [vmem:[#allocation2 + $0xd0] sm:$0xff] }
 0x2fe   : > { %v1661_v1 = vadd.f32 %v8015_v47, %v7702_v62  ;;  %2105 = vst.msk [vmem:[#allocation3 + $0x108] sm:$0xff] %vm2002_vm1, %v1881_v36  ;;  %2167 = vst.msk [vmem:[#allocation4 + $0x108] sm:$0xff] %vm2002_vm1, %v1980_v3  ;;  %v1653_v14 = vadd.f32 %v7702_v62, %v8031_v21  ;;  %v1674_v6 = vadd.f32 %v8070_v25, %v7702_v62  ;;  %v2512_v21 = vld [vmem:[#allocation3 + $0xe0] sm:$0xff] }
 0x2ff   : > { %v8381_v0 = vadd.f32 %v7702_v62, %v8077_v60  ;;  %v8385_v40 = vadd.f32 %v8088_v45, %v7702_v62  ;;  %v1829_v16 = vrot.slane %v1650_v58, 7  ;;  %v1928_v47 = vrot.slane %v1650_v58, 1  ;;  %2041 = vst.msk [vmem:[#allocation2 + $0xf8] sm:$0xff] %vm2002_vm1, %v1650_v58 }
 0x300   : > { %v1832_v54 = vrot.slane %v1661_v1, 7  ;;  %v1931_v10 = vrot.slane %v1661_v1, 1  ;;  %2044 = vst.msk [vmem:[#allocation2 + $0x110] sm:$0xff] %vm2002_vm1, %v1661_v1  ;;  %v1830_v26 = vrot.slane %v1653_v14, 7  ;;  %v1929_v7 = vrot.slane %v1653_v14, 1  ;;  %2042 = vst.msk [vmem:[#allocation2 + $0x100] sm:$0xff] %vm2002_vm1, %v1653_v14 }
 0x301   : > { %v1835_v25 = vrot.slane %v1674_v6, 7  ;;  %v1934_v60 = vrot.slane %v1674_v6, 1  ;;  %2047 = vst.msk [vmem:[#allocation2 + $0x128] sm:$0xff] %vm2002_vm1, %v1674_v6  ;;  %2045 = vst.msk [vmem:[#allocation2 + $0x118] sm:$0xff] %vm2002_vm1, %v8381_v0  ;;  %v1879_v62 = vsel %vm1804_vm2, %v1829_v16, 0.0  ;;  %v1978_v45 = vsel %vm1903_vm3, %v1928_v47, 0.0 }
 0x302   : > { %2048 = vst.msk [vmem:[#allocation2 + $0x130] sm:$0xff] %vm2002_vm1, %v8385_v40  ;;  %v1882_v31 = vsel %vm1804_vm2, %v1832_v54, 0.0  ;;  %v1981_v63 = vsel %vm1903_vm3, %v1931_v10, 0.0  ;;  %2103 = vst.msk [vmem:[#allocation3 + $0xf8] sm:$0xff] %vm2002_vm1, %v1879_v62  ;;  %v1880_v36 = vsel %vm1804_vm2, %v1830_v26, 0.0  ;;  %v1979_v3 = vsel %vm1903_vm3, %v1929_v7, 0.0 }
 0x303   : > { %v8403_v20 = vld [vmem:[#allocation3 + $0xd0] sm:$0xff]  ;;  %2165 = vst.msk [vmem:[#allocation4 + $0xf8] sm:$0xff] %vm2002_vm1, %v1978_v45  ;;  %2106 = vst.msk [vmem:[#allocation3 + $0x110] sm:$0xff] %vm2002_vm1, %v1882_v31  ;;  %v1885_v58 = vsel %vm1804_vm2, %v1835_v25, 0.0  ;;  %v1984_v1 = vsel %vm1903_vm3, %v1934_v60, 0.0  ;;  %v2577_v14 = vadd.f32 %v2545_v52, %v8318_v11  ;;  %v2548_v6 = vmul.f32 %v7640_v24, %v2512_v21  ;;  %v2612_v26 = vld [vmem:[#allocation2 + $0xe0] sm:$0xff] }
 0x304   : > { %2168 = vst.msk [vmem:[#allocation4 + $0x110] sm:$0xff] %vm2002_vm1, %v1981_v63  ;;  %v2546_v16 = vmul.f32 %v7640_v24, %v8403_v20  ;;  %2104 = vst.msk [vmem:[#allocation3 + $0x100] sm:$0xff] %vm2002_vm1, %v1880_v36  ;;  %v1833_v47 = vrot.slane %v8381_v0, 7  ;;  %v8428_v54 = vadd.f32 %v8231_v49, %v8339_v53  ;;  %v8431_v11 = vadd.f32 %v8248_v59, %v2774_v56  ;;  %v2712_v25 = vld [vmem:[#allocation4 + $0xe0] sm:$0xff]  ;;  %v2316_v31 = vld [vmem:[#allocation2 + $0x108] sm:$0xff] }
 0x305   : > { %2166 = vst.msk [vmem:[#allocation4 + $0x100] sm:$0xff] %vm2002_vm1, %v1979_v3  ;;  %2109 = vst.msk [vmem:[#allocation3 + $0x128] sm:$0xff] %vm2002_vm1, %v1885_v58  ;;  %v2645_v52 = vmul.f32 %v7644_v44, %v8309_v43  ;;  %v2877_v10 = vadd.f32 %v2845_v33, %v8335_v13  ;;  %v2580_v7 = vadd.f32 %v2548_v6, %v2480_v2  ;;  %v8437_v45 = vld [vmem:[#allocation3 + $0x108] sm:$0xff] }
 0x306   : > { %2171 = vst.msk [vmem:[#allocation4 + $0x128] sm:$0xff] %vm2002_vm1, %v1984_v1  ;;  %11713 = vst [vmem:[#allocation102_spill] sm:$0xff] %v8428_v54  ;;  %v2578_v60 = vadd.f32 %v2546_v16, %v2478_v22  ;;  %v2646_v62 = vmul.f32 %v7644_v44, %v2311_v34  ;;  %v1883_v49 = vsel %vm1804_vm2, %v1833_v47, 0.0  ;;  %v2745_v59 = vmul.f32 %v7648_v57, %v8333_v8  ;;  %v8455_v36 = vld [vmem:[#allocation2 + $0xf8] sm:$0xff] }
 0x307   : > { %11714 = vst [vmem:[#allocation103_spill] sm:$0xff] %v8431_v11  ;;  %v2946_v53 = vmul.f32 %v7663_v61, %v8309_v43  ;;  %v2247_v13 = vmul.f32 %v7623_v46, %v8403_v20  ;;  %v2252_v56 = vmul.f32 %v7623_v46, %v8437_v45  ;;  %2107 = vst.msk [vmem:[#allocation3 + $0x118] sm:$0xff] %vm2002_vm1, %v1883_v49 }
 0x308   : > { %v2677_v2 = vadd.f32 %v2645_v52, %v2577_v14  ;;  %v8452_v22 = vmul.f32 %v7673_v4, %v8333_v8  ;;  %v2648_v33 = vmul.f32 %v7644_v44, %v2612_v26  ;;  %v2678_v63 = vadd.f32 %v2646_v62, %v2578_v60  ;;  %v2411_v52 = vld [vmem:[#allocation4 + $0xd0] sm:$0xff]  ;;  %v2416_v60 = vld [vmem:[#allocation4 + $0x108] sm:$0xff] }
 0x309   : > { %v8459_v3 = vmul.f32 %v7690_v39, %v8309_v43  ;;  %v2748_v58 = vmul.f32 %v7648_v57, %v2712_v25  ;;  %v2347_v1 = vmul.f32 %v7626_v37, %v2311_v34  ;;  %v2352_v6 = vmul.f32 %v7626_v37, %v2316_v31  ;;  %v2214_v62 = vld [vmem:[#allocation3 + $0xf8] sm:$0xff] }
 0x30a   : > { %11715 = vst [vmem:[#allocation104_spill] sm:$0xff] %v8452_v22  ;;  %v8464_v14 = vadd.f32 %v2946_v53, %v2877_v10  ;;  %v2680_v16 = vadd.f32 %v2648_v33, %v2580_v7  ;;  %v8467_v8 = vmul.f32 %v7655_v28, %v2512_v21  ;;  %v8470_v47 = vmul.f32 %v7663_v61, %v2612_v26  ;;  %v2414_v11 = vld [vmem:[#allocation4 + $0xf8] sm:$0xff] }
 0x30b   : > { %11716 = vst [vmem:[#allocation105_spill] sm:$0xff] %v8459_v3  ;;  %v2379_v43 = vadd.f32 %v2347_v1, %v2247_v13  ;;  %v2384_v49 = vadd.f32 %v2352_v6, %v2252_v56  ;;  %v2250_v41 = vmul.f32 %v7623_v46, %v2214_v62  ;;  %v2350_v42 = vmul.f32 %v7626_v37, %v8455_v36  ;;  %v2217_v6 = vld [vmem:[#allocation3 + $0x110] sm:$0xff] }
 0x30c   : > { %11717 = vst [vmem:[#allocation106_spill] sm:$0xff] %v8464_v14  ;;  %11718 = vst [vmem:[#allocation107_spill] sm:$0xff] %v8467_v8  ;;  %v2777_v10 = vadd.f32 %v2745_v59, %v2677_v2  ;;  %v8476_v7 = vmul.f32 %v7673_v4, %v2712_v25  ;;  %v2947_v21 = vmul.f32 %v7663_v61, %v2311_v34  ;;  %v2317_v8 = vld [vmem:[#allocation2 + $0x110] sm:$0xff]  ;;  %v8759_v14 = vld [vmem:[#allocation4 + $0xa8] sm:$0xff] }
 0x30d   : > { %11719 = vst [vmem:[#allocation108_spill] sm:$0xff] %v8470_v47  ;;  %v2549_v26 = vmul.f32 %v7640_v24, %v2214_v62  ;;  %v2447_v53 = vmul.f32 %v7632_v50, %v2411_v52  ;;  %v8482_v33 = vmul.f32 %v7690_v39, %v2311_v34  ;;  %v2452_v13 = vmul.f32 %v7632_v50, %v2416_v60 }
 0x30e   : > { %11720 = vst [vmem:[#allocation109_spill] sm:$0xff] %v8476_v7  ;;  %v2382_v56 = vadd.f32 %v2350_v42, %v2250_v41  ;;  %v8485_v1 = vadd.f32 %v2748_v58, %v2680_v16  ;;  %v2846_v59 = vmul.f32 %v7655_v28, %v8403_v20  ;;  %v8490_v25 = vmul.f32 %v7644_v44, %v2316_v31  ;;  %v2215_v42 = vld [vmem:[#allocation3 + $0x100] sm:$0xff] }
 0x30f   : > { %11721 = vst [vmem:[#allocation110_spill] sm:$0xff] %v8482_v33  ;;  %v2450_v2 = vmul.f32 %v7632_v50, %v2414_v11  ;;  %v2479_v62 = vadd.f32 %v2447_v53, %v2379_v43  ;;  %v2484_v7 = vadd.f32 %v2452_v13, %v2384_v49  ;;  %v8494_v47 = vmul.f32 %v7663_v61, %v2316_v31  ;;  %v2315_v53 = vld [vmem:[#allocation2 + $0x100] sm:$0xff]  ;;  %v8794_v33 = vld [vmem:[#allocation4 + $0x70] sm:$0xff] }
 0x310   : > { %11722 = vst [vmem:[#allocation111_spill] sm:$0xff] %v8485_v1  ;;  %v8497_v34 = vmul.f32 %v7690_v39, %v2316_v31  ;;  %v2746_v41 = vmul.f32 %v7648_v57, %v2411_v52  ;;  %v2878_v58 = vadd.f32 %v2846_v59, %v2777_v10  ;;  %v2581_v20 = vadd.f32 %v2549_v26, %v7806_v38 }
 0x311   : > { %11723 = vst [vmem:[#allocation112_spill] sm:$0xff] %v8494_v47  ;;  %v2482_v16 = vadd.f32 %v2450_v2, %v2382_v56  ;;  %v8502_v1 = vmul.f32 %v7673_v4, %v2411_v52  ;;  %v2253_v43 = vmul.f32 %v7623_v46, %v2217_v6  ;;  %v2552_v49 = vmul.f32 %v7640_v24, %v2217_v6 }
 0x312   : > { %11724 = vst [vmem:[#allocation113_spill] sm:$0xff] %v8497_v34  ;;  %v1932_v13 = vrot.slane %v8381_v0, 1  ;;  %v8509_v31 = vmul.f32 %v7640_v24, %v8437_v45  ;;  %v8512_v10 = vmul.f32 %v7648_v57, %v2416_v60  ;;  %v2649_v38 = vmul.f32 %v7644_v44, %v8455_v36 }
 0x313   : > { %11725 = vst [vmem:[#allocation114_spill] sm:$0xff] %v8502_v1  ;;  %v2550_v52 = vmul.f32 %v7640_v24, %v2215_v42  ;;  %v2579_v26 = vadd.f32 %v8331_v27, %v2479_v62  ;;  %v2778_v56 = vadd.f32 %v2746_v41, %v2678_v63  ;;  %v2353_v59 = vmul.f32 %v7626_v37, %v2317_v8  ;;  %v2417_v1 = vld [vmem:[#allocation4 + $0x110] sm:$0xff] }
 0x314   : > { %11726 = vst [vmem:[#allocation115_spill] sm:$0xff] %v8512_v10  ;;  %v2584_v2 = vadd.f32 %v2552_v49, %v2484_v7  ;;  %v8519_v47 = vadd.f32 %v2947_v21, %v2878_v58  ;;  %v2681_v0 = vadd.f32 %v2649_v38, %v2581_v20  ;;  %v2650_v18 = vmul.f32 %v7644_v44, %v2315_v53 }
 0x315   : > { %v2582_v51 = vadd.f32 %v2550_v52, %v2482_v16  ;;  %v8524_v10 = vmul.f32 %v7655_v28, %v8437_v45  ;;  %v8527_v54 = vmul.f32 %v7673_v4, %v2416_v60  ;;  %v2385_v34 = vadd.f32 %v2353_v59, %v2253_v43  ;;  %v2415_v16 = vld [vmem:[#allocation4 + $0x100] sm:$0xff] }
 0x316   : > { %11727 = vst [vmem:[#allocation116_spill] sm:$0xff] %v8519_v47  ;;  %v2652_v27 = vmul.f32 %v7644_v44, %v2317_v8  ;;  %v2749_v63 = vmul.f32 %v7648_v57, %v2414_v11  ;;  %v8533_v7 = vmul.f32 %v7690_v39, %v8455_v36  ;;  %v2251_v21 = vmul.f32 %v7623_v46, %v2215_v42 }
 0x317   : > { %11728 = vst [vmem:[#allocation117_spill] sm:$0xff] %v8527_v54  ;;  %v8536_v62 = vadd.f32 %v2650_v18, %v2582_v51  ;;  %v8539_v41 = vadd.f32 %v8299_v35, %v2579_v26  ;;  %v8542_v45 = vadd.f32 %v8348_v15, %v2778_v56  ;;  %v2453_v60 = vmul.f32 %v7632_v50, %v2417_v1  ;;  %v8574_v56 = vld [vmem:[#allocation2 + $0x128] sm:$0xff] }
 0x318   : > { %11729 = vst [vmem:[#allocation118_spill] sm:$0xff] %v8533_v7  ;;  %v2684_v58 = vadd.f32 %v2652_v27, %v2584_v2  ;;  %v2781_v20 = vadd.f32 %v2749_v63, %v2681_v0  ;;  %v2752_v11 = vmul.f32 %v7648_v57, %v2417_v1  ;;  %v2351_v36 = vmul.f32 %v7626_v37, %v2315_v53 }
 0x319   : > { %11730 = vst [vmem:[#allocation119_spill] sm:$0xff] %v8539_v41  ;;  %11731 = vst [vmem:[#allocation120_spill] sm:$0xff] %v8542_v45  ;;  %v1982_v43 = vsel %vm1903_vm3, %v1932_v13, 0.0  ;;  %v8549_v18 = vadd.f32 %v2453_v60, %v2385_v34  ;;  %v8552_v35 = vmul.f32 %v7655_v28, %v2217_v6  ;;  %v8555_v51 = vmul.f32 %v7663_v61, %v2317_v8  ;;  %v8566_v13 = vld [vmem:[#allocation3 + $0x128] sm:$0xff]  ;;  %v11738_v60 = vld [vmem:[#allocation71_spill] sm:$0xff] }
 0x31a   : > { %v8558_v15 = vmul.f32 %v7673_v4, %v2417_v1  ;;  %2169 = vst.msk [vmem:[#allocation4 + $0x118] sm:$0xff] %vm2002_vm1, %v1982_v43  ;;  %v8562_v49 = vmul.f32 %v7690_v39, %v2317_v8  ;;  %v2383_v38 = vadd.f32 %v2351_v36, %v2251_v21  ;;  %v2451_v52 = vmul.f32 %v7632_v50, %v2415_v16  ;;  %v8591_v21 = vld [vmem:[%s11365_s6] ss:$0 sm:$0xff]  ;;  %v2420_v36 = vld [vmem:[#allocation4 + $0x128] sm:$0xff]  ;;  %v2218_v43 = vld [vmem:[#allocation3 + $0x118] sm:$0xff] }
 0x31b   : > { %11732 = vst [vmem:[#allocation121_spill] sm:$0xff] %v8552_v35  ;;  %11733 = vst [vmem:[#allocation122_spill] sm:$0xff] %v8555_v51  ;;  %v2850_v34 = vmul.f32 %v7655_v28, %v2215_v42  ;;  %v8568_v6 = vadd.f32 %v2752_v11, %v2684_v58  ;;  %v8571_v26 = vmul.f32 %v7648_v57, %v2415_v16  ;;  %v1836_v59 = vrot.slane %v8385_v40, 7 }
 0x31c   : > { %11734 = vst [vmem:[#allocation123_spill] sm:$0xff] %v8558_v15  ;;  %11735 = vst [vmem:[#allocation124_spill] sm:$0xff] %v8562_v49  ;;  %v2951_v1 = vmul.f32 %v7663_v61, %v2315_v53  ;;  %v8578_v2 = vmul.f32 %v7673_v4, %v2415_v16  ;;  %v8581_v0 = vmul.f32 %v7690_v39, %v2315_v53  ;;  %v1935_v42 = vrot.slane %v8385_v40, 1  ;;  %v11739_v16 = vld [vmem:[#allocation75_spill] sm:$0xff] }
 0x31d   : > { %v2882_v8 = vadd.f32 %v2850_v34, %v2781_v20  ;;  %v2256_v27 = vmul.f32 %v7623_v46, %v8566_v13  ;;  %v1886_v63 = vsel %vm1804_vm2, %v1836_v59, 0.0  ;;  %v1669_v58 = vadd.f32 %v8591_v21, %v11738_v60  ;;  %v3396_v20 = vld [vmem:[#allocation3 + $0x58] sm:$0xff]  ;;  %v11740_v59 = vld [vmem:[#allocation76_spill] sm:$0xff] }
 0x31e   : > { %11736 = vst [vmem:[#allocation125_spill] sm:$0xff] %v8578_v2  ;;  %11737 = vst [vmem:[#allocation126_spill] sm:$0xff] %v8581_v0  ;;  %v1690_v53 = vadd.f32 %v8591_v21, %v11739_v16  ;;  %v2483_v11 = vadd.f32 %v2451_v52, %v2383_v38  ;;  %v2356_v40 = vmul.f32 %v7626_v37, %v8574_v56  ;;  %v1985_v34 = vsel %vm1903_vm3, %v1935_v42, 0.0  ;;  %v3497_v2 = vld [vmem:[#allocation2 + $0x58] sm:$0xff]  ;;  %v11773_v0 = vld [vmem:[#allocation41_spill] sm:$0xff] }
 0x31f   : > { %2110 = vst.msk [vmem:[#allocation3 + $0x130] sm:$0xff] %vm2002_vm1, %v1886_v63  ;;  %v1682_v54 = vadd.f32 %v8591_v21, %v11740_v59  ;;  %2172 = vst.msk [vmem:[#allocation4 + $0x130] sm:$0xff] %vm2002_vm1, %v1985_v34  ;;  %v1834_v60 = vrot.slane %v1669_v58, 7  ;;  %v1933_v15 = vrot.slane %v1669_v58, 1  ;;  %v1693_v42 = vadd.f32 %v8591_v21, %v8142_v32  ;;  %v11741_v63 = vld [vmem:[#allocation32_spill] sm:$0xff] }
 0x320   : > { %2046 = vst.msk [vmem:[#allocation2 + $0x120] sm:$0xff] %vm2002_vm1, %v1669_v58  ;;  %v1839_v38 = vrot.slane %v1690_v53, 7  ;;  %v1938_v52 = vrot.slane %v1690_v53, 1  ;;  %2051 = vst.msk [vmem:[#allocation2 + $0x158] sm:$0xff] %vm2002_vm1, %v1690_v53  ;;  %v3432_v35 = vmul.f32 %v11741_v63, %v3396_v20  ;;  %v2456_v59 = vmul.f32 %v7632_v50, %v2420_v36 }
 0x321   : > { %v1837_v16 = vrot.slane %v1682_v54, 7  ;;  %v1936_v51 = vrot.slane %v1682_v54, 1  ;;  %2049 = vst.msk [vmem:[#allocation2 + $0x148] sm:$0xff] %vm2002_vm1, %v1682_v54  ;;  %v8614_v34 = vmul.f32 %v7640_v24, %v8566_v13  ;;  %v2553_v58 = vmul.f32 %v7640_v24, %v2218_v43  ;;  %2052 = vst.msk [vmem:[#allocation2 + $0x160] sm:$0xff] %vm2002_vm1, %v1693_v42 }
 0x322   : > { %v1884_v53 = vsel %vm1804_vm2, %v1834_v60, 0.0  ;;  %v1983_v54 = vsel %vm1903_vm3, %v1933_v15, 0.0  ;;  %v1889_v32 = vsel %vm1804_vm2, %v1839_v38, 0.0  ;;  %v1988_v20 = vsel %vm1903_vm3, %v1938_v52, 0.0  ;;  %v2318_v52 = vld [vmem:[#allocation2 + $0x118] sm:$0xff] }
 0x323   : > { %2108 = vst.msk [vmem:[#allocation3 + $0x120] sm:$0xff] %vm2002_vm1, %v1884_v53  ;;  %v1887_v45 = vsel %vm1804_vm2, %v1837_v16, 0.0  ;;  %v8629_v41 = vadd.f32 %v2951_v1, %v2882_v8  ;;  %v8633_v60 = vmul.f32 %v7644_v44, %v8574_v56  ;;  %2170 = vst.msk [vmem:[#allocation4 + $0x120] sm:$0xff] %vm2002_vm1, %v1983_v54  ;;  %v1986_v15 = vsel %vm1903_vm3, %v1936_v51, 0.0  ;;  %v11744_v16 = vld [vmem:[#allocation33_spill] sm:$0xff] }
 0x324   : > { %2113 = vst.msk [vmem:[#allocation3 + $0x158] sm:$0xff] %vm2002_vm1, %v1889_v32  ;;  %2175 = vst.msk [vmem:[#allocation4 + $0x158] sm:$0xff] %vm2002_vm1, %v1988_v20  ;;  %v1840_v38 = vrot.slane %v1693_v42, 7  ;;  %v2853_v1 = vmul.f32 %v7655_v28, %v2218_v43  ;;  %v1939_v8 = vrot.slane %v1693_v42, 1  ;;  %v3464_v53 = vadd.f32 %v3432_v35, %v11744_v16 }
 0x325   : > { %11742 = vst [vmem:[#allocation71_spill] sm:$0xff] %v8629_v41  ;;  %11743 = vst [vmem:[#allocation75_spill] sm:$0xff] %v8633_v60  ;;  %v11745_v60 = vld [vmem:[#allocation34_spill] sm:$0xff]  ;;  %v8645_v41 = vld [vmem:[#allocation4 + $0x58] sm:$0xff]  ;;  %v2583_v32 = vadd.f32 %v8509_v31, %v2483_v11  ;;  %v2254_v20 = vmul.f32 %v7623_v46, %v2218_v43  ;;  %v2585_v51 = vadd.f32 %v2553_v58, %v8549_v18 }
 0x326   : > { %2111 = vst.msk [vmem:[#allocation3 + $0x148] sm:$0xff] %vm2002_vm1, %v1887_v45  ;;  %2173 = vst.msk [vmem:[#allocation4 + $0x148] sm:$0xff] %vm2002_vm1, %v1986_v15  ;;  %v3533_v54 = vmul.f32 %v11745_v60, %v3497_v2  ;;  %v1890_v45 = vsel %vm1804_vm2, %v1840_v38, 0.0  ;;  %v2782_v49 = vadd.f32 %v8571_v26, %v8536_v62  ;;  %v2388_v15 = vadd.f32 %v2356_v40, %v2256_v27  ;;  %v11748_v11 = vld [vmem:[#allocation36_spill] sm:$0xff]  ;;  %v2418_v40 = vld [vmem:[#allocation4 + $0x118] sm:$0xff] }
 0x327   : > { %11746 = vst [vmem:[#allocation76_spill] sm:$0xff] %v8645_v41  ;;  %v1989_v35 = vsel %vm1903_vm3, %v1939_v8, 0.0  ;;  %2114 = vst.msk [vmem:[#allocation3 + $0x160] sm:$0xff] %vm2002_vm1, %v1890_v45  ;;  %v8658_v42 = vmul.f32 %v7648_v57, %v2420_v36  ;;  %v2354_v31 = vmul.f32 %v7626_v37, %v2318_v52  ;;  %v2653_v18 = vmul.f32 %v7644_v44, %v2318_v52  ;;  %v2620_v58 = vld [vmem:[#allocation2 + $0x130] sm:$0xff]  ;;  %v8678_v38 = vld [vmem:[#allocation3 + $0x60] sm:$0xff] }
 0x328   : > { %v3565_v2 = vadd.f32 %v3533_v54, %v3464_v53  ;;  %2176 = vst.msk [vmem:[#allocation4 + $0x160] sm:$0xff] %vm2002_vm1, %v1989_v35  ;;  %v3634_v43 = vmul.f32 %v11748_v11, %v8645_v41  ;;  %v8667_v62 = vmul.f32 %v7655_v28, %v8566_v13  ;;  %v8671_v26 = vmul.f32 %v7663_v61, %v8574_v56  ;;  %v2520_v53 = vld [vmem:[#allocation3 + $0x130] sm:$0xff] }
 0x329   : > { %11747 = vst [vmem:[#allocation32_spill] sm:$0xff] %v8658_v42  ;;  %v8675_v27 = vmul.f32 %v7690_v39, %v8574_v56  ;;  %v2885_v36 = vadd.f32 %v2853_v1, %v8568_v6  ;;  %11752 = vst [vmem:[#allocation127_spill] sm:$0xff] %v8678_v38  ;;  %v8681_v8 = vadd.f32 %v8490_v25, %v2583_v32  ;;  %v8690_v6 = vld [vmem:[#allocation2 + $0x60] sm:$0xff]  ;;  %v11761_v42 = vld [vmem:[#allocation35_spill] sm:$0xff] }
 0x32a   : > { %11749 = vst [vmem:[#allocation33_spill] sm:$0xff] %v8667_v62  ;;  %11750 = vst [vmem:[#allocation34_spill] sm:$0xff] %v8671_v26  ;;  %v2386_v16 = vadd.f32 %v2354_v31, %v2254_v20  ;;  %v2685_v13 = vadd.f32 %v2653_v18, %v2585_v51  ;;  %v3666_v54 = vadd.f32 %v3634_v43, %v3565_v2  ;;  %v2720_v20 = vld [vmem:[#allocation4 + $0x130] sm:$0xff]  ;;  %v11757_v51 = vld [vmem:[#allocation37_spill] sm:$0xff] }
 0x32b   : > { %11751 = vst [vmem:[#allocation36_spill] sm:$0xff] %v8675_v27  ;;  %11753 = vst [vmem:[#allocation128_spill] sm:$0xff] %v8681_v8  ;;  %v8684_v45 = vadd.f32 %v8524_v10, %v2782_v49  ;;  %v2488_v35 = vadd.f32 %v2456_v59, %v2388_v15  ;;  %v2954_v56 = vmul.f32 %v7663_v61, %v2318_v52  ;;  %v8697_v10 = vld [vmem:[#allocation4 + $0x60] sm:$0xff]  ;;  %v8746_v27 = vld [vmem:[#allocation4 + $0x68] sm:$0xff] }
 0x32c   : > { %v8688_v26 = vmul.f32 %v7690_v39, %v2318_v52  ;;  %11756 = vst [vmem:[#allocation131_spill] sm:$0xff] %v8690_v6  ;;  %v2454_v1 = vmul.f32 %v7632_v50, %v2418_v40  ;;  %v2753_v25 = vmul.f32 %v7648_v57, %v2418_v40  ;;  %v2656_v32 = vmul.f32 %v7644_v44, %v2620_v58  ;;  %v2319_v31 = vld [vmem:[#allocation2 + $0x120] sm:$0xff] }
 0x32d   : > { %11754 = vst [vmem:[#allocation129_spill] sm:$0xff] %v8684_v45  ;;  %v3735_v2 = vmul.f32 %v11757_v51, %v8678_v38  ;;  %v8699_v49 = vadd.f32 %v2954_v56, %v2885_v36  ;;  %v8702_v59 = vmul.f32 %v7673_v4, %v2418_v40  ;;  %v2556_v52 = vmul.f32 %v7640_v24, %v2520_v53  ;;  %v3221_v56 = vld [vmem:[#allocation2 + $0x158] sm:$0xff]  ;;  %v8748_v7 = vld [vmem:[#allocation4 + $0x120] sm:$0xff] }
 0x32e   : > { %11755 = vst [vmem:[#allocation130_spill] sm:$0xff] %v8688_v26  ;;  %v8706_v15 = vmul.f32 %v7663_v61, %v2620_v58  ;;  %v8708_v18 = vadd.f32 %v2454_v1, %v2386_v16  ;;  %v8710_v43 = vadd.f32 %v2753_v25, %v2685_v13  ;;  %v3836_v45 = vmul.f32 %v11761_v42, %v8690_v6  ;;  %v3219_v13 = vld [vmem:[#allocation2 + $0x148] sm:$0xff]  ;;  %v11787_v6 = vld [vmem:[#allocation50_spill] sm:$0xff] }
 0x32f   : > { %11758 = vst [vmem:[#allocation132_spill] sm:$0xff] %v8699_v49  ;;  %11759 = vst [vmem:[#allocation133_spill] sm:$0xff] %v8702_v59  ;;  %v3767_v62 = vadd.f32 %v3735_v2, %v3666_v54  ;;  %v2588_v8 = vadd.f32 %v2556_v52, %v2488_v35  ;;  %v2756_v36 = vmul.f32 %v7648_v57, %v2720_v20  ;;  %v11763_v59 = vld [vmem:[#allocation38_spill] sm:$0xff]  ;;  %v8726_v1 = vld [vmem:[#allocation3 + $0xa8] sm:$0xff] }
 0x330   : > { %11760 = vst [vmem:[#allocation134_spill] sm:$0xff] %v8706_v15  ;;  %v8716_v40 = vmul.f32 %v7655_v28, %v2520_v53  ;;  %v3937_v58 = vmul.f32 %v11763_v59, %v8697_v10  ;;  %v8721_v15 = vmul.f32 %v7673_v4, %v2720_v20  ;;  %v8724_v16 = vmul.f32 %v7626_v37, %v2319_v31  ;;  %v8739_v20 = vld [vmem:[#allocation2 + $0xa8] sm:$0xff] }
 0x331   : > { %v3868_v54 = vadd.f32 %v3836_v45, %v3767_v62  ;;  %11765 = vst [vmem:[#allocation136_spill] sm:$0xff] %v8726_v1  ;;  %v1685_v35 = vadd.f32 %v8591_v21, %v8150_v30  ;;  %v8731_v53 = vmul.f32 %v7644_v44, %v2319_v31  ;;  %v8734_v25 = vmul.f32 %v7663_v61, %v2319_v31  ;;  %v6348_v52 = vld [vmem:[#allocation3 + $0x68] sm:$0xff]  ;;  %v2219_v62 = vld [vmem:[#allocation3 + $0x120] sm:$0xff] }
 0x332   : > { %11762 = vst [vmem:[#allocation135_spill] sm:$0xff] %v8716_v40  ;;  %11764 = vst [vmem:[#allocation38_spill] sm:$0xff] %v8721_v15  ;;  %v8737_v2 = vmul.f32 %v7690_v39, %v2319_v31  ;;  %v11768_v15 = vld [vmem:[#allocation29_spill] sm:$0xff]  ;;  %v8743_v45 = vmul.f32 %v7690_v39, %v3221_v56  ;;  %v2688_v47 = vadd.f32 %v2656_v32, %v2588_v8  ;;  %v11774_v56 = vld [vmem:[#allocation46_spill] sm:$0xff] }
 0x333   : > { %11767 = vst [vmem:[#allocation138_spill] sm:$0xff] %v8739_v20  ;;  %v3132_v40 = vmul.f32 %v6348_v52, %v11768_v15  ;;  %v3969_v49 = vadd.f32 %v3937_v58, %v3868_v54  ;;  %v1838_v30 = vrot.slane %v1685_v35, 7  ;;  %v1937_v26 = vrot.slane %v1685_v35, 1  ;;  %2050 = vst.msk [vmem:[#allocation2 + $0x150] sm:$0xff] %vm2002_vm1, %v1685_v35  ;;  %v11775_v58 = vld [vmem:[#allocation49_spill] sm:$0xff] }
 0x334   : > { %11766 = vst [vmem:[#allocation137_spill] sm:$0xff] %v8737_v2  ;;  %11769 = vst [vmem:[#allocation29_spill] sm:$0xff] %v8743_v45  ;;  %v8751_v31 = vmul.f32 %v7690_v39, %v3219_v13  ;;  %v11772_v2 = vld [vmem:[#allocation48_spill] sm:$0xff]  ;;  %v4442_v54 = vmul.f32 %v11775_v58, %v8739_v20  ;;  %v8765_v13 = vld [vmem:[#allocation3 + $0x70] sm:$0xff]  ;;  %v8768_v35 = vmul.f32 %v7623_v46, %v2219_v62 }
 0x335   : > { %11770 = vst [vmem:[#allocation139_spill] sm:$0xff] %v8746_v27  ;;  %v4341_v52 = vmul.f32 %v11772_v2, %v8726_v1  ;;  %v3164_v22 = vadd.f32 %v3132_v40, %v11773_v0  ;;  %v4070_v45 = vadd.f32 %v11774_v56, %v3969_v49  ;;  %11776 = vst [vmem:[#allocation48_spill] sm:$0xff] %v8759_v14  ;;  %v1888_v8 = vsel %vm1804_vm2, %v1838_v30, 0.0  ;;  %v8773_v49 = vld [vmem:[#allocation3 + $0xb0] sm:$0xff]  ;;  %v11780_v30 = vld [vmem:[#allocation31_spill] sm:$0xff] }
 0x336   : > { %11771 = vst [vmem:[#allocation140_spill] sm:$0xff] %v8751_v31  ;;  %v1987_v32 = vsel %vm1903_vm3, %v1937_v26, 0.0  ;;  %11777 = vst [vmem:[#allocation41_spill] sm:$0xff] %v8765_v13  ;;  %v8771_v0 = vmul.f32 %v7640_v24, %v2219_v62  ;;  %v11779_v40 = vld [vmem:[#allocation54_spill] sm:$0xff]  ;;  %v3334_v31 = vmul.f32 %v11780_v30, %v8746_v27  ;;  %v8784_v29 = vmul.f32 %v7632_v50, %v8748_v7  ;;  %v8802_v1 = vld [vmem:[#allocation3 + $0x78] sm:$0xff] }
 0x337   : > { %11778 = vst [vmem:[#allocation46_spill] sm:$0xff] %v8773_v49  ;;  %2112 = vst.msk [vmem:[#allocation3 + $0x150] sm:$0xff] %vm2002_vm1, %v1888_v8  ;;  %v3265_v56 = vadd.f32 %v11779_v40, %v3164_v22  ;;  %v8780_v26 = vld [vmem:[#allocation2 + $0x70] sm:$0xff]  ;;  %v8788_v9 = vmul.f32 %v7648_v57, %v8748_v7  ;;  %v8791_v3 = vmul.f32 %v7655_v28, %v2219_v62  ;;  %v11783_v8 = vld [vmem:[#allocation47_spill] sm:$0xff] }
 0x338   : > { %2174 = vst.msk [vmem:[#allocation4 + $0x150] sm:$0xff] %vm2002_vm1, %v1987_v32  ;;  %11781 = vst [vmem:[#allocation49_spill] sm:$0xff] %v8780_v26  ;;  %v4171_v32 = vadd.f32 %v11783_v8, %v4070_v45  ;;  %v8796_v22 = vadd.f32 %v2756_v36, %v2688_v47  ;;  %v11785_v40 = vld [vmem:[#allocation51_spill] sm:$0xff]  ;;  %v3435_v20 = vmul.f32 %v11741_v63, %v8765_v13  ;;  %v11788_v62 = vld [vmem:[#allocation52_spill] sm:$0xff] }
 0x339   : > { %11782 = vst [vmem:[#allocation54_spill] sm:$0xff] %v8788_v9  ;;  %11784 = vst [vmem:[#allocation31_spill] sm:$0xff] %v8794_v33  ;;  %v4543_v23 = vmul.f32 %v11785_v40, %v8759_v14  ;;  %v3366_v5 = vadd.f32 %v3334_v31, %v3265_v56  ;;  %v4644_v38 = vmul.f32 %v11788_v62, %v8773_v49  ;;  %v6349_v45 = vld [vmem:[%s11366_s7 + $0x20] sm:$0x7]  ;;  %v11791_v13 = vld [vmem:[#allocation45_spill] sm:$0xff] }
 0x33a   : > { %11786 = vst [vmem:[#allocation47_spill] sm:$0xff] %v8802_v1  ;;  %v4272_v9 = vadd.f32 %v11787_v6, %v4171_v32  ;;  %v11789_v47 = vld [vmem:[#allocation24_spill] sm:$0xff]  ;;  %v3536_v31 = vmul.f32 %v11745_v60, %v8780_v26  ;;  %v3637_v8 = vmul.f32 %v11748_v11, %v8794_v33  ;;  %v1706_v6 = vadd.f32 %v8591_v21, %v8184_v19 }
 0x33b   : > { %v8811_v36 = vrot.slane %v6349_v45, %v11789_v47  ;;  %v3467_v56 = vadd.f32 %v3435_v20, %v3366_v5  ;;  %v1698_v32 = vadd.f32 %v8591_v21, %v8190_v48  ;;  %v3738_v41 = vmul.f32 %v11757_v51, %v8802_v1  ;;  %v11790_v49 = vld [vmem:[#allocation44_spill] sm:$0xff]  ;;  %v8829_v48 = vld [vmem:[#allocation2 + $0x78] sm:$0xff] }
 0x33c   : > { %v4373_v14 = vadd.f32 %v4341_v52, %v4272_v9  ;;  %v1709_v47 = vadd.f32 %v8591_v21, %v8204_v12  ;;  %v2759_v26 = vadd.f32 %v11791_v13, %v11790_v49  ;;  %v1843_v20 = vrot.slane %v1706_v6, 7  ;;  %2055 = vst.msk [vmem:[#allocation2 + $0x178] sm:$0xff] %vm2002_vm1, %v1706_v6  ;;  %11792 = vst [vmem:[#allocation51_spill] sm:$0xff] %v8829_v48  ;;  %v8832_v12 = vld [vmem:[#allocation2 + $0xb0] sm:$0xff] }
 0x33d   : > { %v3568_v5 = vadd.f32 %v3536_v31, %v3467_v56  ;;  %v1942_v27 = vrot.slane %v1706_v6, 1  ;;  %v1841_v33 = vrot.slane %v1698_v32, 7  ;;  %2053 = vst.msk [vmem:[#allocation2 + $0x168] sm:$0xff] %vm2002_vm1, %v1698_v32  ;;  %v1940_v9 = vrot.slane %v1698_v32, 1  ;;  %v8851_v6 = vld [vmem:[#allocation4 + $0xb0] sm:$0xff]  ;;  %v8858_v32 = vld [vmem:[#allocation3 + $0x20] sm:$0xff] }
 0x33e   : > { %v4474_v19 = vadd.f32 %v4442_v54, %v4373_v14  ;;  %v1844_v52 = vrot.slane %v1709_v47, 7  ;;  %v1943_v1 = vrot.slane %v1709_v47, 1  ;;  %2056 = vst.msk [vmem:[#allocation2 + $0x180] sm:$0xff] %vm2002_vm1, %v1709_v47  ;;  %v1893_v13 = vsel %vm1804_vm2, %v1843_v20, 0.0  ;;  %v8840_v54 = vld [vmem:[#allocation4 + $0x78] sm:$0xff]  ;;  %11794 = vst [vmem:[#allocation52_spill] sm:$0xff] %v8851_v6 }
 0x33f   : > { %v3669_v51 = vadd.f32 %v3637_v8, %v3568_v5  ;;  %v1992_v49 = vsel %vm1903_vm3, %v1942_v27, 0.0  ;;  %v1891_v31 = vsel %vm1804_vm2, %v1841_v33, 0.0  ;;  %11793 = vst [vmem:[#allocation50_spill] sm:$0xff] %v8840_v54  ;;  %2117 = vst.msk [vmem:[#allocation3 + $0x178] sm:$0xff] %vm2002_vm1, %v1893_v13  ;;  %v1990_v56 = vsel %vm1903_vm3, %v1940_v9, 0.0  ;;  %v8862_v5 = vld [vmem:[#allocation2 + $0x20] sm:$0xff] }
 0x340   : > { %v4575_v14 = vadd.f32 %v4543_v23, %v4474_v19  ;;  %2179 = vst.msk [vmem:[#allocation4 + $0x178] sm:$0xff] %vm2002_vm1, %v1992_v49  ;;  %2115 = vst.msk [vmem:[#allocation3 + $0x168] sm:$0xff] %vm2002_vm1, %v1891_v31  ;;  %v1894_v8 = vsel %vm1804_vm2, %v1844_v52, 0.0  ;;  %v1993_v27 = vsel %vm1903_vm3, %v1943_v1, 0.0  ;;  %v3839_v33 = vmul.f32 %v11761_v42, %v8829_v48  ;;  %v11796_v19 = vld [vmem:[#allocation25_spill] sm:$0xff]  ;;  %v8873_v52 = vld [vmem:[#allocation3 + $0xb8] sm:$0xff] }
 0x341   : > { %v3770_v23 = vadd.f32 %v3738_v41, %v3669_v51  ;;  %2177 = vst.msk [vmem:[#allocation4 + $0x168] sm:$0xff] %vm2002_vm1, %v1990_v56  ;;  %2118 = vst.msk [vmem:[#allocation3 + $0x180] sm:$0xff] %vm2002_vm1, %v1894_v8  ;;  %v2828_v47 = vmul.f32 %v8858_v32, %v7655_v28  ;;  %v2929_v1 = vmul.f32 %v8862_v5, %v7663_v61  ;;  %v3222_v13 = vld [vmem:[#allocation2 + $0x160] sm:$0xff] }
 0x342   : > { %2180 = vst.msk [vmem:[#allocation4 + $0x180] sm:$0xff] %vm2002_vm1, %v1993_v27  ;;  %11795 = vst [vmem:[#allocation24_spill] sm:$0xff] %v8862_v5  ;;  %v2387_v41 = vadd.f32 %v8724_v16, %v8768_v35  ;;  %v4676_v51 = vadd.f32 %v4644_v38, %v4575_v14  ;;  %v4745_v20 = vmul.f32 %v8811_v36, %v8832_v12  ;;  %v8877_v8 = vld [vmem:[#allocation4 + $0x20] sm:$0xff]  ;;  %v8889_v27 = vld [vmem:[#allocation2 + $0xb8] sm:$0xff] }
 0x343   : > { %v8871_v9 = vrot.slane %v6349_v45, %v11796_v19  ;;  %11797 = vst [vmem:[#allocation44_spill] sm:$0xff] %v8873_v52  ;;  %v3871_v49 = vadd.f32 %v3839_v33, %v3770_v23  ;;  %v3940_v31 = vmul.f32 %v11763_v59, %v8840_v54  ;;  %v2860_v56 = vadd.f32 %v2828_v47, %v2759_v26  ;;  %v8894_v26 = vld [vmem:[%s11367_s8] ss:$0 sm:$0xff]  ;;  %v11802_v33 = vld [vmem:[#allocation39_spill] sm:$0xff]  ;;  %v11806_v5 = vld [vmem:[#allocation42_spill] sm:$0xff] }
 0x344   : > { %11798 = vst [vmem:[#allocation45_spill] sm:$0xff] %v8877_v8  ;;  %v3030_v16 = vmul.f32 %v8877_v8, %v7673_v4  ;;  %v2586_v38 = vadd.f32 %v8771_v0, %v8708_v18  ;;  %v8885_v35 = vmul.f32 %v7673_v4, %v8748_v7  ;;  %v4777_v45 = vadd.f32 %v4745_v20, %v4676_v51  ;;  %v8898_v18 = vld [vmem:[#allocation4 + $0xb8] sm:$0xff]  ;;  %v8900_v0 = vld [vmem:[#allocation3 + $0xc0] sm:$0xff] }
 0x345   : > { %v4846_v14 = vmul.f32 %v8871_v9, %v8851_v6  ;;  %11800 = vst [vmem:[#allocation141_spill] sm:$0xff] %v8889_v27  ;;  %11801 = vst [vmem:[#allocation142_spill] sm:$0xff] %v8894_v26  ;;  %v3972_v23 = vadd.f32 %v3940_v31, %v3871_v49  ;;  %v4041_v47 = vmul.f32 %v11802_v33, %v8873_v52  ;;  %v6353_v51 = vld [vmem:[#allocation3 + $0x60] sm:$0xff] }
 0x346   : > { %11799 = vst [vmem:[#allocation25_spill] sm:$0xff] %v8885_v35  ;;  %v2961_v7 = vadd.f32 %v2929_v1, %v2860_v56  ;;  %v3131_v20 = vmul.f32 %v6353_v51, %v11768_v15  ;;  %v11803_v19 = vld [vmem:[#allocation40_spill] sm:$0xff]  ;;  %v2886_v54 = vadd.f32 %v8791_v3, %v8710_v43  ;;  %v8910_v49 = vmul.f32 %v7690_v39, %v3222_v13 }
 0x347   : > { %v8905_v35 = vadd.f32 %v11803_v19, %v8796_v22  ;;  %v4878_v31 = vadd.f32 %v4846_v14, %v4777_v45  ;;  %v2487_v48 = vadd.f32 %v8784_v29, %v2387_v41  ;;  %v4073_v8 = vadd.f32 %v4041_v47, %v3972_v23  ;;  %v11809_v19 = vld [vmem:[#allocation43_spill] sm:$0xff]  ;;  %v8925_v45 = vld [vmem:[#allocation2 + $0xc0] sm:$0xff]  ;;  %v6354_v14 = vld [vmem:[#allocation3 + $0x8] sm:$0xff] }
 0x348   : > { %11805 = vst [vmem:[#allocation40_spill] sm:$0xff] %v8910_v49  ;;  %v4142_v1 = vmul.f32 %v11806_v5, %v8889_v27  ;;  %v3062_v56 = vadd.f32 %v3030_v16, %v2961_v7  ;;  %v8916_v51 = vadd.f32 %v8731_v53, %v2586_v38  ;;  %v4243_v3 = vmul.f32 %v11809_v19, %v8898_v18  ;;  %v8929_v16 = vld [vmem:[#allocation3 + $0x68] sm:$0xff] }
 0x349   : > { %11804 = vst [vmem:[#allocation39_spill] sm:$0xff] %v8905_v35  ;;  %v8919_v22 = vadd.f32 %v8894_v26, %v4878_v31  ;;  %v4344_v43 = vmul.f32 %v11772_v2, %v8900_v0  ;;  %v3333_v41 = vmul.f32 %v8697_v10, %v11780_v30  ;;  %v1701_v53 = vadd.f32 %v8591_v21, %v8272_v17  ;;  %v6355_v47 = vld [vmem:[#allocation2 + $0x8] sm:$0xff]  ;;  %v8942_v21 = vld [vmem:[#allocation4 + $0xc0] sm:$0xff] }
 0x34a   : > { %11807 = vst [vmem:[#allocation42_spill] sm:$0xff] %v8916_v51  ;;  %v4174_v13 = vadd.f32 %v4142_v1, %v4073_v8  ;;  %v3163_v29 = vadd.f32 %v3131_v20, %v3062_v56  ;;  %v2226_v23 = vmul.f32 %v6354_v14, %v7623_v46  ;;  %v2326_v8 = vmul.f32 %v6355_v47, %v7626_v37  ;;  %v6356_v7 = vld [vmem:[#allocation4 + $0x8] sm:$0xff]  ;;  %v11810_v1 = vld [vmem:[#allocation64_spill] sm:$0xff] }
 0x34b   : > { %11808 = vst [vmem:[#allocation143_spill] sm:$0xff] %v8919_v22  ;;  %v4948_v38 = vsel %vm2002_vm1, %v8919_v22, 0.0  ;;  %v2426_v20 = vmul.f32 %v6356_v7, %v7632_v50  ;;  %v1842_v35 = vrot.slane %v1701_v53, 7  ;;  %v1941_v49 = vrot.slane %v1701_v53, 1  ;;  %2054 = vst.msk [vmem:[#allocation2 + $0x170] sm:$0xff] %vm2002_vm1, %v1701_v53  ;;  %v8946_v47 = vld [vmem:[#allocation2 + $0x68] sm:$0xff] }
 0x34c   : > { %4949 = vadd.xlane.f32.xlu0 %v4948_v38  ;;  %v4275_v31 = vadd.f32 %v4243_v3, %v4174_v13  ;;  %v3264_v56 = vadd.f32 %v11810_v1, %v3163_v29  ;;  %v4445_v17 = vmul.f32 %v11775_v58, %v8925_v45  ;;  %11811 = vst [vmem:[#allocation43_spill] sm:$0xff] %v8942_v21  ;;  %v6357_v7 = vld [vmem:[#allocation3 + $0x10] sm:$0xff]  ;;  %v8949_v29 = vld [vmem:[#allocation3 + $0xc8] sm:$0xff] }
 0x34d   : > { %v3434_v14 = vmul.f32 %v11741_v63, %v8929_v16  ;;  %v2358_v22 = vadd.f32 %v2326_v8, %v2226_v23  ;;  %v2526_v3 = vmul.f32 %v6357_v7, %v7640_v24  ;;  %11812 = vst [vmem:[#allocation64_spill] sm:$0xff] %v8949_v29  ;;  %v8951_v38 = vld [vmem:[#allocation2 + $0xc8] sm:$0xff]  ;;  %v1892_v1 = vsel %vm1804_vm2, %v1842_v35, 0.0  ;;  %v11817_v7 = vld [vmem:[#allocation139_spill] sm:$0xff] }
 0x34e   : > { %v4376_v13 = vadd.f32 %v4344_v43, %v4275_v31  ;;  %11813 = vst [vmem:[#allocation144_spill] sm:$0xff] %v8951_v38  ;;  %v3365_v53 = vadd.f32 %v3333_v41, %v3264_v56  ;;  %v1991_v51 = vsel %vm1903_vm3, %v1941_v49, 0.0  ;;  %v8958_v39 = vadd.f32 %v8614_v34, %v2487_v48  ;;  %v8963_v8 = vld [vmem:[#allocation4 + $0xc8] sm:$0xff]  ;;  %2116 = vst.msk [vmem:[#allocation3 + $0x170] sm:$0xff] %vm2002_vm1, %v1892_v1  ;;  %v6358_v41 = vld [vmem:[#allocation2 + $0x10] sm:$0xff] }
 0x34f   : > { %v8961_v23 = vadd.f32 %v8734_v25, %v2886_v54  ;;  %11816 = vst [vmem:[#allocation147_spill] sm:$0xff] %v8963_v8  ;;  %2178 = vst.msk [vmem:[#allocation4 + $0x170] sm:$0xff] %vm2002_vm1, %v1991_v51  ;;  %v2458_v43 = vadd.f32 %v2426_v20, %v2358_v22  ;;  %v2626_v31 = vmul.f32 %v6358_v41, %v7644_v44  ;;  %v6359_v51 = vld [vmem:[#allocation4 + $0x10] sm:$0xff]  ;;  %v11820_v41 = vld [vmem:[#allocation49_spill] sm:$0xff] }
 0x350   : > { %11814 = vst [vmem:[#allocation145_spill] sm:$0xff] %v8958_v39  ;;  %v4477_v35 = vadd.f32 %v4445_v17, %v4376_v13  ;;  %v4546_v55 = vmul.f32 %v11785_v40, %v8942_v21  ;;  %v3466_v49 = vadd.f32 %v3434_v14, %v3365_v53  ;;  %v3535_v34 = vmul.f32 %v11745_v60, %v8946_v47  ;;  %v11818_v13 = vld [vmem:[#allocation41_spill] sm:$0xff] }
 0x351   : > { %11815 = vst [vmem:[#allocation146_spill] sm:$0xff] %v8961_v23  ;;  %v4647_v25 = vmul.f32 %v11788_v62, %v8949_v29  ;;  %v4748_v48 = vmul.f32 %v8811_v36, %v8951_v38  ;;  %v2558_v54 = vadd.f32 %v2526_v3, %v2458_v43  ;;  %v2726_v22 = vmul.f32 %v6359_v51, %v7648_v57  ;;  %v11819_v53 = vld [vmem:[#allocation37_spill] sm:$0xff]  ;;  %v6360_v38 = vld [vmem:[#allocation3 + $0x18] sm:$0xff] }
 0x352   : > { %v4578_v20 = vadd.f32 %v4546_v55, %v4477_v35  ;;  %v4849_v56 = vmul.f32 %v8871_v9, %v8963_v8  ;;  %v3567_v17 = vadd.f32 %v3535_v34, %v3466_v49  ;;  %v3636_v14 = vmul.f32 %v11748_v11, %v11817_v7  ;;  %v11821_v35 = vld [vmem:[#allocation31_spill] sm:$0xff]  ;;  %v11822_v49 = vld [vmem:[#allocation46_spill] sm:$0xff] }
 0x353   : > { %v3737_v1 = vmul.f32 %v11819_v53, %v11818_v13  ;;  %v3838_v23 = vmul.f32 %v11761_v42, %v11820_v41  ;;  %v2658_v39 = vadd.f32 %v2626_v31, %v2558_v54  ;;  %v2827_v3 = vmul.f32 %v6360_v38, %v7655_v28  ;;  %v6361_v41 = vld [vmem:[#allocation2 + $0x18] sm:$0xff] }
 0x354   : > { %v4679_v43 = vadd.f32 %v4647_v25, %v4578_v20  ;;  %v3668_v51 = vadd.f32 %v3636_v14, %v3567_v17  ;;  %v3939_v55 = vmul.f32 %v11763_v59, %v11821_v35  ;;  %v4040_v34 = vmul.f32 %v11822_v49, %v11802_v33  ;;  %v6362_v14 = vld [vmem:[#allocation4 + $0x18] sm:$0xff] }
 0x355   : > { %v4141_v8 = vmul.f32 %v8832_v12, %v11806_v5  ;;  %v4242_v13 = vmul.f32 %v8851_v6, %v11809_v19  ;;  %v2758_v29 = vadd.f32 %v2726_v22, %v2658_v39  ;;  %v2928_v31 = vmul.f32 %v6361_v41, %v7663_v61  ;;  %v11823_v39 = vld [vmem:[#allocation24_spill] sm:$0xff] }
 0x356   : > { %v4780_v54 = vadd.f32 %v4748_v48, %v4679_v43  ;;  %v3769_v38 = vadd.f32 %v3737_v1, %v3668_v51  ;;  %v4343_v25 = vmul.f32 %v11772_v2, %v8873_v52  ;;  %v8999_v20 = vmul.f32 %v11775_v58, %v8889_v27  ;;  %v11824_v43 = vld [vmem:[#allocation45_spill] sm:$0xff] }
 0x357   : > { %v2859_v17 = vadd.f32 %v2827_v3, %v2758_v29  ;;  %v3029_v35 = vmul.f32 %v6362_v14, %v7673_v4  ;;  %v2229_v6 = vmul.f32 %v8858_v32, %v7623_v46  ;;  %v2329_v22 = vmul.f32 %v11823_v39, %v7626_v37  ;;  %v6363_v29 = vld [vmem:[#allocation3 + $0x58] sm:$0xff]  ;;  %v9013_v52 = vld [vmem:[#allocation3 + $0x28] sm:$0xff] }
 0x358   : > { %v4881_v41 = vadd.f32 %v4849_v56, %v4780_v54  ;;  %v3870_v48 = vadd.f32 %v3838_v23, %v3769_v38  ;;  %v9008_v1 = vmul.f32 %v11785_v40, %v8898_v18  ;;  %v2429_v51 = vmul.f32 %v11824_v43, %v7632_v50  ;;  %11825 = vst [vmem:[#allocation139_spill] sm:$0xff] %v9013_v52  ;;  %v9032_v39 = vld [vmem:[#allocation2 + $0x28] sm:$0xff] }
 0x359   : > { %v2960_v27 = vadd.f32 %v2928_v31, %v2859_v17  ;;  %v3130_v3 = vmul.f32 %v6363_v29, %v11768_v15  ;;  %v2361_v14 = vadd.f32 %v2329_v22, %v2229_v6  ;;  %v2529_v32 = vmul.f32 %v9013_v52, %v7640_v24  ;;  %11827 = vst [vmem:[#allocation49_spill] sm:$0xff] %v9032_v39  ;;  %v11829_v29 = vld [vmem:[#allocation127_spill] sm:$0xff] }
 0x35a   : > { %v9018_v56 = vadd.f32 %v8894_v26, %v4881_v41  ;;  %v3971_v23 = vadd.f32 %v3939_v55, %v3870_v48  ;;  %v9022_v54 = vmul.f32 %v11788_v62, %v8900_v0  ;;  %v9026_v31 = vmul.f32 %v8811_v36, %v8925_v45  ;;  %v11828_v48 = vld [vmem:[#allocation76_spill] sm:$0xff]  ;;  %v9042_v26 = vld [vmem:[#allocation3 + $0x30] sm:$0xff] }
 0x35b   : > { %v9030_v6 = vmul.f32 %v8871_v9, %v8942_v21  ;;  %v3061_v38 = vadd.f32 %v3029_v35, %v2960_v27  ;;  %v2461_v17 = vadd.f32 %v2429_v51, %v2361_v14  ;;  %v2629_v22 = vmul.f32 %v9032_v39, %v7644_v44  ;;  %v11830_v35 = vld [vmem:[#allocation131_spill] sm:$0xff]  ;;  %v9046_v21 = vld [vmem:[#allocation4 + $0x28] sm:$0xff] }
 0x35c   : > { %11826 = vst [vmem:[#allocation41_spill] sm:$0xff] %v9018_v56  ;;  %v4957_v55 = vsel %vm2002_vm1, %v9018_v56, 0.0  ;;  %v4072_v41 = vadd.f32 %v4040_v34, %v3971_v23  ;;  %v3332_v43 = vmul.f32 %v11828_v48, %v11780_v30  ;;  %v3433_v52 = vmul.f32 %v11829_v29, %v11741_v63  ;;  %11831 = vst [vmem:[#allocation46_spill] sm:$0xff] %v9046_v21  ;;  %v11834_v29 = vld [vmem:[#allocation136_spill] sm:$0xff] }
 0x35d   : > { %4958 = vadd.xlane.f32.xlu1 %v4957_v55  ;;  %v3162_v27 = vadd.f32 %v3130_v3, %v3061_v38  ;;  %v3534_v51 = vmul.f32 %v11830_v35, %v11745_v60  ;;  %v2561_v14 = vadd.f32 %v2529_v32, %v2461_v17  ;;  %v2729_v56 = vmul.f32 %v9046_v21, %v7648_v57  ;;  %v11832_v3 = vld [vmem:[#allocation55_spill] sm:$0xff] }
 0x35e   : > { %v4173_v34 = vadd.f32 %v4141_v8, %v4072_v41  ;;  %v3635_v23 = vmul.f32 %v8697_v10, %v11748_v11  ;;  %v3736_v48 = vmul.f32 %v11819_v53, %v8929_v16  ;;  %v9056_v55 = vmul.f32 %v11761_v42, %v8946_v47  ;;  %v9065_v41 = vld [vmem:[#allocation3 + $0x38] sm:$0xff]  ;;  %v11835_v47 = vld [vmem:[#allocation138_spill] sm:$0xff] }
 0x35f   : > { %v3263_v38 = vadd.f32 %v11832_v3, %v3162_v27  ;;  %v9061_v32 = vmul.f32 %v11763_v59, %v11817_v7  ;;  %v2661_v17 = vadd.f32 %v2629_v22, %v2561_v14  ;;  %v2830_v8 = vmul.f32 %v7655_v28, %v9042_v26  ;;  %11833 = vst [vmem:[#allocation24_spill] sm:$0xff] %v9065_v41  ;;  %v11837_v27 = vld [vmem:[#allocation48_spill] sm:$0xff]  ;;  %v9079_v7 = vld [vmem:[#allocation2 + $0x30] sm:$0xff]  ;;  %v9081_v22 = vld [vmem:[#allocation2 + $0x38] sm:$0xff] }
 0x360   : > { %v4274_v10 = vadd.f32 %v4242_v13, %v4173_v34  ;;  %v9069_v16 = vmul.f32 %v11834_v29, %v11802_v33  ;;  %v9073_v35 = vmul.f32 %v11835_v47, %v11806_v5  ;;  %v9077_v3 = vmul.f32 %v11837_v27, %v11809_v19  ;;  %11839 = vst [vmem:[#allocation127_spill] sm:$0xff] %v9081_v22  ;;  %v9083_v14 = vld [vmem:[#allocation4 + $0x38] sm:$0xff]  ;;  %v9091_v47 = vld [vmem:[#allocation4 + $0x30] sm:$0xff] }
 0x361   : > { %11840 = vst [vmem:[#allocation131_spill] sm:$0xff] %v9083_v14  ;;  %v3364_v21 = vadd.f32 %v3332_v43, %v3263_v38  ;;  %v9087_v13 = vmul.f32 %v11822_v49, %v11772_v2  ;;  %v2761_v34 = vadd.f32 %v2729_v56, %v2661_v17  ;;  %v2931_v29 = vmul.f32 %v7663_v61, %v9079_v7  ;;  %v9101_v38 = vld [vmem:[#allocation3 + $0x40] sm:$0xff] }
 0x362   : > { %11836 = vst [vmem:[#allocation45_spill] sm:$0xff] %v9073_v35  ;;  %11838 = vst [vmem:[#allocation76_spill] sm:$0xff] %v9077_v3  ;;  %v4375_v39 = vadd.f32 %v4343_v25, %v4274_v10  ;;  %v9095_v27 = vmul.f32 %v8832_v12, %v11775_v58  ;;  %v3032_v3 = vmul.f32 %v7673_v4, %v9091_v47  ;;  %v11844_v12 = vld [vmem:[#allocation52_spill] sm:$0xff] }
 0x363   : > { %11841 = vst [vmem:[#allocation55_spill] sm:$0xff] %v9087_v13  ;;  %v2232_v43 = vmul.f32 %v7623_v46, %v9065_v41  ;;  %11843 = vst [vmem:[#allocation138_spill] sm:$0xff] %v9101_v38  ;;  %v3465_v49 = vadd.f32 %v3433_v52, %v3364_v21  ;;  %v2862_v56 = vadd.f32 %v2830_v8, %v2761_v34  ;;  %v11846_v13 = vld [vmem:[#allocation44_spill] sm:$0xff]  ;;  %v6367_v41 = vld [vmem:[#allocation3 + $0x70] sm:$0xff] }
 0x364   : > { %11842 = vst [vmem:[#allocation136_spill] sm:$0xff] %v9095_v27  ;;  %v2332_v17 = vmul.f32 %v7626_v37, %v9081_v22  ;;  %v2432_v25 = vmul.f32 %v7632_v50, %v9083_v14  ;;  %v4476_v10 = vadd.f32 %v8999_v20, %v4375_v39  ;;  %v9110_v27 = vmul.f32 %v11844_v12, %v11785_v40  ;;  %v9117_v21 = vld [vmem:[#allocation2 + $0x40] sm:$0xff]  ;;  %v11848_v39 = vld [vmem:[#allocation141_spill] sm:$0xff] }
 0x365   : > { %v9114_v35 = vmul.f32 %v11788_v62, %v11846_v13  ;;  %v3133_v52 = vmul.f32 %v6367_v41, %v11768_v15  ;;  %v3566_v8 = vadd.f32 %v3534_v51, %v3465_v49  ;;  %v2963_v34 = vadd.f32 %v2931_v29, %v2862_v56  ;;  %v11851_v41 = vld [vmem:[#allocation31_spill] sm:$0xff]  ;;  %v9136_v49 = vld [vmem:[#allocation2 + $0x80] sm:$0xff] }
 0x366   : > { %11845 = vst [vmem:[#allocation48_spill] sm:$0xff] %v9110_v27  ;;  %v2364_v22 = vadd.f32 %v2332_v17, %v2232_v43  ;;  %v2532_v14 = vmul.f32 %v7640_v24, %v9101_v38  ;;  %v4577_v20 = vadd.f32 %v9008_v1, %v4476_v10  ;;  %v9124_v12 = vmul.f32 %v8811_v36, %v11848_v39  ;;  %v9132_v27 = vld [vmem:[#allocation4 + $0x40] sm:$0xff]  ;;  %v11855_v10 = vld [vmem:[#allocation47_spill] sm:$0xff] }
 0x367   : > { %11847 = vst [vmem:[#allocation52_spill] sm:$0xff] %v9114_v35  ;;  %v9128_v13 = vmul.f32 %v8871_v9, %v8898_v18  ;;  %v3335_v35 = vmul.f32 %v11851_v41, %v11780_v30  ;;  %v3667_v51 = vadd.f32 %v3635_v23, %v3566_v8  ;;  %v3064_v29 = vadd.f32 %v3032_v3, %v2963_v34  ;;  %v9134_v43 = vld [vmem:[#allocation3 + $0x80] sm:$0xff]  ;;  %v11856_v41 = vld [vmem:[#allocation51_spill] sm:$0xff]  ;;  %v11857_v23 = vld [vmem:[#allocation50_spill] sm:$0xff] }
 0x368   : > { %11849 = vst [vmem:[#allocation44_spill] sm:$0xff] %v9124_v12  ;;  %11852 = vst [vmem:[#allocation31_spill] sm:$0xff] %v9134_v43  ;;  %v9138_v1 = vld [vmem:[#allocation4 + $0x80] sm:$0xff]  ;;  %v2464_v56 = vadd.f32 %v2432_v25, %v2364_v22  ;;  %v2632_v17 = vmul.f32 %v7644_v44, %v9117_v21  ;;  %v4678_v18 = vadd.f32 %v9022_v54, %v4577_v20  ;;  %v2797_v8 = vld [vmem:[#allocation3 + $0x48] sm:$0xff] }
 0x369   : > { %11850 = vst [vmem:[#allocation141_spill] sm:$0xff] %v9128_v13  ;;  %11853 = vst [vmem:[#allocation148_spill] sm:$0xff] %v9136_v49  ;;  %v3436_v39 = vmul.f32 %v11855_v10, %v11741_v63  ;;  %v3537_v13 = vmul.f32 %v11856_v41, %v11745_v60  ;;  %v3638_v3 = vmul.f32 %v11857_v23, %v11748_v11  ;;  %v2898_v41 = vld [vmem:[#allocation2 + $0x48] sm:$0xff] }
 0x36a   : > { %11854 = vst [vmem:[#allocation149_spill] sm:$0xff] %v9138_v1  ;;  %v3768_v34 = vadd.f32 %v3736_v48, %v3667_v51  ;;  %v3165_v12 = vadd.f32 %v3133_v52, %v3064_v29  ;;  %v2564_v38 = vadd.f32 %v2532_v14, %v2464_v56  ;;  %v2732_v22 = vmul.f32 %v7648_v57, %v9132_v27  ;;  %v11858_v14 = vld [vmem:[#allocation58_spill] sm:$0xff] }
 0x36b   : > { %v4779_v25 = vadd.f32 %v9026_v31, %v4678_v18  ;;  %v3739_v54 = vmul.f32 %v11819_v53, %v9134_v43  ;;  %v9156_v20 = vmul.f32 %v11761_v42, %v9136_v49  ;;  %v9160_v10 = vmul.f32 %v11763_v59, %v9138_v1  ;;  %v2999_v31 = vld [vmem:[#allocation4 + $0x48] sm:$0xff]  ;;  %v11859_v43 = vld [vmem:[#allocation43_spill] sm:$0xff] }
 0x36c   : > { %v3869_v48 = vadd.f32 %v9056_v55, %v3768_v34  ;;  %v3266_v52 = vadd.f32 %v11858_v14, %v3165_v12  ;;  %v2664_v51 = vadd.f32 %v2632_v17, %v2564_v38  ;;  %v2833_v29 = vmul.f32 %v7655_v28, %v2797_v8  ;;  %v11860_v8 = vld [vmem:[#allocation142_spill] sm:$0xff] }
 0x36d   : > { %v4880_v56 = vadd.f32 %v9030_v6, %v4779_v25  ;;  %v9168_v18 = vmul.f32 %v8900_v0, %v11802_v33  ;;  %v9172_v49 = vmul.f32 %v8925_v45, %v11806_v5  ;;  %v9176_v23 = vmul.f32 %v11859_v43, %v11809_v19  ;;  %v11862_v0 = vld [vmem:[#allocation64_spill] sm:$0xff] }
 0x36e   : > { %v3970_v55 = vadd.f32 %v9061_v32, %v3869_v48  ;;  %v3367_v38 = vadd.f32 %v3335_v35, %v3266_v52  ;;  %v2764_v12 = vadd.f32 %v2732_v22, %v2664_v51  ;;  %v2934_v17 = vmul.f32 %v7663_v61, %v2898_v41  ;;  %v11863_v45 = vld [vmem:[#allocation144_spill] sm:$0xff]  ;;  %v9193_v35 = vld [vmem:[#allocation3 + $0xd0] sm:$0xff]  ;;  %v11867_v51 = vld [vmem:[#allocation147_spill] sm:$0xff] }
 0x36f   : > { %v9181_v6 = vadd.f32 %v11860_v8, %v4880_v56  ;;  %v9185_v34 = vmul.f32 %v11862_v0, %v11772_v2  ;;  %v9189_v25 = vmul.f32 %v11863_v45, %v11775_v58  ;;  %v3035_v43 = vmul.f32 %v7673_v4, %v2999_v31  ;;  %11865 = vst [vmem:[#allocation58_spill] sm:$0xff] %v9193_v35  ;;  %v9195_v22 = vld [vmem:[#allocation2 + $0xd0] sm:$0xff]  ;;  %v9213_v0 = vld [vmem:[#allocation4 + $0x88] sm:$0xff] }
 0x370   : > { %v4071_v14 = vadd.f32 %v9069_v16, %v3970_v55  ;;  %v3468_v32 = vadd.f32 %v3436_v39, %v3367_v38  ;;  %11866 = vst [vmem:[#allocation43_spill] sm:$0xff] %v9195_v22  ;;  %v2865_v41 = vadd.f32 %v2833_v29, %v2764_v12  ;;  %v2231_v48 = vmul.f32 %v9042_v26, %v7623_v46  ;;  %v9205_v45 = vld [vmem:[#allocation4 + $0xd0] sm:$0xff]  ;;  %v11870_v29 = vld [vmem:[#allocation45_spill] sm:$0xff] }
 0x371   : > { %11861 = vst [vmem:[#allocation47_spill] sm:$0xff] %v9181_v6  ;;  %11864 = vst [vmem:[#allocation51_spill] sm:$0xff] %v9189_v25  ;;  %v4954_v52 = vsel %vm2002_vm1, %v9181_v6, 0.0  ;;  %v9203_v56 = vmul.f32 %v11867_v51, %v11785_v40  ;;  %v2331_v16 = vmul.f32 %v9079_v7, %v7626_v37  ;;  %v2431_v39 = vmul.f32 %v9091_v47, %v7632_v50  ;;  %v6368_v12 = vld [vmem:[#allocation3 + $0x88] sm:$0xff]  ;;  %v9215_v51 = vld [vmem:[#allocation3 + $0x90] sm:$0xff] }
 0x372   : > { %11869 = vst [vmem:[#allocation150_spill] sm:$0xff] %v9205_v45  ;;  %4955 = vadd.xlane.f32.xlu0 %v4954_v52  ;;  %v4172_v31 = vadd.f32 %v11870_v29, %v4071_v14  ;;  %v3569_v55 = vadd.f32 %v3537_v13, %v3468_v32  ;;  %v2966_v38 = vadd.f32 %v2934_v17, %v2865_v41  ;;  %11871 = vst [vmem:[#allocation45_spill] sm:$0xff] %v9213_v0  ;;  %v9225_v52 = vld [vmem:[#allocation2 + $0x90] sm:$0xff]  ;;  %v11875_v13 = vld [vmem:[#allocation24_spill] sm:$0xff] }
 0x373   : > { %11868 = vst [vmem:[#allocation142_spill] sm:$0xff] %v9203_v56  ;;  %v3136_v6 = vmul.f32 %v6368_v12, %v11768_v15  ;;  %v9219_v56 = vmul.f32 %v11788_v62, %v9193_v35  ;;  %v9223_v1 = vmul.f32 %v8811_v36, %v9195_v22  ;;  %11874 = vst [vmem:[#allocation153_spill] sm:$0xff] %v9225_v52  ;;  %v11876_v32 = vld [vmem:[#allocation76_spill] sm:$0xff]  ;;  %v9234_v35 = vld [vmem:[#allocation4 + $0x90] sm:$0xff] }
 0x374   : > { %v2363_v14 = vadd.f32 %v2331_v16, %v2231_v48  ;;  %v2531_v17 = vmul.f32 %v7640_v24, %v11875_v13  ;;  %v4273_v41 = vadd.f32 %v11876_v32, %v4172_v31  ;;  %v3670_v29 = vadd.f32 %v3638_v3, %v3569_v55  ;;  %11878 = vst [vmem:[#allocation154_spill] sm:$0xff] %v9234_v35  ;;  %v11880_v31 = vld [vmem:[#allocation55_spill] sm:$0xff] }
 0x375   : > { %11872 = vst [vmem:[#allocation151_spill] sm:$0xff] %v9219_v56  ;;  %11873 = vst [vmem:[#allocation152_spill] sm:$0xff] %v9223_v1  ;;  %v9232_v12 = vmul.f32 %v8871_v9, %v9205_v45  ;;  %v3067_v25 = vadd.f32 %v3035_v43, %v2966_v38  ;;  %v3706_v56 = vld [vmem:[#allocation3 + $0x98] sm:$0xff]  ;;  %v3338_v22 = vmul.f32 %v11780_v30, %v9213_v0 }
 0x376   : > { %v3439_v48 = vmul.f32 %v11741_v63, %v9215_v51  ;;  %v2463_v16 = vadd.f32 %v2431_v39, %v2363_v14  ;;  %v11879_v1 = vld [vmem:[#allocation127_spill] sm:$0xff]  ;;  %v4374_v3 = vadd.f32 %v11880_v31, %v4273_v41  ;;  %v3771_v55 = vadd.f32 %v3739_v54, %v3670_v29  ;;  %v11884_v54 = vld [vmem:[#allocation136_spill] sm:$0xff] }
 0x377   : > { %11877 = vst [vmem:[#allocation76_spill] sm:$0xff] %v9232_v12  ;;  %v2631_v13 = vmul.f32 %v7644_v44, %v11879_v1  ;;  %v3168_v32 = vadd.f32 %v3136_v6, %v3067_v25  ;;  %v3540_v43 = vmul.f32 %v11745_v60, %v9225_v52  ;;  %v9245_v38 = vld [vmem:[#allocation3 + $0xd8] sm:$0xff]  ;;  %v3641_v12 = vmul.f32 %v11748_v11, %v9234_v35 }
 0x378   : > { %11881 = vst [vmem:[#allocation55_spill] sm:$0xff] %v9245_v38  ;;  %v3742_v45 = vmul.f32 %v11819_v53, %v3706_v56  ;;  %v9250_v0 = vld [vmem:[#allocation2 + $0x98] sm:$0xff]  ;;  %v2563_v14 = vadd.f32 %v2531_v17, %v2463_v16  ;;  %v4475_v6 = vadd.f32 %v11884_v54, %v4374_v3  ;;  %v3872_v25 = vadd.f32 %v9156_v20, %v3771_v55  ;;  %v9265_v53 = vld [vmem:[#allocation3 + $0xe0] sm:$0xff]  ;;  %v11890_v55 = vld [vmem:[#allocation138_spill] sm:$0xff] }
 0x379   : > { %11882 = vst [vmem:[#allocation155_spill] sm:$0xff] %v9250_v0  ;;  %v9252_v39 = vld [vmem:[#allocation2 + $0xd8] sm:$0xff]  ;;  %v3843_v52 = vmul.f32 %v11761_v42, %v9250_v0  ;;  %11888 = vst [vmem:[#allocation156_spill] sm:$0xff] %v9265_v53  ;;  %v9271_v16 = vmul.f32 %v11802_v33, %v9245_v38  ;;  %v9273_v3 = vld [vmem:[#allocation2 + $0xe0] sm:$0xff]  ;;  %v9289_v38 = vmul.f32 %v11772_v2, %v9265_v53 }
 0x37a   : > { %v11883_v1 = vld [vmem:[#allocation131_spill] sm:$0xff]  ;;  %11889 = vst [vmem:[#allocation157_spill] sm:$0xff] %v9273_v3  ;;  %v2663_v20 = vadd.f32 %v2631_v13, %v2563_v14  ;;  %v11891_v54 = vld [vmem:[#allocation48_spill] sm:$0xff]  ;;  %v3973_v0 = vadd.f32 %v9160_v10, %v3872_v25  ;;  %v9281_v42 = vmul.f32 %v11806_v5, %v9252_v39  ;;  %v2933_v14 = vmul.f32 %v7663_v61, %v9117_v21  ;;  %v11896_v21 = vld [vmem:[#allocation49_spill] sm:$0xff] }
 0x37b   : > { %v2731_v41 = vmul.f32 %v7648_v57, %v11883_v1  ;;  %v11885_v29 = vld [vmem:[#allocation67_spill] sm:$0xff]  ;;  %v9297_v25 = vmul.f32 %v11775_v58, %v9273_v3  ;;  %v3034_v53 = vmul.f32 %v7673_v4, %v9132_v27  ;;  %v2530_v27 = vmul.f32 %v9042_v26, %v7640_v24 }
 0x37c   : > { %v3269_v31 = vadd.f32 %v11885_v29, %v3168_v32  ;;  %v9261_v35 = vld [vmem:[#allocation4 + $0x98] sm:$0xff]  ;;  %v2832_v32 = vmul.f32 %v7655_v28, %v11890_v55  ;;  %v4576_v29 = vadd.f32 %v11891_v54, %v4475_v6  ;;  %v11892_v6 = vld [vmem:[#allocation52_spill] sm:$0xff]  ;;  %v4074_v10 = vadd.f32 %v9168_v18, %v3973_v0  ;;  %v11898_v0 = vld [vmem:[#allocation46_spill] sm:$0xff] }
 0x37d   : > { %11886 = vst [vmem:[#allocation136_spill] sm:$0xff] %v9261_v35  ;;  %v9263_v56 = vld [vmem:[#allocation4 + $0xd8] sm:$0xff]  ;;  %v3944_v17 = vmul.f32 %v11763_v59, %v9261_v35  ;;  %v2763_v13 = vadd.f32 %v2731_v41, %v2663_v20  ;;  %11893 = vst [vmem:[#allocation138_spill] sm:$0xff] %v9297_v25  ;;  %v6369_v25 = vld [vmem:[#allocation3 + $0x80] sm:$0xff]  ;;  %v2630_v24 = vmul.f32 %v9079_v7, %v7644_v44 }
 0x37e   : > { %11887 = vst [vmem:[#allocation67_spill] sm:$0xff] %v9263_v56  ;;  %v3370_v1 = vadd.f32 %v3338_v22, %v3269_v31  ;;  %v9285_v35 = vmul.f32 %v11809_v19, %v9263_v56  ;;  %v4677_v55 = vadd.f32 %v11892_v6, %v4576_v29  ;;  %v9299_v31 = vld [vmem:[#allocation4 + $0xe0] sm:$0xff]  ;;  %v11895_v41 = vld [vmem:[#allocation139_spill] sm:$0xff]  ;;  %v2330_v56 = vmul.f32 %v11896_v21, %v7626_v37  ;;  %v9346_v44 = vld [vmem:[#allocation2 + $0x88] sm:$0xff] }
 0x37f   : > { %11894 = vst [vmem:[#allocation48_spill] sm:$0xff] %v9299_v31  ;;  %v2864_v54 = vadd.f32 %v2832_v32, %v2763_v13  ;;  %v2230_v20 = vmul.f32 %v11895_v41, %v7623_v46  ;;  %v11897_v29 = vld [vmem:[#allocation44_spill] sm:$0xff]  ;;  %v3135_v32 = vmul.f32 %v6369_v25, %v11768_v15  ;;  %v11899_v46 = vld [vmem:[#allocation141_spill] sm:$0xff] }
 0x380   : > { %v3471_v22 = vadd.f32 %v3439_v48, %v3370_v1  ;;  %v4778_v6 = vadd.f32 %v11897_v29, %v4677_v55  ;;  %v4175_v1 = vadd.f32 %v9172_v49, %v4074_v10  ;;  %v2430_v48 = vmul.f32 %v11898_v0, %v7632_v50  ;;  %v9340_v25 = vld [vmem:[#allocation3 + $0x88] sm:$0xff] }
 0x381   : > { %v2965_v3 = vadd.f32 %v2933_v14, %v2864_v54  ;;  %v2362_v13 = vadd.f32 %v2330_v56, %v2230_v20  ;;  %v9318_v49 = vmul.f32 %v11785_v40, %v9299_v31  ;;  %v9326_v14 = vld [vmem:[#allocation2 + $0xe8] sm:$0xff]  ;;  %v11904_v54 = vld [vmem:[#allocation51_spill] sm:$0xff] }
 0x382   : > { %v3572_v18 = vadd.f32 %v3540_v43, %v3471_v22  ;;  %v4879_v41 = vadd.f32 %v11899_v46, %v4778_v6  ;;  %v4276_v37 = vadd.f32 %v9176_v23, %v4175_v1  ;;  %v9320_v43 = vld [vmem:[#allocation3 + $0xe8] sm:$0xff]  ;;  %11901 = vst [vmem:[#allocation139_spill] sm:$0xff] %v9326_v14  ;;  %v9336_v10 = vmul.f32 %v8811_v36, %v9326_v14  ;;  %v11924_v14 = vld [vmem:[#allocation63_spill] sm:$0xff] }
 0x383   : > { %11900 = vst [vmem:[#allocation52_spill] sm:$0xff] %v9320_v43  ;;  %v9324_v50 = vmul.f32 %v11788_v62, %v9320_v43  ;;  %v3066_v56 = vadd.f32 %v3034_v53, %v2965_v3  ;;  %v2462_v55 = vadd.f32 %v2430_v48, %v2362_v13  ;;  %v9338_v22 = vld [vmem:[#allocation4 + $0xe8] sm:$0xff]  ;;  %v3438_v48 = vmul.f32 %v11741_v63, %v9340_v25  ;;  %v11907_v13 = vld [vmem:[#allocation24_spill] sm:$0xff] }
 0x384   : > { %v3673_v21 = vadd.f32 %v3641_v12, %v3572_v18  ;;  %v9331_v26 = vadd.f32 %v11860_v8, %v4879_v41  ;;  %v4377_v23 = vadd.f32 %v9185_v34, %v4276_v37  ;;  %11903 = vst [vmem:[#allocation44_spill] sm:$0xff] %v9338_v22  ;;  %v9344_v53 = vmul.f32 %v8871_v9, %v9338_v22  ;;  %v11905_v6 = vld [vmem:[#allocation149_spill] sm:$0xff]  ;;  %v11906_v18 = vld [vmem:[#allocation78_spill] sm:$0xff] }
 0x385   : > { %v3167_v3 = vadd.f32 %v3135_v32, %v3066_v56  ;;  %v2562_v7 = vadd.f32 %v2530_v27, %v2462_v55  ;;  %v2730_v34 = vmul.f32 %v9091_v47, %v7648_v57  ;;  %v3337_v1 = vmul.f32 %v11905_v6, %v11780_v30  ;;  %v11908_v57 = vld [vmem:[#allocation142_spill] sm:$0xff]  ;;  %v11910_v56 = vld [vmem:[#allocation37_spill] sm:$0xff] }
 0x386   : > { %11902 = vst [vmem:[#allocation49_spill] sm:$0xff] %v9331_v26  ;;  %v3774_v12 = vadd.f32 %v3742_v45, %v3673_v21  ;;  %v4951_v45 = vsel %vm2002_vm1, %v9331_v26, 0.0  ;;  %v4478_v20 = vadd.f32 %v11904_v54, %v4377_v23  ;;  %v2831_v27 = vmul.f32 %v7655_v28, %v11907_v13  ;;  %v11913_v54 = vld [vmem:[#allocation153_spill] sm:$0xff] }
 0x387   : > { %4952 = vadd.xlane.f32.xlu1 %v4951_v45  ;;  %v3268_v0 = vadd.f32 %v11906_v18, %v3167_v3  ;;  %v2662_v32 = vadd.f32 %v2630_v24, %v2562_v7  ;;  %v3539_v41 = vmul.f32 %v11745_v60, %v9346_v44  ;;  %v3741_v55 = vmul.f32 %v11910_v56, %v9215_v51  ;;  %v11912_v3 = vld [vmem:[#allocation151_spill] sm:$0xff]  ;;  %v11923_v22 = vld [vmem:[#allocation65_spill] sm:$0xff] }
 0x388   : > { %v3875_v29 = vadd.f32 %v3843_v52, %v3774_v12  ;;  %v4579_v47 = vadd.f32 %v11908_v57, %v4478_v20  ;;  %v11909_v52 = vld [vmem:[#allocation45_spill] sm:$0xff]  ;;  %v11911_v12 = vld [vmem:[#allocation127_spill] sm:$0xff]  ;;  %v3068_v43 = vadd.f32 %v11924_v14, %v11923_v22 }
 0x389   : > { %v3640_v37 = vmul.f32 %v11748_v11, %v11909_v52  ;;  %v3369_v21 = vadd.f32 %v3337_v1, %v3268_v0  ;;  %v2762_v23 = vadd.f32 %v2730_v34, %v2662_v32  ;;  %v2932_v24 = vmul.f32 %v7663_v61, %v11911_v12  ;;  %v11916_v1 = vld [vmem:[#allocation58_spill] sm:$0xff]  ;;  %v11917_v51 = vld [vmem:[#allocation131_spill] sm:$0xff]  ;;  %v3101_v32 = vld [vmem:[#allocation3 + $0xa0] sm:$0xff] }
 0x38a   : > { %v3976_v46 = vadd.f32 %v3944_v17, %v3875_v29  ;;  %v4680_v7 = vadd.f32 %v11912_v3, %v4579_v47  ;;  %v11914_v17 = vld [vmem:[#allocation35_spill] sm:$0xff]  ;;  %v11915_v29 = vld [vmem:[#allocation154_spill] sm:$0xff]  ;;  %v4044_v0 = vmul.f32 %v11916_v1, %v11802_v33  ;;  %v3033_v34 = vmul.f32 %v7673_v4, %v11917_v51  ;;  %v11918_v12 = vld [vmem:[#allocation152_spill] sm:$0xff] }
 0x38b   : > { %v3842_v20 = vmul.f32 %v11914_v17, %v11913_v54  ;;  %v3943_v18 = vmul.f32 %v11763_v59, %v11915_v29  ;;  %v3470_v13 = vadd.f32 %v3438_v48, %v3369_v21  ;;  %v2863_v57 = vadd.f32 %v2831_v27, %v2762_v23  ;;  %v11920_v3 = vld [vmem:[#allocation150_spill] sm:$0xff]  ;;  %v3202_v48 = vld [vmem:[#allocation2 + $0xa0] sm:$0xff]  ;;  %v11921_v29 = vld [vmem:[#allocation55_spill] sm:$0xff] }
 0x38c   : > { %v4077_v45 = vadd.f32 %v9271_v16, %v3976_v46  ;;  %v4781_v26 = vadd.f32 %v11918_v12, %v4680_v7  ;;  %v11919_v16 = vld [vmem:[#allocation43_spill] sm:$0xff]  ;;  %v9385_v54 = vmul.f32 %v11920_v3, %v11809_v19  ;;  %v9389_v27 = vmul.f32 %v11772_v2, %v11921_v29  ;;  %v3303_v7 = vld [vmem:[#allocation4 + $0xa0] sm:$0xff] }
 0x38d   : > { %v4145_v46 = vmul.f32 %v11919_v16, %v11806_v5  ;;  %v3571_v21 = vadd.f32 %v3539_v41, %v3470_v13  ;;  %v2964_v23 = vadd.f32 %v2932_v24, %v2863_v57  ;;  %v6370_v51 = vld [vmem:[#allocation3 + $0x78] sm:$0xff]  ;;  %v11922_v12 = vld [vmem:[#allocation76_spill] sm:$0xff]  ;;  %v3137_v4 = vmul.f32 %v11768_v15, %v3101_v32  ;;  %v11925_v24 = vld [vmem:[#allocation30_spill] sm:$0xff] }
 0x38e   : > { %v4178_v47 = vadd.f32 %v9281_v42, %v4077_v45  ;;  %v3134_v28 = vmul.f32 %v6370_v51, %v11768_v15  ;;  %v4882_v42 = vadd.f32 %v11922_v12, %v4781_v26  ;;  %v9399_v41 = vmul.f32 %v11775_v58, %v9252_v39  ;;  %v11927_v14 = vld [vmem:[#allocation67_spill] sm:$0xff] }
 0x38f   : > { %v3672_v61 = vadd.f32 %v3640_v37, %v3571_v21  ;;  %v3065_v13 = vadd.f32 %v3033_v34, %v2964_v23  ;;  %v3238_v57 = vmul.f32 %v11925_v24, %v3202_v48  ;;  %v3169_v12 = vadd.f32 %v3137_v4, %v3068_v43  ;;  %v11928_v37 = vld [vmem:[#allocation156_spill] sm:$0xff]  ;;  %v3404_v21 = vld [vmem:[#allocation3 + $0xa8] sm:$0xff]  ;;  %v11929_v23 = vld [vmem:[#allocation138_spill] sm:$0xff] }
 0x390   : > { %v4279_v45 = vadd.f32 %v9285_v35, %v4178_v47  ;;  %v9403_v51 = vadd.f32 %v11860_v8, %v4882_v42  ;;  %v3339_v35 = vmul.f32 %v11780_v30, %v3303_v7  ;;  %v9409_v22 = vmul.f32 %v11785_v40, %v11927_v14  ;;  %v11931_v7 = vld [vmem:[#allocation69_spill] sm:$0xff] }
 0x391   : > { %v3773_v47 = vadd.f32 %v3741_v55, %v3672_v61  ;;  %v9413_v32 = vmul.f32 %v11788_v62, %v11928_v37  ;;  %v3166_v34 = vadd.f32 %v3134_v28, %v3065_v13  ;;  %v3270_v61 = vadd.f32 %v3238_v57, %v3169_v12  ;;  %v11932_v28 = vld [vmem:[#allocation50_spill] sm:$0xff]  ;;  %v3505_v24 = vld [vmem:[#allocation2 + $0xa8] sm:$0xff] }
 0x392   : > { %11926 = vst [vmem:[#allocation46_spill] sm:$0xff] %v9403_v51  ;;  %v4380_v26 = vadd.f32 %v9289_v38, %v4279_v45  ;;  %v4960_v48 = vsel %vm2002_vm1, %v9403_v51, 0.0  ;;  %v11930_v38 = vld [vmem:[#allocation157_spill] sm:$0xff]  ;;  %v9424_v55 = vmul.f32 %v8871_v9, %v9299_v31  ;;  %v3336_v13 = vmul.f32 %v11932_v28, %v11780_v30 }
 0x393   : > { %v9420_v4 = vmul.f32 %v8811_v36, %v11930_v38  ;;  %4961 = vadd.xlane.f32.xlu0 %v4960_v48  ;;  %v3874_v43 = vadd.f32 %v3842_v20, %v3773_v47  ;;  %v3267_v45 = vadd.f32 %v11931_v7, %v3166_v34  ;;  %v3371_v38 = vadd.f32 %v3339_v35, %v3270_v61  ;;  %v11934_v47 = vld [vmem:[#allocation148_spill] sm:$0xff]  ;;  %v9437_v7 = vld [vmem:[#allocation4 + $0xa8] sm:$0xff] }
 0x394   : > { %v4481_v42 = vadd.f32 %v11929_v23, %v4380_v26  ;;  %v11933_v26 = vld [vmem:[#allocation31_spill] sm:$0xff]  ;;  %v3440_v57 = vmul.f32 %v11741_v63, %v3404_v21  ;;  %v3538_v48 = vmul.f32 %v11934_v47, %v11745_v60  ;;  %v3639_v34 = vmul.f32 %v11905_v6, %v11748_v11 }
 0x395   : > { %v3437_v23 = vmul.f32 %v11933_v26, %v11741_v63  ;;  %v3975_v12 = vadd.f32 %v3943_v18, %v3874_v43  ;;  %v3368_v20 = vadd.f32 %v3336_v13, %v3267_v45  ;;  %v3541_v35 = vmul.f32 %v11745_v60, %v3505_v24  ;;  %v9447_v45 = vld [vmem:[#allocation3 + $0xb0] sm:$0xff]  ;;  %v11937_v26 = vld [vmem:[#allocation64_spill] sm:$0xff] }
 0x396   : > { %v4582_v51 = vadd.f32 %v9318_v49, %v4481_v42  ;;  %v3740_v49 = vmul.f32 %v11910_v56, %v9340_v25  ;;  %v3472_v42 = vadd.f32 %v3440_v57, %v3371_v38  ;;  %v3841_v18 = vmul.f32 %v11914_v17, %v9346_v44  ;;  %v11935_v25 = vld [vmem:[#allocation79_spill] sm:$0xff]  ;;  %v9456_v44 = vld [vmem:[#allocation2 + $0xb0] sm:$0xff] }
 0x397   : > { %v4076_v61 = vadd.f32 %v4044_v0, %v3975_v12  ;;  %v3469_v21 = vadd.f32 %v3437_v23, %v3368_v20  ;;  %v3942_v43 = vmul.f32 %v11763_v59, %v11909_v52  ;;  %v4043_v23 = vmul.f32 %v11937_v26, %v11802_v33  ;;  %v6371_v57 = vld [vmem:[#allocation3 + $0xb8] sm:$0xff] }
 0x398   : > { %v4683_v28 = vadd.f32 %v9324_v50, %v4582_v51  ;;  %v3573_v13 = vadd.f32 %v3541_v35, %v3472_v42  ;;  %v3642_v50 = vmul.f32 %v11748_v11, %v9437_v7  ;;  %v11936_v51 = vld [vmem:[#allocation73_spill] sm:$0xff]  ;;  %v3140_v52 = vmul.f32 %v6371_v57, %v11768_v15  ;;  %v9464_v42 = vld [vmem:[#allocation4 + $0xb8] sm:$0xff] }
 0x399   : > { %v3071_v38 = vadd.f32 %v11936_v51, %v11935_v25  ;;  %v4177_v24 = vadd.f32 %v4145_v46, %v4076_v61  ;;  %v3570_v0 = vadd.f32 %v3538_v48, %v3469_v21  ;;  %v11939_v35 = vld [vmem:[#allocation147_spill] sm:$0xff]  ;;  %v9469_v21 = vld [vmem:[#allocation4 + $0xb0] sm:$0xff]  ;;  %v9480_v51 = vld [vmem:[#allocation3 + $0xc0] sm:$0xff]  ;;  %v3342_v26 = vmul.f32 %v11780_v30, %v9464_v42 }
 0x39a   : > { %v4784_v6 = vadd.f32 %v9336_v10, %v4683_v28  ;;  %v11938_v10 = vld [vmem:[#allocation144_spill] sm:$0xff]  ;;  %v3674_v47 = vadd.f32 %v3642_v50, %v3573_v13  ;;  %v3743_v28 = vmul.f32 %v11910_v56, %v9447_v45  ;;  %v4245_v61 = vmul.f32 %v11939_v35, %v11809_v19 }
 0x39b   : > { %v4144_v20 = vmul.f32 %v11938_v10, %v11806_v5  ;;  %v4278_v46 = vadd.f32 %v9385_v54, %v4177_v24  ;;  %v3671_v48 = vadd.f32 %v3639_v34, %v3570_v0  ;;  %v3172_v25 = vadd.f32 %v3140_v52, %v3071_v38  ;;  %v9483_v24 = vld [vmem:[#allocation3 + $0xf0] sm:$0xff]  ;;  %v11942_v0 = vld [vmem:[#allocation89_spill] sm:$0xff] }
 0x39c   : > { %v4885_v12 = vadd.f32 %v9344_v53, %v4784_v6  ;;  %v9476_v6 = vmul.f32 %v11916_v1, %v11772_v2  ;;  %v3775_v13 = vadd.f32 %v3743_v28, %v3674_v47  ;;  %v3844_v50 = vmul.f32 %v11914_v17, %v9456_v44  ;;  %11941 = vst [vmem:[#allocation51_spill] sm:$0xff] %v9483_v24  ;;  %v9494_v47 = vld [vmem:[#allocation2 + $0xc0] sm:$0xff]  ;;  %v9497_v28 = vld [vmem:[#allocation2 + $0xf0] sm:$0xff] }
 0x39d   : > { %v4379_v54 = vadd.f32 %v9389_v27, %v4278_v46  ;;  %v3772_v34 = vadd.f32 %v3740_v49, %v3671_v48  ;;  %v3273_v38 = vadd.f32 %v11942_v0, %v3172_v25  ;;  %v4046_v10 = vmul.f32 %v11802_v33, %v9483_v24  ;;  %11943 = vst [vmem:[#allocation149_spill] sm:$0xff] %v9497_v28  ;;  %v9509_v0 = vld [vmem:[#allocation4 + $0xc0] sm:$0xff] }
 0x39e   : > { %v9472_v53 = vadd.f32 %v11860_v8, %v4885_v12  ;;  %v3876_v52 = vadd.f32 %v3844_v50, %v3775_v13  ;;  %v3945_v12 = vmul.f32 %v11763_v59, %v9469_v21  ;;  %v3443_v48 = vmul.f32 %v11741_v63, %v9480_v51 }
 0x39f   : > { %v4480_v27 = vadd.f32 %v9399_v41, %v4379_v54  ;;  %v3873_v49 = vadd.f32 %v3841_v18, %v3772_v34  ;;  %v3374_v46 = vadd.f32 %v3342_v26, %v3273_v38  ;;  %v4447_v35 = vmul.f32 %v11919_v16, %v11775_v58  ;;  %v9512_v54 = vld [vmem:[#allocation4 + $0xf0] sm:$0xff]  ;;  %v11965_v16 = vld [vmem:[#allocation53_spill] sm:$0xff] }
 0x3a0   : > { %11940 = vst [vmem:[#allocation141_spill] sm:$0xff] %v9472_v53  ;;  %v4969_v57 = vsel %vm2002_vm1, %v9472_v53, 0.0  ;;  %v9505_v25 = vmul.f32 %v11920_v3, %v11785_v40  ;;  %v3977_v13 = vadd.f32 %v3945_v12, %v3876_v52  ;;  %v4147_v50 = vmul.f32 %v11806_v5, %v9497_v28  ;;  %11944 = vst [vmem:[#allocation78_spill] sm:$0xff] %v9512_v54  ;;  %v9522_v12 = vld [vmem:[#allocation3 + $0xc8] sm:$0xff]  ;;  %v11945_v53 = vld [vmem:[#allocation56_spill] sm:$0xff] }
 0x3a1   : > { %4970 = vadd.xlane.f32.xlu1 %v4969_v57  ;;  %v4581_v41 = vadd.f32 %v9409_v22, %v4480_v27  ;;  %v3974_v18 = vadd.f32 %v3942_v43, %v3873_v49  ;;  %v3475_v34 = vadd.f32 %v3443_v48, %v3374_v46  ;;  %v3544_v38 = vmul.f32 %v11745_v60, %v9494_v47  ;;  %v11946_v28 = vld [vmem:[#allocation59_spill] sm:$0xff] }
 0x3a2   : > { %v9518_v26 = vmul.f32 %v11788_v62, %v11921_v29  ;;  %v4078_v57 = vadd.f32 %v4046_v10, %v3977_v13  ;;  %v4248_v52 = vmul.f32 %v11809_v19, %v9512_v54  ;;  %v2767_v22 = vadd.f32 %v11946_v28, %v11945_v53  ;;  %v9527_v49 = vld [vmem:[#allocation3 + $0xf8] sm:$0xff]  ;;  %v9539_v54 = vld [vmem:[#allocation2 + $0xc8] sm:$0xff] }
 0x3a3   : > { %v4682_v43 = vadd.f32 %v9413_v32, %v4581_v41  ;;  %v4075_v27 = vadd.f32 %v4043_v23, %v3974_v18  ;;  %v3576_v46 = vadd.f32 %v3544_v38, %v3475_v34  ;;  %v3645_v48 = vmul.f32 %v11748_v11, %v9509_v0  ;;  %v11947_v53 = vld [vmem:[#allocation61_spill] sm:$0xff]  ;;  %v9543_v41 = vld [vmem:[#allocation2 + $0xf8] sm:$0xff] }
 0x3a4   : > { %v9533_v29 = vmul.f32 %v8811_v36, %v9252_v39  ;;  %v9537_v10 = vmul.f32 %v8871_v9, %v11927_v14  ;;  %v4179_v13 = vadd.f32 %v4147_v50, %v4078_v57  ;;  %v2868_v32 = vadd.f32 %v11947_v53, %v2767_v22  ;;  %11948 = vst [vmem:[#allocation24_spill] sm:$0xff] %v9543_v41  ;;  %v9545_v18 = vld [vmem:[#allocation4 + $0xf8] sm:$0xff]  ;;  %v9551_v50 = vld [vmem:[#allocation4 + $0xc8] sm:$0xff]  ;;  %v6372_v22 = vld [vmem:[#allocation3 + $0xb0] sm:$0xff] }
 0x3a5   : > { %v4783_v23 = vadd.f32 %v9420_v4, %v4682_v43  ;;  %v4176_v28 = vadd.f32 %v4144_v20, %v4075_v27  ;;  %11949 = vst [vmem:[#allocation142_spill] sm:$0xff] %v9545_v18  ;;  %v3677_v34 = vadd.f32 %v3645_v48, %v3576_v46  ;;  %v3746_v39 = vmul.f32 %v11910_v56, %v9522_v12  ;;  %v11951_v57 = vld [vmem:[#allocation57_spill] sm:$0xff]  ;;  %v9556_v27 = vld [vmem:[#allocation3 + $0x100] sm:$0xff] }
 0x3a6   : > { %v4280_v38 = vadd.f32 %v4248_v52, %v4179_v13  ;;  %v4349_v24 = vmul.f32 %v11772_v2, %v9527_v49  ;;  %11950 = vst [vmem:[#allocation45_spill] sm:$0xff] %v9551_v50  ;;  %v2969_v31 = vadd.f32 %v11951_v57, %v2868_v32  ;;  %v3139_v4 = vmul.f32 %v6372_v22, %v11768_v15  ;;  %v9558_v46 = vld [vmem:[#allocation2 + $0x100] sm:$0xff]  ;;  %v9566_v57 = vld [vmem:[#allocation3 + $0x108] sm:$0xff]  ;;  %v11955_v22 = vld [vmem:[#allocation62_spill] sm:$0xff] }
 0x3a7   : > { %v4884_v20 = vadd.f32 %v9424_v55, %v4783_v23  ;;  %v4277_v43 = vadd.f32 %v4245_v61, %v4176_v28  ;;  %11952 = vst [vmem:[#allocation37_spill] sm:$0xff] %v9556_v27  ;;  %11953 = vst [vmem:[#allocation127_spill] sm:$0xff] %v9558_v46  ;;  %v3778_v48 = vadd.f32 %v3746_v39, %v3677_v34  ;;  %v9573_v28 = vld [vmem:[#allocation4 + $0x100] sm:$0xff]  ;;  %v9581_v14 = vld [vmem:[#allocation2 + $0x108] sm:$0xff] }
 0x3a8   : > { %v3847_v52 = vmul.f32 %v11914_v17, %v9539_v54  ;;  %v4381_v13 = vadd.f32 %v4349_v24, %v4280_v38  ;;  %v4450_v53 = vmul.f32 %v11775_v58, %v9543_v41  ;;  %v4551_v32 = vmul.f32 %v11785_v40, %v9545_v18  ;;  %11954 = vst [vmem:[#allocation151_spill] sm:$0xff] %v9566_v57  ;;  %v6373_v18 = vld [vmem:[#allocation3 + $0xa8] sm:$0xff] }
 0x3a9   : > { %v3070_v55 = vadd.f32 %v11955_v22, %v2969_v31  ;;  %v9570_v61 = vadd.f32 %v11860_v8, %v4884_v20  ;;  %v4378_v23 = vadd.f32 %v9476_v6, %v4277_v43  ;;  %11957 = vst [vmem:[#allocation35_spill] sm:$0xff] %v9573_v28  ;;  %v3948_v24 = vmul.f32 %v11763_v59, %v9551_v50  ;;  %v9583_v8 = vld [vmem:[#allocation3 + $0xb8] sm:$0xff]  ;;  %v9593_v22 = vld [vmem:[#allocation3 + $0x110] sm:$0xff] }
 0x3aa   : > { %v3879_v34 = vadd.f32 %v3847_v52, %v3778_v48  ;;  %v4482_v39 = vadd.f32 %v4450_v53, %v4381_v13  ;;  %v4652_v38 = vmul.f32 %v11788_v62, %v9556_v27  ;;  %v4753_v37 = vmul.f32 %v8811_v36, %v9558_v46  ;;  %11958 = vst [vmem:[#allocation154_spill] sm:$0xff] %v9581_v14  ;;  %v9591_v53 = vld [vmem:[#allocation4 + $0x108] sm:$0xff]  ;;  %v9617_v50 = vld [vmem:[#allocation3 + $0x118] sm:$0xff] }
 0x3ab   : > { %11956 = vst [vmem:[#allocation153_spill] sm:$0xff] %v9570_v61  ;;  %v3171_v31 = vadd.f32 %v3139_v4, %v3070_v55  ;;  %v4966_v6 = vsel %vm2002_vm1, %v9570_v61, 0.0  ;;  %v4479_v20 = vadd.f32 %v4447_v35, %v4378_v23  ;;  %v4049_v48 = vmul.f32 %v11802_v33, %v9566_v57  ;;  %11959 = vst [vmem:[#allocation131_spill] sm:$0xff] %v9591_v53  ;;  %v11961_v4 = vld [vmem:[#allocation93_spill] sm:$0xff]  ;;  %v9607_v61 = vld [vmem:[#allocation4 + $0x110] sm:$0xff] }
 0x3ac   : > { %v3980_v43 = vadd.f32 %v3948_v24, %v3879_v34  ;;  %4967 = vadd.xlane.f32.xlu0 %v4966_v6  ;;  %v4583_v52 = vadd.f32 %v4551_v32, %v4482_v39  ;;  %v4854_v13 = vmul.f32 %v8871_v9, %v9573_v28  ;;  %11960 = vst [vmem:[#allocation152_spill] sm:$0xff] %v9593_v22  ;;  %v9603_v24 = vld [vmem:[#allocation2 + $0xb8] sm:$0xff]  ;;  %v9605_v6 = vld [vmem:[#allocation2 + $0x110] sm:$0xff]  ;;  %11963 = vst [vmem:[#allocation76_spill] sm:$0xff] %v9607_v61 }
 0x3ad   : > { %v3272_v55 = vadd.f32 %v11961_v4, %v3171_v31  ;;  %v3341_v3 = vmul.f32 %v9469_v21, %v11780_v30  ;;  %v4580_v35 = vadd.f32 %v9505_v25, %v4479_v20  ;;  %v4150_v34 = vmul.f32 %v11806_v5, %v9581_v14  ;;  %11962 = vst [vmem:[#allocation55_spill] sm:$0xff] %v9605_v6  ;;  %v11964_v4 = vld [vmem:[#allocation68_spill] sm:$0xff] }
 0x3ae   : > { %v4081_v23 = vadd.f32 %v4049_v48, %v3980_v43  ;;  %v3442_v32 = vmul.f32 %v11741_v63, %v9583_v8  ;;  %v4684_v39 = vadd.f32 %v4652_v38, %v4583_v52  ;;  %v2968_v1 = vadd.f32 %v11965_v16, %v11964_v4  ;;  %11966 = vst [vmem:[#allocation65_spill] sm:$0xff] %v9617_v50  ;;  %v11967_v16 = vld [vmem:[#allocation60_spill] sm:$0xff] }
 0x3af   : > { %v3373_v31 = vadd.f32 %v3341_v3, %v3272_v55  ;;  %v3138_v25 = vmul.f32 %v6373_v18, %v11768_v15  ;;  %v4681_v20 = vadd.f32 %v9518_v26, %v4580_v35  ;;  %v4251_v48 = vmul.f32 %v11809_v19, %v9591_v53 }
 0x3b0   : > { %v4182_v43 = vadd.f32 %v4150_v34, %v4081_v23  ;;  %v4352_v38 = vmul.f32 %v11772_v2, %v9593_v22  ;;  %v4785_v52 = vadd.f32 %v4753_v37, %v4684_v39  ;;  %v3543_v3 = vmul.f32 %v11745_v60, %v9603_v24  ;;  %v9627_v34 = vld [vmem:[#allocation2 + $0x118] sm:$0xff] }
 0x3b1   : > { %v3474_v41 = vadd.f32 %v3442_v32, %v3373_v31  ;;  %v3069_v55 = vadd.f32 %v11967_v16, %v2968_v1  ;;  %v4782_v18 = vadd.f32 %v9533_v29, %v4681_v20  ;;  %v4453_v26 = vmul.f32 %v11775_v58, %v9605_v6  ;;  %11968 = vst [vmem:[#allocation63_spill] sm:$0xff] %v9627_v34 }
 0x3b2   : > { %v4283_v4 = vadd.f32 %v4251_v48, %v4182_v43  ;;  %v4554_v35 = vmul.f32 %v11785_v40, %v9607_v61  ;;  %v4886_v23 = vadd.f32 %v4854_v13, %v4785_v52  ;;  %v3644_v32 = vmul.f32 %v11748_v11, %v9464_v42  ;;  %v9639_v13 = vld [vmem:[%s11367_s8] ss:$0 sm:$0xff]  ;;  %v9644_v43 = vld [vmem:[#allocation4 + $0x118] sm:$0xff]  ;;  %v11971_v48 = vld [vmem:[#allocation90_spill] sm:$0xff] }
 0x3b3   : > { %v3575_v37 = vadd.f32 %v3543_v3, %v3474_v41  ;;  %v3170_v39 = vadd.f32 %v3138_v25, %v3069_v55  ;;  %v4883_v31 = vadd.f32 %v9537_v10, %v4782_v18  ;;  %v4655_v29 = vmul.f32 %v11788_v62, %v9617_v50  ;;  %11970 = vst [vmem:[#allocation69_spill] sm:$0xff] %v9644_v43 }
 0x3b4   : > { %v4384_v1 = vadd.f32 %v4352_v38, %v4283_v4  ;;  %v3745_v20 = vmul.f32 %v11910_v56, %v9480_v51  ;;  %v9642_v41 = vadd.f32 %v9639_v13, %v4886_v23  ;;  %v3340_v38 = vmul.f32 %v9437_v7, %v11780_v30 }
 0x3b5   : > { %v3676_v25 = vadd.f32 %v3644_v32, %v3575_v37  ;;  %v3271_v10 = vadd.f32 %v11971_v48, %v3170_v39  ;;  %v9650_v52 = vadd.f32 %v9639_v13, %v4883_v31  ;;  %v4756_v3 = vmul.f32 %v8811_v36, %v9627_v34 }
 0x3b6   : > { %11969 = vst [vmem:[#allocation138_spill] sm:$0xff] %v9642_v41  ;;  %v4485_v51 = vadd.f32 %v4453_v26, %v4384_v1  ;;  %v3846_v16 = vmul.f32 %v11914_v17, %v9494_v47  ;;  %v4972_v55 = vsel %vm2002_vm1, %v9642_v41, 0.0  ;;  %v3441_v23 = vmul.f32 %v9447_v45, %v11741_v63 }
 0x3b7   : > { %11972 = vst [vmem:[#allocation50_spill] sm:$0xff] %v9650_v52  ;;  %v3777_v18 = vadd.f32 %v3745_v20, %v3676_v25  ;;  %v3372_v4 = vadd.f32 %v3340_v38, %v3271_v10  ;;  %v4963_v7 = vsel %vm2002_vm1, %v9650_v52, 0.0  ;;  %4973 = vadd.xlane.f32.xlu0 %v4972_v55  ;;  %v4857_v26 = vmul.f32 %v8871_v9, %v9644_v43  ;;  %v11974_v25 = vld [vmem:[#allocation81_spill] sm:$0xff]  ;;  %v6375_v10 = vld [vmem:[#allocation3 + $0xc0] sm:$0xff] }
 0x3b8   : > { %v4586_v37 = vadd.f32 %v4554_v35, %v4485_v51  ;;  %v3947_v32 = vmul.f32 %v11763_v59, %v9509_v0  ;;  %4964 = vadd.xlane.f32.xlu1 %v4963_v7  ;;  %v4048_v39 = vmul.f32 %v9556_v27, %v11802_v33  ;;  %v3542_v45 = vmul.f32 %v9456_v44, %v11745_v60  ;;  %v11973_v35 = vld [vmem:[#allocation82_spill] sm:$0xff] }
 0x3b9   : > { %v3878_v47 = vadd.f32 %v3846_v16, %v3777_v18  ;;  %v3473_v31 = vadd.f32 %v3441_v23, %v3372_v4  ;;  %v4149_v20 = vmul.f32 %v9558_v46, %v11806_v5  ;;  %v3072_v48 = vadd.f32 %v11974_v25, %v11973_v35 }
 0x3ba   : > { %v4687_v1 = vadd.f32 %v4655_v29, %v4586_v37  ;;  %v3141_v38 = vmul.f32 %v6375_v10, %v11768_v15  ;;  %v4250_v16 = vmul.f32 %v9573_v28, %v11809_v19  ;;  %v3643_v18 = vmul.f32 %v9469_v21, %v11748_v11 }
 0x3bb   : > { %v3979_v51 = vadd.f32 %v3947_v32, %v3878_v47  ;;  %v3574_v55 = vadd.f32 %v3542_v45, %v3473_v31  ;;  %v4351_v44 = vmul.f32 %v11772_v2, %v9566_v57  ;;  %v4452_v29 = vmul.f32 %v11775_v58, %v9581_v14 }
 0x3bc   : > { %v4788_v4 = vadd.f32 %v4756_v3, %v4687_v1  ;;  %v3173_v23 = vadd.f32 %v3141_v38, %v3072_v48  ;;  %v4553_v37 = vmul.f32 %v11785_v40, %v9591_v53  ;;  %v3744_v47 = vmul.f32 %v11910_v56, %v9583_v8  ;;  %v11975_v3 = vld [vmem:[#allocation92_spill] sm:$0xff] }
 0x3bd   : > { %v4080_v7 = vadd.f32 %v4048_v39, %v3979_v51  ;;  %v3675_v32 = vadd.f32 %v3643_v18, %v3574_v55  ;;  %v4654_v21 = vmul.f32 %v11788_v62, %v9593_v22  ;;  %v3343_v1 = vmul.f32 %v9509_v0, %v11780_v30 }
 0x3be   : > { %v4889_v31 = vadd.f32 %v4857_v26, %v4788_v4  ;;  %v3274_v45 = vadd.f32 %v11975_v3, %v3173_v23  ;;  %v4755_v39 = vmul.f32 %v8811_v36, %v9605_v6  ;;  %v3845_v48 = vmul.f32 %v11914_v17, %v9603_v24  ;;  %v11977_v23 = vld [vmem:[#allocation27_spill] sm:$0xff]  ;;  %v11981_v3 = vld [vmem:[#allocation136_spill] sm:$0xff] }
 0x3bf   : > { %v4181_v35 = vadd.f32 %v4149_v20, %v4080_v7  ;;  %v3776_v25 = vadd.f32 %v3744_v47, %v3675_v32  ;;  %v4856_v8 = vmul.f32 %v8871_v9, %v9607_v61  ;;  %v3444_v38 = vmul.f32 %v9522_v12, %v11741_v63  ;;  %v11978_v7 = vld [vmem:[#allocation155_spill] sm:$0xff]  ;;  %v11979_v47 = vld [vmem:[#allocation24_spill] sm:$0xff] }
 0x3c0   : > { %v9697_v10 = vadd.f32 %v9639_v13, %v4889_v31  ;;  %v3375_v26 = vadd.f32 %v3343_v1, %v3274_v45  ;;  %v3946_v20 = vmul.f32 %v11763_v59, %v9464_v42  ;;  %v4047_v55 = vmul.f32 %v9527_v49, %v11802_v33  ;;  %v11980_v42 = vld [vmem:[#allocation28_spill] sm:$0xff] }
 0x3c1   : > { %v4282_v51 = vadd.f32 %v4250_v16, %v4181_v35  ;;  %v3877_v0 = vadd.f32 %v3845_v48, %v3776_v25  ;;  %v3545_v4 = vmul.f32 %v9539_v54, %v11745_v60  ;;  %v2942_v32 = vmul.f32 %v11978_v7, %v11977_v23  ;;  %v11982_v35 = vld [vmem:[#allocation45_spill] sm:$0xff]  ;;  %v6377_v23 = vld [vmem:[#allocation3 + $0xd0] sm:$0xff] }
 0x3c2   : > { %11976 = vst [vmem:[#allocation31_spill] sm:$0xff] %v9697_v10  ;;  %v4981_v24 = vsel %vm2002_vm1, %v9697_v10, 0.0  ;;  %v3476_v18 = vadd.f32 %v3444_v38, %v3375_v26  ;;  %v4148_v31 = vmul.f32 %v11979_v47, %v11806_v5  ;;  %v3043_v45 = vmul.f32 %v11981_v3, %v11980_v42  ;;  %v11983_v48 = vld [vmem:[#allocation85_spill] sm:$0xff]  ;;  %v6376_v38 = vld [vmem:[#allocation3 + $0xd8] sm:$0xff] }
 0x3c3   : > { %4982 = vadd.xlane.f32.xlu1 %v4981_v24  ;;  %v4383_v12 = vadd.f32 %v4351_v44, %v4282_v51  ;;  %v3978_v16 = vadd.f32 %v3946_v20, %v3877_v0  ;;  %v3646_v25 = vmul.f32 %v11982_v35, %v11748_v11  ;;  %v2974_v26 = vadd.f32 %v2942_v32, %v11983_v48  ;;  %v11984_v44 = vld [vmem:[#allocation142_spill] sm:$0xff] }
 0x3c4   : > { %v3577_v1 = vadd.f32 %v3545_v4, %v3476_v18  ;;  %v3144_v54 = vmul.f32 %v6376_v38, %v11768_v15  ;;  %v4249_v51 = vmul.f32 %v11984_v44, %v11809_v19  ;;  %v4350_v0 = vmul.f32 %v9556_v27, %v11772_v2  ;;  %v11985_v18 = vld [vmem:[#allocation58_spill] sm:$0xff]  ;;  %v11986_v38 = vld [vmem:[#allocation43_spill] sm:$0xff] }
 0x3c5   : > { %v4484_v10 = vadd.f32 %v4452_v29, %v4383_v12  ;;  %v4079_v7 = vadd.f32 %v4047_v55, %v3978_v16  ;;  %v4451_v20 = vmul.f32 %v9558_v46, %v11775_v58  ;;  %v3747_v4 = vmul.f32 %v11985_v18, %v11910_v56 }
 0x3c6   : > { %v3678_v24 = vadd.f32 %v3646_v25, %v3577_v1  ;;  %v3075_v3 = vadd.f32 %v3043_v45, %v2974_v26  ;;  %v4552_v29 = vmul.f32 %v9573_v28, %v11785_v40  ;;  %v4653_v55 = vmul.f32 %v11788_v62, %v9566_v57 }
 0x3c7   : > { %v4585_v32 = vadd.f32 %v4553_v37, %v4484_v10  ;;  %v4180_v48 = vadd.f32 %v4148_v31, %v4079_v7  ;;  %v4754_v12 = vmul.f32 %v8811_v36, %v9581_v14  ;;  %v3848_v41 = vmul.f32 %v11986_v38, %v11914_v17  ;;  %v11987_v10 = vld [vmem:[#allocation150_spill] sm:$0xff]  ;;  %v11988_v7 = vld [vmem:[#allocation95_spill] sm:$0xff] }
 0x3c8   : > { %v3779_v16 = vadd.f32 %v3747_v4, %v3678_v24  ;;  %v3176_v1 = vadd.f32 %v3144_v54, %v3075_v3  ;;  %v4855_v37 = vmul.f32 %v8871_v9, %v9591_v53  ;;  %v3949_v31 = vmul.f32 %v11987_v10, %v11763_v59  ;;  %v11989_v24 = vld [vmem:[#allocation67_spill] sm:$0xff]  ;;  %v9801_v14 = vld [vmem:[#allocation3 + $0x130] sm:$0xff]  ;;  %v12015_v53 = vld [vmem:[#allocation72_spill] sm:$0xff] }
 0x3c9   : > { %v4686_v25 = vadd.f32 %v4654_v21, %v4585_v32  ;;  %v4281_v52 = vadd.f32 %v4249_v51, %v4180_v48  ;;  %v4050_v26 = vmul.f32 %v9593_v22, %v11802_v33  ;;  %v3346_v4 = vmul.f32 %v11989_v24, %v11780_v30  ;;  %v11991_v48 = vld [vmem:[#allocation86_spill] sm:$0xff]  ;;  %12007 = vst [vmem:[#allocation89_spill] sm:$0xff] %v9801_v14 }
 0x3ca   : > { %v3880_v45 = vadd.f32 %v3848_v41, %v3779_v16  ;;  %v3277_v18 = vadd.f32 %v11988_v7, %v3176_v1  ;;  %v4151_v21 = vmul.f32 %v9605_v6, %v11806_v5  ;;  %v4252_v54 = vmul.f32 %v9607_v61, %v11809_v19  ;;  %v11990_v41 = vld [vmem:[#allocation156_spill] sm:$0xff]  ;;  %v11992_v16 = vld [vmem:[#allocation70_spill] sm:$0xff] }
 0x3cb   : > { %v4787_v42 = vadd.f32 %v4755_v39, %v4686_v25  ;;  %v4382_v38 = vadd.f32 %v4350_v0, %v4281_v52  ;;  %v3447_v32 = vmul.f32 %v11990_v41, %v11741_v63  ;;  %v2771_v10 = vadd.f32 %v11992_v16, %v11991_v48  ;;  %v9758_v25 = vld [vmem:[#allocation3 + $0x120] sm:$0xff]  ;;  %v12010_v61 = vld [vmem:[#allocation110_spill] sm:$0xff] }
 0x3cc   : > { %v3981_v51 = vadd.f32 %v3949_v31, %v3880_v45  ;;  %v3378_v3 = vadd.f32 %v3346_v4, %v3277_v18  ;;  %v4353_v39 = vmul.f32 %v9617_v50, %v11772_v2  ;;  %v4454_v52 = vmul.f32 %v9627_v34, %v11775_v58  ;;  %v11993_v31 = vld [vmem:[#allocation157_spill] sm:$0xff] }
 0x3cd   : > { %v4888_v1 = vadd.f32 %v4856_v8, %v4787_v42  ;;  %v4483_v7 = vadd.f32 %v4451_v20, %v4382_v38  ;;  %v3548_v45 = vmul.f32 %v11993_v31, %v11745_v60  ;;  %v11994_v18 = vld [vmem:[#allocation77_spill] sm:$0xff]  ;;  %v11996_v42 = vld [vmem:[#allocation48_spill] sm:$0xff]  ;;  %v4356_v22 = vmul.f32 %v11772_v2, %v9801_v14 }
 0x3ce   : > { %v4082_v0 = vadd.f32 %v4050_v26, %v3981_v51  ;;  %v3479_v24 = vadd.f32 %v3447_v32, %v3378_v3  ;;  %v2872_v4 = vadd.f32 %v11994_v18, %v2771_v10  ;;  %v3649_v20 = vmul.f32 %v11996_v42, %v11748_v11  ;;  %v11997_v38 = vld [vmem:[#allocation52_spill] sm:$0xff]  ;;  %v12000_v32 = vld [vmem:[#allocation74_spill] sm:$0xff]  ;;  %v9786_v42 = vld [vmem:[#allocation2 + $0x128] sm:$0xff] }
 0x3cf   : > { %v9764_v41 = vadd.f32 %v9639_v13, %v4888_v1  ;;  %v4584_v8 = vadd.f32 %v4552_v29, %v4483_v7  ;;  %v3750_v48 = vmul.f32 %v11997_v38, %v11910_v56  ;;  %v9770_v26 = vld [vmem:[#allocation2 + $0x120] sm:$0xff]  ;;  %v3143_v10 = vmul.f32 %v6377_v23, %v11768_v15  ;;  %12003 = vst [vmem:[#allocation144_spill] sm:$0xff] %v9786_v42  ;;  %v9788_v23 = vld [vmem:[#allocation4 + $0x128] sm:$0xff] }
 0x3d0   : > { %v4183_v16 = vadd.f32 %v4151_v21, %v4082_v0  ;;  %11998 = vst [vmem:[#allocation79_spill] sm:$0xff] %v9770_v26  ;;  %v9772_v51 = vld [vmem:[#allocation4 + $0x120] sm:$0xff]  ;;  %v3580_v3 = vadd.f32 %v3548_v45, %v3479_v24  ;;  %v2973_v31 = vadd.f32 %v12000_v32, %v2872_v4  ;;  %v4555_v7 = vmul.f32 %v9644_v43, %v11785_v40  ;;  %v9782_v0 = vld [vmem:[#allocation3 + $0x128] sm:$0xff]  ;;  %v12002_v45 = vld [vmem:[#allocation139_spill] sm:$0xff] }
 0x3d1   : > { %11995 = vst [vmem:[#allocation148_spill] sm:$0xff] %v9764_v41  ;;  %11999 = vst [vmem:[#allocation73_spill] sm:$0xff] %v9772_v51  ;;  %v4978_v29 = vsel %vm2002_vm1, %v9764_v41, 0.0  ;;  %v4685_v1 = vadd.f32 %v4653_v55, %v4584_v8  ;;  %v4656_v21 = vmul.f32 %v11788_v62, %v9758_v25  ;;  %v3851_v4 = vmul.f32 %v12002_v45, %v11914_v17  ;;  %v12005_v38 = vld [vmem:[#allocation80_spill] sm:$0xff]  ;;  %v9791_v8 = vld [vmem:[#allocation4 + $0xd0] sm:$0xff] }
 0x3d2   : > { %12001 = vst [vmem:[#allocation64_spill] sm:$0xff] %v9782_v0  ;;  %4979 = vadd.xlane.f32.xlu0 %v4978_v29  ;;  %v4284_v18 = vadd.f32 %v4252_v54, %v4183_v16  ;;  %v3681_v24 = vadd.f32 %v3649_v20, %v3580_v3  ;;  %12004 = vst [vmem:[#allocation147_spill] sm:$0xff] %v9788_v23  ;;  %v3074_v55 = vadd.f32 %v12005_v38, %v2973_v31  ;;  %v12006_v54 = vld [vmem:[#allocation44_spill] sm:$0xff]  ;;  %v9803_v38 = vld [vmem:[#allocation3 + $0xd8] sm:$0xff] }
 0x3d3   : > { %v4786_v32 = vadd.f32 %v4754_v12, %v4685_v1  ;;  %v4757_v41 = vmul.f32 %v8811_v36, %v9770_v26  ;;  %v4858_v29 = vmul.f32 %v8871_v9, %v9772_v51  ;;  %v3952_v20 = vmul.f32 %v12006_v54, %v11763_v59 }
 0x3d4   : > { %v4385_v16 = vadd.f32 %v4353_v39, %v4284_v18  ;;  %v3782_v3 = vadd.f32 %v3750_v48, %v3681_v24  ;;  %v4053_v45 = vmul.f32 %v11802_v33, %v9782_v0  ;;  %v3175_v31 = vadd.f32 %v3143_v10, %v3074_v55  ;;  %v9811_v18 = vld [vmem:[#allocation2 + $0x130] sm:$0xff]  ;;  %v9816_v55 = vld [vmem:[#allocation2 + $0xd8] sm:$0xff] }
 0x3d5   : > { %v4887_v12 = vadd.f32 %v4855_v37, %v4786_v32  ;;  %v4154_v1 = vmul.f32 %v11806_v5, %v9786_v42  ;;  %v4255_v57 = vmul.f32 %v11809_v19, %v9788_v23  ;;  %v3345_v54 = vmul.f32 %v11780_v30, %v9791_v8  ;;  %12008 = vst [vmem:[#allocation56_spill] sm:$0xff] %v9811_v18  ;;  %v9813_v24 = vld [vmem:[#allocation4 + $0x130] sm:$0xff]  ;;  %v12011_v37 = vld [vmem:[#allocation87_spill] sm:$0xff] }
 0x3d6   : > { %v4486_v39 = vadd.f32 %v4454_v52, %v4385_v16  ;;  %v3883_v48 = vadd.f32 %v3851_v4, %v3782_v3  ;;  %12009 = vst [vmem:[#allocation59_spill] sm:$0xff] %v9813_v24  ;;  %v3276_v10 = vadd.f32 %v12010_v61, %v3175_v31  ;;  %v12012_v32 = vld [vmem:[#allocation66_spill] sm:$0xff]  ;;  %v3446_v52 = vmul.f32 %v11741_v63, %v9803_v38  ;;  %v6378_v4 = vld [vmem:[#allocation3 + $0xc8] sm:$0xff]  ;;  %v9828_v31 = vld [vmem:[#allocation4 + $0xd8] sm:$0xff] }
 0x3d7   : > { %v2972_v6 = vadd.f32 %v12012_v32, %v12011_v37  ;;  %v9821_v28 = vadd.f32 %v9639_v13, %v4887_v12  ;;  %v3142_v16 = vmul.f32 %v6378_v4, %v11768_v15  ;;  %12014 = vst [vmem:[#allocation57_spill] sm:$0xff] %v9828_v31  ;;  %v4457_v37 = vmul.f32 %v11775_v58, %v9811_v18  ;;  %v3713_v4 = vld [vmem:[#allocation3 + $0xe0] sm:$0xff] }
 0x3d8   : > { %v4587_v3 = vadd.f32 %v4555_v7, %v4486_v39  ;;  %v3984_v46 = vadd.f32 %v3952_v20, %v3883_v48  ;;  %v3377_v61 = vadd.f32 %v3345_v54, %v3276_v10  ;;  %v4558_v32 = vmul.f32 %v11785_v40, %v9813_v24  ;;  %v3814_v7 = vld [vmem:[#allocation2 + $0xe0] sm:$0xff]  ;;  %v9839_v39 = vld [vmem:[#allocation3 + $0x138] sm:$0xff]  ;;  %v3409_v10 = vld [vmem:[#allocation3 + $0xd0] sm:$0xff] }
 0x3d9   : > { %12013 = vst [vmem:[#allocation61_spill] sm:$0xff] %v9821_v28  ;;  %v3073_v27 = vadd.f32 %v12015_v53, %v2972_v6  ;;  %v4975_v12 = vsel %vm2002_vm1, %v9821_v28, 0.0  ;;  %v3547_v44 = vmul.f32 %v11745_v60, %v9816_v55  ;;  %12016 = vst [vmem:[#allocation62_spill] sm:$0xff] %v9839_v39  ;;  %v9841_v53 = vld [vmem:[#allocation2 + $0x138] sm:$0xff]  ;;  %v4659_v28 = vmul.f32 %v11788_v62, %v9839_v39 }
 0x3da   : > { %4976 = vadd.xlane.f32.xlu1 %v4975_v12  ;;  %v4688_v20 = vadd.f32 %v4656_v21, %v4587_v3  ;;  %v4085_v54 = vadd.f32 %v4053_v45, %v3984_v46  ;;  %12017 = vst [vmem:[#allocation93_spill] sm:$0xff] %v9841_v53  ;;  %v3478_v6 = vadd.f32 %v3446_v52, %v3377_v61  ;;  %v9851_v3 = vld [vmem:[#allocation4 + $0x138] sm:$0xff]  ;;  %v3915_v52 = vld [vmem:[#allocation4 + $0xe0] sm:$0xff]  ;;  %v3510_v61 = vld [vmem:[#allocation2 + $0xd0] sm:$0xff] }
 0x3db   : > { %v3174_v48 = vadd.f32 %v3142_v16, %v3073_v27  ;;  %v4760_v43 = vmul.f32 %v8811_v36, %v9841_v53  ;;  %v3648_v34 = vmul.f32 %v11748_v11, %v9828_v31  ;;  %v3344_v21 = vmul.f32 %v11982_v35, %v11780_v30  ;;  %12018 = vst [vmem:[#allocation68_spill] sm:$0xff] %v9851_v3  ;;  %v12019_v27 = vld [vmem:[#allocation105_spill] sm:$0xff] }
 0x3dc   : > { %v4789_v46 = vadd.f32 %v4757_v41, %v4688_v20  ;;  %v4186_v45 = vadd.f32 %v4154_v1, %v4085_v54  ;;  %v3579_v12 = vadd.f32 %v3547_v44, %v3478_v6  ;;  %v4861_v39 = vmul.f32 %v8871_v9, %v9851_v3  ;;  %v12020_v6 = vld [vmem:[#allocation99_spill] sm:$0xff] }
 0x3dd   : > { %v3275_v16 = vadd.f32 %v12019_v27, %v3174_v48  ;;  %v3749_v53 = vmul.f32 %v11910_v56, %v3713_v4  ;;  %v3850_v47 = vmul.f32 %v11914_v17, %v3814_v7  ;;  %v3445_v50 = vmul.f32 %v11741_v63, %v3409_v10  ;;  %v12021_v48 = vld [vmem:[#allocation98_spill] sm:$0xff] }
 0x3de   : > { %v4890_v31 = vadd.f32 %v4858_v29, %v4789_v46  ;;  %v4287_v35 = vadd.f32 %v4255_v57, %v4186_v45  ;;  %v3680_v41 = vadd.f32 %v3648_v34, %v3579_v12  ;;  %v3951_v20 = vmul.f32 %v11763_v59, %v3915_v52  ;;  %v12023_v29 = vld [vmem:[#allocation51_spill] sm:$0xff]  ;;  %v12024_v46 = vld [vmem:[#allocation30_spill] sm:$0xff]  ;;  %v12025_v45 = vld [vmem:[#allocation149_spill] sm:$0xff] }
 0x3df   : > { %v3376_v1 = vadd.f32 %v3344_v21, %v3275_v16  ;;  %v4052_v44 = vmul.f32 %v9758_v25, %v11802_v33  ;;  %v3546_v54 = vmul.f32 %v11745_v60, %v3510_v61  ;;  %v3076_v27 = vadd.f32 %v12021_v48, %v12020_v6  ;;  %v12026_v61 = vld [vmem:[#allocation78_spill] sm:$0xff] }
 0x3e0   : > { %v9866_v4 = vadd.f32 %v9639_v13, %v4890_v31  ;;  %v4388_v7 = vadd.f32 %v4356_v22, %v4287_v35  ;;  %v3781_v3 = vadd.f32 %v3749_v53, %v3680_v41  ;;  %v4153_v57 = vmul.f32 %v9770_v26, %v11806_v5 }
 0x3e1   : > { %v3477_v10 = vadd.f32 %v3445_v50, %v3376_v1  ;;  %v3647_v34 = vmul.f32 %v11748_v11, %v9791_v8  ;;  %v3145_v21 = vmul.f32 %v12023_v29, %v11768_v15  ;;  %v3246_v12 = vmul.f32 %v12025_v45, %v12024_v46 }
 0x3e2   : > { %12022 = vst [vmem:[#allocation53_spill] sm:$0xff] %v9866_v4  ;;  %v4984_v52 = vsel %vm2002_vm1, %v9866_v4, 0.0  ;;  %v4489_v31 = vadd.f32 %v4457_v37, %v4388_v7  ;;  %v3882_v16 = vadd.f32 %v3850_v47, %v3781_v3  ;;  %v4254_v50 = vmul.f32 %v9772_v51, %v11809_v19 }
 0x3e3   : > { %v3578_v22 = vadd.f32 %v3546_v54, %v3477_v10  ;;  %4985 = vadd.xlane.f32.xlu0 %v4984_v52  ;;  %v4355_v53 = vmul.f32 %v11772_v2, %v9782_v0  ;;  %v3177_v8 = vadd.f32 %v3145_v21, %v3076_v27  ;;  %v3347_v35 = vmul.f32 %v12026_v61, %v11780_v30  ;;  %v12028_v52 = vld [vmem:[#allocation65_spill] sm:$0xff]  ;;  %v12031_v61 = vld [vmem:[#allocation104_spill] sm:$0xff] }
 0x3e4   : > { %v4590_v41 = vadd.f32 %v4558_v32, %v4489_v31  ;;  %v3983_v1 = vadd.f32 %v3951_v20, %v3882_v16  ;;  %v3748_v48 = vmul.f32 %v11910_v56, %v9803_v38  ;;  %v4456_v47 = vmul.f32 %v11775_v58, %v9786_v42  ;;  %v12029_v16 = vld [vmem:[#allocation24_spill] sm:$0xff] }
 0x3e5   : > { %v3679_v6 = vadd.f32 %v3647_v34, %v3578_v22  ;;  %v4557_v37 = vmul.f32 %v11785_v40, %v9788_v23  ;;  %v4658_v3 = vmul.f32 %v11788_v62, %v9801_v14  ;;  %v3278_v54 = vadd.f32 %v3246_v12, %v3177_v8  ;;  %v12030_v8 = vld [vmem:[#allocation106_spill] sm:$0xff] }
 0x3e6   : > { %v4691_v27 = vadd.f32 %v4659_v28, %v4590_v41  ;;  %v4084_v7 = vadd.f32 %v4052_v44, %v3983_v1  ;;  %v3849_v32 = vmul.f32 %v11914_v17, %v9816_v55  ;;  %v4759_v20 = vmul.f32 %v8811_v36, %v9811_v18  ;;  %v12027_v28 = vld [vmem:[#allocation57_spill] sm:$0xff] }
 0x3e7   : > { %v3780_v10 = vadd.f32 %v3748_v48, %v3679_v6  ;;  %v9898_v38 = vmul.f32 %v8871_v9, %v9813_v24  ;;  %v3379_v34 = vadd.f32 %v3347_v35, %v3278_v54  ;;  %v3448_v29 = vmul.f32 %v9527_v49, %v11741_v63  ;;  %v6379_v49 = vld [vmem:[#allocation3 + $0x108] sm:$0xff] }
 0x3e8   : > { %v4792_v21 = vadd.f32 %v4760_v43, %v4691_v27  ;;  %v4185_v45 = vadd.f32 %v4153_v57, %v4084_v7  ;;  %v3950_v44 = vmul.f32 %v11763_v59, %v12027_v28  ;;  %v4051_v55 = vmul.f32 %v12028_v52, %v11802_v33  ;;  %v12032_v57 = vld [vmem:[#allocation63_spill] sm:$0xff]  ;;  %v12033_v54 = vld [vmem:[#allocation69_spill] sm:$0xff] }
 0x3e9   : > { %v3881_v12 = vadd.f32 %v3849_v32, %v3780_v10  ;;  %v3480_v31 = vadd.f32 %v3448_v29, %v3379_v34  ;;  %v3549_v22 = vmul.f32 %v12029_v16, %v11745_v60  ;;  %v3079_v41 = vadd.f32 %v12031_v61, %v12030_v8  ;;  %v12034_v10 = vld [vmem:[#allocation142_spill] sm:$0xff]  ;;  %v12038_v61 = vld [vmem:[#allocation113_spill] sm:$0xff] }
 0x3ea   : > { %v4893_v35 = vadd.f32 %v4861_v39, %v4792_v21  ;;  %v4286_v1 = vadd.f32 %v4254_v50, %v4185_v45  ;;  %v3148_v43 = vmul.f32 %v6379_v49, %v11768_v15  ;;  %v4152_v48 = vmul.f32 %v12032_v57, %v11806_v5 }
 0x3eb   : > { %v3982_v6 = vadd.f32 %v3950_v44, %v3881_v12  ;;  %v4253_v27 = vmul.f32 %v12033_v54, %v11809_v19  ;;  %v3581_v7 = vadd.f32 %v3549_v22, %v3480_v31  ;;  %v3650_v32 = vmul.f32 %v12034_v10, %v11748_v11  ;;  %v12036_v12 = vld [vmem:[#allocation37_spill] sm:$0xff]  ;;  %v12037_v44 = vld [vmem:[#allocation131_spill] sm:$0xff] }
 0x3ec   : > { %v9918_v34 = vadd.f32 %v9639_v13, %v4893_v35  ;;  %v4387_v29 = vadd.f32 %v4355_v53, %v4286_v1  ;;  %v3180_v50 = vadd.f32 %v3148_v43, %v3079_v41  ;;  %v4354_v21 = vmul.f32 %v9758_v25, %v11772_v2  ;;  %v12039_v1 = vld [vmem:[#allocation127_spill] sm:$0xff] }
 0x3ed   : > { %v4083_v39 = vadd.f32 %v4051_v55, %v3982_v6  ;;  %v3682_v45 = vadd.f32 %v3650_v32, %v3581_v7  ;;  %v3751_v28 = vmul.f32 %v12036_v12, %v11910_v56  ;;  %v3350_v16 = vmul.f32 %v12037_v44, %v11780_v30  ;;  %v9935_v7 = vld [vmem:[#allocation3 + $0x140] sm:$0xff] }
 0x3ee   : > { %12035 = vst [vmem:[#allocation60_spill] sm:$0xff] %v9918_v34  ;;  %v4993_v31 = vsel %vm2002_vm1, %v9918_v34, 0.0  ;;  %v4488_v22 = vadd.f32 %v4456_v47, %v4387_v29  ;;  %v3281_v35 = vadd.f32 %v12038_v61, %v3180_v50  ;;  %v4455_v53 = vmul.f32 %v9770_v26, %v11775_v58  ;;  %12040 = vst [vmem:[#allocation90_spill] sm:$0xff] %v9935_v7  ;;  %v12041_v47 = vld [vmem:[#allocation152_spill] sm:$0xff] }
 0x3ef   : > { %v4184_v8 = vadd.f32 %v4152_v48, %v4083_v39  ;;  %4994 = vadd.xlane.f32.xlu1 %v4993_v31  ;;  %v4556_v55 = vmul.f32 %v9772_v51, %v11785_v40  ;;  %v3783_v41 = vadd.f32 %v3751_v28, %v3682_v45  ;;  %v3852_v6 = vmul.f32 %v12039_v1, %v11914_v17  ;;  %v12042_v39 = vld [vmem:[#allocation35_spill] sm:$0xff]  ;;  %v12049_v34 = vld [vmem:[#allocation96_spill] sm:$0xff] }
 0x3f0   : > { %v4589_v49 = vadd.f32 %v4557_v37, %v4488_v22  ;;  %v3382_v10 = vadd.f32 %v3350_v16, %v3281_v35  ;;  %v3451_v48 = vmul.f32 %v12041_v47, %v11741_v63  ;;  %v4657_v32 = vmul.f32 %v11788_v62, %v9782_v0  ;;  %v9945_v37 = vld [vmem:[#allocation2 + $0x140] sm:$0xff]  ;;  %v12044_v16 = vld [vmem:[#allocation55_spill] sm:$0xff]  ;;  %v12045_v35 = vld [vmem:[#allocation102_spill] sm:$0xff] }
 0x3f1   : > { %v4285_v43 = vadd.f32 %v4253_v27, %v4184_v8  ;;  %v3884_v29 = vadd.f32 %v3852_v6, %v3783_v41  ;;  %v3953_v50 = vmul.f32 %v12042_v39, %v11763_v59  ;;  %v4054_v45 = vmul.f32 %v11802_v33, %v9935_v7  ;;  %12043 = vst [vmem:[#allocation82_spill] sm:$0xff] %v9945_v37  ;;  %v12046_v41 = vld [vmem:[#allocation83_spill] sm:$0xff]  ;;  %v10029_v7 = vld [vmem:[#allocation4 + $0x160] sm:$0xff] }
 0x3f2   : > { %v4690_v12 = vadd.f32 %v4658_v3, %v4589_v49  ;;  %v3483_v27 = vadd.f32 %v3451_v48, %v3382_v10  ;;  %v3552_v31 = vmul.f32 %v12044_v16, %v11745_v60  ;;  %v4758_v22 = vmul.f32 %v8811_v36, %v9786_v42  ;;  %v9955_v3 = vld [vmem:[#allocation4 + $0x140] sm:$0xff]  ;;  %12066 = vst [vmem:[#allocation86_spill] sm:$0xff] %v10029_v7  ;;  %v10031_v42 = vld [vmem:[#allocation3 + $0x168] sm:$0xff] }
 0x3f3   : > { %v4386_v28 = vadd.f32 %v4354_v21, %v4285_v43  ;;  %v3985_v8 = vadd.f32 %v3953_v50, %v3884_v29  ;;  %v4155_v61 = vmul.f32 %v11806_v5, %v9945_v37  ;;  %v2775_v1 = vadd.f32 %v12046_v41, %v12045_v35  ;;  %12047 = vst [vmem:[#allocation81_spill] sm:$0xff] %v9955_v3  ;;  %v9957_v21 = vld [vmem:[#allocation3 + $0x148] sm:$0xff]  ;;  %v12048_v43 = vld [vmem:[#allocation76_spill] sm:$0xff] }
 0x3f4   : > { %v4791_v6 = vadd.f32 %v4759_v20, %v4690_v12  ;;  %v3584_v49 = vadd.f32 %v3552_v31, %v3483_v27  ;;  %v3653_v10 = vmul.f32 %v12048_v43, %v11748_v11  ;;  %v4859_v48 = vmul.f32 %v8871_v9, %v9788_v23  ;;  %v9967_v12 = vld [vmem:[#allocation2 + $0x148] sm:$0xff]  ;;  %12067 = vst [vmem:[#allocation70_spill] sm:$0xff] %v10031_v42  ;;  %v3514_v26 = vld [vmem:[#allocation2 + $0x100] sm:$0xff] }
 0x3f5   : > { %v4487_v39 = vadd.f32 %v4455_v53, %v4386_v28  ;;  %v4086_v29 = vadd.f32 %v4054_v45, %v3985_v8  ;;  %v4256_v50 = vmul.f32 %v11809_v19, %v9955_v3  ;;  %v2876_v4 = vadd.f32 %v12049_v34, %v2775_v1  ;;  %v9969_v28 = vld [vmem:[#allocation4 + $0x148] sm:$0xff]  ;;  %v12051_v8 = vld [vmem:[#allocation91_spill] sm:$0xff]  ;;  %v6380_v3 = vld [vmem:[#allocation3 + $0x100] sm:$0xff] }
 0x3f6   : > { %v4892_v20 = vadd.f32 %v9898_v38, %v4791_v6  ;;  %12050 = vst [vmem:[#allocation92_spill] sm:$0xff] %v9969_v28  ;;  %v3685_v27 = vadd.f32 %v3653_v10, %v3584_v49  ;;  %v3754_v31 = vmul.f32 %v12028_v52, %v11910_v56  ;;  %v4357_v45 = vmul.f32 %v11772_v2, %v9957_v21  ;;  %v9980_v1 = vld [vmem:[#allocation3 + $0x150] sm:$0xff]  ;;  %v9992_v10 = vld [vmem:[#allocation3 + $0x158] sm:$0xff] }
 0x3f7   : > { %v4588_v53 = vadd.f32 %v4556_v55, %v4487_v39  ;;  %v4187_v35 = vadd.f32 %v4155_v61, %v4086_v29  ;;  %v2977_v41 = vadd.f32 %v12051_v8, %v2876_v4  ;;  %v3147_v34 = vmul.f32 %v6380_v3, %v11768_v15  ;;  %12053 = vst [vmem:[#allocation136_spill] sm:$0xff] %v9980_v1  ;;  %v9982_v6 = vld [vmem:[#allocation2 + $0x150] sm:$0xff] }
 0x3f8   : > { %v9978_v38 = vadd.f32 %v9639_v13, %v4892_v20  ;;  %12054 = vst [vmem:[#allocation45_spill] sm:$0xff] %v9982_v6  ;;  %v3786_v39 = vadd.f32 %v3754_v31, %v3685_v27  ;;  %v3855_v52 = vmul.f32 %v12032_v57, %v11914_v17  ;;  %v4458_v49 = vmul.f32 %v11775_v58, %v9967_v12  ;;  %v9990_v3 = vld [vmem:[#allocation4 + $0x150] sm:$0xff]  ;;  %v10001_v31 = vld [vmem:[#allocation4 + $0x100] sm:$0xff] }
 0x3f9   : > { %v4689_v55 = vadd.f32 %v4657_v32, %v4588_v53  ;;  %v4288_v61 = vadd.f32 %v4256_v50, %v4187_v35  ;;  %v4559_v4 = vmul.f32 %v11785_v40, %v9969_v28  ;;  %12055 = vst [vmem:[#allocation85_spill] sm:$0xff] %v9990_v3  ;;  %12056 = vst [vmem:[#allocation58_spill] sm:$0xff] %v9992_v10  ;;  %v12057_v32 = vld [vmem:[#allocation97_spill] sm:$0xff]  ;;  %v9999_v50 = vld [vmem:[#allocation2 + $0x158] sm:$0xff] }
 0x3fa   : > { %12052 = vst [vmem:[#allocation155_spill] sm:$0xff] %v9978_v38  ;;  %v3078_v29 = vadd.f32 %v12057_v32, %v2977_v41  ;;  %v4990_v20 = vsel %vm2002_vm1, %v9978_v38, 0.0  ;;  %v3887_v27 = vadd.f32 %v3855_v52, %v3786_v39  ;;  %v3956_v57 = vmul.f32 %v12033_v54, %v11763_v59  ;;  %12058 = vst [vmem:[#allocation43_spill] sm:$0xff] %v9999_v50  ;;  %v10007_v32 = vld [vmem:[#allocation4 + $0x158] sm:$0xff] }
 0x3fb   : > { %v4790_v53 = vadd.f32 %v4758_v22, %v4689_v55  ;;  %4991 = vadd.xlane.f32.xlu0 %v4990_v20  ;;  %v4389_v35 = vadd.f32 %v4357_v45, %v4288_v61  ;;  %v4660_v8 = vmul.f32 %v11788_v62, %v9980_v1  ;;  %v4761_v41 = vmul.f32 %v8811_v36, %v9982_v6  ;;  %v10015_v61 = vld [vmem:[#allocation3 + $0x160] sm:$0xff]  ;;  %v12061_v20 = vld [vmem:[#allocation126_spill] sm:$0xff] }
 0x3fc   : > { %12059 = vst [vmem:[#allocation150_spill] sm:$0xff] %v10007_v32  ;;  %v3179_v38 = vadd.f32 %v3147_v34, %v3078_v29  ;;  %v4862_v55 = vmul.f32 %v8871_v9, %v9990_v3  ;;  %v3988_v54 = vadd.f32 %v3956_v57, %v3887_v27  ;;  %v4057_v39 = vmul.f32 %v11802_v33, %v9992_v10  ;;  %v12065_v27 = vld [vmem:[#allocation84_spill] sm:$0xff] }
 0x3fd   : > { %v4891_v22 = vadd.f32 %v4859_v48, %v4790_v53  ;;  %v4490_v52 = vadd.f32 %v4458_v49, %v4389_v35  ;;  %v4158_v45 = vmul.f32 %v11806_v5, %v9999_v50  ;;  %12060 = vst [vmem:[#allocation95_spill] sm:$0xff] %v10015_v61  ;;  %v3349_v46 = vmul.f32 %v11780_v30, %v10001_v31  ;;  %v10025_v53 = vld [vmem:[#allocation2 + $0x160] sm:$0xff]  ;;  %v12064_v49 = vld [vmem:[#allocation103_spill] sm:$0xff] }
 0x3fe   : > { %v3280_v37 = vadd.f32 %v12061_v20, %v3179_v38  ;;  %v4089_v34 = vadd.f32 %v4057_v39, %v3988_v54  ;;  %v4259_v29 = vmul.f32 %v11809_v19, %v10007_v32  ;;  %12063 = vst [vmem:[#allocation156_spill] sm:$0xff] %v10025_v53  ;;  %v2976_v57 = vadd.f32 %v12065_v27, %v12064_v49  ;;  %v12068_v20 = vld [vmem:[#allocation151_spill] sm:$0xff]  ;;  %v10040_v49 = vld [vmem:[#allocation2 + $0x168] sm:$0xff] }
 0x3ff   : > { %v10021_v48 = vadd.f32 %v9639_v13, %v4891_v22  ;;  %v4591_v35 = vadd.f32 %v4559_v4, %v4490_v52  ;;  %v3450_v0 = vmul.f32 %v12068_v20, %v11741_v63  ;;  %v6381_v22 = vld [vmem:[#allocation3 + $0xf8] sm:$0xff]  ;;  %v4360_v18 = vmul.f32 %v11772_v2, %v10015_v61  ;;  %v12069_v4 = vld [vmem:[#allocation88_spill] sm:$0xff] }
 0x400   : > { %v3381_v38 = vadd.f32 %v3349_v46, %v3280_v37  ;;  %v3146_v54 = vmul.f32 %v6381_v22, %v11768_v15  ;;  %v4190_v24 = vadd.f32 %v4158_v45, %v4089_v34  ;;  %v3077_v52 = vadd.f32 %v12069_v4, %v2976_v57  ;;  %v10045_v37 = vld [vmem:[#allocation4 + $0x168] sm:$0xff]  ;;  %v12071_v22 = vld [vmem:[#allocation154_spill] sm:$0xff] }
 0x401   : > { %12062 = vst [vmem:[#allocation67_spill] sm:$0xff] %v10021_v48  ;;  %v4987_v39 = vsel %vm2002_vm1, %v10021_v48, 0.0  ;;  %v4692_v27 = vadd.f32 %v4660_v8, %v4591_v35  ;;  %v4461_v46 = vmul.f32 %v11775_v58, %v10025_v53  ;;  %12070 = vst [vmem:[#allocation157_spill] sm:$0xff] %v10045_v37  ;;  %v3551_v14 = vmul.f32 %v12071_v22, %v11745_v60  ;;  %v3312_v48 = vld [vmem:[#allocation4 + $0xf8] sm:$0xff] }
 0x402   : > { %4988 = vadd.xlane.f32.xlu1 %v4987_v39  ;;  %v3482_v20 = vadd.f32 %v3450_v0, %v3381_v38  ;;  %v4291_v45 = vadd.f32 %v4259_v29, %v4190_v24  ;;  %v4562_v34 = vmul.f32 %v11785_v40, %v10029_v7  ;;  %v4663_v23 = vmul.f32 %v11788_v62, %v10031_v42  ;;  %v3413_v38 = vld [vmem:[#allocation3 + $0x100] sm:$0xff]  ;;  %v12072_v29 = vld [vmem:[#allocation118_spill] sm:$0xff] }
 0x403   : > { %v3178_v57 = vadd.f32 %v3146_v54, %v3077_v52  ;;  %v4793_v39 = vadd.f32 %v4761_v41, %v4692_v27  ;;  %v4764_v8 = vmul.f32 %v8811_v36, %v10040_v49  ;;  %v3652_v0 = vmul.f32 %v12037_v44, %v11748_v11 }
 0x404   : > { %v3583_v35 = vadd.f32 %v3551_v14, %v3482_v20  ;;  %v4392_v4 = vadd.f32 %v4360_v18, %v4291_v45  ;;  %v4865_v24 = vmul.f32 %v8871_v9, %v10045_v37  ;;  %v3348_v51 = vmul.f32 %v11780_v30, %v3312_v48 }
 0x405   : > { %v3279_v22 = vadd.f32 %v12072_v29, %v3178_v57  ;;  %v4894_v42 = vadd.f32 %v4862_v55, %v4793_v39  ;;  %v3753_v41 = vmul.f32 %v12041_v47, %v11910_v56  ;;  %v3854_v14 = vmul.f32 %v12044_v16, %v11914_v17  ;;  %v3716_v39 = vld [vmem:[#allocation3 + $0x108] sm:$0xff]  ;;  %v12074_v16 = vld [vmem:[#allocation116_spill] sm:$0xff] }
 0x406   : > { %v3684_v54 = vadd.f32 %v3652_v0, %v3583_v35  ;;  %v4493_v52 = vadd.f32 %v4461_v46, %v4392_v4  ;;  %v3955_v18 = vmul.f32 %v12048_v43, %v11763_v59  ;;  %v3449_v27 = vmul.f32 %v11741_v63, %v3413_v38  ;;  %v12075_v46 = vld [vmem:[#allocation114_spill] sm:$0xff] }
 0x407   : > { %v3380_v44 = vadd.f32 %v3348_v51, %v3279_v22  ;;  %v10069_v20 = vadd.f32 %v9639_v13, %v4894_v42  ;;  %v4056_v55 = vmul.f32 %v9980_v1, %v11802_v33  ;;  %v3550_v45 = vmul.f32 %v11745_v60, %v3514_v26  ;;  %v6382_v0 = vld [vmem:[#allocation3 + $0x110] sm:$0xff] }
 0x408   : > { %v3785_v48 = vadd.f32 %v3753_v41, %v3684_v54  ;;  %v4594_v47 = vadd.f32 %v4562_v34, %v4493_v52  ;;  %v3080_v35 = vadd.f32 %v12075_v46, %v12074_v16  ;;  %v3149_v51 = vmul.f32 %v6382_v0, %v11768_v15  ;;  %v3315_v26 = vld [vmem:[#allocation4 + $0x110] sm:$0xff]  ;;  %v3817_v54 = vld [vmem:[#allocation2 + $0x108] sm:$0xff] }
 0x409   : > { %12073 = vst [vmem:[#allocation77_spill] sm:$0xff] %v10069_v20  ;;  %v3481_v57 = vadd.f32 %v3449_v27, %v3380_v44  ;;  %v4996_v43 = vsel %vm2002_vm1, %v10069_v20, 0.0  ;;  %v4157_v38 = vmul.f32 %v9982_v6, %v11806_v5  ;;  %v4258_v4 = vmul.f32 %v9990_v3, %v11809_v19  ;;  %v3918_v0 = vld [vmem:[#allocation4 + $0x108] sm:$0xff] }
 0x40a   : > { %v3886_v42 = vadd.f32 %v3854_v14, %v3785_v48  ;;  %4997 = vadd.xlane.f32.xlu0 %v4996_v43  ;;  %v4695_v34 = vadd.f32 %v4663_v23, %v4594_v47  ;;  %v3651_v22 = vmul.f32 %v11748_v11, %v10001_v31  ;;  %v3181_v41 = vadd.f32 %v3149_v51, %v3080_v35  ;;  %v3416_v48 = vld [vmem:[#allocation3 + $0x118] sm:$0xff]  ;;  %v12076_v23 = vld [vmem:[#allocation124_spill] sm:$0xff] }
 0x40b   : > { %v3582_v29 = vadd.f32 %v3550_v45, %v3481_v57  ;;  %v4359_v44 = vmul.f32 %v11772_v2, %v9992_v10  ;;  %v4460_v14 = vmul.f32 %v11775_v58, %v9999_v50  ;;  %v3752_v27 = vmul.f32 %v11910_v56, %v3716_v39  ;;  %v3517_v51 = vld [vmem:[#allocation2 + $0x118] sm:$0xff] }
 0x40c   : > { %v3987_v52 = vadd.f32 %v3955_v18, %v3886_v42  ;;  %v4796_v16 = vadd.f32 %v4764_v8, %v4695_v34  ;;  %v3282_v45 = vadd.f32 %v12076_v23, %v3181_v41  ;;  %v3351_v47 = vmul.f32 %v11780_v30, %v3315_v26  ;;  %v2813_v34 = vld [vmem:[#allocation3 + $0xe8] sm:$0xff]  ;;  %v12078_v23 = vld [vmem:[#allocation26_spill] sm:$0xff] }
 0x40d   : > { %v3683_v46 = vadd.f32 %v3651_v22, %v3582_v29  ;;  %v4561_v18 = vmul.f32 %v11785_v40, %v10007_v32  ;;  %v4662_v57 = vmul.f32 %v11788_v62, %v10015_v61  ;;  %v3853_v35 = vmul.f32 %v11914_v17, %v3817_v54  ;;  %v2914_v29 = vld [vmem:[#allocation2 + $0xe8] sm:$0xff] }
 0x40e   : > { %v4088_v31 = vadd.f32 %v4056_v55, %v3987_v52  ;;  %v4897_v43 = vadd.f32 %v4865_v24, %v4796_v16  ;;  %v3383_v42 = vadd.f32 %v3351_v47, %v3282_v45  ;;  %v3452_v8 = vmul.f32 %v11741_v63, %v3416_v48  ;;  %v10103_v52 = vld [vmem:[#allocation4 + $0x118] sm:$0xff]  ;;  %v3015_v16 = vld [vmem:[#allocation4 + $0xe8] sm:$0xff] }
 0x40f   : > { %v3784_v39 = vadd.f32 %v3752_v27, %v3683_v46  ;;  %v4763_v55 = vmul.f32 %v8811_v36, %v10025_v53  ;;  %v4864_v26 = vmul.f32 %v8871_v9, %v10029_v7  ;;  %v3954_v41 = vmul.f32 %v11763_v59, %v3918_v0  ;;  %v12079_v47 = vld [vmem:[#allocation27_spill] sm:$0xff] }
 0x410   : > { %v4189_v22 = vadd.f32 %v4157_v38, %v4088_v31  ;;  %v10106_v54 = vadd.f32 %v9639_v13, %v4897_v43  ;;  %v3484_v27 = vadd.f32 %v3452_v8, %v3383_v42  ;;  %v3553_v48 = vmul.f32 %v11745_v60, %v3517_v51  ;;  %v12080_v51 = vld [vmem:[#allocation111_spill] sm:$0xff]  ;;  %v12081_v42 = vld [vmem:[#allocation28_spill] sm:$0xff] }
 0x411   : > { %v3885_v24 = vadd.f32 %v3853_v35, %v3784_v39  ;;  %v4055_v38 = vmul.f32 %v9957_v21, %v11802_v33  ;;  %v2849_v45 = vmul.f32 %v12078_v23, %v2813_v34  ;;  %v2950_v31 = vmul.f32 %v12079_v47, %v2914_v29 }
 0x412   : > { %12077 = vst [vmem:[#allocation48_spill] sm:$0xff] %v10106_v54  ;;  %v4290_v46 = vadd.f32 %v4258_v4, %v4189_v22  ;;  %v5005_v0 = vsel %vm2002_vm1, %v10106_v54, 0.0  ;;  %v3585_v37 = vadd.f32 %v3553_v48, %v3484_v27  ;;  %v3654_v35 = vmul.f32 %v11748_v11, %v10103_v52  ;;  %v6383_v48 = vld [vmem:[#allocation3 + $0x128] sm:$0xff] }
 0x413   : > { %v3986_v20 = vadd.f32 %v3954_v41, %v3885_v24  ;;  %5006 = vadd.xlane.f32.xlu1 %v5005_v0  ;;  %v4156_v4 = vmul.f32 %v9967_v12, %v11806_v5  ;;  %v2881_v39 = vadd.f32 %v2849_v45, %v12080_v51  ;;  %v3051_v8 = vmul.f32 %v12081_v42, %v3015_v16 }
 0x414   : > { %v4391_v43 = vadd.f32 %v4359_v44, %v4290_v46  ;;  %v4257_v29 = vmul.f32 %v9969_v28, %v11809_v19  ;;  %v3686_v22 = vadd.f32 %v3654_v35, %v3585_v37  ;;  %v3755_v41 = vmul.f32 %v9758_v25, %v11910_v56  ;;  %v12113_v28 = vld [vmem:[#allocation101_spill] sm:$0xff] }
 0x415   : > { %v4087_v34 = vadd.f32 %v4055_v38, %v3986_v20  ;;  %v4358_v27 = vmul.f32 %v9980_v1, %v11772_v2  ;;  %v2982_v44 = vadd.f32 %v2950_v31, %v2881_v39  ;;  %v3152_v46 = vmul.f32 %v6383_v48, %v11768_v15  ;;  %v12082_v38 = vld [vmem:[#allocation79_spill] sm:$0xff]  ;;  %v12084_v48 = vld [vmem:[#allocation36_spill] sm:$0xff] }
 0x416   : > { %v4492_v24 = vadd.f32 %v4460_v14, %v4391_v43  ;;  %v4459_v16 = vmul.f32 %v9982_v6, %v11775_v58  ;;  %v3787_v20 = vadd.f32 %v3755_v41, %v3686_v22  ;;  %v3856_v45 = vmul.f32 %v12082_v38, %v11914_v17  ;;  %v12086_v38 = vld [vmem:[#allocation119_spill] sm:$0xff]  ;;  %v12112_v1 = vld [vmem:[#allocation64_spill] sm:$0xff] }
 0x417   : > { %v4188_v23 = vadd.f32 %v4156_v4, %v4087_v34  ;;  %v4560_v25 = vmul.f32 %v9990_v3, %v11785_v40  ;;  %v4661_v14 = vmul.f32 %v11788_v62, %v9992_v10  ;;  %v3083_v0 = vadd.f32 %v3051_v8, %v2982_v44  ;;  %v12083_v4 = vld [vmem:[#allocation73_spill] sm:$0xff]  ;;  %v12097_v10 = vld [vmem:[#allocation62_spill] sm:$0xff] }
 0x418   : > { %v4593_v37 = vadd.f32 %v4561_v18, %v4492_v24  ;;  %v4762_v35 = vmul.f32 %v8811_v36, %v9999_v50  ;;  %v3888_v43 = vadd.f32 %v3856_v45, %v3787_v20  ;;  %v3957_v51 = vmul.f32 %v12083_v4, %v11763_v59  ;;  %v12087_v45 = vld [vmem:[#allocation100_spill] sm:$0xff] }
 0x419   : > { %v4289_v31 = vadd.f32 %v4257_v29, %v4188_v23  ;;  %v4863_v34 = vmul.f32 %v8871_v9, %v10007_v32  ;;  %v4058_v18 = vmul.f32 %v10015_v61, %v11802_v33  ;;  %v3184_v22 = vadd.f32 %v3152_v46, %v3083_v0  ;;  %v6384_v50 = vld [vmem:[#allocation3 + $0x120] sm:$0xff] }
 0x41a   : > { %v4694_v39 = vadd.f32 %v4662_v57, %v4593_v37  ;;  %v3989_v24 = vadd.f32 %v3957_v51, %v3888_v43  ;;  %v4159_v8 = vmul.f32 %v10025_v53, %v11806_v5  ;;  %v4260_v29 = vmul.f32 %v10029_v7, %v11809_v19  ;;  %v12085_v57 = vld [vmem:[#allocation147_spill] sm:$0xff]  ;;  %v10157_v43 = vld [vmem:[#allocation3 + $0x170] sm:$0xff]  ;;  %v12089_v51 = vld [vmem:[#allocation89_spill] sm:$0xff] }
 0x41b   : > { %v4390_v41 = vadd.f32 %v4358_v27, %v4289_v31  ;;  %v3285_v23 = vadd.f32 %v12084_v48, %v3184_v22  ;;  %v3354_v20 = vmul.f32 %v12085_v57, %v11780_v30  ;;  %v2779_v37 = vadd.f32 %v12087_v45, %v12086_v38  ;;  %v12088_v27 = vld [vmem:[#allocation70_spill] sm:$0xff]  ;;  %v12090_v22 = vld [vmem:[#allocation107_spill] sm:$0xff]  ;;  %v12103_v53 = vld [vmem:[#allocation68_spill] sm:$0xff] }
 0x41c   : > { %v4795_v44 = vadd.f32 %v4763_v55, %v4694_v39  ;;  %v4090_v54 = vadd.f32 %v4058_v18, %v3989_v24  ;;  %v4361_v46 = vmul.f32 %v12088_v27, %v11772_v2  ;;  %v4462_v0 = vmul.f32 %v10040_v49, %v11775_v58 }
 0x41d   : > { %v4491_v4 = vadd.f32 %v4459_v16, %v4390_v41  ;;  %v3386_v55 = vadd.f32 %v3354_v20, %v3285_v23  ;;  %v3455_v39 = vmul.f32 %v12089_v51, %v11741_v63  ;;  %v2880_v48 = vadd.f32 %v12090_v22, %v2779_v37  ;;  %v12091_v16 = vld [vmem:[#allocation157_spill] sm:$0xff]  ;;  %v12092_v41 = vld [vmem:[#allocation56_spill] sm:$0xff] }
 0x41e   : > { %v4896_v31 = vadd.f32 %v4864_v26, %v4795_v44  ;;  %v4191_v47 = vadd.f32 %v4159_v8, %v4090_v54  ;;  %v4563_v18 = vmul.f32 %v12091_v16, %v11785_v40  ;;  %v3556_v24 = vmul.f32 %v12092_v41, %v11745_v60  ;;  %v10169_v26 = vld [vmem:[#allocation2 + $0x170] sm:$0xff]  ;;  %v12095_v20 = vld [vmem:[#allocation108_spill] sm:$0xff] }
 0x41f   : > { %v4592_v42 = vadd.f32 %v4560_v25, %v4491_v4  ;;  %v10171_v44 = vld [vmem:[#allocation4 + $0x170] sm:$0xff]  ;;  %v3487_v23 = vadd.f32 %v3455_v39, %v3386_v55  ;;  %v2981_v45 = vadd.f32 %v12095_v20, %v2880_v48  ;;  %v3151_v25 = vmul.f32 %v6384_v50, %v11768_v15  ;;  %v12096_v4 = vld [vmem:[#allocation59_spill] sm:$0xff]  ;;  %v12100_v50 = vld [vmem:[#allocation109_spill] sm:$0xff] }
 0x420   : > { %v10167_v38 = vadd.f32 %v9639_v13, %v4896_v31  ;;  %12094 = vst [vmem:[#allocation74_spill] sm:$0xff] %v10171_v44  ;;  %v4292_v8 = vadd.f32 %v4260_v29, %v4191_v47  ;;  %v4664_v37 = vmul.f32 %v11788_v62, %v10157_v43  ;;  %v3657_v22 = vmul.f32 %v12096_v4, %v11748_v11  ;;  %v10183_v39 = vld [vmem:[#allocation3 + $0x178] sm:$0xff] }
 0x421   : > { %v4693_v54 = vadd.f32 %v4661_v14, %v4592_v42  ;;  %v3588_v31 = vadd.f32 %v3556_v24, %v3487_v23  ;;  %v3758_v55 = vmul.f32 %v12097_v10, %v11910_v56  ;;  %12098 = vst [vmem:[#allocation139_spill] sm:$0xff] %v10183_v39  ;;  %v10185_v48 = vld [vmem:[#allocation2 + $0x178] sm:$0xff]  ;;  %v3082_v42 = vadd.f32 %v12100_v50, %v2981_v45  ;;  %v10194_v24 = vld [vmem:[#allocation4 + $0x120] sm:$0xff]  ;;  %v12102_v23 = vld [vmem:[#allocation93_spill] sm:$0xff] }
 0x422   : > { %12093 = vst [vmem:[#allocation52_spill] sm:$0xff] %v10167_v38  ;;  %v5002_v13 = vsel %vm2002_vm1, %v10167_v38, 0.0  ;;  %12099 = vst [vmem:[#allocation80_spill] sm:$0xff] %v10185_v48  ;;  %v4393_v14 = vadd.f32 %v4361_v46, %v4292_v8  ;;  %v4765_v29 = vmul.f32 %v8811_v36, %v10169_v26  ;;  %v4866_v20 = vmul.f32 %v8871_v9, %v10171_v44  ;;  %v10192_v38 = vld [vmem:[#allocation4 + $0x178] sm:$0xff]  ;;  %v10204_v50 = vld [vmem:[#allocation3 + $0x180] sm:$0xff] }
 0x423   : > { %5003 = vadd.xlane.f32.xlu0 %v5002_v13  ;;  %v4794_v47 = vadd.f32 %v4762_v35, %v4693_v54  ;;  %12101 = vst [vmem:[#allocation44_spill] sm:$0xff] %v10192_v38  ;;  %v3689_v10 = vadd.f32 %v3657_v22, %v3588_v31  ;;  %v3859_v7 = vmul.f32 %v12102_v23, %v11914_v17  ;;  %12104 = vst [vmem:[#allocation110_spill] sm:$0xff] %v10204_v50  ;;  %v10208_v31 = vld [vmem:[#allocation2 + $0x180] sm:$0xff]  ;;  %v12106_v23 = vld [vmem:[#allocation137_spill] sm:$0xff] }
 0x424   : > { %v3960_v45 = vmul.f32 %v12103_v53, %v11763_v59  ;;  %v3183_v13 = vadd.f32 %v3151_v25, %v3082_v42  ;;  %v4494_v46 = vadd.f32 %v4462_v0, %v4393_v14  ;;  %v4061_v54 = vmul.f32 %v11802_v33, %v10183_v39  ;;  %12105 = vst [vmem:[#allocation87_spill] sm:$0xff] %v10208_v31  ;;  %v12110_v42 = vld [vmem:[#allocation120_spill] sm:$0xff] }
 0x425   : > { %v4895_v35 = vadd.f32 %v4863_v34, %v4794_v47  ;;  %v4162_v8 = vmul.f32 %v11806_v5, %v10185_v48  ;;  %v3790_v3 = vadd.f32 %v3758_v55, %v3689_v10  ;;  %v4263_v22 = vmul.f32 %v11809_v19, %v10192_v38  ;;  %v10216_v34 = vld [vmem:[%s11367_s8] ss:$0 sm:$0xff]  ;;  %v12111_v47 = vld [vmem:[#allocation94_spill] sm:$0xff]  ;;  %v6386_v10 = vld [vmem:[#allocation3 + $0x118] sm:$0xff] }
 0x426   : > { %v3284_v61 = vadd.f32 %v12106_v23, %v3183_v13  ;;  %v3353_v53 = vmul.f32 %v11780_v30, %v10194_v24  ;;  %12107 = vst [vmem:[#allocation66_spill] sm:$0xff] %v10216_v34  ;;  %v4595_v25 = vadd.f32 %v4563_v18, %v4494_v46  ;;  %v10221_v55 = vld [vmem:[#allocation4 + $0x180] sm:$0xff]  ;;  %v2980_v14 = vadd.f32 %v12111_v47, %v12110_v42 }
 0x427   : > { %v10219_v0 = vadd.f32 %v10216_v34, %v4895_v35  ;;  %12109 = vst [vmem:[#allocation105_spill] sm:$0xff] %v10221_v55  ;;  %v3150_v13 = vmul.f32 %v6386_v10, %v11768_v15  ;;  %v3891_v23 = vadd.f32 %v3859_v7, %v3790_v3  ;;  %v4364_v6 = vmul.f32 %v11772_v2, %v10204_v50  ;;  %v10237_v3 = vld [vmem:[#allocation3 + $0x188] sm:$0xff] }
 0x428   : > { %v3385_v32 = vadd.f32 %v3353_v53, %v3284_v61  ;;  %v3454_v16 = vmul.f32 %v12112_v1, %v11741_v63  ;;  %v4696_v18 = vadd.f32 %v4664_v37, %v4595_v25  ;;  %v4465_v46 = vmul.f32 %v11775_v58, %v10208_v31  ;;  %12114 = vst [vmem:[#allocation99_spill] sm:$0xff] %v10237_v3  ;;  %v10239_v61 = vld [vmem:[#allocation2 + $0x188] sm:$0xff]  ;;  %v12116_v1 = vld [vmem:[#allocation144_spill] sm:$0xff] }
 0x429   : > { %12108 = vst [vmem:[#allocation72_spill] sm:$0xff] %v10219_v0  ;;  %v4999_v35 = vsel %vm2002_vm1, %v10219_v0, 0.0  ;;  %v3081_v42 = vadd.f32 %v12113_v28, %v2980_v14  ;;  %v3992_v47 = vadd.f32 %v3960_v45, %v3891_v23  ;;  %v4566_v7 = vmul.f32 %v11785_v40, %v10221_v55  ;;  %12115 = vst [vmem:[#allocation98_spill] sm:$0xff] %v10239_v61  ;;  %v10249_v45 = vld [vmem:[#allocation4 + $0x188] sm:$0xff] }
 0x42a   : > { %5000 = vadd.xlane.f32.xlu1 %v4999_v35  ;;  %v3486_v53 = vadd.f32 %v3454_v16, %v3385_v32  ;;  %v3555_v10 = vmul.f32 %v12116_v1, %v11745_v60  ;;  %v4797_v0 = vadd.f32 %v4765_v29, %v4696_v18  ;;  %v4667_v37 = vmul.f32 %v11788_v62, %v10237_v3  ;;  %v3417_v29 = vld [vmem:[#allocation3 + $0x120] sm:$0xff]  ;;  %v12118_v1 = vld [vmem:[#allocation130_spill] sm:$0xff] }
 0x42b   : > { %v10247_v28 = vmul.f32 %v8811_v36, %v10239_v61  ;;  %12117 = vst [vmem:[#allocation51_spill] sm:$0xff] %v10249_v45  ;;  %v3182_v25 = vadd.f32 %v3150_v13, %v3081_v42  ;;  %v4093_v14 = vadd.f32 %v4061_v54, %v3992_v47  ;;  %v10253_v23 = vmul.f32 %v8871_v9, %v10249_v45  ;;  %v3518_v13 = vld [vmem:[#allocation2 + $0x120] sm:$0xff]  ;;  %v12124_v45 = vld [vmem:[#allocation82_spill] sm:$0xff] }
 0x42c   : > { %v3587_v32 = vadd.f32 %v3555_v10, %v3486_v53  ;;  %v3656_v16 = vmul.f32 %v12085_v57, %v11748_v11  ;;  %v4898_v35 = vadd.f32 %v4866_v20, %v4797_v0  ;;  %v3757_v18 = vmul.f32 %v12089_v51, %v11910_v56 }
 0x42d   : > { %v3283_v61 = vadd.f32 %v12118_v1, %v3182_v25  ;;  %v3352_v3 = vmul.f32 %v10103_v52, %v11780_v30  ;;  %v4194_v54 = vadd.f32 %v4162_v8, %v4093_v14  ;;  %v3858_v47 = vmul.f32 %v12092_v41, %v11914_v17  ;;  %v12120_v25 = vld [vmem:[#allocation71_spill] sm:$0xff]  ;;  %v12121_v14 = vld [vmem:[#allocation125_spill] sm:$0xff]  ;;  %v12123_v1 = vld [vmem:[#allocation30_spill] sm:$0xff] }
 0x42e   : > { %v3688_v42 = vadd.f32 %v3656_v16, %v3587_v32  ;;  %v3959_v53 = vmul.f32 %v12096_v4, %v11763_v59  ;;  %v10267_v57 = vadd.f32 %v10216_v34, %v4898_v35  ;;  %v4060_v51 = vmul.f32 %v10157_v43, %v11802_v33  ;;  %v12122_v16 = vld [vmem:[#allocation90_spill] sm:$0xff] }
 0x42f   : > { %v3384_v20 = vadd.f32 %v3352_v3, %v3283_v61  ;;  %v3453_v0 = vmul.f32 %v11741_v63, %v3417_v29  ;;  %v4295_v10 = vadd.f32 %v4263_v22, %v4194_v54  ;;  %v3554_v8 = vmul.f32 %v11745_v60, %v3518_v13 }
 0x430   : > { %12119 = vst [vmem:[#allocation149_spill] sm:$0xff] %v10267_v57  ;;  %v3789_v52 = vadd.f32 %v3757_v18, %v3688_v42  ;;  %v3084_v32 = vadd.f32 %v12121_v14, %v12120_v25  ;;  %v5008_v41 = vsel %vm2002_vm1, %v10267_v57, 0.0  ;;  %v3153_v35 = vmul.f32 %v12122_v16, %v11768_v15  ;;  %v3720_v18 = vld [vmem:[#allocation3 + $0x128] sm:$0xff]  ;;  %v3120_v16 = vld [vmem:[#allocation3 + $0x158] sm:$0xff] }
 0x431   : > { %v3485_v4 = vadd.f32 %v3453_v0, %v3384_v20  ;;  %v3254_v34 = vmul.f32 %v12124_v45, %v12123_v1  ;;  %5009 = vadd.xlane.f32.xlu0 %v5008_v41  ;;  %v4396_v3 = vadd.f32 %v4364_v6, %v4295_v10  ;;  %v4161_v22 = vmul.f32 %v10169_v26, %v11806_v5  ;;  %v12125_v20 = vld [vmem:[#allocation81_spill] sm:$0xff] }
 0x432   : > { %v3890_v61 = vadd.f32 %v3858_v47, %v3789_v52  ;;  %v4262_v29 = vmul.f32 %v10171_v44, %v11809_v19  ;;  %v3655_v54 = vmul.f32 %v11748_v11, %v10194_v24  ;;  %v3185_v42 = vadd.f32 %v3153_v35, %v3084_v32  ;;  %v3821_v10 = vld [vmem:[#allocation2 + $0x128] sm:$0xff] }
 0x433   : > { %v3586_v13 = vadd.f32 %v3554_v8, %v3485_v4  ;;  %v3355_v0 = vmul.f32 %v12125_v20, %v11780_v30  ;;  %v4497_v25 = vadd.f32 %v4465_v46, %v4396_v3  ;;  %v4363_v6 = vmul.f32 %v11772_v2, %v10183_v39  ;;  %v3922_v24 = vld [vmem:[#allocation4 + $0x128] sm:$0xff] }
 0x434   : > { %v3991_v45 = vadd.f32 %v3959_v53, %v3890_v61  ;;  %v4464_v47 = vmul.f32 %v11775_v58, %v10185_v48  ;;  %v4565_v52 = vmul.f32 %v11785_v40, %v10192_v38  ;;  %v3756_v14 = vmul.f32 %v11910_v56, %v3720_v18 }
 0x435   : > { %v3687_v8 = vadd.f32 %v3655_v54, %v3586_v13  ;;  %v3286_v32 = vadd.f32 %v3254_v34, %v3185_v42  ;;  %v4598_v41 = vadd.f32 %v4566_v7, %v4497_v25  ;;  %v4666_v46 = vmul.f32 %v11788_v62, %v10204_v50  ;;  %v12155_v50 = vld [vmem:[#allocation54_spill] sm:$0xff] }
 0x436   : > { %v4092_v4 = vadd.f32 %v4060_v51, %v3991_v45  ;;  %v4767_v53 = vmul.f32 %v8811_v36, %v10208_v31  ;;  %v3857_v3 = vmul.f32 %v11914_v17, %v3821_v10  ;;  %v3456_v13 = vmul.f32 %v9957_v21, %v11741_v63  ;;  %v12126_v10 = vld [vmem:[#allocation132_spill] sm:$0xff]  ;;  %v12127_v21 = vld [vmem:[#allocation133_spill] sm:$0xff] }
 0x437   : > { %v3788_v35 = vadd.f32 %v3756_v14, %v3687_v8  ;;  %v3387_v61 = vadd.f32 %v3355_v0, %v3286_v32  ;;  %v4699_v54 = vadd.f32 %v4667_v37, %v4598_v41  ;;  %v4868_v34 = vmul.f32 %v8871_v9, %v10221_v55  ;;  %v12128_v32 = vld [vmem:[#allocation92_spill] sm:$0xff]  ;;  %v3320_v55 = vld [vmem:[#allocation4 + $0x148] sm:$0xff] }
 0x438   : > { %v4193_v18 = vadd.f32 %v4161_v22, %v4092_v4  ;;  %v3958_v7 = vmul.f32 %v11763_v59, %v3922_v24  ;;  %v4059_v42 = vmul.f32 %v12088_v27, %v11802_v33  ;;  %v3557_v25 = vmul.f32 %v9967_v12, %v11745_v60  ;;  %v12129_v12 = vld [vmem:[#allocation157_spill] sm:$0xff] }
 0x439   : > { %v3889_v51 = vadd.f32 %v3857_v3, %v3788_v35  ;;  %v3488_v20 = vadd.f32 %v3456_v13, %v3387_v61  ;;  %v4800_v0 = vadd.f32 %v10247_v28, %v4699_v54  ;;  %v3087_v37 = vadd.f32 %v12127_v21, %v12126_v10  ;;  %v12130_v13 = vld [vmem:[#allocation136_spill] sm:$0xff]  ;;  %v12135_v21 = vld [vmem:[#allocation45_spill] sm:$0xff] }
 0x43a   : > { %v4294_v45 = vadd.f32 %v4262_v29, %v4193_v18  ;;  %v3156_v22 = vmul.f32 %v11768_v15, %v3120_v16  ;;  %v4160_v14 = vmul.f32 %v10040_v49, %v11806_v5  ;;  %v3658_v41 = vmul.f32 %v12128_v32, %v11748_v11  ;;  %v12131_v18 = vld [vmem:[#allocation66_spill] sm:$0xff]  ;;  %v12136_v32 = vld [vmem:[#allocation95_spill] sm:$0xff]  ;;  %v12152_v31 = vld [vmem:[#allocation145_spill] sm:$0xff] }
 0x43b   : > { %v3990_v8 = vadd.f32 %v3958_v7, %v3889_v51  ;;  %v3589_v24 = vadd.f32 %v3557_v25, %v3488_v20  ;;  %v4901_v4 = vadd.f32 %v10253_v23, %v4800_v0  ;;  %v4261_v28 = vmul.f32 %v12129_v12, %v11809_v19  ;;  %v4026_v20 = vld [vmem:[#allocation3 + $0x190] sm:$0xff]  ;;  %v12133_v25 = vld [vmem:[#allocation29_spill] sm:$0xff] }
 0x43c   : > { %v4395_v35 = vadd.f32 %v4363_v6, %v4294_v45  ;;  %v3188_v29 = vadd.f32 %v3156_v22, %v3087_v37  ;;  %v4362_v61 = vmul.f32 %v10157_v43, %v11772_v2  ;;  %v3759_v54 = vmul.f32 %v12130_v13, %v11910_v56  ;;  %v12134_v6 = vld [vmem:[#allocation150_spill] sm:$0xff] }
 0x43d   : > { %v4091_v3 = vadd.f32 %v4059_v42, %v3990_v8  ;;  %v3690_v16 = vadd.f32 %v3658_v41, %v3589_v24  ;;  %v10326_v7 = vadd.f32 %v12131_v18, %v4901_v4  ;;  %v3358_v0 = vmul.f32 %v12134_v6, %v11780_v30  ;;  %v4127_v24 = vld [vmem:[#allocation2 + $0x190] sm:$0xff] }
 0x43e   : > { %v4496_v51 = vadd.f32 %v4464_v47, %v4395_v35  ;;  %v3289_v23 = vadd.f32 %v12133_v25, %v3188_v29  ;;  %v4463_v42 = vmul.f32 %v10169_v26, %v11775_v58  ;;  %v3860_v37 = vmul.f32 %v12135_v21, %v11914_v17 }
 0x43f   : > { %12132 = vst [vmem:[#allocation78_spill] sm:$0xff] %v10326_v7  ;;  %v4192_v45 = vadd.f32 %v4160_v14, %v4091_v3  ;;  %v3791_v10 = vadd.f32 %v3759_v54, %v3690_v16  ;;  %v5017_v22 = vsel %vm2002_vm1, %v10326_v7, 0.0  ;;  %v3459_v41 = vmul.f32 %v12136_v32, %v11741_v63  ;;  %v12137_v14 = vld [vmem:[#allocation85_spill] sm:$0xff]  ;;  %v4228_v54 = vld [vmem:[#allocation4 + $0x190] sm:$0xff] }
 0x440   : > { %v4597_v8 = vadd.f32 %v4565_v52, %v4496_v51  ;;  %v3390_v47 = vadd.f32 %v3358_v0, %v3289_v23  ;;  %5018 = vadd.xlane.f32.xlu1 %v5017_v22  ;;  %v3961_v29 = vmul.f32 %v12137_v14, %v11763_v59  ;;  %v4062_v3 = vmul.f32 %v11802_v33, %v4026_v20  ;;  %v12138_v52 = vld [vmem:[#allocation156_spill] sm:$0xff]  ;;  %v12139_v20 = vld [vmem:[#allocation86_spill] sm:$0xff]  ;;  %v12141_v22 = vld [vmem:[#allocation115_spill] sm:$0xff] }
 0x441   : > { %v4293_v4 = vadd.f32 %v4261_v28, %v4192_v45  ;;  %v3892_v35 = vadd.f32 %v3860_v37, %v3791_v10  ;;  %v4564_v13 = vmul.f32 %v10171_v44, %v11785_v40  ;;  %v3560_v51 = vmul.f32 %v12138_v52, %v11745_v60  ;;  %v12140_v37 = vld [vmem:[#allocation128_spill] sm:$0xff]  ;;  %v3119_v14 = vld [vmem:[#allocation3 + $0x150] sm:$0xff] }
 0x442   : > { %v4698_v16 = vadd.f32 %v4666_v46, %v4597_v8  ;;  %v3491_v25 = vadd.f32 %v3459_v41, %v3390_v47  ;;  %v4665_v0 = vmul.f32 %v11788_v62, %v10183_v39  ;;  %v4163_v45 = vmul.f32 %v11806_v5, %v4127_v24 }
 0x443   : > { %v4394_v23 = vadd.f32 %v4362_v61, %v4293_v4  ;;  %v3993_v28 = vadd.f32 %v3961_v29, %v3892_v35  ;;  %v3661_v46 = vmul.f32 %v12139_v20, %v11748_v11  ;;  %v2783_v8 = vadd.f32 %v12141_v22, %v12140_v37  ;;  %v10356_v35 = vld [vmem:[#allocation3 + $0x198] sm:$0xff]  ;;  %v12142_v29 = vld [vmem:[#allocation121_spill] sm:$0xff] }
 0x444   : > { %v4799_v10 = vadd.f32 %v4767_v53, %v4698_v16  ;;  %v3592_v21 = vadd.f32 %v3560_v51, %v3491_v25  ;;  %v4766_v41 = vmul.f32 %v8811_v36, %v10185_v48  ;;  %v4264_v4 = vmul.f32 %v11809_v19, %v4228_v54  ;;  %v10370_v54 = vld [vmem:[#allocation2 + $0x198] sm:$0xff]  ;;  %v10378_v22 = vld [vmem:[#allocation2 + $0x1a8] sm:$0xff]  ;;  %v10420_v48 = vld [vmem:[#allocation4 + $0x1a0] sm:$0xff] }
 0x445   : > { %v4495_v47 = vadd.f32 %v4463_v42, %v4394_v23  ;;  %v4094_v61 = vadd.f32 %v4062_v3, %v3993_v28  ;;  %v3762_v53 = vmul.f32 %v12088_v27, %v11910_v56  ;;  %v2884_v16 = vadd.f32 %v12142_v29, %v2783_v8  ;;  %v10365_v3 = vld [vmem:[#allocation3 + $0x1a8] sm:$0xff]  ;;  %v10382_v8 = vld [vmem:[#allocation4 + $0x198] sm:$0xff] }
 0x446   : > { %v4900_v7 = vadd.f32 %v4868_v34, %v4799_v10  ;;  %v3693_v24 = vadd.f32 %v3661_v46, %v3592_v21  ;;  %v4365_v42 = vmul.f32 %v11772_v2, %v10356_v35  ;;  %v3863_v23 = vmul.f32 %v10040_v49, %v11914_v17  ;;  %v12144_v10 = vld [vmem:[#allocation122_spill] sm:$0xff]  ;;  %v10391_v29 = vld [vmem:[#allocation4 + $0x1a8] sm:$0xff] }
 0x447   : > { %v4596_v25 = vadd.f32 %v4564_v13, %v4495_v47  ;;  %v4195_v51 = vadd.f32 %v4163_v45, %v4094_v61  ;;  %v2985_v27 = vadd.f32 %v12144_v10, %v2884_v16  ;;  %v3155_v21 = vmul.f32 %v11768_v15, %v3119_v14  ;;  %v3220_v13 = vld [vmem:[#allocation2 + $0x150] sm:$0xff]  ;;  %v12145_v61 = vld [vmem:[#allocation123_spill] sm:$0xff] }
 0x448   : > { %v10368_v34 = vadd.f32 %v12131_v18, %v4900_v7  ;;  %v3794_v28 = vadd.f32 %v3762_v53, %v3693_v24  ;;  %v4466_v37 = vmul.f32 %v11775_v58, %v10370_v54  ;;  %v3964_v49 = vmul.f32 %v12129_v12, %v11763_v59  ;;  %v10393_v16 = vld [vmem:[#allocation4 + $0x150] sm:$0xff] }
 0x449   : > { %v4697_v45 = vadd.f32 %v4665_v0, %v4596_v25  ;;  %v4296_v46 = vadd.f32 %v4264_v4, %v4195_v51  ;;  %v4065_v14 = vmul.f32 %v11802_v33, %v10365_v3  ;;  %v3086_v0 = vadd.f32 %v12145_v61, %v2985_v27  ;;  %v3118_v25 = vld [vmem:[#allocation3 + $0x148] sm:$0xff]  ;;  %v10406_v61 = vld [vmem:[#allocation3 + $0x1b0] sm:$0xff] }
 0x44a   : > { %12143 = vst [vmem:[#allocation57_spill] sm:$0xff] %v10368_v34  ;;  %v5014_v7 = vsel %vm2002_vm1, %v10368_v34, 0.0  ;;  %v3895_v47 = vadd.f32 %v3863_v23, %v3794_v28  ;;  %v4867_v24 = vmul.f32 %v8871_v9, %v10192_v38  ;;  %v4567_v12 = vmul.f32 %v11785_v40, %v10382_v8  ;;  %v10396_v23 = vld [vmem:[#allocation3 + $0x1a0] sm:$0xff] }
 0x44b   : > { %5015 = vadd.xlane.f32.xlu0 %v5014_v7  ;;  %v4798_v4 = vadd.f32 %v4766_v41, %v4697_v45  ;;  %v4397_v53 = vadd.f32 %v4365_v42, %v4296_v46  ;;  %v3256_v51 = vmul.f32 %v12123_v1, %v3220_v13  ;;  %v10398_v28 = vld [vmem:[#allocation2 + $0x1a0] sm:$0xff]  ;;  %v4166_v41 = vmul.f32 %v11806_v5, %v10378_v22 }
 0x44c   : > { %v3996_v10 = vadd.f32 %v3964_v49, %v3895_v47  ;;  %v3187_v27 = vadd.f32 %v3155_v21, %v3086_v0  ;;  %v4668_v46 = vmul.f32 %v11788_v62, %v10396_v23  ;;  %v4769_v7 = vmul.f32 %v8811_v36, %v10398_v28  ;;  %v10415_v47 = vld [vmem:[#allocation2 + $0x1b0] sm:$0xff]  ;;  %v12147_v0 = vld [vmem:[#allocation129_spill] sm:$0xff] }
 0x44d   : > { %v4899_v42 = vadd.f32 %v4867_v24, %v4798_v4  ;;  %v4498_v45 = vadd.f32 %v4466_v37, %v4397_v53  ;;  %v4267_v34 = vmul.f32 %v11809_v19, %v10391_v29  ;;  %v3357_v49 = vmul.f32 %v11780_v30, %v10393_v16  ;;  %v12148_v4 = vld [vmem:[#allocation112_spill] sm:$0xff] }
 0x44e   : > { %v4097_v13 = vadd.f32 %v4065_v14, %v3996_v10  ;;  %v3288_v57 = vadd.f32 %v3256_v51, %v3187_v27  ;;  %v2984_v24 = vadd.f32 %v12148_v4, %v12147_v0  ;;  %v3154_v53 = vmul.f32 %v11768_v15, %v3118_v25  ;;  %v12149_v27 = vld [vmem:[#allocation58_spill] sm:$0xff]  ;;  %v12150_v25 = vld [vmem:[#allocation117_spill] sm:$0xff] }
 0x44f   : > { %v10413_v21 = vadd.f32 %v12131_v18, %v4899_v42  ;;  %v4599_v37 = vadd.f32 %v4567_v12, %v4498_v45  ;;  %v4368_v51 = vmul.f32 %v11772_v2, %v10406_v61  ;;  %v3458_v39 = vmul.f32 %v12149_v27, %v11741_v63  ;;  %v10430_v0 = vld [vmem:[#allocation4 + $0x1b0] sm:$0xff] }
 0x450   : > { %v4198_v14 = vadd.f32 %v4166_v41, %v4097_v13  ;;  %v3389_v10 = vadd.f32 %v3357_v49, %v3288_v57  ;;  %v4870_v45 = vmul.f32 %v8871_v9, %v10420_v48  ;;  %v3085_v4 = vadd.f32 %v12150_v25, %v2984_v24  ;;  %v12151_v49 = vld [vmem:[#allocation43_spill] sm:$0xff]  ;;  %v3421_v25 = vld [vmem:[#allocation3 + $0x150] sm:$0xff] }
 0x451   : > { %12146 = vst [vmem:[#allocation65_spill] sm:$0xff] %v10413_v21  ;;  %v5011_v12 = vsel %vm2002_vm1, %v10413_v21, 0.0  ;;  %v4700_v42 = vadd.f32 %v4668_v46, %v4599_v37  ;;  %v4469_v13 = vmul.f32 %v11775_v58, %v10415_v47  ;;  %v3559_v27 = vmul.f32 %v12151_v49, %v11745_v60  ;;  %v12153_v21 = vld [vmem:[#allocation75_spill] sm:$0xff]  ;;  %v12154_v37 = vld [vmem:[#allocation42_spill] sm:$0xff] }
 0x452   : > { %5012 = vadd.xlane.f32.xlu1 %v5011_v12  ;;  %v4299_v41 = vadd.f32 %v4267_v34, %v4198_v14  ;;  %v3490_v57 = vadd.f32 %v3458_v39, %v3389_v10  ;;  %v10439_v46 = vadd.f32 %v12153_v21, %v12152_v31  ;;  %v10443_v38 = vadd.f32 %v12155_v50, %v12154_v37  ;;  %v10447_v14 = vld [vmem:[#allocation3 + $0x1b8] sm:$0xff]  ;;  %v12158_v50 = vld [vmem:[#allocation140_spill] sm:$0xff] }
 0x453   : > { %v4801_v44 = vadd.f32 %v4769_v7, %v4700_v42  ;;  %v3186_v24 = vadd.f32 %v3154_v53, %v3085_v4  ;;  %v4570_v34 = vmul.f32 %v11785_v40, %v10430_v0  ;;  %v3660_v10 = vmul.f32 %v12134_v6, %v11748_v11  ;;  %v10453_v21 = vld [vmem:[#allocation2 + $0x1b8] sm:$0xff]  ;;  %v3121_v42 = vld [vmem:[#allocation3 + $0x160] sm:$0xff] }
 0x454   : > { %12156 = vst [vmem:[#allocation24_spill] sm:$0xff] %v10443_v38  ;;  %v4400_v12 = vadd.f32 %v4368_v51, %v4299_v41  ;;  %v3591_v39 = vadd.f32 %v3559_v27, %v3490_v57  ;;  %v4671_v31 = vmul.f32 %v11788_v62, %v10447_v14  ;;  %12157 = vst [vmem:[#allocation106_spill] sm:$0xff] %v10453_v21  ;;  %v3522_v51 = vld [vmem:[#allocation2 + $0x150] sm:$0xff]  ;;  %v10459_v57 = vld [vmem:[#allocation4 + $0x1b8] sm:$0xff] }
 0x455   : > { %v4902_v49 = vadd.f32 %v4870_v45, %v4801_v44  ;;  %v3287_v7 = vadd.f32 %v12158_v50, %v3186_v24  ;;  %v3356_v53 = vmul.f32 %v11780_v30, %v3320_v55  ;;  %v4772_v41 = vmul.f32 %v8811_v36, %v10453_v21  ;;  %12159 = vst [vmem:[#allocation104_spill] sm:$0xff] %v10459_v57  ;;  %v3225_v24 = vld [vmem:[#allocation2 + $0x178] sm:$0xff]  ;;  %v12161_v38 = vld [vmem:[#allocation25_spill] sm:$0xff] }
 0x456   : > { %v4501_v4 = vadd.f32 %v4469_v13, %v4400_v12  ;;  %v3692_v6 = vadd.f32 %v3660_v10, %v3591_v39  ;;  %v3761_v44 = vmul.f32 %v12136_v32, %v11910_v56  ;;  %v4873_v27 = vmul.f32 %v8871_v9, %v10459_v57 }
 0x457   : > { %v10464_v45 = vadd.f32 %v12131_v18, %v4902_v49  ;;  %v3388_v37 = vadd.f32 %v3356_v53, %v3287_v7  ;;  %v3457_v55 = vmul.f32 %v11741_v63, %v3421_v25  ;;  %v3862_v50 = vmul.f32 %v12138_v52, %v11914_v17  ;;  %v12160_v49 = vld [vmem:[#allocation146_spill] sm:$0xff]  ;;  %v3724_v53 = vld [vmem:[#allocation3 + $0x158] sm:$0xff] }
 0x458   : > { %v4602_v13 = vadd.f32 %v4570_v34, %v4501_v4  ;;  %v3793_v12 = vadd.f32 %v3761_v44, %v3692_v6  ;;  %v3558_v39 = vmul.f32 %v11745_v60, %v3522_v51  ;;  %v3088_v21 = vadd.f32 %v12161_v38, %v12160_v49  ;;  %v3323_v51 = vld [vmem:[#allocation4 + $0x160] sm:$0xff]  ;;  %v3525_v49 = vld [vmem:[#allocation2 + $0x168] sm:$0xff] }
 0x459   : > { %v5020_v32 = vsel %vm2002_vm1, %v10464_v45, 0.0  ;;  %v3489_v10 = vadd.f32 %v3457_v55, %v3388_v37  ;;  %v3157_v57 = vmul.f32 %v11768_v15, %v3121_v42  ;;  %v3963_v34 = vmul.f32 %v12139_v20, %v11763_v59  ;;  %v3825_v55 = vld [vmem:[#allocation2 + $0x158] sm:$0xff] }
 0x45a   : > { %5021 = vadd.xlane.f32.xlu0 %v5020_v32  ;;  %v4703_v7 = vadd.f32 %v4671_v31, %v4602_v13  ;;  %v3894_v25 = vadd.f32 %v3862_v50, %v3793_v12  ;;  %v4064_v52 = vmul.f32 %v10396_v23, %v11802_v33  ;;  %v10482_v4 = vmul.f32 %v12123_v1, %v3225_v24  ;;  %v3424_v13 = vld [vmem:[#allocation3 + $0x168] sm:$0xff]  ;;  %v3926_v24 = vld [vmem:[#allocation4 + $0x158] sm:$0xff]  ;;  %v12162_v32 = vld [vmem:[#allocation40_spill] sm:$0xff] }
 0x45b   : > { %v3590_v6 = vadd.f32 %v3558_v39, %v3489_v10  ;;  %v3659_v38 = vmul.f32 %v11748_v11, %v10393_v16  ;;  %v3189_v44 = vadd.f32 %v3157_v57, %v3088_v21  ;;  %v4165_v31 = vmul.f32 %v10398_v28, %v11806_v5 }
 0x45c   : > { %v4804_v42 = vadd.f32 %v4772_v41, %v4703_v7  ;;  %v3995_v37 = vadd.f32 %v3963_v34, %v3894_v25  ;;  %v4266_v20 = vmul.f32 %v10420_v48, %v11809_v19  ;;  %v3760_v50 = vmul.f32 %v11910_v56, %v3724_v53 }
 0x45d   : > { %v3691_v12 = vadd.f32 %v3659_v38, %v3590_v6  ;;  %v3290_v39 = vadd.f32 %v12162_v32, %v3189_v44  ;;  %v3359_v10 = vmul.f32 %v11780_v30, %v3323_v51  ;;  %v4367_v41 = vmul.f32 %v11772_v2, %v10365_v3  ;;  %v10499_v6 = vld [vmem:[#allocation4 + $0x168] sm:$0xff]  ;;  %v2922_v44 = vld [vmem:[#allocation2 + $0x138] sm:$0xff] }
 0x45e   : > { %v4905_v16 = vadd.f32 %v4873_v27, %v4804_v42  ;;  %v4096_v21 = vadd.f32 %v4064_v52, %v3995_v37  ;;  %v4468_v57 = vmul.f32 %v11775_v58, %v10378_v22  ;;  %v3861_v25 = vmul.f32 %v11914_v17, %v3825_v55  ;;  %v3023_v42 = vld [vmem:[#allocation4 + $0x138] sm:$0xff] }
 0x45f   : > { %v3792_v7 = vadd.f32 %v3760_v50, %v3691_v12  ;;  %v3391_v34 = vadd.f32 %v3359_v10, %v3290_v39  ;;  %v3460_v53 = vmul.f32 %v11741_v63, %v3424_v13  ;;  %v4569_v52 = vmul.f32 %v11785_v40, %v10391_v29  ;;  %v3124_v50 = vld [vmem:[#allocation3 + $0x178] sm:$0xff] }
 0x460   : > { %v10502_v38 = vadd.f32 %v12131_v18, %v4905_v16  ;;  %v4197_v27 = vadd.f32 %v4165_v31, %v4096_v21  ;;  %v3962_v51 = vmul.f32 %v11763_v59, %v3926_v24  ;;  %v4063_v55 = vmul.f32 %v10356_v35, %v11802_v33  ;;  %v12164_v21 = vld [vmem:[#allocation27_spill] sm:$0xff]  ;;  %v12165_v35 = vld [vmem:[#allocation28_spill] sm:$0xff] }
 0x461   : > { %v3893_v37 = vadd.f32 %v3861_v25, %v3792_v7  ;;  %v3492_v12 = vadd.f32 %v3460_v53, %v3391_v34  ;;  %v3561_v13 = vmul.f32 %v11745_v60, %v3525_v49  ;;  %v4164_v31 = vmul.f32 %v10370_v54, %v11806_v5 }
 0x462   : > { %12163 = vst [vmem:[#allocation63_spill] sm:$0xff] %v10502_v38  ;;  %v5029_v32 = vsel %vm2002_vm1, %v10502_v38, 0.0  ;;  %v4298_v39 = vadd.f32 %v4266_v20, %v4197_v27  ;;  %v3662_v24 = vmul.f32 %v11748_v11, %v10499_v6  ;;  %v2958_v7 = vmul.f32 %v12164_v21, %v2922_v44  ;;  %v12166_v38 = vld [vmem:[#allocation39_spill] sm:$0xff] }
 0x463   : > { %5030 = vadd.xlane.f32.xlu1 %v5029_v32  ;;  %v3994_v10 = vadd.f32 %v3962_v51, %v3893_v37  ;;  %v3593_v16 = vadd.f32 %v3561_v13, %v3492_v12  ;;  %v3059_v25 = vmul.f32 %v12165_v35, %v3023_v42  ;;  %v4670_v49 = vmul.f32 %v11788_v62, %v10406_v61 }
 0x464   : > { %v4399_v34 = vadd.f32 %v4367_v41, %v4298_v39  ;;  %v4265_v20 = vmul.f32 %v10382_v8, %v11809_v19  ;;  %v3763_v54 = vmul.f32 %v10157_v43, %v11910_v56  ;;  %v2990_v32 = vadd.f32 %v2958_v7, %v12166_v38 }
 0x465   : > { %v4095_v53 = vadd.f32 %v4063_v55, %v3994_v10  ;;  %v3694_v27 = vadd.f32 %v3662_v24, %v3593_v16  ;;  %v3160_v51 = vmul.f32 %v11768_v15, %v3124_v50  ;;  %v4771_v44 = vmul.f32 %v8811_v36, %v10415_v47  ;;  %v12167_v50 = vld [vmem:[#allocation74_spill] sm:$0xff] }
 0x466   : > { %v4500_v37 = vadd.f32 %v4468_v57, %v4399_v34  ;;  %v4872_v41 = vmul.f32 %v8871_v9, %v10430_v0  ;;  %v4366_v42 = vmul.f32 %v10396_v23, %v11772_v2  ;;  %v3864_v43 = vmul.f32 %v10169_v26, %v11914_v17 }
 0x467   : > { %v4196_v8 = vadd.f32 %v4164_v31, %v4095_v53  ;;  %v3795_v12 = vadd.f32 %v3763_v54, %v3694_v27  ;;  %v3091_v55 = vadd.f32 %v3059_v25, %v2990_v32  ;;  %v4467_v38 = vmul.f32 %v10398_v28, %v11775_v58  ;;  %v12168_v25 = vld [vmem:[#allocation44_spill] sm:$0xff]  ;;  %v3123_v54 = vld [vmem:[#allocation3 + $0x170] sm:$0xff] }
 0x468   : > { %v4601_v13 = vadd.f32 %v4569_v52, %v4500_v37  ;;  %v4568_v57 = vmul.f32 %v10420_v48, %v11785_v40  ;;  %v3965_v39 = vmul.f32 %v12167_v50, %v11763_v59  ;;  %v4066_v23 = vmul.f32 %v10406_v61, %v11802_v33  ;;  %v12170_v32 = vld [vmem:[#allocation32_spill] sm:$0xff]  ;;  %v12176_v50 = vld [vmem:[#allocation99_spill] sm:$0xff] }
 0x469   : > { %v4297_v24 = vadd.f32 %v4265_v20, %v4196_v8  ;;  %v3896_v10 = vadd.f32 %v3864_v43, %v3795_v12  ;;  %v3192_v31 = vadd.f32 %v3160_v51, %v3091_v55  ;;  %v4669_v26 = vmul.f32 %v11788_v62, %v10365_v3  ;;  %v12173_v55 = vld [vmem:[#allocation135_spill] sm:$0xff] }
 0x46a   : > { %v4702_v16 = vadd.f32 %v4670_v49, %v4601_v13  ;;  %v4770_v52 = vmul.f32 %v8811_v36, %v10378_v22  ;;  %v4167_v28 = vmul.f32 %v10415_v47, %v11806_v5  ;;  %v3362_v34 = vmul.f32 %v12168_v25, %v11780_v30  ;;  %v12169_v49 = vld [vmem:[#allocation110_spill] sm:$0xff] }
 0x46b   : > { %v4398_v48 = vadd.f32 %v4366_v42, %v4297_v24  ;;  %v3997_v21 = vadd.f32 %v3965_v39, %v3896_v10  ;;  %v3293_v7 = vadd.f32 %v10482_v4, %v3192_v31  ;;  %v4871_v61 = vmul.f32 %v8871_v9, %v10391_v29  ;;  %v12172_v42 = vld [vmem:[#allocation87_spill] sm:$0xff]  ;;  %v3224_v10 = vld [vmem:[#allocation2 + $0x170] sm:$0xff] }
 0x46c   : > { %v4803_v20 = vadd.f32 %v4771_v44, %v4702_v16  ;;  %v4268_v3 = vmul.f32 %v10430_v0, %v11809_v19  ;;  %v3463_v22 = vmul.f32 %v12169_v49, %v11741_v63  ;;  %v2787_v4 = vadd.f32 %v12170_v32, %v10439_v46  ;;  %v12171_v44 = vld [vmem:[#allocation106_spill] sm:$0xff]  ;;  %v12175_v46 = vld [vmem:[#allocation105_spill] sm:$0xff] }
 0x46d   : > { %v4499_v53 = vadd.f32 %v4467_v38, %v4398_v48  ;;  %v4098_v47 = vadd.f32 %v4066_v23, %v3997_v21  ;;  %v3394_v27 = vadd.f32 %v3362_v34, %v3293_v7  ;;  %v4369_v37 = vmul.f32 %v10447_v14, %v11772_v2  ;;  %v6387_v48 = vld [vmem:[#allocation4 + $0x128] sm:$0xff]  ;;  %v12178_v34 = vld [vmem:[#allocation104_spill] sm:$0xff]  ;;  %v12180_v32 = vld [vmem:[#allocation38_spill] sm:$0xff] }
 0x46e   : > { %v4904_v51 = vadd.f32 %v4872_v41, %v4803_v20  ;;  %v4470_v29 = vmul.f32 %v12171_v44, %v11775_v58  ;;  %v3564_v0 = vmul.f32 %v12172_v42, %v11745_v60  ;;  %v2888_v13 = vadd.f32 %v12173_v55, %v2787_v4 }
 0x46f   : > { %v4600_v8 = vadd.f32 %v4568_v57, %v4499_v53  ;;  %v4199_v12 = vadd.f32 %v4167_v28, %v4098_v47  ;;  %v3495_v43 = vadd.f32 %v3463_v22, %v3394_v27  ;;  %v3665_v41 = vmul.f32 %v12175_v46, %v11748_v11  ;;  %v12177_v57 = vld [vmem:[#allocation134_spill] sm:$0xff]  ;;  %v10584_v27 = vld [vmem:[#allocation3 + $0x1c8] sm:$0xff] }
 0x470   : > { %v10567_v38 = vadd.f32 %v12131_v18, %v4904_v51  ;;  %v3766_v39 = vmul.f32 %v12176_v50, %v11910_v56  ;;  %v3159_v24 = vmul.f32 %v11768_v15, %v3123_v54  ;;  %v2989_v28 = vadd.f32 %v12177_v57, %v2888_v13  ;;  %v12179_v22 = vld [vmem:[#allocation98_spill] sm:$0xff]  ;;  %v12181_v51 = vld [vmem:[#allocation24_spill] sm:$0xff] }
 0x471   : > { %v4701_v23 = vadd.f32 %v4669_v26, %v4600_v8  ;;  %v4300_v31 = vadd.f32 %v4268_v3, %v4199_v12  ;;  %v3596_v16 = vadd.f32 %v3564_v0, %v3495_v43  ;;  %v3057_v21 = vmul.f32 %v6387_v48, %v12165_v35  ;;  %v10582_v26 = vld [vmem:[#allocation3 + $0x1c0] sm:$0xff]  ;;  %v10587_v35 = vld [vmem:[#allocation4 + $0x170] sm:$0xff]  ;;  %v12182_v0 = vld [vmem:[#allocation33_spill] sm:$0xff] }
 0x472   : > { %12174 = vst [vmem:[#allocation69_spill] sm:$0xff] %v10567_v38  ;;  %v5026_v7 = vsel %vm2002_vm1, %v10567_v38, 0.0  ;;  %v4571_v20 = vmul.f32 %v12178_v34, %v11785_v40  ;;  %v3867_v53 = vmul.f32 %v12179_v22, %v11914_v17  ;;  %v3090_v4 = vadd.f32 %v12180_v32, %v2989_v28  ;;  %v3122_v12 = vld [vmem:[#allocation3 + $0x168] sm:$0xff]  ;;  %v10596_v50 = vld [vmem:[#allocation2 + $0x1c0] sm:$0xff]  ;;  %v10602_v28 = vpop.xlane.xlu0 %793 }
 0x473   : > { %5027 = vadd.xlane.f32.xlu0 %v5026_v7  ;;  %v4802_v54 = vadd.f32 %v4770_v52, %v4701_v23  ;;  %v4401_v47 = vadd.f32 %v4369_v37, %v4300_v31  ;;  %v3697_v3 = vadd.f32 %v3665_v41, %v3596_v16  ;;  %v2887_v8 = vadd.f32 %v12182_v0, %v12181_v51  ;;  %v12183_v52 = vld [vmem:[#allocation51_spill] sm:$0xff]  ;;  %v10598_v23 = vld [vmem:[#allocation4 + $0x1c0] sm:$0xff]  ;;  %v10600_v16 = vld [vmem:[#allocation2 + $0x1c8] sm:$0xff] }
 0x474   : > { %v3260_v43 = vmul.f32 %v12123_v1, %v3224_v10  ;;  %v4672_v55 = vmul.f32 %v11788_v62, %v10582_v26  ;;  %v3968_v37 = vmul.f32 %v12183_v52, %v11763_v59  ;;  %v3191_v57 = vadd.f32 %v3159_v24, %v3090_v4  ;;  %v10615_v24 = vld [vmem:[#allocation4 + $0x1c8] sm:$0xff]  ;;  %v12186_v4 = vld [vmem:[#allocation34_spill] sm:$0xff] }
 0x475   : > { %v4903_v13 = vadd.f32 %v4871_v61, %v4802_v54  ;;  %v4502_v41 = vadd.f32 %v4470_v29, %v4401_v47  ;;  %v3798_v31 = vadd.f32 %v3766_v39, %v3697_v3  ;;  %v4773_v10 = vmul.f32 %v8811_v36, %v10596_v50  ;;  %v12185_v3 = vld [vmem:[#allocation139_spill] sm:$0xff]  ;;  %v3223_v52 = vld [vmem:[#allocation2 + $0x168] sm:$0xff] }
 0x476   : > { %v4874_v48 = vmul.f32 %v8871_v9, %v10598_v23  ;;  %v4069_v61 = vmul.f32 %v11802_v33, %v10584_v27  ;;  %v3361_v29 = vmul.f32 %v11780_v30, %v10587_v35  ;;  %v3292_v54 = vadd.f32 %v3260_v43, %v3191_v57 }
 0x477   : > { %v10613_v7 = vadd.f32 %v12131_v18, %v4903_v13  ;;  %v4603_v39 = vadd.f32 %v4571_v20, %v4502_v41  ;;  %v3899_v22 = vadd.f32 %v3867_v53, %v3798_v31  ;;  %v4170_v47 = vmul.f32 %v11806_v5, %v10600_v16  ;;  %v10625_v20 = vpop.xlane.xlu1 %796  ;;  %v10627_v41 = vld [vmem:[#allocation3 + $0x1d0] sm:$0xff] }
 0x478   : > { %v3462_v32 = vmul.f32 %v12185_v3, %v11741_v63  ;;  %v2988_v51 = vadd.f32 %v12186_v4, %v2887_v8  ;;  %v3158_v0 = vmul.f32 %v11768_v15, %v3122_v12  ;;  %v3393_v43 = vadd.f32 %v3361_v29, %v3292_v54  ;;  %v10631_v4 = vld [vmem:[#allocation2 + $0x1d0] sm:$0xff]  ;;  %v12187_v12 = vld [vmem:[#allocation80_spill] sm:$0xff] }
 0x479   : > { %12184 = vst [vmem:[#allocation142_spill] sm:$0xff] %v10613_v7  ;;  %v5023_v13 = vsel %vm2002_vm1, %v10613_v7, 0.0  ;;  %v4704_v38 = vadd.f32 %v4672_v55, %v4603_v39  ;;  %v4000_v53 = vadd.f32 %v3968_v37, %v3899_v22  ;;  %v4271_v31 = vmul.f32 %v11809_v19, %v10615_v24  ;;  %v10638_v39 = vpop.xlane.xlu0 %799 }
 0x47a   : > { %5024 = vadd.xlane.f32.xlu1 %v5023_v13  ;;  %v3089_v57 = vadd.f32 %v3057_v21, %v2988_v51  ;;  %v3494_v15 = vadd.f32 %v3462_v32, %v3393_v43  ;;  %v3563_v7 = vmul.f32 %v12187_v12, %v11745_v60  ;;  %v3259_v55 = vmul.f32 %v12123_v1, %v3223_v52  ;;  %v10640_v13 = vld [vmem:[#allocation4 + $0x1d0] sm:$0xff] }
 0x47b   : > { %v4805_v3 = vadd.f32 %v4773_v10, %v4704_v38  ;;  %v4101_v8 = vadd.f32 %v4069_v61, %v4000_v53  ;;  %v4372_v37 = vmul.f32 %v11772_v2, %v10627_v41  ;;  %v3664_v21 = vmul.f32 %v12168_v25, %v11748_v11  ;;  %v3425_v10 = vld [vmem:[#allocation3 + $0x170] sm:$0xff]  ;;  %v10653_v52 = vpop.xlane.xlu1 %802 }
 0x47c   : > { %v3190_v29 = vadd.f32 %v3158_v0, %v3089_v57  ;;  %v3595_v38 = vadd.f32 %v3563_v7, %v3494_v15  ;;  %v4473_v61 = vmul.f32 %v11775_v58, %v10631_v4  ;;  %v3360_v1 = vmul.f32 %v10499_v6, %v11780_v30  ;;  %v3526_v25 = vld [vmem:[#allocation2 + $0x170] sm:$0xff] }
 0x47d   : > { %v4906_v22 = vadd.f32 %v4874_v48, %v4805_v3  ;;  %v4202_v54 = vadd.f32 %v4170_v47, %v4101_v8  ;;  %v4639_v48 = vld [vmem:[#allocation3 + $0x1d8] sm:$0xff]  ;;  %v3765_v7 = vmul.f32 %v12169_v49, %v11910_v56  ;;  %v4574_v53 = vmul.f32 %v11785_v40, %v10640_v13 }
 0x47e   : > { %v3291_v32 = vadd.f32 %v3259_v55, %v3190_v29  ;;  %v3696_v47 = vadd.f32 %v3664_v21, %v3595_v38  ;;  %v3461_v57 = vmul.f32 %v11741_v63, %v3425_v10  ;;  %v4675_v49 = vmul.f32 %v11788_v62, %v4639_v48  ;;  %v4740_v8 = vld [vmem:[#allocation2 + $0x1d8] sm:$0xff]  ;;  %v10664_v55 = vpop.xlane.xlu0 %805 }
 0x47f   : > { %v10649_v51 = vadd.f32 %v12131_v18, %v4906_v22  ;;  %v4303_v0 = vadd.f32 %v4271_v31, %v4202_v54  ;;  %v3866_v31 = vmul.f32 %v12172_v42, %v11914_v17  ;;  %v3562_v12 = vmul.f32 %v11745_v60, %v3526_v25  ;;  %v3728_v54 = vld [vmem:[#allocation3 + $0x178] sm:$0xff] }
 0x480   : > { %v3392_v43 = vadd.f32 %v3360_v1, %v3291_v32  ;;  %v3797_v3 = vadd.f32 %v3765_v7, %v3696_v47  ;;  %v3967_v63 = vmul.f32 %v12175_v46, %v11763_v59  ;;  %v4841_v38 = vld [vmem:[#allocation4 + $0x1d8] sm:$0xff]  ;;  %v3663_v21 = vmul.f32 %v11748_v11, %v10587_v35 }
 0x481   : > { %v5032_v30 = vsel %vm2002_vm1, %v10649_v51, 0.0  ;;  %v4404_v6 = vadd.f32 %v4372_v37, %v4303_v0  ;;  %v4068_v37 = vmul.f32 %v10582_v26, %v11802_v33  ;;  %v4776_v32 = vmul.f32 %v8811_v36, %v4740_v8  ;;  %v3829_v1 = vld [vmem:[#allocation2 + $0x178] sm:$0xff]  ;;  %v10675_v0 = vpop.xlane.xlu1 %808 }
 0x482   : > { %5033 = vadd.xlane.f32.xlu0 %v5032_v30  ;;  %v3493_v15 = vadd.f32 %v3461_v57, %v3392_v43  ;;  %v3898_v22 = vadd.f32 %v3866_v31, %v3797_v3  ;;  %v3764_v48 = vmul.f32 %v11910_v56, %v3728_v54  ;;  %v4877_v7 = vmul.f32 %v8871_v9, %v4841_v38  ;;  %v3930_v35 = vld [vmem:[#allocation4 + $0x178] sm:$0xff]  ;;  %v10682_v57 = vpop.xlane.xlu0 %811 }
 0x483   : > { %v4505_v29 = vadd.f32 %v4473_v61, %v4404_v6  ;;  %v4169_v61 = vmul.f32 %v10596_v50, %v11806_v5  ;;  %v4270_v11 = vmul.f32 %v10598_v23, %v11809_v19  ;;  %v3865_v43 = vmul.f32 %v11914_v17, %v3829_v1 }
 0x484   : > { %v3594_v42 = vadd.f32 %v3562_v12, %v3493_v15  ;;  %v3999_v60 = vadd.f32 %v3967_v63, %v3898_v22  ;;  %v4371_v3 = vmul.f32 %v11772_v2, %v10584_v27  ;;  %v3966_v56 = vmul.f32 %v11763_v59, %v3930_v35 }
 0x485   : > { %v4606_v10 = vadd.f32 %v4574_v53, %v4505_v29  ;;  %v4472_v12 = vmul.f32 %v11775_v58, %v10600_v16  ;;  %v10691_v29 = vpop.xlane.xlu1 %814  ;;  %v4168_v22 = vmul.f32 %v12171_v44, %v11806_v5  ;;  %v4269_v54 = vmul.f32 %v12178_v34, %v11809_v19 }
 0x486   : > { %v3695_v46 = vadd.f32 %v3663_v21, %v3594_v42  ;;  %v4100_v25 = vadd.f32 %v4068_v37, %v3999_v60  ;;  %v10695_v63 = vpop.xlane.xlu0 %4949  ;;  %v4674_v5 = vmul.f32 %v11788_v62, %v10627_v41  ;;  %v4370_v21 = vmul.f32 %v10582_v26, %v11772_v2  ;;  %v6388_v26 = vld [vmem:[%s7353_s24] sm:$0xff] }
 0x487   : > { %v4707_v47 = vadd.f32 %v4675_v49, %v4606_v10  ;;  %v4067_v49 = vmul.f32 %v10447_v14, %v11802_v33  ;;  %v4573_v33 = vmul.f32 %v11785_v40, %v10615_v24  ;;  %v4775_v34 = vmul.f32 %v8811_v36, %v10631_v4 }
 0x488   : > { %v3796_v53 = vadd.f32 %v3764_v48, %v3695_v46  ;;  %v4201_v6 = vadd.f32 %v4169_v61, %v4100_v25  ;;  %v4471_v61 = vmul.f32 %v10596_v50, %v11775_v58  ;;  %v4876_v1 = vmul.f32 %v8871_v9, %v10640_v13 }
 0x489   : > { %v4808_v30 = vadd.f32 %v4776_v32, %v4707_v47  ;;  %v10708_v44 = vpop.xlane.xlu1 %4958  ;;  %v857_v32 = vmul.f32 0.03125, %v10602_v28  ;;  %v4572_v2 = vmul.f32 %v10598_v23, %v11785_v40  ;;  %v859_v28 = vmul.f32 0.03125, %v10638_v39  ;;  %v6389_v23 = vld [vmem:[%s7353_s24 + $0x10] sm:$0xff]  ;;  %v6390_v39 = vld [vmem:[%s11367_s8] ss:$0 sm:$0xff] }
 0x48a   : > { %v3897_v31 = vadd.f32 %v3865_v43, %v3796_v53  ;;  %v4302_v15 = vadd.f32 %v4270_v11, %v4201_v6  ;;  %v10712_v10 = vpop.xlane.xlu0 %4955  ;;  %v4673_v58 = vmul.f32 %v11788_v62, %v10584_v27  ;;  %v858_v13 = vmul.f32 0.03125, %v10625_v20 }
 0x48b   : > { %v4909_v8 = vadd.f32 %v4877_v7, %v4808_v30  ;;  %v10724_v48 = vsub.f32 %v6388_v26, %v857_v32  ;;  %v4774_v40 = vmul.f32 %v8811_v36, %v10600_v16  ;;  %v10735_v35 = vsub.f32 %v6389_v23, %v859_v28  ;;  %v6391_v30 = vld [vmem:[%s7353_s24 + $0x8] sm:$0xff] }
 0x48c   : > { %v3998_v17 = vadd.f32 %v3966_v56, %v3897_v31  ;;  %v4403_v59 = vadd.f32 %v4371_v3, %v4302_v15  ;;  %v861_v62 = vmul.f32 0.03125, %v10664_v55  ;;  %v4875_v36 = vmul.f32 %v8871_v9, %v10615_v24  ;;  %v6392_v56 = vld [vmem:[%s7353_s24 + $0x20] sm:$0xff] }
 0x48d   : > { %v10698_v37 = vadd.f32 %v12131_v18, %v4909_v8  ;;  %v4953_v4 = vpop.xlane.xlu1 %4952  ;;  %v953_v27 = vmul.f32 %v10724_v48, %v10724_v48  ;;  %v10752_v6 = vsub.f32 %v6391_v30, %v858_v13  ;;  %v860_v55 = vmul.f32 0.03125, %v10653_v52 }
 0x48e   : > { %v4099_v14 = vadd.f32 %v4067_v49, %v3998_v17  ;;  %v4504_v42 = vadd.f32 %v4472_v12, %v4403_v59  ;;  %v10729_v50 = vpop.xlane.xlu0 %4961  ;;  %v10756_v49 = vsub.f32 %v6392_v56, %v861_v62  ;;  %v863_v9 = vmul.f32 0.03125, %v10682_v57  ;;  %v6393_v12 = vld [vmem:[%s7353_s24 + $0x18] sm:$0xff] }
 0x48f   : > { %v5041_v38 = vsel %vm2002_vm1, %v10698_v37, 0.0  ;;  %v1081_v8 = vsel %vm671_vm0, %v953_v27, 0.0  ;;  %v955_v24 = vmul.f32 %v10735_v35, %v10735_v35  ;;  %v10763_v17 = vsub.f32 %v6393_v12, %v860_v55  ;;  %v12191_v27 = vld [vmem:[#allocation46_spill] sm:$0xff] }
 0x490   : > { %5042 = vadd.xlane.f32.xlu1 %v5041_v38  ;;  %v4200_v18 = vadd.f32 %v4168_v22, %v4099_v14  ;;  %v4605_v19 = vadd.f32 %v4573_v33, %v4504_v42  ;;  %v862_v52 = vmul.f32 0.03125, %v10675_v0  ;;  %v954_v59 = vmul.f32 %v10752_v6, %v10752_v6  ;;  %v6394_v33 = vld [vmem:[%s7353_s24 + $0x30] sm:$0xff]  ;;  %v6395_v0 = vld [vmem:[%s7353_s24 + $0x28] sm:$0xff] }
 0x491   : > { %v10749_v43 = vpop.xlane.xlu1 %4970  ;;  %v10771_v14 = vsub.f32 %v6394_v33, %v863_v9  ;;  %v1087_v57 = vsel %vm671_vm0, %v955_v24, 0.0  ;;  %v5045_v38 = vmul.f32 0.0625, %v10695_v63  ;;  %v5048_v30 = vmul.f32 0.0625, %v10708_v44  ;;  %v12192_v9 = vld [vmem:[#allocation153_spill] sm:$0xff]  ;;  %v12194_v33 = vld [vmem:[#allocation50_spill] sm:$0xff] }
 0x492   : > { %v4301_v60 = vadd.f32 %v4269_v54, %v4200_v18  ;;  %v4706_v41 = vadd.f32 %v4674_v5, %v4605_v19  ;;  %v4968_v31 = vpop.xlane.xlu0 %4967  ;;  %v957_v54 = vmul.f32 %v10756_v49, %v10756_v49  ;;  %v1084_v32 = vsel %vm671_vm0, %v954_v59, 0.0 }
 0x493   : > { %v864_v19 = vmul.f32 0.03125, %v10691_v29 }
 0x494   : > { %v4402_v46 = vadd.f32 %v4370_v21, %v4301_v60  ;;  %v4807_v47 = vadd.f32 %v4775_v34, %v4706_v41  ;;  %v10780_v21 = vsub.f32 %v6395_v0, %v862_v52  ;;  %v956_v34 = vmul.f32 %v10763_v17, %v10763_v17  ;;  %v12193_v52 = vld [vmem:[#allocation41_spill] sm:$0xff] }
 0x495   : > { %v4965_v42 = vpop.xlane.xlu1 %4964  ;;  %v1093_v63 = vsel %vm671_vm0, %v957_v54, 0.0  ;;  %v959_v60 = vmul.f32 %v10771_v14, %v10771_v14  ;;  %v10831_v44 = vsub.f32 %v12193_v52, %v5048_v30 }
 0x496   : > { %v4503_v7 = vadd.f32 %v4471_v61, %v4402_v46  ;;  %v4908_v25 = vadd.f32 %v4876_v1, %v4807_v47  ;;  %v4974_v18 = vpop.xlane.xlu0 %4973  ;;  %v12188_v61 = vld [vmem:[#allocation143_spill] sm:$0xff]  ;;  %v5047_v1 = vmul.f32 0.0625, %v10712_v10  ;;  %v1090_v29 = vsel %vm671_vm0, %v956_v34, 0.0 }
 0x497   : > { %v10790_v41 = vsub.f32 %v12188_v61, %v5045_v38  ;;  %v958_v28 = vmul.f32 %v10780_v21, %v10780_v21  ;;  %v5046_v47 = vmul.f32 0.0625, %v4953_v4  ;;  %v5050_v56 = vmul.f32 0.0625, %v4965_v42 }
 0x498   : > { %v4604_v11 = vadd.f32 %v4572_v2, %v4503_v7  ;;  %v10740_v53 = vadd.f32 %v6390_v39, %v4908_v25  ;;  %v6396_v2 = vld [vmem:[%s7353_s24 + $0x38] sm:$0xff]  ;;  %v5053_v12 = vmul.f32 0.0625, %v4974_v18  ;;  %v5112_v34 = vmul.f32 %v10831_v44, %v10831_v44  ;;  %s12219_s24 = sld [smem:[#allocation21_spill]] }
 0x499   : > { %v10793_v46 = vpop.xlane.xlu1 %4982  ;;  %v10796_v26 = vsub.f32 %v6396_v2, %v864_v19  ;;  %v12189_v25 = vld [vmem:[#allocation47_spill] sm:$0xff]  ;;  %v5109_v10 = vmul.f32 %v10790_v41, %v10790_v41  ;;  %v5052_v19 = vmul.f32 0.0625, %v10749_v43  ;;  %v12197_v43 = vld [vmem:[#allocation141_spill] sm:$0xff] }
 0x49a   : > { %v4705_v20 = vadd.f32 %v4673_v58, %v4604_v11  ;;  %v5038_v16 = vsel %vm2002_vm1, %v10740_v53, 0.0  ;;  %v4980_v7 = vpop.xlane.xlu0 %4979  ;;  %v1099_v58 = vsel %vm671_vm0, %v959_v60, 0.0  ;;  %v10803_v13 = vsub.f32 %v12189_v25, %v5047_v1  ;;  %v12196_v1 = vld [vmem:[#allocation148_spill] sm:$0xff] }
 0x49b   : > { %5039 = vadd.xlane.f32.xlu0 %v5038_v16  ;;  %v5049_v11 = vmul.f32 0.0625, %v10729_v50  ;;  %v960_v23 = vmul.f32 %v10796_v26, %v10796_v26  ;;  %v5141_v62 = vsel %vm2002_vm1, %v5109_v10, 0.0 }
 0x49c   : > { %v4806_v3 = vadd.f32 %v4774_v40, %v4705_v20  ;;  %v1096_v40 = vsel %vm671_vm0, %v958_v28, 0.0  ;;  %v5111_v16 = vmul.f32 %v10803_v13, %v10803_v13 }
 0x49d   : > { %v10816_v20 = vsub.f32 %v12191_v27, %v5049_v11  ;;  %v4977_v50 = vpop.xlane.xlu1 %4976  ;;  %v12198_v11 = vld [vmem:[#allocation61_spill] sm:$0xff] }
 0x49e   : > { %v4907_v15 = vadd.f32 %v4875_v36, %v4806_v3  ;;  %v5051_v36 = vmul.f32 0.0625, %v4968_v31  ;;  %v4986_v55 = vpop.xlane.xlu0 %4985  ;;  %v1102_v3 = vsel %vm671_vm0, %v960_v23, 0.0  ;;  %v5147_v31 = vsel %vm2002_vm1, %v5111_v16, 0.0  ;;  %p12222_p10 = scmp.ne.s32.totalorder %s12219_s24, 0 }
 0x49f   : > { %1082 = vadd.xlane.f32.xlu0 %v1081_v8  ;;  %v5054_v60 = vmul.f32 0.0625, %v4977_v50  ;;  %v5057_v28 = vmul.f32 0.0625, %v4986_v55  ;;  %v5056_v16 = vmul.f32 0.0625, %v10793_v46 }
 0x4a0   : > { %v10765_v22 = vadd.f32 %v6390_v39, %v4907_v15  ;;  %v12190_v39 = vld [vmem:[#allocation49_spill] sm:$0xff]  ;;  %v10825_v24 = vsub.f32 %v12192_v9, %v5051_v36  ;;  %v5113_v15 = vmul.f32 %v10816_v20, %v10816_v20  ;;  %v12200_v9 = vld [vmem:[#allocation155_spill] sm:$0xff]  ;;  %p6523_p8 = pnand %p6522_p0, %p12222_p10 }
 0x4a1   : > { %v10812_v4 = vsub.f32 %v12190_v39, %v5046_v47  ;;  %v4995_v59 = vpop.xlane.xlu1 %4994  ;;  %v12199_v39 = vld [vmem:[#allocation53_spill] sm:$0xff] }
 0x4a2   : > { %v5035_v5 = vsel %vm2002_vm1, %v10765_v22, 0.0  ;;  %v4992_v38 = vpop.xlane.xlu0 %4991  ;;  %v5153_v42 = vsel %vm2002_vm1, %v5113_v15, 0.0  ;;  %v5115_v18 = vmul.f32 %v10825_v24, %v10825_v24  ;;  %p6524_p9 = pneg %p6523_p8 }
 0x4a3   : > { %5036 = vadd.xlane.f32.xlu1 %v5035_v5  ;;  %1088 = vadd.xlane.f32.xlu0 %v1087_v57  ;;  %v5110_v8 = vmul.f32 %v10812_v4, %v10812_v4  ;;  %v10834_v57 = vsub.f32 %v12194_v33, %v5050_v56  ;;  %v12195_v5 = vld [vmem:[#allocation138_spill] sm:$0xff]  ;;  %v5059_v36 = vmul.f32 0.0625, %v4992_v38  ;;  %v12202_v38 = vld [vmem:[#allocation67_spill] sm:$0xff] }
 0x4a4   : > { %v10839_v0 = vsub.f32 %v12195_v5, %v5053_v12  ;;  %v5159_v61 = vsel %vm2002_vm1, %v5115_v18, 0.0  ;;  %v12201_v12 = vld [vmem:[#allocation31_spill] sm:$0xff]  ;;  %v12203_v18 = vld [vmem:[#allocation77_spill] sm:$0xff] }
 0x4a5   : > { %v5144_v54 = vsel %vm2002_vm1, %v5110_v8, 0.0  ;;  %v4989_v47 = vpop.xlane.xlu1 %4988  ;;  %v10880_v52 = vsub.f32 %v12201_v12, %v5056_v16  ;;  %v12208_v12 = vld [vmem:[#allocation48_spill] sm:$0xff] }
 0x4a6   : > { %v4998_v25 = vpop.xlane.xlu0 %4997 }
 0x4a7   : > { %1085 = vadd.xlane.f32.xlu1 %v1084_v32  ;;  %1094 = vadd.xlane.f32.xlu0 %v1093_v63  ;;  %v5055_v32 = vmul.f32 0.0625, %v4980_v7  ;;  %v5114_v63 = vmul.f32 %v10834_v57, %v10834_v57  ;;  %v10855_v7 = vsub.f32 %v12197_v43, %v5052_v19  ;;  %v5061_v46 = vmul.f32 0.0625, %v4998_v25  ;;  %v12204_v43 = vld [vmem:[#allocation52_spill] sm:$0xff] }
 0x4a9   : > { %v10850_v2 = vsub.f32 %v12196_v1, %v5055_v32  ;;  %v5156_v10 = vsel %vm2002_vm1, %v5114_v63, 0.0  ;;  %v5116_v50 = vmul.f32 %v10855_v7, %v10855_v7  ;;  %v5007_v30 = vpop.xlane.xlu1 %5006  ;;  %v10889_v32 = vsub.f32 %v12203_v18, %v5061_v46 }
 0x4ab   : > { %1091 = vadd.xlane.f32.xlu1 %v1090_v29  ;;  %1100 = vadd.xlane.f32.xlu0 %v1099_v58  ;;  %v5117_v29 = vmul.f32 %v10839_v0, %v10839_v0  ;;  %v5150_v58 = vsel %vm2002_vm1, %v5112_v34, 0.0  ;;  %v5119_v27 = vmul.f32 %v10850_v2, %v10850_v2  ;;  %v5162_v33 = vsel %vm2002_vm1, %v5116_v50, 0.0  ;;  %v12207_v50 = vld [vmem:[#allocation149_spill] sm:$0xff] }
 0x4ac   : > { %v5125_v25 = vmul.f32 %v10889_v32, %v10889_v32 }
 0x4ad   : > { %v5165_v23 = vsel %vm2002_vm1, %v5117_v29, 0.0  ;;  %v5171_v8 = vsel %vm2002_vm1, %v5119_v27, 0.0  ;;  %v12206_v27 = vld [vmem:[#allocation72_spill] sm:$0xff] }
 0x4ae   : > { %v5189_v16 = vsel %vm2002_vm1, %v5125_v25, 0.0 }
 0x4af   : > { %1097 = vadd.xlane.f32.xlu1 %v1096_v40  ;;  %5142 = vadd.xlane.f32.xlu0 %v5141_v62  ;;  %v10860_v40 = vsub.f32 %v12198_v11, %v5054_v60  ;;  %v10864_v62 = vsub.f32 %v12199_v39, %v5057_v28  ;;  %v5060_v60 = vmul.f32 0.0625, %v4995_v59  ;;  %v12205_v59 = vld [vmem:[#allocation60_spill] sm:$0xff] }
 0x4b0   : > { %v5004_v56 = vpop.xlane.xlu0 %5003 }
 0x4b1   : > { %v5118_v55 = vmul.f32 %v10860_v40, %v10860_v40  ;;  %v5121_v15 = vmul.f32 %v10864_v62, %v10864_v62  ;;  %v5063_v34 = vmul.f32 0.0625, %v5004_v56  ;;  %v10904_v11 = vsub.f32 %v12205_v59, %v5060_v60  ;;  %v12209_v60 = vld [vmem:[#allocation57_spill] sm:$0xff] }
 0x4b2   : > { %v5064_v56 = vmul.f32 0.0625, %v5007_v30 }
 0x4b3   : > { %1103 = vadd.xlane.f32.xlu1 %v1102_v3  ;;  %5148 = vadd.xlane.f32.xlu0 %v5147_v31  ;;  %v5058_v3 = vmul.f32 0.0625, %v4989_v47  ;;  %v10875_v31 = vsub.f32 %v12200_v9, %v5059_v36  ;;  %v5177_v5 = vsel %vm2002_vm1, %v5121_v15, 0.0 }
 0x4b5   : > { %v5123_v19 = vmul.f32 %v10875_v31, %v10875_v31 }
 0x4b7   : > { %5145 = vadd.xlane.f32.xlu1 %v5144_v54  ;;  %5154 = vadd.xlane.f32.xlu0 %v5153_v42  ;;  %v5168_v54 = vsel %vm2002_vm1, %v5118_v55, 0.0  ;;  %v10885_v42 = vsub.f32 %v12202_v38, %v5058_v3  ;;  %v5001_v63 = vpop.xlane.xlu1 %5000  ;;  %v5183_v47 = vsel %vm2002_vm1, %v5123_v19, 0.0 }
 0x4b8   : > { %v5062_v28 = vmul.f32 0.0625, %v5001_v63 }
 0x4b9   : > { %v5122_v29 = vmul.f32 %v10885_v42, %v10885_v42 }
 0x4ba   : > { %v10909_v36 = vsub.f32 %v12206_v27, %v5062_v28 }
 0x4bb   : > { %5151 = vadd.xlane.f32.xlu1 %v5150_v58  ;;  %5160 = vadd.xlane.f32.xlu0 %v5159_v61  ;;  %v5120_v61 = vmul.f32 %v10880_v52, %v10880_v52  ;;  %v10899_v58 = vsub.f32 %v12204_v43, %v5063_v34  ;;  %v5180_v39 = vsel %vm2002_vm1, %v5122_v29, 0.0 }
 0x4bc   : > { %v5126_v9 = vmul.f32 %v10909_v36, %v10909_v36 }
 0x4bd   : > { %v5127_v3 = vmul.f32 %v10899_v58, %v10899_v58 }
 0x4be   : > { %v5010_v1 = vpop.xlane.xlu0 %5009  ;;  %v5192_v30 = vsel %vm2002_vm1, %v5126_v9, 0.0 }
 0x4bf   : > { %5157 = vadd.xlane.f32.xlu1 %v5156_v10  ;;  %5166 = vadd.xlane.f32.xlu0 %v5165_v23  ;;  %v5065_v10 = vmul.f32 0.0625, %v5010_v1  ;;  %v5174_v23 = vsel %vm2002_vm1, %v5120_v61, 0.0  ;;  %v5195_v15 = vsel %vm2002_vm1, %v5127_v3, 0.0  ;;  %v10939_v1 = vld [vmem:[%s11370_s11] sm:$0xff]  }
 0x4c0   : > { %6069 = vmatprep.subr.bf16.mxu1 %v10939_v1 }
 0x4c1   : > { %v10913_v55 = vsub.f32 %v12207_v50, %v5065_v10  ;;  %v12210_v10 = vld [vmem:[#allocation78_spill] sm:$0xff] }
 0x4c3   : > { %5163 = vadd.xlane.f32.xlu1 %v5162_v33  ;;  %5172 = vadd.xlane.f32.xlu0 %v5171_v8  ;;  %v5124_v8 = vmul.f32 %v10904_v11, %v10904_v11  ;;  %v5129_v46 = vmul.f32 %v10913_v55, %v10913_v55  ;;  %v10925_v33 = vsub.f32 %v12208_v12, %v5064_v56 }
 0x4c5   : > { %v5201_v38 = vsel %vm2002_vm1, %v5129_v46, 0.0 }
 0x4c7   : > { %5169 = vadd.xlane.f32.xlu1 %v5168_v54  ;;  %5178 = vadd.xlane.f32.xlu0 %v5177_v5  ;;  %v5186_v54 = vsel %vm2002_vm1, %v5124_v8, 0.0  ;;  %v5128_v5 = vmul.f32 %v10925_v33, %v10925_v33 }
 0x4c9   : > { %v5198_v63 = vsel %vm2002_vm1, %v5128_v5, 0.0 }
 0x4cb   : > { %5175 = vadd.xlane.f32.xlu1 %v5174_v23  ;;  %5184 = vadd.xlane.f32.xlu0 %v5183_v47  ;;  %v12211_v23 = vld [vmem:[#allocation65_spill] sm:$0xff] }
 0x4cd   : > { %v5019_v19 = vpop.xlane.xlu1 %5018 }
 0x4ce   : > { %v5068_v28 = vmul.f32 0.0625, %v5019_v19 }
 0x4cf   : > { %5181 = vadd.xlane.f32.xlu1 %v5180_v39  ;;  %5190 = vadd.xlane.f32.xlu0 %v5189_v16 }
 0x4d0   : > { %v10946_v59 = vsub.f32 %v12210_v10, %v5068_v28  ;;  %v12214_v28 = vld [vmem:[#allocation142_spill] sm:$0xff] }
 0x4d2   : > { %v5132_v50 = vmul.f32 %v10946_v59, %v10946_v59 }
 0x4d3   : > { %5187 = vadd.xlane.f32.xlu1 %v5186_v54  ;;  %5196 = vadd.xlane.f32.xlu0 %v5195_v15 }
 0x4d4   : > { %v5210_v9 = vsel %vm2002_vm1, %v5132_v50, 0.0 }
 0x4d7   : > { %5193 = vadd.xlane.f32.xlu1 %v5192_v30  ;;  %5202 = vadd.xlane.f32.xlu0 %v5201_v38  ;;  %v12212_v38 = vld [vmem:[#allocation69_spill] sm:$0xff] }
 0x4d8   : > { %v5016_v18 = vpop.xlane.xlu0 %5015 }
 0x4d9   : > { %v5067_v34 = vmul.f32 0.0625, %v5016_v18 }
 0x4db   : > { %v10934_v61 = vsub.f32 %v12209_v60, %v5067_v34  ;;  %5199 = vadd.xlane.f32.xlu1 %v5198_v63  ;;  %v12213_v60 = vld [vmem:[#allocation63_spill] sm:$0xff] }
 0x4dd   : > { %v5131_v29 = vmul.f32 %v10934_v61, %v10934_v61 }
 0x4df   : > { %v5013_v47 = vpop.xlane.xlu1 %5012  ;;  %v5207_v43 = vsel %vm2002_vm1, %v5131_v29, 0.0 }
 0x4e0   : > { %v5066_v25 = vmul.f32 0.0625, %v5013_v47  ;;  %5208 = vadd.xlane.f32.xlu0 %v5207_v43 }
 0x4e2   : > { %v10949_v39 = vsub.f32 %v12211_v23, %v5066_v25 }
 0x4e4   : > { %v5130_v27 = vmul.f32 %v10949_v39, %v10949_v39 }
 0x4e6   : > { %v5204_v16 = vsel %vm2002_vm1, %v5130_v27, 0.0 }
 0x4e7   : > { %v5022_v3 = vpop.xlane.xlu0 %5021  ;;  %5205 = vadd.xlane.f32.xlu1 %v5204_v16 }
 0x4e8   : > { %v5069_v56 = vmul.f32 0.0625, %v5022_v3 }
 0x4ea   : > { %v10957_v8 = vsub.f32 %v10464_v45, %v5069_v56 }
 0x4eb   : > { %5211 = vadd.xlane.f32.xlu1 %v5210_v9 }
 0x4ec   : > { %v5133_v15 = vmul.f32 %v10957_v8, %v10957_v8 }
 0x4ee   : > { %v5213_v46 = vsel %vm2002_vm1, %v5133_v15, 0.0 }
 0x4ef   : > { %5214 = vadd.xlane.f32.xlu0 %v5213_v46 }
 0x4f0   : > { %v5031_v54 = vpop.xlane.xlu1 %5030 }
 0x4f1   : > { %v5072_v45 = vmul.f32 0.0625, %v5031_v54 }
 0x4f3   : > { %v10970_v29 = vsub.f32 %v12213_v60, %v5072_v45 }
 0x4f5   : > { %v5136_v10 = vmul.f32 %v10970_v29, %v10970_v29 }
 0x4f7   : > { %v5222_v50 = vsel %vm2002_vm1, %v5136_v10, 0.0 }
 0x500   : > { %v5028_v12 = vpop.xlane.xlu0 %5027 }
 0x501   : > { %v5071_v30 = vmul.f32 0.0625, %v5028_v12 }
 0x503   : > { %v10964_v5 = vsub.f32 %v12212_v38, %v5071_v30 }
 0x505   : > { %v5135_v18 = vmul.f32 %v10964_v5, %v10964_v5 }
 0x507   : > { %v5025_v19 = vpop.xlane.xlu1 %5024  ;;  %v5219_v34 = vsel %vm2002_vm1, %v5135_v18, 0.0 }
 0x508   : > { %v5070_v63 = vmul.f32 0.0625, %v5025_v19  ;;  %5220 = vadd.xlane.f32.xlu0 %v5219_v34 }
 0x50a   : > { %v10973_v47 = vsub.f32 %v12214_v28, %v5070_v63 }
 0x50c   : > { %v5134_v43 = vmul.f32 %v10973_v47, %v10973_v47 }
 0x50e   : > { %v5216_v25 = vsel %vm2002_vm1, %v5134_v43, 0.0 }
 0x50f   : > { %v5034_v23 = vpop.xlane.xlu0 %5033  ;;  %5217 = vadd.xlane.f32.xlu1 %v5216_v25 }
 0x510   : > { %v5073_v27 = vmul.f32 0.0625, %v5034_v23 }
 0x512   : > { %v10981_v16 = vsub.f32 %v10649_v51, %v5073_v27 }
 0x513   : > { %5223 = vadd.xlane.f32.xlu1 %v5222_v50 }
 0x514   : > { %v5137_v3 = vmul.f32 %v10981_v16, %v10981_v16 }
 0x516   : > { %v5225_v56 = vsel %vm2002_vm1, %v5137_v3, 0.0 }
 0x517   : > { %5226 = vadd.xlane.f32.xlu0 %v5225_v56 }
 0x51d   : > { %v5043_v15 = vpop.xlane.xlu1 %5042 }
 0x51e   : > { %v5076_v38 = vmul.f32 0.0625, %v5043_v15 }
 0x520   : > { %v10994_v28 = vsub.f32 %v10698_v37, %v5076_v38 }
 0x528   : > { %v5040_v9 = vpop.xlane.xlu0 %5039 }
 0x529   : > { %v5075_v46 = vmul.f32 0.0625, %v5040_v9  ;;  %v5140_v9 = vmul.f32 %v10994_v28, %v10994_v28 }
 0x52b   : > { %v10988_v12 = vsub.f32 %v10740_v53, %v5075_v46 }
 0x52c   : > { %v1083_v54 = vpop.xlane.xlu0 %1082 }
 0x52d   : > { %v1145_v30 = vmul.f32 0.03125, %v1083_v54  ;;  %v5139_v51 = vmul.f32 %v10988_v12, %v10988_v12 }
 0x52f   : > { %v1193_v45 = vadd.f32 1e-05, %v1145_v30  ;;  %v5231_v19 = vsel %vm2002_vm1, %v5139_v51, 0.0  ;;  %v5234_v51 = vsel %vm2002_vm1, %v5140_v9, 0.0 }
 0x530   : > { %v5037_v18 = vpop.xlane.xlu1 %5036  ;;  %5232 = vadd.xlane.f32.xlu0 %v5231_v19  ;;  %v1089_v63 = vpop.xlane.xlu0 %1088 }
 0x531   : > { %v5074_v34 = vmul.f32 0.0625, %v5037_v18  ;;  %6267 = vrsqrt.f32 %v1193_v45  ;;  %v1147_v60 = vmul.f32 0.03125, %v1089_v63 }
 0x533   : > { %v10997_v53 = vsub.f32 %v10765_v22, %v5074_v34  ;;  %v1195_v25 = vadd.f32 1e-05, %v1147_v60 }
 0x534   : > { %v1086_v43 = vpop.xlane.xlu1 %1085  ;;  %v1095_v27 = vpop.xlane.xlu0 %1094 }
 0x535   : > { %v1146_v10 = vmul.f32 0.03125, %v1086_v43  ;;  %v5138_v23 = vmul.f32 %v10997_v53, %v10997_v53  ;;  %6269 = vrsqrt.f32 %v1195_v25  ;;  %v1149_v50 = vmul.f32 0.03125, %v1095_v27 }
 0x537   : > { %v1194_v3 = vadd.f32 1e-05, %v1146_v10  ;;  %v5228_v56 = vsel %vm2002_vm1, %v5138_v23, 0.0  ;;  %v1197_v15 = vadd.f32 1e-05, %v1149_v50 }
 0x538   : > { %5229 = vadd.xlane.f32.xlu1 %v5228_v56  ;;  %v1092_v37 = vpop.xlane.xlu1 %1091  ;;  %v1101_v46 = vpop.xlane.xlu0 %1100  ;;  %v11009_v50 = vld [vmem:[%s11362_s3] ss:$0 sm:$0xff] }
 0x539   : > { %6271 = vrsqrt.f32 %v1194_v3  ;;  %v1148_v22 = vmul.f32 0.03125, %v1092_v37  ;;  %v1151_v54 = vmul.f32 0.03125, %v1101_v46 }
 0x53a   : > { %6273 = vrsqrt.f32 %v1197_v15 }
 0x53b   : > { %v1196_v30 = vadd.f32 1e-05, %v1148_v22  ;;  %v6268_v38 = vpop.eup %6267  ;;  %v1199_v45 = vadd.f32 1e-05, %v1151_v54 }
 0x53c   : > { %5235 = vadd.xlane.f32.xlu1 %v5234_v51  ;;  %v1098_v18 = vpop.xlane.xlu1 %1097  ;;  %v1289_v34 = vmul.f32 %v6268_v38, %v10724_v48  ;;  %v5143_v63 = vpop.xlane.xlu0 %5142  ;;  %v11018_v38 = vld [vmem:[%s11363_s4] ss:$0 sm:$0xff] }
 0x53d   : > { %6275 = vrsqrt.f32 %v1196_v30  ;;  %v1150_v19 = vmul.f32 0.03125, %v1098_v18  ;;  %v5237_v60 = vmul.f32 0.0625, %v5143_v63 }
 0x53e   : > { %6277 = vrsqrt.f32 %v1199_v45  ;;  %v1343_v3 = vmul.f32 %v11009_v50, %v1289_v34 }
 0x53f   : > { %v1198_v43 = vadd.f32 1e-05, %v1150_v19  ;;  %v6270_v25 = vpop.eup %6269  ;;  %v5269_v23 = vadd.f32 1e-05, %v5237_v60 }
 0x540   : > { %v1104_v10 = vpop.xlane.xlu1 %1103  ;;  %v5149_v56 = vpop.xlane.xlu0 %5148  ;;  %v1291_v9 = vmul.f32 %v6270_v25, %v10735_v35  ;;  %v1397_v18 = vadd.f32 %v11018_v38, %v1343_v3 }
 0x541   : > { %6279 = vrsqrt.f32 %v1198_v43  ;;  %v1152_v27 = vmul.f32 0.03125, %v1104_v10  ;;  %v5239_v48 = vmul.f32 0.0625, %v5149_v56 }
 0x542   : > { %6281 = vrsqrt.f32 %v5269_v23  ;;  %v1345_v34 = vmul.f32 %v11009_v50, %v1291_v9 }
 0x543   : > { %v6272_v37 = vpop.eup %6271  ;;  %v1200_v15 = vadd.f32 1e-05, %v1152_v27  ;;  %v5271_v54 = vadd.f32 1e-05, %v5239_v48 }
 0x544   : > { %v6274_v22 = vpop.eup %6273  ;;  %v1290_v46 = vmul.f32 %v6272_v37, %v10752_v6  ;;  %v5146_v30 = vpop.xlane.xlu1 %5145 }
 0x545   : > { %v1293_v51 = vmul.f32 %v6274_v22, %v10756_v49  ;;  %6283 = vrsqrt.f32 %v1200_v15  ;;  %v5238_v35 = vmul.f32 0.0625, %v5146_v30  ;;  %v5155_v45 = vpop.xlane.xlu0 %5154  ;;  %v1399_v15 = vadd.f32 %v11018_v38, %v1345_v34 }
 0x546   : > { %v1344_v19 = vmul.f32 %v11009_v50, %v1290_v46  ;;  %6285 = vrsqrt.f32 %v5271_v54  ;;  %v5241_v6 = vmul.f32 0.0625, %v5155_v45 }
 0x547   : > { %v6276_v63 = vpop.eup %6275  ;;  %v5270_v60 = vadd.f32 1e-05, %v5238_v35  ;;  %v1347_v3 = vmul.f32 %v11009_v50, %v1293_v51 }
 0x548   : > { %v6278_v43 = vpop.eup %6277  ;;  %v1292_v49 = vmul.f32 %v6276_v63, %v10763_v17  ;;  %v1398_v25 = vadd.f32 %v11018_v38, %v1344_v19  ;;  %v5273_v10 = vadd.f32 1e-05, %v5241_v6  ;;  %v5152_v23 = vpop.xlane.xlu1 %5151 }
 0x549   : > { %v1295_v27 = vmul.f32 %v6278_v43, %v10771_v14  ;;  %6287 = vrsqrt.f32 %v5270_v60  ;;  %v5240_v56 = vmul.f32 0.0625, %v5152_v23  ;;  %v5161_v48 = vpop.xlane.xlu0 %5160  ;;  %v1401_v45 = vadd.f32 %v11018_v38, %v1347_v3 }
 0x54a   : > { %v1425_v37 = vpack.c.bf16 %v1398_v25, %v1397_v18  ;;  %v1346_v9 = vmul.f32 %v11009_v50, %v1292_v49  ;;  %v5243_v22 = vmul.f32 0.0625, %v5161_v48  ;;  %6289 = vrsqrt.f32 %v5273_v10 }
 0x54b   : > { %v6280_v46 = vpop.eup %6279  ;;  %v5272_v17 = vadd.f32 1e-05, %v5240_v56  ;;  %v1349_v18 = vmul.f32 %v11009_v50, %v1295_v27  ;;  %v11042_v27 = vld [vmem:[%s12215_s10] ss:$0 sm:$0xff]  ;;  %s6615_s10 = smov [#allocation11]  }
 0x54c   : > { %v6282_v54 = vpop.eup %6281  ;;  %v1294_v30 = vmul.f32 %v6280_v46, %v10780_v21  ;;  %6061 = vmatprep.mubr.msk.bf16.mxu1 %vm671_vm0, %v1425_v37  ;;  %v1400_v14 = vadd.f32 %v11018_v38, %v1346_v9  ;;  %v5275_v51 = vadd.f32 1e-05, %v5243_v22  ;;  %v5158_v35 = vpop.xlane.xlu1 %5157  ;;  %s6525_s16 = sshll.u32 %s6615_s10, 4  ;;  %s6526_s16 = int_to_ptr.vmem [resolvable:$false] %s6525_s16 }
 0x54d   : > { %6291 = vrsqrt.f32 %v5272_v17  ;;  %v5242_v19 = vmul.f32 0.0625, %v5158_v35  ;;  %v5167_v34 = vpop.xlane.xlu0 %5166  ;;  %v5333_v21 = vmul.f32 %v6282_v54, %v10790_v41  ;;  %v1403_v48 = vadd.f32 %v11018_v38, %v1349_v18  ;;  %s6527_s18 = scalar_lea.vmem %s6526_s16, 8192  ;;  %p6528_p12 = scmp.lt.s32.totalorder %s11303_s9, %s6526_s16 }
 0x54e   : > { %v1426_v6 = vpack.c.bf16 %v1400_v14, %v1399_v15  ;;  %v1348_v63 = vmul.f32 %v11009_v50, %v1294_v30  ;;  %6293 = vrsqrt.f32 %v5275_v51  ;;  %v5245_v60 = vmul.f32 0.0625, %v5167_v34  ;;  %p6529_p1 = scmp.lt.s32.totalorder %s6527_s18, %s6521_s22 }
 0x54f   : > { %v6284_v43 = vpop.eup %6283  ;;  %v5274_v49 = vadd.f32 1e-05, %v5242_v19  ;;  %v5371_v54 = vmul.f32 %v11042_v27, %v5333_v21 }
 0x550   : > { %v6286_v25 = vpop.eup %6285  ;;  %v1296_v10 = vmul.f32 %v6284_v43, %v10796_v26  ;;  %6062 = vmatmul.mubr.msk.bf16.vlgmr.msra.gmra.mrb[0].mxu1 %vm671_vm0, %v1426_v6  ;;  %v1402_v23 = vadd.f32 %v11018_v38, %v1348_v63  ;;  %v5277_v3 = vadd.f32 1e-05, %v5245_v60  ;;  %v5164_v56 = vpop.xlane.xlu1 %5163  ;;  %p6530_p6 = por %p6529_p1, %p6528_p12 }
 0x551   : > { %6295 = vrsqrt.f32 %v5274_v49  ;;  %6070 = vmatpush3.bf16.msra.mxu1 %v10939_v1  ;;  %v5244_v41 = vmul.f32 0.0625, %v5164_v56  ;;  %v5173_v37 = vpop.xlane.xlu0 %5172  ;;  %v5335_v46 = vmul.f32 %v6286_v25, %v10803_v13  ;;  %v11054_v1 = vld [vmem:[%s12216_s27] ss:$0 sm:$0xff] }
 0x552   : > { %v1427_v9 = vpack.c.bf16 %v1402_v23, %v1401_v45  ;;  %v1350_v26 = vmul.f32 %v11009_v50, %v1296_v10  ;;  %6297 = vrsqrt.f32 %v5277_v3  ;;  %v5247_v15 = vmul.f32 0.0625, %v5173_v37  ;;  %p6531_p13 = pnand %p6530_p6, %p6524_p9 }
 0x553   : > { %v6288_v22 = vpop.eup %6287  ;;  %v5276_v17 = vadd.f32 1e-05, %v5244_v41  ;;  %v5409_v60 = vadd.f32 %v11054_v1, %v5371_v54 }
 0x554   : > { %6065 = vmatprep.mubr.msk.bf16.mxu1 %vm671_vm0, %v1427_v9  ;;  %v1404_v30 = vadd.f32 %v11018_v38, %v1350_v26  ;;  %v5334_v14 = vmul.f32 %v6288_v22, %v10812_v4  ;;  %v5279_v50 = vadd.f32 1e-05, %v5247_v15  ;;  %v5170_v51 = vpop.xlane.xlu1 %5169  ;;  %v6290_v35 = vpop.eup %6289  ;;  %v5373_v38 = vmul.f32 %v11042_v27, %v5335_v46 }
 0x555   : > { %6299 = vrsqrt.f32 %v5276_v17  ;;  %v5246_v45 = vmul.f32 0.0625, %v5170_v51  ;;  %v5179_v13 = vpop.xlane.xlu0 %5178  ;;  %v5337_v4 = vmul.f32 %v6290_v35, %v10816_v20 }
 0x556   : > { %v1428_v18 = vpack.c.bf16 %v1404_v30, %v1403_v48  ;;  %v5249_v19 = vmul.f32 0.0625, %v5179_v13  ;;  %v5372_v34 = vmul.f32 %v11042_v27, %v5334_v14  ;;  %6301 = vrsqrt.f32 %v5279_v50 }
 0x557   : > { %v6292_v6 = vpop.eup %6291  ;;  %v5278_v63 = vadd.f32 1e-05, %v5246_v45  ;;  %v5411_v9 = vadd.f32 %v11054_v1, %v5373_v38  ;;  %v5375_v54 = vmul.f32 %v11042_v27, %v5337_v4 }
 0x558   : > { %v6294_v43 = vpop.eup %6293  ;;  %6066 = vmatmul.mubr.msk.bf16.gmra.mrb[4].mxu1 %vm671_vm0, %v1428_v18  ;;  %v5336_v21 = vmul.f32 %v6292_v6, %v10831_v44  ;;  %v5281_v49 = vadd.f32 1e-05, %v5249_v19  ;;  %v5176_v25 = vpop.xlane.xlu1 %5175  ;;  %v5410_v10 = vadd.f32 %v11054_v1, %v5372_v34 }
 0x559   : > { %6303 = vrsqrt.f32 %v5278_v63  ;;  %v5248_v23 = vmul.f32 0.0625, %v5176_v25  ;;  %v5185_v3 = vpop.xlane.xlu0 %5184  ;;  %v5339_v26 = vmul.f32 %v6294_v43, %v10825_v24  ;;  %v5413_v6 = vadd.f32 %v11054_v1, %v5375_v54 }
 0x55a   : > { %v5374_v56 = vmul.f32 %v11042_v27, %v5336_v21  ;;  %v5251_v48 = vmul.f32 0.0625, %v5185_v3  ;;  %v5441_v41 = vpack.c.bf16 %v5410_v10, %v5409_v60  ;;  %6305 = vrsqrt.f32 %v5281_v49 }
 0x55b   : > { %v6296_v37 = vpop.eup %6295  ;;  %v5280_v20 = vadd.f32 1e-05, %v5248_v23 }
 0x55c   : > { %v6298_v15 = vpop.eup %6297  ;;  %v5412_v44 = vadd.f32 %v11054_v1, %v5374_v56  ;;  %v5338_v22 = vmul.f32 %v6296_v37, %v10834_v57  ;;  %v5283_v46 = vadd.f32 1e-05, %v5251_v48  ;;  %6071 = vmatprep.mubr.msk.bf16.mxu1 %vm2002_vm1, %v5441_v41  ;;  %v5182_v17 = vpop.xlane.xlu1 %5181  ;;  %v5377_v57 = vmul.f32 %v11042_v27, %v5339_v26 }
 0x55d   : > { %6307 = vrsqrt.f32 %v5280_v20  ;;  %v5250_v30 = vmul.f32 0.0625, %v5182_v17  ;;  %v5191_v14 = vpop.xlane.xlu0 %5190  ;;  %v5341_v45 = vmul.f32 %v6298_v15, %v10839_v0 }
 0x55e   : > { %6309 = vrsqrt.f32 %v5283_v46  ;;  %v5253_v50 = vmul.f32 0.0625, %v5191_v14  ;;  %v5442_v51 = vpack.c.bf16 %v5412_v44, %v5411_v9  ;;  %v5376_v24 = vmul.f32 %v11042_v27, %v5338_v22 }
 0x55f   : > { %v6300_v35 = vpop.eup %6299  ;;  %v5282_v13 = vadd.f32 1e-05, %v5250_v30  ;;  %v5379_v10 = vmul.f32 %v11042_v27, %v5341_v45 }
 0x560   : > { %v5340_v18 = vmul.f32 %v6300_v35, %v10855_v7  ;;  %v5285_v19 = vadd.f32 1e-05, %v5253_v50  ;;  %6072 = vmatmul.mubr.msk.bf16.vlgmr.msra.gmra.mrb[8].mxu1 %vm2002_vm1, %v5442_v51  ;;  %v5188_v34 = vpop.xlane.xlu1 %5187  ;;  %v5414_v38 = vadd.f32 %v11054_v1, %v5376_v24  ;;  %v6302_v63 = vpop.eup %6301  ;;  %v5415_v7 = vadd.f32 %v11054_v1, %v5377_v57 }
 0x561   : > { %6311 = vrsqrt.f32 %v5282_v13  ;;  %v5252_v60 = vmul.f32 0.0625, %v5188_v34  ;;  %v5197_v43 = vpop.xlane.xlu0 %5196  ;;  %v5343_v23 = vmul.f32 %v6302_v63, %v10850_v2  ;;  %v5417_v2 = vadd.f32 %v11054_v1, %v5379_v10 }
 0x562   : > { %v5255_v4 = vmul.f32 0.0625, %v5197_v43  ;;  %v5443_v21 = vpack.c.bf16 %v5414_v38, %v5413_v6  ;;  %v5378_v0 = vmul.f32 %v11042_v27, %v5340_v18  ;;  %6313 = vrsqrt.f32 %v5285_v19 }
 0x563   : > { %v6304_v49 = vpop.eup %6303  ;;  %v5284_v25 = vadd.f32 1e-05, %v5252_v60  ;;  %v5381_v14 = vmul.f32 %v11042_v27, %v5343_v23 }
 0x564   : > { %v5342_v3 = vmul.f32 %v6304_v49, %v10860_v40  ;;  %v5287_v56 = vadd.f32 1e-05, %v5255_v4  ;;  %6075 = vmatprep.mubr.msk.bf16.mxu1 %vm2002_vm1, %v5443_v21  ;;  %v5194_v48 = vpop.xlane.xlu1 %5193  ;;  %v5416_v41 = vadd.f32 %v11054_v1, %v5378_v0  ;;  %v6306_v37 = vpop.eup %6305 }
 0x565   : > { %6315 = vrsqrt.f32 %v5284_v25  ;;  %v5254_v9 = vmul.f32 0.0625, %v5194_v48  ;;  %v5203_v22 = vpop.xlane.xlu0 %5202  ;;  %v5345_v40 = vmul.f32 %v6306_v37, %v10864_v62 }
 0x566   : > { %v5444_v26 = vpack.c.bf16 %v5416_v41, %v5415_v7  ;;  %v5380_v20 = vmul.f32 %v11042_v27, %v5342_v3  ;;  %6317 = vrsqrt.f32 %v5287_v56  ;;  %v5257_v13 = vmul.f32 0.0625, %v5203_v22 }
 0x567   : > { %v6308_v15 = vpop.eup %6307  ;;  %v5286_v44 = vadd.f32 1e-05, %v5254_v9  ;;  %v5383_v19 = vmul.f32 %v11042_v27, %v5345_v40 }
 0x568   : > { %v6310_v46 = vpop.eup %6309  ;;  %v5344_v17 = vmul.f32 %v6308_v15, %v10880_v52  ;;  %6076 = vmatmul.mubr.msk.bf16.gmra.mrb[12].mxu1 %vm2002_vm1, %v5444_v26  ;;  %v5200_v54 = vpop.xlane.xlu1 %5199  ;;  %v5418_v30 = vadd.f32 %v11054_v1, %v5380_v20  ;;  %v5419_v52 = vadd.f32 %v11054_v1, %v5381_v14 }
 0x569   : > { %6319 = vrsqrt.f32 %v5286_v44  ;;  %v5256_v50 = vmul.f32 0.0625, %v5200_v54  ;;  %v5347_v45 = vmul.f32 %v6310_v46, %v10875_v31  ;;  %v5289_v31 = vadd.f32 1e-05, %v5257_v13 }
 0x56a   : > { %v5445_v51 = vpack.c.bf16 %v5418_v30, %v5417_v2  ;;  %v5382_v24 = vmul.f32 %v11042_v27, %v5344_v17  ;;  %v5421_v0 = vadd.f32 %v11054_v1, %v5383_v19 }
 0x56b   : > { %v6312_v35 = vpop.eup %6311  ;;  %v5288_v57 = vadd.f32 1e-05, %v5256_v50  ;;  %v5385_v4 = vmul.f32 %v11042_v27, %v5347_v45 }
 0x56c   : > { %v5346_v62 = vmul.f32 %v6312_v35, %v10885_v42  ;;  %6079 = vmatprep.mubr.msk.bf16.mxu1 %vm2002_vm1, %v5445_v51  ;;  %v5420_v18 = vadd.f32 %v11054_v1, %v5382_v24  ;;  %v6314_v34 = vpop.eup %6313 }
 0x56d   : > { %6321 = vrsqrt.f32 %v5288_v57  ;;  %v5209_v6 = vpop.xlane.xlu0 %5208  ;;  %v5349_v42 = vmul.f32 %v6314_v34, %v10889_v32  ;;  %v5423_v56 = vadd.f32 %v11054_v1, %v5385_v4 }
 0x56e   : > { %v5446_v38 = vpack.c.bf16 %v5420_v18, %v5419_v52  ;;  %v5384_v63 = vmul.f32 %v11042_v27, %v5346_v62  ;;  %v5259_v43 = vmul.f32 0.0625, %v5209_v6  ;;  %6323 = vrsqrt.f32 %v5289_v31 }
 0x56f   : > { %v6316_v60 = vpop.eup %6315  ;;  %v5387_v37 = vmul.f32 %v11042_v27, %v5349_v42 }
 0x570   : > { %v5348_v21 = vmul.f32 %v6316_v60, %v10904_v11  ;;  %6080 = vmatmul.mubr.msk.bf16.gmra.mrb[16].mxu1 %vm2002_vm1, %v5446_v38  ;;  %v5422_v49 = vadd.f32 %v11054_v1, %v5384_v63  ;;  %v6318_v25 = vpop.eup %6317  ;;  %v5291_v3 = vadd.f32 1e-05, %v5259_v43 }
 0x571   : > { %v5351_v48 = vmul.f32 %v6318_v25, %v10899_v58  ;;  %v5425_v58 = vadd.f32 %v11054_v1, %v5387_v37 }
 0x572   : > { %v5447_v7 = vpack.c.bf16 %v5422_v49, %v5421_v0  ;;  %v5386_v10 = vmul.f32 %v11042_v27, %v5348_v21  ;;  %6325 = vrsqrt.f32 %v5291_v3 }
 0x573   : > { %v6320_v23 = vpop.eup %6319  ;;  %v5389_v46 = vmul.f32 %v11042_v27, %v5351_v48 }
 0x574   : > { %v5350_v32 = vmul.f32 %v6320_v23, %v10909_v36  ;;  %v5206_v11 = vpop.xlane.xlu1 %5205  ;;  %6083 = vmatprep.mubr.msk.bf16.mxu1 %vm2002_vm1, %v5447_v7  ;;  %v5424_v41 = vadd.f32 %v11054_v1, %v5386_v10 }
 0x575   : > { %v5258_v9 = vmul.f32 0.0625, %v5206_v11  ;;  %v5427_v14 = vadd.f32 %v11054_v1, %v5389_v46 }
 0x576   : > { %v5448_v26 = vpack.c.bf16 %v5424_v41, %v5423_v56  ;;  %v5388_v20 = vmul.f32 %v11042_v27, %v5350_v32 }
 0x577   : > { %v6322_v15 = vpop.eup %6321  ;;  %v5290_v44 = vadd.f32 1e-05, %v5258_v9 }
 0x578   : > { %v5352_v22 = vmul.f32 %v6322_v15, %v10925_v33  ;;  %v5212_v2 = vpop.xlane.xlu1 %5211  ;;  %6084 = vmatmul.mubr.msk.bf16.gmra.mrb[20].mxu1 %vm2002_vm1, %v5448_v26  ;;  %v5426_v36 = vadd.f32 %v11054_v1, %v5388_v20  ;;  %v6324_v50 = vpop.eup %6323 }
 0x579   : > { %6327 = vrsqrt.f32 %v5290_v44  ;;  %v5260_v40 = vmul.f32 0.0625, %v5212_v2  ;;  %v5353_v24 = vmul.f32 %v6324_v50, %v10913_v55 }
 0x57a   : > { %v5449_v17 = vpack.c.bf16 %v5426_v36, %v5425_v58  ;;  %v5390_v54 = vmul.f32 %v11042_v27, %v5352_v22 }
 0x57b   : > { %v5292_v30 = vadd.f32 1e-05, %v5260_v40  ;;  %v5391_v62 = vmul.f32 %v11042_v27, %v5353_v24 }
 0x57c   : > { %6087 = vmatprep.mubr.msk.bf16.mxu1 %vm2002_vm1, %v5449_v17  ;;  %v5428_v33 = vadd.f32 %v11054_v1, %v5390_v54  ;;  %v6326_v35 = vpop.eup %6325  ;;  %v5215_v31 = vpop.xlane.xlu0 %5214 }
 0x57d   : > { %6329 = vrsqrt.f32 %v5292_v30  ;;  %v5355_v13 = vmul.f32 %v6326_v35, %v10934_v61  ;;  %v5429_v34 = vadd.f32 %v11054_v1, %v5391_v62 }
 0x57e   : > { %v5450_v51 = vpack.c.bf16 %v5428_v33, %v5427_v14 }
 0x57f   : > { %v5393_v55 = vmul.f32 %v11042_v27, %v5355_v13 }
 0x580   : > { %6088 = vmatmul.mubr.msk.bf16.gmra.mrb[24].mxu1 %vm2002_vm1, %v5450_v51 }
 0x581   : > { %v5431_v61 = vadd.f32 %v11054_v1, %v5393_v55 }
 0x583   : > { %v6328_v45 = vpop.eup %6327 }
 0x584   : > { %v5354_v57 = vmul.f32 %v6328_v45, %v10949_v39 }
 0x586   : > { %v5392_v52 = vmul.f32 %v11042_v27, %v5354_v57 }
 0x587   : > { %v6330_v18 = vpop.eup %6329 }
 0x588   : > { %v5356_v19 = vmul.f32 %v6330_v18, %v10946_v59  ;;  %v5430_v6 = vadd.f32 %v11054_v1, %v5392_v52  ;;  %v5261_v59 = vmul.f32 0.0625, %v5215_v31 }
 0x58a   : > { %v5451_v38 = vpack.c.bf16 %v5430_v6, %v5429_v34  ;;  %v5394_v63 = vmul.f32 %v11042_v27, %v5356_v19  ;;  %v5293_v4 = vadd.f32 1e-05, %v5261_v59 }
 0x58c   : > { %6091 = vmatprep.mubr.msk.bf16.mxu1 %vm2002_vm1, %v5451_v38  ;;  %v5432_v39 = vadd.f32 %v11054_v1, %v5394_v63  ;;  %6331 = vrsqrt.f32 %v5293_v4 }
 0x58e   : > { %v5452_v60 = vpack.c.bf16 %v5432_v39, %v5431_v61 }
 0x590   : > { %6092 = vmatmul.mubr.msk.bf16.gmra.mrb[28].mxu1 %vm2002_vm1, %v5452_v60 }
 0x595   : > { %v5221_v43 = vpop.xlane.xlu0 %5220 }
 0x596   : > { %v5263_v42 = vmul.f32 0.0625, %v5221_v43  ;;  %v6332_v3 = vpop.eup %6331 }
 0x597   : > { %v5357_v56 = vmul.f32 %v6332_v3, %v10957_v8 }
 0x598   : > { %v5295_v21 = vadd.f32 1e-05, %v5263_v42 }
 0x599   : > { %v5395_v37 = vmul.f32 %v11042_v27, %v5357_v56 }
 0x59a   : > { %6333 = vrsqrt.f32 %v5295_v21  ;;  %v11169_v21 = vld [vmem:[%s12217_s13] ss:$0 sm:$0xff] }
 0x59b   : > { %v5433_v15 = vadd.f32 %v11054_v1, %v5395_v37 }
 0x59c   : > { %v5218_v0 = vpop.xlane.xlu1 %5217 }
 0x59d   : > { %v5262_v49 = vmul.f32 0.0625, %v5218_v0 }
 0x59f   : > { %v5294_v25 = vadd.f32 1e-05, %v5262_v49 }
 0x5a0   : > { %v5224_v7 = vpop.xlane.xlu1 %5223 }
 0x5a1   : > { %6335 = vrsqrt.f32 %v5294_v25  ;;  %v5264_v10 = vmul.f32 0.0625, %v5224_v7 }
 0x5a3   : > { %v5296_v23 = vadd.f32 1e-05, %v5264_v10  ;;  %v6399_v10 = vld [vmem:[%s6907_s30 + $0x10] sm:$0xff] }
 0x5a4   : > { %v6334_v48 = vpop.eup %6333  ;;  %v5227_v36 = vpop.xlane.xlu0 %5226 }
 0x5a5   : > { %6337 = vrsqrt.f32 %v5296_v23  ;;  %v5359_v11 = vmul.f32 %v6334_v48, %v10964_v5  ;;  %v6400_v48 = vld [vmem:[%s6907_s30] sm:$0xff] }
 0x5a7   : > { %v5397_v22 = vmul.f32 %v11042_v27, %v5359_v11 }
 0x5a9   : > { %v5435_v5 = vadd.f32 %v11054_v1, %v5397_v22 }
 0x5ab   : > { %v6336_v32 = vpop.eup %6335 }
 0x5ac   : > { %v5358_v41 = vmul.f32 %v6336_v32, %v10973_v47 }
 0x5ae   : > { %v5396_v9 = vmul.f32 %v11042_v27, %v5358_v41  ;;  %v6401_v41 = vld [vmem:[%s6907_s30 + $0x18] sm:$0xff] }
 0x5af   : > { %v6338_v26 = vpop.eup %6337 }
 0x5b0   : > { %v5360_v20 = vmul.f32 %v6338_v26, %v10970_v29  ;;  %v5434_v44 = vadd.f32 %v11054_v1, %v5396_v9  ;;  %v5265_v29 = vmul.f32 0.0625, %v5227_v36  ;;  %v6402_v9 = vld [vmem:[%s6907_s30 + $0x8] sm:$0xff]  ;;  %v6404_v36 = vld [vmem:[%s6907_s30 + $0x20] sm:$0xff] }
 0x5b2   : > { %v5453_v8 = vpack.c.bf16 %v5434_v44, %v5433_v15  ;;  %v5398_v2 = vmul.f32 %v11042_v27, %v5360_v20  ;;  %v5297_v40 = vadd.f32 1e-05, %v5265_v29 }
 0x5b4   : > { %6095 = vmatprep.mubr.msk.bf16.mxu1 %vm2002_vm1, %v5453_v8  ;;  %v5436_v47 = vadd.f32 %v11054_v1, %v5398_v2  ;;  %6339 = vrsqrt.f32 %v5297_v40  ;;  %v6403_v2 = vld [vmem:[%s6907_s30 + $0x30] sm:$0xff]  ;;  %v6405_v40 = vld [vmem:[%s6907_s30 + $0x38] sm:$0xff] }
 0x5b6   : > { %v5454_v58 = vpack.c.bf16 %v5436_v47, %v5435_v5 }
 0x5b8   : > { %6096 = vmatmul.mubr.msk.bf16.gmra.mrb[32].mxu1 %vm2002_vm1, %v5454_v58 }
 0x5bd   : > { %v5233_v46 = vpop.xlane.xlu0 %5232 }
 0x5be   : > { %v5267_v17 = vmul.f32 0.0625, %v5233_v46  ;;  %v6340_v35 = vpop.eup %6339 }
 0x5bf   : > { %v5361_v45 = vmul.f32 %v6340_v35, %v10981_v16  ;;  %v6407_v35 = vld [vmem:[%s6907_s30 + $0x50] sm:$0xff] }
 0x5c0   : > { %v5299_v54 = vadd.f32 1e-05, %v5267_v17 }
 0x5c1   : > { %v5399_v18 = vmul.f32 %v11042_v27, %v5361_v45 }
 0x5c2   : > { %6341 = vrsqrt.f32 %v5299_v54  ;;  %v6406_v54 = vld [vmem:[%s6907_s30 + $0x28] sm:$0xff] }
 0x5c3   : > { %v5437_v55 = vadd.f32 %v11054_v1, %v5399_v18 }
 0x5c5   : > { %v5230_v30 = vpop.xlane.xlu1 %5229 }
 0x5c6   : > { %v5266_v14 = vmul.f32 0.0625, %v5230_v30 }
 0x5c8   : > { %v5298_v33 = vadd.f32 1e-05, %v5266_v14 }
 0x5c9   : > { %v5236_v50 = vpop.xlane.xlu1 %5235 }
 0x5ca   : > { %6343 = vrsqrt.f32 %v5298_v33  ;;  %v5268_v51 = vmul.f32 0.0625, %v5236_v50 }
 0x5cc   : > { %v5300_v24 = vadd.f32 1e-05, %v5268_v51  ;;  %v6342_v13 = vpop.eup %6341 }
 0x5cd   : > { %v5363_v62 = vmul.f32 %v6342_v13, %v10988_v12 }
 0x5ce   : > { %6345 = vrsqrt.f32 %v5300_v24 }
 0x5cf   : > { %v5401_v63 = vmul.f32 %v11042_v27, %v5363_v62  ;;  %v6408_v62 = vld [vmem:[%s6907_s30 + $0x40] sm:$0xff] }
 0x5d1   : > { %v5439_v12 = vadd.f32 %v11054_v1, %v5401_v63 }
 0x5d4   : > { %v6344_v57 = vpop.eup %6343 }
 0x5d5   : > { %v5362_v52 = vmul.f32 %v6344_v57, %v10997_v53 }
 0x5d7   : > { %v5400_v19 = vmul.f32 %v11042_v27, %v5362_v52 }
 0x5d8   : > { %v6346_v34 = vpop.eup %6345 }
 0x5d9   : > { %v5364_v6 = vmul.f32 %v6346_v34, %v10994_v28  ;;  %v5438_v38 = vadd.f32 %v11054_v1, %v5400_v19  ;;  %v6409_v19 = vld [vmem:[%s6907_s30 + $0x58] sm:$0xff] }
 0x5db   : > { %v5455_v16 = vpack.c.bf16 %v5438_v38, %v5437_v55  ;;  %v5402_v61 = vmul.f32 %v11042_v27, %v5364_v6  ;;  %v6410_v6 = vld [vmem:[%s6907_s30 + $0x48] sm:$0xff] }
 0x5dd   : > { %6099 = vmatprep.mubr.msk.bf16.mxu1 %vm2002_vm1, %v5455_v16  ;;  %v5440_v53 = vadd.f32 %v11054_v1, %v5402_v61 }
 0x5df   : > { %v5456_v39 = vpack.c.bf16 %v5440_v53, %v5439_v12  ;;  %v6411_v53 = vld [vmem:[%s6907_s30 + $0x70] sm:$0xff] }
 0x5e1   : > { %6100 = vmatmul.mubr.msk.bf16.gmra.mrb[36].mxu1 %vm2002_vm1, %v5456_v39 }
 0x623   : > { %v6063_v28 = vpop.f32.mrb[0].mxu1 }
 0x624   : > { %v1713_v60 = vpop.f32.mrb[1].mxu1 }
 0x625   : > { %v6064_v31 = vpop.f32.mrb[2].mxu1 }
 0x626   : > { %v1716_v59 = vpop.f32.mrb[3].mxu1  ;;  %v6412_v31 = vld [vmem:[%s6907_s30 + $0x60] sm:$0xff] }
 0x62b   : > { %v6067_v43 = vpop.f32.mrb[4].mxu1 }
 0x62c   : > { %v1729_v4 = vpop.f32.mrb[5].mxu1 }
 0x62d   : > { %v6068_v42 = vpop.f32.mrb[6].mxu1  ;;  %v6413_v4 = vld [vmem:[%s6907_s30 + $0x78] sm:$0xff] }
 0x62e   : > { %v1732_v27 = vpop.f32.mrb[7].mxu1 }
 0x62f   : > { %v6414_v27 = vld [vmem:[%s6907_s30 + $0x68] sm:$0xff] }
 0x633   : > { %v6073_v1 = vpop.f32.mrb[8].mxu1 }
 0x634   : > { %v5560_v0 = vadd.f32 %v6073_v1, %v11169_v21  ;;  %v5551_v49 = vpop.f32.mrb[9].mxu1 }
 0x635   : > { %v5552_v25 = vadd.f32 %v11169_v21, %v5551_v49  ;;  %v6074_v7 = vpop.f32.mrb[10].mxu1 }
 0x636   : > { %v5680_v23 = vadd.f32 %v6399_v10, %v5560_v0  ;;  %v5563_v3 = vadd.f32 %v6074_v7, %v11169_v21  ;;  %v5554_v56 = vpop.f32.mrb[11].mxu1 }
 0x637   : > { %v5678_v32 = vadd.f32 %v6400_v48, %v5552_v25  ;;  %v5555_v11 = vadd.f32 %v11169_v21, %v5554_v56 }
 0x638   : > { %5712 = vst.msk [vmem:[%s11179_s1 + $0x10] sm:$0xff] %vm671_vm0, %v5680_v23  ;;  %v5681_v37 = vadd.f32 %v6401_v41, %v5563_v3  ;;  %v6415_v23 = vld [vmem:[%s6907_s30 + $0x90] sm:$0xff] }
 0x639   : > { %5710 = vst.msk [vmem:[%s11179_s1] sm:$0xff] %vm671_vm0, %v5678_v32  ;;  %v5679_v26 = vadd.f32 %v6402_v9, %v5555_v11  ;;  %v6416_v32 = vld [vmem:[%s6907_s30 + $0x80] sm:$0xff] }
 0x63a   : > { %5713 = vst.msk [vmem:[%s11179_s1 + $0x18] sm:$0xff] %vm671_vm0, %v5681_v37  ;;  %v6417_v37 = vld [vmem:[%s6907_s30 + $0x98] sm:$0xff] }
 0x63b   : > { %5711 = vst.msk [vmem:[%s11179_s1 + $0x8] sm:$0xff] %vm671_vm0, %v5679_v26  ;;  %v6077_v20 = vpop.f32.mrb[12].mxu1  ;;  %v6418_v26 = vld [vmem:[%s6907_s30 + $0x88] sm:$0xff] }
 0x63c   : > { %v5576_v15 = vadd.f32 %v6077_v20, %v11169_v21  ;;  %v5567_v44 = vpop.f32.mrb[13].mxu1 }
 0x63d   : > { %v5568_v22 = vadd.f32 %v11169_v21, %v5567_v44  ;;  %v6078_v8 = vpop.f32.mrb[14].mxu1 }
 0x63e   : > { %v5684_v5 = vadd.f32 %v6403_v2, %v5576_v15  ;;  %v5579_v47 = vadd.f32 %v6078_v8, %v11169_v21  ;;  %v5570_v58 = vpop.f32.mrb[15].mxu1 }
 0x63f   : > { %v5682_v29 = vadd.f32 %v6404_v36, %v5568_v22  ;;  %v5571_v46 = vadd.f32 %v11169_v21, %v5570_v58 }
 0x640   : > { %5716 = vst.msk [vmem:[%s11179_s1 + $0x30] sm:$0xff] %vm671_vm0, %v5684_v5  ;;  %v5685_v17 = vadd.f32 %v6405_v40, %v5579_v47  ;;  %v6419_v5 = vld [vmem:[%s6907_s30 + $0xb0] sm:$0xff] }
 0x641   : > { %5714 = vst.msk [vmem:[%s11179_s1 + $0x20] sm:$0xff] %vm671_vm0, %v5682_v29  ;;  %v5683_v30 = vadd.f32 %v6406_v54, %v5571_v46  ;;  %v6420_v29 = vld [vmem:[%s6907_s30 + $0xa0] sm:$0xff] }
 0x642   : > { %5717 = vst.msk [vmem:[%s11179_s1 + $0x38] sm:$0xff] %vm671_vm0, %v5685_v17  ;;  %v6421_v17 = vld [vmem:[%s6907_s30 + $0xb8] sm:$0xff] }
 0x643   : > { %5715 = vst.msk [vmem:[%s11179_s1 + $0x28] sm:$0xff] %vm671_vm0, %v5683_v30  ;;  %v6081_v14 = vpop.f32.mrb[16].mxu1  ;;  %v6422_v30 = vld [vmem:[%s6907_s30 + $0xa8] sm:$0xff] }
 0x644   : > { %v5592_v33 = vadd.f32 %v6081_v14, %v11169_v21  ;;  %v5583_v50 = vpop.f32.mrb[17].mxu1 }
 0x645   : > { %v5584_v51 = vadd.f32 %v11169_v21, %v5583_v50  ;;  %v6082_v24 = vpop.f32.mrb[18].mxu1 }
 0x646   : > { %v5688_v45 = vadd.f32 %v6407_v35, %v5592_v33  ;;  %v5595_v13 = vadd.f32 %v6082_v24, %v11169_v21  ;;  %v5586_v57 = vpop.f32.mrb[19].mxu1 }
 0x647   : > { %v5686_v52 = vadd.f32 %v6408_v62, %v5584_v51  ;;  %v5587_v18 = vadd.f32 %v11169_v21, %v5586_v57 }
 0x648   : > { %5720 = vst.msk [vmem:[%s11179_s1 + $0x50] sm:$0xff] %vm671_vm0, %v5688_v45  ;;  %v5689_v34 = vadd.f32 %v6409_v19, %v5595_v13  ;;  %v6423_v45 = vld [vmem:[%s6907_s30 + $0xd0] sm:$0xff] }
 0x649   : > { %5718 = vst.msk [vmem:[%s11179_s1 + $0x40] sm:$0xff] %vm671_vm0, %v5686_v52  ;;  %v5687_v55 = vadd.f32 %v6410_v6, %v5587_v18  ;;  %v6424_v52 = vld [vmem:[%s6907_s30 + $0xc0] sm:$0xff] }
 0x64a   : > { %5721 = vst.msk [vmem:[%s11179_s1 + $0x58] sm:$0xff] %vm671_vm0, %v5689_v34  ;;  %v6425_v34 = vld [vmem:[%s6907_s30 + $0xd8] sm:$0xff] }
 0x64b   : > { %5719 = vst.msk [vmem:[%s11179_s1 + $0x48] sm:$0xff] %vm671_vm0, %v5687_v55  ;;  %v6085_v38 = vpop.f32.mrb[20].mxu1  ;;  %v6426_v55 = vld [vmem:[%s6907_s30 + $0xc8] sm:$0xff] }
 0x64c   : > { %v5608_v63 = vadd.f32 %v6085_v38, %v11169_v21  ;;  %v5599_v16 = vpop.f32.mrb[21].mxu1 }
 0x64d   : > { %v5600_v61 = vadd.f32 %v11169_v21, %v5599_v16  ;;  %v6086_v12 = vpop.f32.mrb[22].mxu1 }
 0x64e   : > { %v5692_v39 = vadd.f32 %v6411_v53, %v5608_v63  ;;  %v5611_v28 = vadd.f32 %v6086_v12, %v11169_v21  ;;  %v5602_v60 = vpop.f32.mrb[23].mxu1 }
 0x64f   : > { %v5690_v59 = vadd.f32 %v6412_v31, %v5600_v61  ;;  %v5603_v43 = vadd.f32 %v11169_v21, %v5602_v60 }
 0x650   : > { %5724 = vst.msk [vmem:[%s11179_s1 + $0x70] sm:$0xff] %vm671_vm0, %v5692_v39  ;;  %v5693_v42 = vadd.f32 %v6413_v4, %v5611_v28  ;;  %v6427_v39 = vld [vmem:[%s6907_s30 + $0xf0] sm:$0xff] }
 0x651   : > { %5722 = vst.msk [vmem:[%s11179_s1 + $0x60] sm:$0xff] %vm671_vm0, %v5690_v59  ;;  %v5691_v1 = vadd.f32 %v6414_v27, %v5603_v43  ;;  %v6428_v59 = vld [vmem:[%s6907_s30 + $0xe0] sm:$0xff] }
 0x652   : > { %5725 = vst.msk [vmem:[%s11179_s1 + $0x78] sm:$0xff] %vm671_vm0, %v5693_v42  ;;  %v6429_v42 = vld [vmem:[%s6907_s30 + $0xf8] sm:$0xff] }
 0x653   : > { %5723 = vst.msk [vmem:[%s11179_s1 + $0x68] sm:$0xff] %vm671_vm0, %v5691_v1  ;;  %v6089_v0 = vpop.f32.mrb[24].mxu1  ;;  %v6430_v1 = vld [vmem:[%s6907_s30 + $0xe8] sm:$0xff] }
 0x654   : > { %v5624_v49 = vadd.f32 %v6089_v0, %v11169_v21  ;;  %v5615_v25 = vpop.f32.mrb[25].mxu1 }
 0x655   : > { %v5616_v7 = vadd.f32 %v11169_v21, %v5615_v25  ;;  %v6090_v10 = vpop.f32.mrb[26].mxu1 }
 0x656   : > { %v5696_v3 = vadd.f32 %v6415_v23, %v5624_v49  ;;  %v5627_v56 = vadd.f32 %v6090_v10, %v11169_v21  ;;  %v5618_v48 = vpop.f32.mrb[27].mxu1 }
 0x657   : > { %v5694_v11 = vadd.f32 %v6416_v32, %v5616_v7  ;;  %v5619_v41 = vadd.f32 %v11169_v21, %v5618_v48 }
 0x658   : > { %5728 = vst.msk [vmem:[%s11179_s1 + $0x90] sm:$0xff] %vm671_vm0, %v5696_v3  ;;  %v5697_v9 = vadd.f32 %v6417_v37, %v5627_v56 }
 0x659   : > { %5726 = vst.msk [vmem:[%s11179_s1 + $0x80] sm:$0xff] %vm671_vm0, %v5694_v11  ;;  %v5695_v20 = vadd.f32 %v6418_v26, %v5619_v41 }
 0x65a   : > { %5729 = vst.msk [vmem:[%s11179_s1 + $0x98] sm:$0xff] %vm671_vm0, %v5697_v9 }
 0x65b   : > { %5727 = vst.msk [vmem:[%s11179_s1 + $0x88] sm:$0xff] %vm671_vm0, %v5695_v20 }
 0x663   : > { %v6093_v15 = vpop.f32.mrb[28].mxu1 }
 0x664   : > { %v5640_v44 = vadd.f32 %v6093_v15, %v11169_v21  ;;  %v5631_v22 = vpop.f32.mrb[29].mxu1 }
 0x665   : > { %v5632_v8 = vadd.f32 %v11169_v21, %v5631_v22  ;;  %v6094_v2 = vpop.f32.mrb[30].mxu1 }
 0x666   : > { %v5700_v47 = vadd.f32 %v6419_v5, %v5640_v44  ;;  %v5643_v58 = vadd.f32 %v6094_v2, %v11169_v21  ;;  %v5634_v36 = vpop.f32.mrb[31].mxu1 }
 0x667   : > { %v5698_v46 = vadd.f32 %v6420_v29, %v5632_v8  ;;  %v5635_v40 = vadd.f32 %v11169_v21, %v5634_v36 }
 0x668   : > { %5732 = vst.msk [vmem:[%s11179_s1 + $0xb0] sm:$0xff] %vm671_vm0, %v5700_v47  ;;  %v5701_v54 = vadd.f32 %v6421_v17, %v5643_v58 }
 0x669   : > { %5730 = vst.msk [vmem:[%s11179_s1 + $0xa0] sm:$0xff] %vm671_vm0, %v5698_v46  ;;  %v5699_v14 = vadd.f32 %v6422_v30, %v5635_v40 }
 0x66a   : > { %5733 = vst.msk [vmem:[%s11179_s1 + $0xb8] sm:$0xff] %vm671_vm0, %v5701_v54 }
 0x66b   : > { %5731 = vst.msk [vmem:[%s11179_s1 + $0xa8] sm:$0xff] %vm671_vm0, %v5699_v14 }
 0x68b   : > { %v6097_v33 = vpop.f32.mrb[32].mxu1 }
 0x68c   : > { %v5656_v50 = vadd.f32 %v6097_v33, %v11169_v21  ;;  %v5647_v51 = vpop.f32.mrb[33].mxu1 }
 0x68d   : > { %v5648_v24 = vadd.f32 %v11169_v21, %v5647_v51  ;;  %v6098_v35 = vpop.f32.mrb[34].mxu1 }
 0x68e   : > { %v5704_v13 = vadd.f32 %v6423_v45, %v5656_v50  ;;  %v5659_v57 = vadd.f32 %v6098_v35, %v11169_v21  ;;  %v5650_v62 = vpop.f32.mrb[35].mxu1 }
 0x68f   : > { %v5702_v18 = vadd.f32 %v6424_v52, %v5648_v24  ;;  %v5651_v19 = vadd.f32 %v11169_v21, %v5650_v62 }
 0x690   : > { %5736 = vst.msk [vmem:[%s11179_s1 + $0xd0] sm:$0xff] %vm671_vm0, %v5704_v13  ;;  %v5705_v6 = vadd.f32 %v6425_v34, %v5659_v57 }
 0x691   : > { %5734 = vst.msk [vmem:[%s11179_s1 + $0xc0] sm:$0xff] %vm671_vm0, %v5702_v18  ;;  %v5703_v38 = vadd.f32 %v6426_v55, %v5651_v19 }
 0x692   : > { %5737 = vst.msk [vmem:[%s11179_s1 + $0xd8] sm:$0xff] %vm671_vm0, %v5705_v6 }
 0x693   : > { %5735 = vst.msk [vmem:[%s11179_s1 + $0xc8] sm:$0xff] %vm671_vm0, %v5703_v38 }
 0x6b4   : > { %v6101_v63 = vpop.f32.mrb[36].mxu1 }
 0x6b5   : > { %v5672_v16 = vadd.f32 %v6101_v63, %v11169_v21  ;;  %v5663_v61 = vpop.f32.mrb[37].mxu1 }
 0x6b6   : > { %v5664_v12 = vadd.f32 %v11169_v21, %v5663_v61  ;;  %v6102_v53 = vpop.f32.mrb[38].mxu1 }
 0x6b7   : > { %v5708_v28 = vadd.f32 %v6427_v39, %v5672_v16  ;;  %v5675_v60 = vadd.f32 %v6102_v53, %v11169_v21  ;;  %v5666_v31 = vpop.f32.mrb[39].mxu1 }
 0x6b8   : > { %v5706_v43 = vadd.f32 %v6428_v59, %v5664_v12  ;;  %v5667_v4 = vadd.f32 %v11169_v21, %v5666_v31 }
 0x6b9   : > { %5740 = vst.msk [vmem:[%s11179_s1 + $0xf0] sm:$0xff] %vm671_vm0, %v5708_v28  ;;  %v5709_v27 = vadd.f32 %v6429_v42, %v5675_v60 }
 0x6ba   : > { %5738 = vst.msk [vmem:[%s11179_s1 + $0xe0] sm:$0xff] %vm671_vm0, %v5706_v43  ;;  %v5707_v0 = vadd.f32 %v6430_v1, %v5667_v4 }
 0x6bb   : > { %5741 = vst.msk [vmem:[%s11179_s1 + $0xf8] sm:$0xff] %vm671_vm0, %v5709_v27 }
 0x6bc   : > { %5739 = vst.msk [vmem:[%s11179_s1 + $0xe8] sm:$0xff] %vm671_vm0, %v5707_v0 }
 0x6bd   : > { %6534 = shalt.err (!%p6531_p13)
}
 0x6be   : > { %s6535_s30 = scalar_lea.hbm %s11301_s29, 4096  ;;  %s6539_s20 = scalar_lea.hbm %s12221_s23, 8192 }
 0x6bf   : > { %p6536_p11 = scmp.ne.s32.totalorder %s11301_s29, %s6535_s30  ;;  %p6540_p7 = scmp.lt.u32.totalorder %s11301_s29, %s12221_s23 }
 0x6c0   : > { %p6541_p4 = scmp.lt.u32.totalorder %s6539_s20, %s6535_s30  ;;  %p6543_p0 = scmp.lt.u32.totalorder %s6535_s30, %s11301_s29 }
 0x6c1   : > { %p6537_p2 = pnand %p6536_p11, %p12222_p10 }
 0x6c2   : > { %p6542_p3 = por %p6541_p4, %p6540_p7 }
 0x6c3   : > { %p6538_p5 = pneg %p6537_p2 }
 0x6c4   : > { %p6544_p8 = por %p6543_p0, %p6542_p3 }
 0x6c6   : > { %p6545_p9 = pnand %p6544_p8, %p6538_p5 }
 0x6c8   : > { %6548 = shalt.err (!%p6545_p9)
}
 0x6c9   : > { %s6616_s17 = smov 128   ;;  %s6617_s15 = smov 8  }
 0x6ca   : > { %6113 = dma.vmem_to_hbm [thread:$0]  (%p12222_p10), %s11303_s9, 4096, %s11301_s29, %s5743_s25, %s6616_s17, %s6616_s17, %s6617_s15  }
 0x6cb PF: > { %s12223_s12 = sld [smem:[#allocation15_spill]]  ;;  %s12224_s19 = sld [smem:[#allocation23_spill]] }
 0x6cc   : > { %s12225_s28 = sld [smem:[#allocation19_spill]] }
 0x6d1   : > { %s5774_s22 = sand.u32 1, %s12223_s12   ;;  %p12226_p12 = scmp.ne.s32.totalorder %s12224_s19, 0 }
 0x6d2   : > { %p12227_p1 = scmp.ge.s32.totalorder %s12225_s28, 2  ;;  %s5775_s10 = scalar_lea.sflag [#allocation7], %s5774_s22 }
 0x6d4   : > { %p6126_p6 = pnand %p12227_p1, %p12226_p12 }
 0x6d6   : > { %6582 = dma.done.wait (!%p6126_p6), %s5775_s10, 4096  }
 0x6d7   : > { %6584 = vsyncadd (!%p6126_p6), %s5775_s10, 4294963200  ;;  %s32_s30 = sadd.s32 1, %s12225_s28   ;;  %s12228_s16 = sld [smem:[#allocation16_spill]] }
 0x6d8   : > { %p29_p13 = scmp.ge.s32.totalorder %s32_s30, 4   ;;  %s12229_s27 = sld [smem:[#allocation22_spill]] }
 0x6d9   : > { %s12230_s28 = sld [smem:[#allocation18_spill]]  ;;  %s12231_s29 = sld [smem:[#allocation20_spill]] }
 0x6da   : > { %s12232_s25 = smov %s6591_s26  ;;  %31 = sbr.rel (!%p29_p13) target bundleno = 14 (0xe), region = 168 }
 0x6dd   : > { %s12233_s26 = smov %s12228_s16 }
 0x6e1   :  { %5780 = vsyncpa [#allocation6], 1 }
 0x6e2   :  { %5782 = vsyncpa [#allocation6 + $0x1], 1 }
 0x6e3   :  { %5783 = vsyncpa [#allocation9], 1 }
 0x6e4   :  { %5785 = vsyncpa [#allocation9 + $0x1], 1 }
 0x6e5   :  { %5786 = vsyncpa [#allocation7], 1 }
 0x6e6   :  { %5788 = vsyncpa [#allocation7 + $0x1], 1 }

</bundles_post_ra>
